<compile_context>
chip_gen: v7x
topology: tpu7x:2x2x1
jax: 0.10.0
libtpu: 0.0.40
codegen_flags: <defaults>
</compile_context>

<pallas_src>
import functools
import math

import jax
import jax.numpy as jnp
from jax import lax
from jax.experimental import pallas as pl
from jax.experimental.pallas import tpu as pltpu


def _layer_norm(x, w, b, eps=1e-5):
    mu = jnp.mean(x, axis=-1, keepdims=True)
    var = jnp.mean((x - mu) ** 2, axis=-1, keepdims=True)
    return (x - mu) * lax.rsqrt(var + eps) * w + b


def _softmax(s):
    s = s - jnp.max(s, axis=-1, keepdims=True)
    p = jnp.exp(s)
    return p * pl.reciprocal(jnp.sum(p, axis=-1, keepdims=True), approx=True)


def _mha(q_in, kv_in, proj, mask, nhead):
    """Multi-head attention on 2-D activations (one batch element).

    q_in: (Sq, D) f32, kv_in: (Sk, D) f32.
    proj = (wq, bq, wk, bk, wv, bv, wo_heads, bo): matmul weights already bf16
    (biases f32), with Wo pre-split into per-head row blocks so the output
    projection folds into the head loop and no concat is needed.
    """
    wq, bq, wk, bk, wv, bv, wo_heads, bo = proj
    d = q_in.shape[-1]
    hd = d // nhead
    bf16 = jnp.bfloat16

    # Projections: bf16 operands on the MXU, f32 accumulate, f32 bias add.
    q = jnp.dot(q_in.astype(bf16), wq, preferred_element_type=jnp.float32) + bq
    k = jnp.dot(kv_in.astype(bf16), wk, preferred_element_type=jnp.float32) + bk
    v = jnp.dot(kv_in.astype(bf16), wv, preferred_element_type=jnp.float32) + bv
    # Fold 1/sqrt(hd) once into q instead of scaling every head's score matrix.
    q = q * (1.0 / math.sqrt(hd))

    out = None
    # TODO(synk): heads stay a short static loop (2-D dots only) since Mosaic's
    # dot_general does not take the two batch dims a fully head-batched einsum
    # would need at this layout; everything else is batched/fused.
    for h in range(nhead):
        qh = q[:, h * hd:(h + 1) * hd].astype(bf16)
        kh = k[:, h * hd:(h + 1) * hd].astype(bf16)
        vh = v[:, h * hd:(h + 1) * hd].astype(bf16)
        # q @ k^T without an explicit transpose: contract the last dims.
        s = lax.dot_general(qh, kh, (((1,), (1,)), ((), ())),
                            preferred_element_type=jnp.float32) + mask
        p = _softmax(s)                                     # f32
        oh = jnp.dot(p.astype(bf16), vh, preferred_element_type=jnp.float32)
        contrib = jnp.dot(oh.astype(bf16), wo_heads[h],
                          preferred_element_type=jnp.float32)
        out = contrib if out is None else out + contrib
    return out + bo


def decoder_stack_kernel(x_ref, mem_ref, tmask_ref, mmask_ref,
                         sa_wq, sa_bq, sa_wk, sa_bk, sa_wv, sa_bv, sa_wo, sa_bo,
                         ca_wq, ca_bq, ca_wk, ca_bk, ca_wv, ca_bv, ca_wo, ca_bo,
                         ln1_w, ln1_b, ln2_w, ln2_b, ln3_w, ln3_b,
                         ff_w1, ff_b1, ff_w2, ff_b2,
                         out_ref, *, nhead, num_layers):
    bf16 = jnp.bfloat16
    x = x_ref[0]            # (S, D)  f32
    mem = mem_ref[0]        # (Sm, D) f32
    tmask = tmask_ref[...]  # (S, S)  additive f32 mask
    mmask = mmask_ref[...]  # (S, Sm) additive f32 mask

    d = x.shape[-1]
    hd = d // nhead

    def split_out_proj(wo_ref):
        wo = wo_ref[...]  # slice f32 (sublane-aligned), then cast per head
        return [wo[h * hd:(h + 1) * hd, :].astype(bf16) for h in range(nhead)]

    # Load + cast every weight exactly ONCE; they stay resident across all
    # num_layers applications of the shared decoder layer.
    sa_proj = (sa_wq[...].astype(bf16), sa_bq[...],
               sa_wk[...].astype(bf16), sa_bk[...],
               sa_wv[...].astype(bf16), sa_bv[...],
               split_out_proj(sa_wo), sa_bo[...])
    ca_proj = (ca_wq[...].astype(bf16), ca_bq[...],
               ca_wk[...].astype(bf16), ca_bk[...],
               ca_wv[...].astype(bf16), ca_bv[...],
               split_out_proj(ca_wo), ca_bo[...])
    l1w, l1b = ln1_w[...], ln1_b[...]
    l2w, l2b = ln2_w[...], ln2_b[...]
    l3w, l3b = ln3_w[...], ln3_b[...]
    w1, b1 = ff_w1[...].astype(bf16), ff_b1[...]
    w2, b2 = ff_w2[...].astype(bf16), ff_b2[...]

    # Same layer object repeated in the ModuleList => identical weights each
    # iteration; short static unroll keeps everything in VMEM/vregs.
    for _ in range(num_layers):
        # masked self-attention + residual + LayerNorm (post-norm)
        sa = _mha(x, x, sa_proj, tmask, nhead)
        x = _layer_norm(x + sa, l1w, l1b)
        # cross-attention over encoder memory
        ca = _mha(x, mem, ca_proj, mmask, nhead)
        x = _layer_norm(x + ca, l2w, l2b)
        # feed-forward (ReLU); dropout is identity in inference
        h1 = jnp.maximum(
            jnp.dot(x.astype(bf16), w1, preferred_element_type=jnp.float32) + b1,
            0.0)
        ff = jnp.dot(h1.astype(bf16), w2, preferred_element_type=jnp.float32) + b2
        x = _layer_norm(x + ff, l3w, l3b)

    out_ref[0] = x.astype(out_ref.dtype)


def _full_spec(shape):
    nd = len(shape)
    # Constant block index across the grid => DMA'd once, single buffer reused.
    return pl.BlockSpec(shape, lambda b, _nd=nd: (0,) * _nd)


def transformer_decoder(x, memory, tgt_mask, memory_mask, params, *,
                        nhead, num_layers):
    B, S, D = x.shape
    _, Sm, _ = memory.shape
    weights = list(params)
    inputs = [x, memory, tgt_mask, memory_mask] + weights
    in_specs = [
        pl.BlockSpec((1, S, D), lambda b: (b, 0, 0)),
        pl.BlockSpec((1, Sm, D), lambda b: (b, 0, 0)),
        _full_spec(tgt_mask.shape),
        _full_spec(memory_mask.shape),
    ] + [_full_spec(w.shape) for w in weights]
    out_spec = pl.BlockSpec((1, S, D), lambda b: (b, 0, 0))

    return pl.pallas_call(
        functools.partial(decoder_stack_kernel, nhead=nhead,
                          num_layers=num_layers),
        out_shape=jax.ShapeDtypeStruct((B, S, D), jnp.float32),
        grid_spec=pltpu.PrefetchScalarGridSpec(
            num_scalar_prefetch=0,
            grid=(B,),                     # batch axis -> 2 TCs on v7x
            in_specs=in_specs,
            out_specs=out_spec,
        ),
        compiler_params=pltpu.CompilerParams(
            dimension_semantics=("parallel",)),
    )(*inputs)


def init_params(key, d_model, dim_ff):
    # exact count of random draws: 8 (self-attn w/b) + 8 (cross-attn w/b)
    # + 4 (ffn w/b) = 20   (layer norms are deterministic ones/zeros)
    n_random = 20
    keys = iter(jax.random.split(key, n_random))

    def w(shape):
        return 0.02 * jax.random.normal(next(keys), shape, jnp.float32)

    def b(n):
        return 0.02 * jax.random.normal(next(keys), (1, n), jnp.float32)

    params = []
    # self-attention q,k,v,o projections (weight, bias) x4
    for _ in range(4):
        params.append(w((d_model, d_model)))
        params.append(b(d_model))
    # cross-attention q,k,v,o projections
    for _ in range(4):
        params.append(w((d_model, d_model)))
        params.append(b(d_model))
    # three layer norms (gamma=1, beta=0)
    for _ in range(3):
        params.append(jnp.ones((1, d_model), jnp.float32))
        params.append(jnp.zeros((1, d_model), jnp.float32))
    # feed-forward
    params.append(w((d_model, dim_ff)))
    params.append(b(dim_ff))
    params.append(w((dim_ff, d_model)))
    params.append(b(d_model))
    return params


if __name__ == "__main__":
    B, S, Sm, D, NHEAD, DFF, NUM_LAYERS = 2, 8, 8, 32, 4, 64, 6

    key = jax.random.PRNGKey(0)
    kx, km, kp = jax.random.split(key, 3)
    x = jax.random.normal(kx, (B, S, D), jnp.float32)
    memory = jax.random.normal(km, (B, Sm, D), jnp.float32)

    # Additive float masks: causal tgt_mask, no memory_mask.
    tgt_mask = jnp.triu(jnp.full((S, S), -1e9, jnp.float32), k=1)
    memory_mask = jnp.zeros((S, Sm), jnp.float32)

    params = init_params(kp, D, DFF)

    out = transformer_decoder(x, memory, tgt_mask, memory_mask, params,
                              nhead=NHEAD, num_layers=NUM_LAYERS)
    out = jax.block_until_ready(out)
    assert out.shape == (B, S, D)
    assert bool(jnp.all(jnp.isfinite(out)))
    print("KERNEL_OK")
</pallas_src>

<mosaic_0001>
module attributes {stable_mosaic.version = 11 : i64} {
  func.func @decoder_stack_kernel(%arg0: i32, %arg1: memref<1x8x32xf32, #tpu.memory_space<vmem>>, %arg2: memref<1x8x32xf32, #tpu.memory_space<vmem>>, %arg3: memref<8x8xf32, #tpu.memory_space<vmem>>, %arg4: memref<8x8xf32, #tpu.memory_space<vmem>>, %arg5: memref<32x32xf32, #tpu.memory_space<vmem>>, %arg6: memref<1x32xf32, #tpu.memory_space<vmem>>, %arg7: memref<32x32xf32, #tpu.memory_space<vmem>>, %arg8: memref<1x32xf32, #tpu.memory_space<vmem>>, %arg9: memref<32x32xf32, #tpu.memory_space<vmem>>, %arg10: memref<1x32xf32, #tpu.memory_space<vmem>>, %arg11: memref<32x32xf32, #tpu.memory_space<vmem>>, %arg12: memref<1x32xf32, #tpu.memory_space<vmem>>, %arg13: memref<32x32xf32, #tpu.memory_space<vmem>>, %arg14: memref<1x32xf32, #tpu.memory_space<vmem>>, %arg15: memref<32x32xf32, #tpu.memory_space<vmem>>, %arg16: memref<1x32xf32, #tpu.memory_space<vmem>>, %arg17: memref<32x32xf32, #tpu.memory_space<vmem>>, %arg18: memref<1x32xf32, #tpu.memory_space<vmem>>, %arg19: memref<32x32xf32, #tpu.memory_space<vmem>>, %arg20: memref<1x32xf32, #tpu.memory_space<vmem>>, %arg21: memref<1x32xf32, #tpu.memory_space<vmem>>, %arg22: memref<1x32xf32, #tpu.memory_space<vmem>>, %arg23: memref<1x32xf32, #tpu.memory_space<vmem>>, %arg24: memref<1x32xf32, #tpu.memory_space<vmem>>, %arg25: memref<1x32xf32, #tpu.memory_space<vmem>>, %arg26: memref<1x32xf32, #tpu.memory_space<vmem>>, %arg27: memref<32x64xf32, #tpu.memory_space<vmem>>, %arg28: memref<1x64xf32, #tpu.memory_space<vmem>>, %arg29: memref<64x32xf32, #tpu.memory_space<vmem>>, %arg30: memref<1x32xf32, #tpu.memory_space<vmem>>, %arg31: memref<1x8x32xf32, #tpu.memory_space<vmem>>) attributes {dimension_semantics = [#tpu.dimension_semantics<parallel>], iteration_bounds = array<i64: 2>, scalar_prefetch = 0 : i64, scratch_operands = 0 : i64, tpu.core_type = #tpu.core_type<tc>, window_params = [{transform_indices = @transform_0, window_bounds = array<i64: 1, 8, 32>}, {transform_indices = @transform_1, window_bounds = array<i64: 1, 8, 32>}, {pipeline_mode = #tpu.pipeline_mode<synchronous>, transform_indices = @transform_2, window_bounds = array<i64: 8, 8>}, {pipeline_mode = #tpu.pipeline_mode<synchronous>, transform_indices = @transform_3, window_bounds = array<i64: 8, 8>}, {pipeline_mode = #tpu.pipeline_mode<synchronous>, transform_indices = @transform_4, window_bounds = array<i64: 32, 32>}, {pipeline_mode = #tpu.pipeline_mode<synchronous>, transform_indices = @transform_5, window_bounds = array<i64: 1, 32>}, {pipeline_mode = #tpu.pipeline_mode<synchronous>, transform_indices = @transform_6, window_bounds = array<i64: 32, 32>}, {pipeline_mode = #tpu.pipeline_mode<synchronous>, transform_indices = @transform_7, window_bounds = array<i64: 1, 32>}, {pipeline_mode = #tpu.pipeline_mode<synchronous>, transform_indices = @transform_8, window_bounds = array<i64: 32, 32>}, {pipeline_mode = #tpu.pipeline_mode<synchronous>, transform_indices = @transform_9, window_bounds = array<i64: 1, 32>}, {pipeline_mode = #tpu.pipeline_mode<synchronous>, transform_indices = @transform_10, window_bounds = array<i64: 32, 32>}, {pipeline_mode = #tpu.pipeline_mode<synchronous>, transform_indices = @transform_11, window_bounds = array<i64: 1, 32>}, {pipeline_mode = #tpu.pipeline_mode<synchronous>, transform_indices = @transform_12, window_bounds = array<i64: 32, 32>}, {pipeline_mode = #tpu.pipeline_mode<synchronous>, transform_indices = @transform_13, window_bounds = array<i64: 1, 32>}, {pipeline_mode = #tpu.pipeline_mode<synchronous>, transform_indices = @transform_14, window_bounds = array<i64: 32, 32>}, {pipeline_mode = #tpu.pipeline_mode<synchronous>, transform_indices = @transform_15, window_bounds = array<i64: 1, 32>}, {pipeline_mode = #tpu.pipeline_mode<synchronous>, transform_indices = @transform_16, window_bounds = array<i64: 32, 32>}, {pipeline_mode = #tpu.pipeline_mode<synchronous>, transform_indices = @transform_17, window_bounds = array<i64: 1, 32>}, {pipeline_mode = #tpu.pipeline_mode<synchronous>, transform_indices = @transform_18, window_bounds = array<i64: 32, 32>}, {pipeline_mode = #tpu.pipeline_mode<synchronous>, transform_indices = @transform_19, window_bounds = array<i64: 1, 32>}, {pipeline_mode = #tpu.pipeline_mode<synchronous>, transform_indices = @transform_20, window_bounds = array<i64: 1, 32>}, {pipeline_mode = #tpu.pipeline_mode<synchronous>, transform_indices = @transform_21, window_bounds = array<i64: 1, 32>}, {pipeline_mode = #tpu.pipeline_mode<synchronous>, transform_indices = @transform_22, window_bounds = array<i64: 1, 32>}, {pipeline_mode = #tpu.pipeline_mode<synchronous>, transform_indices = @transform_23, window_bounds = array<i64: 1, 32>}, {pipeline_mode = #tpu.pipeline_mode<synchronous>, transform_indices = @transform_24, window_bounds = array<i64: 1, 32>}, {pipeline_mode = #tpu.pipeline_mode<synchronous>, transform_indices = @transform_25, window_bounds = array<i64: 1, 32>}, {pipeline_mode = #tpu.pipeline_mode<synchronous>, transform_indices = @transform_26, window_bounds = array<i64: 32, 64>}, {pipeline_mode = #tpu.pipeline_mode<synchronous>, transform_indices = @transform_27, window_bounds = array<i64: 1, 64>}, {pipeline_mode = #tpu.pipeline_mode<synchronous>, transform_indices = @transform_28, window_bounds = array<i64: 64, 32>}, {pipeline_mode = #tpu.pipeline_mode<synchronous>, transform_indices = @transform_29, window_bounds = array<i64: 1, 32>}, {transform_indices = @transform_30, window_bounds = array<i64: 1, 8, 32>}]} {
    %c0 = arith.constant 0 : index
    %c0_0 = arith.constant 0 : index
    %c0_1 = arith.constant 0 : index
    %0 = vector.load %arg1[%c0, %c0_0, %c0_1] : memref<1x8x32xf32, #tpu.memory_space<vmem>>, vector<1x8x32xf32>
    %1 = vector.shape_cast %0 : vector<1x8x32xf32> to vector<8x32xf32>
    %c0_2 = arith.constant 0 : index
    %c0_3 = arith.constant 0 : index
    %c0_4 = arith.constant 0 : index
    %2 = vector.load %arg2[%c0_2, %c0_3, %c0_4] : memref<1x8x32xf32, #tpu.memory_space<vmem>>, vector<1x8x32xf32>
    %3 = vector.shape_cast %2 : vector<1x8x32xf32> to vector<8x32xf32>
    %c0_5 = arith.constant 0 : index
    %c0_6 = arith.constant 0 : index
    %4 = vector.load %arg3[%c0_5, %c0_6] : memref<8x8xf32, #tpu.memory_space<vmem>>, vector<8x8xf32>
    %c0_7 = arith.constant 0 : index
    %c0_8 = arith.constant 0 : index
    %5 = vector.load %arg4[%c0_7, %c0_8] : memref<8x8xf32, #tpu.memory_space<vmem>>, vector<8x8xf32>
    %c0_9 = arith.constant 0 : index
    %c0_10 = arith.constant 0 : index
    %6 = vector.load %arg5[%c0_9, %c0_10] : memref<32x32xf32, #tpu.memory_space<vmem>>, vector<32x32xf32>
    %7 = arith.truncf %6 : vector<32x32xf32> to vector<32x32xbf16>
    %c0_11 = arith.constant 0 : index
    %c0_12 = arith.constant 0 : index
    %8 = vector.load %arg6[%c0_11, %c0_12] : memref<1x32xf32, #tpu.memory_space<vmem>>, vector<1x32xf32>
    %c0_13 = arith.constant 0 : index
    %c0_14 = arith.constant 0 : index
    %9 = vector.load %arg7[%c0_13, %c0_14] : memref<32x32xf32, #tpu.memory_space<vmem>>, vector<32x32xf32>
    %10 = arith.truncf %9 : vector<32x32xf32> to vector<32x32xbf16>
    %c0_15 = arith.constant 0 : index
    %c0_16 = arith.constant 0 : index
    %11 = vector.load %arg8[%c0_15, %c0_16] : memref<1x32xf32, #tpu.memory_space<vmem>>, vector<1x32xf32>
    %c0_17 = arith.constant 0 : index
    %c0_18 = arith.constant 0 : index
    %12 = vector.load %arg9[%c0_17, %c0_18] : memref<32x32xf32, #tpu.memory_space<vmem>>, vector<32x32xf32>
    %13 = arith.truncf %12 : vector<32x32xf32> to vector<32x32xbf16>
    %c0_19 = arith.constant 0 : index
    %c0_20 = arith.constant 0 : index
    %14 = vector.load %arg10[%c0_19, %c0_20] : memref<1x32xf32, #tpu.memory_space<vmem>>, vector<1x32xf32>
    %c0_21 = arith.constant 0 : index
    %c0_22 = arith.constant 0 : index
    %15 = vector.load %arg11[%c0_21, %c0_22] : memref<32x32xf32, #tpu.memory_space<vmem>>, vector<32x32xf32>
    %16 = vector.extract_strided_slice %15 {offsets = [0, 0], sizes = [8, 32], strides = [1, 1]} : vector<32x32xf32> to vector<8x32xf32>
    %17 = arith.truncf %16 : vector<8x32xf32> to vector<8x32xbf16>
    %18 = vector.extract_strided_slice %15 {offsets = [8, 0], sizes = [8, 32], strides = [1, 1]} : vector<32x32xf32> to vector<8x32xf32>
    %19 = arith.truncf %18 : vector<8x32xf32> to vector<8x32xbf16>
    %20 = vector.extract_strided_slice %15 {offsets = [16, 0], sizes = [8, 32], strides = [1, 1]} : vector<32x32xf32> to vector<8x32xf32>
    %21 = arith.truncf %20 : vector<8x32xf32> to vector<8x32xbf16>
    %22 = vector.extract_strided_slice %15 {offsets = [24, 0], sizes = [8, 32], strides = [1, 1]} : vector<32x32xf32> to vector<8x32xf32>
    %23 = arith.truncf %22 : vector<8x32xf32> to vector<8x32xbf16>
    %c0_23 = arith.constant 0 : index
    %c0_24 = arith.constant 0 : index
    %24 = vector.load %arg12[%c0_23, %c0_24] : memref<1x32xf32, #tpu.memory_space<vmem>>, vector<1x32xf32>
    %c0_25 = arith.constant 0 : index
    %c0_26 = arith.constant 0 : index
    %25 = vector.load %arg13[%c0_25, %c0_26] : memref<32x32xf32, #tpu.memory_space<vmem>>, vector<32x32xf32>
    %26 = arith.truncf %25 : vector<32x32xf32> to vector<32x32xbf16>
    %c0_27 = arith.constant 0 : index
    %c0_28 = arith.constant 0 : index
    %27 = vector.load %arg14[%c0_27, %c0_28] : memref<1x32xf32, #tpu.memory_space<vmem>>, vector<1x32xf32>
    %c0_29 = arith.constant 0 : index
    %c0_30 = arith.constant 0 : index
    %28 = vector.load %arg15[%c0_29, %c0_30] : memref<32x32xf32, #tpu.memory_space<vmem>>, vector<32x32xf32>
    %29 = arith.truncf %28 : vector<32x32xf32> to vector<32x32xbf16>
    %c0_31 = arith.constant 0 : index
    %c0_32 = arith.constant 0 : index
    %30 = vector.load %arg16[%c0_31, %c0_32] : memref<1x32xf32, #tpu.memory_space<vmem>>, vector<1x32xf32>
    %c0_33 = arith.constant 0 : index
    %c0_34 = arith.constant 0 : index
    %31 = vector.load %arg17[%c0_33, %c0_34] : memref<32x32xf32, #tpu.memory_space<vmem>>, vector<32x32xf32>
    %32 = arith.truncf %31 : vector<32x32xf32> to vector<32x32xbf16>
    %c0_35 = arith.constant 0 : index
    %c0_36 = arith.constant 0 : index
    %33 = vector.load %arg18[%c0_35, %c0_36] : memref<1x32xf32, #tpu.memory_space<vmem>>, vector<1x32xf32>
    %c0_37 = arith.constant 0 : index
    %c0_38 = arith.constant 0 : index
    %34 = vector.load %arg19[%c0_37, %c0_38] : memref<32x32xf32, #tpu.memory_space<vmem>>, vector<32x32xf32>
    %35 = vector.extract_strided_slice %34 {offsets = [0, 0], sizes = [8, 32], strides = [1, 1]} : vector<32x32xf32> to vector<8x32xf32>
    %36 = arith.truncf %35 : vector<8x32xf32> to vector<8x32xbf16>
    %37 = vector.extract_strided_slice %34 {offsets = [8, 0], sizes = [8, 32], strides = [1, 1]} : vector<32x32xf32> to vector<8x32xf32>
    %38 = arith.truncf %37 : vector<8x32xf32> to vector<8x32xbf16>
    %39 = vector.extract_strided_slice %34 {offsets = [16, 0], sizes = [8, 32], strides = [1, 1]} : vector<32x32xf32> to vector<8x32xf32>
    %40 = arith.truncf %39 : vector<8x32xf32> to vector<8x32xbf16>
    %41 = vector.extract_strided_slice %34 {offsets = [24, 0], sizes = [8, 32], strides = [1, 1]} : vector<32x32xf32> to vector<8x32xf32>
    %42 = arith.truncf %41 : vector<8x32xf32> to vector<8x32xbf16>
    %c0_39 = arith.constant 0 : index
    %c0_40 = arith.constant 0 : index
    %43 = vector.load %arg20[%c0_39, %c0_40] : memref<1x32xf32, #tpu.memory_space<vmem>>, vector<1x32xf32>
    %c0_41 = arith.constant 0 : index
    %c0_42 = arith.constant 0 : index
    %44 = vector.load %arg21[%c0_41, %c0_42] : memref<1x32xf32, #tpu.memory_space<vmem>>, vector<1x32xf32>
    %c0_43 = arith.constant 0 : index
    %c0_44 = arith.constant 0 : index
    %45 = vector.load %arg22[%c0_43, %c0_44] : memref<1x32xf32, #tpu.memory_space<vmem>>, vector<1x32xf32>
    %c0_45 = arith.constant 0 : index
    %c0_46 = arith.constant 0 : index
    %46 = vector.load %arg23[%c0_45, %c0_46] : memref<1x32xf32, #tpu.memory_space<vmem>>, vector<1x32xf32>
    %c0_47 = arith.constant 0 : index
    %c0_48 = arith.constant 0 : index
    %47 = vector.load %arg24[%c0_47, %c0_48] : memref<1x32xf32, #tpu.memory_space<vmem>>, vector<1x32xf32>
    %c0_49 = arith.constant 0 : index
    %c0_50 = arith.constant 0 : index
    %48 = vector.load %arg25[%c0_49, %c0_50] : memref<1x32xf32, #tpu.memory_space<vmem>>, vector<1x32xf32>
    %c0_51 = arith.constant 0 : index
    %c0_52 = arith.constant 0 : index
    %49 = vector.load %arg26[%c0_51, %c0_52] : memref<1x32xf32, #tpu.memory_space<vmem>>, vector<1x32xf32>
    %c0_53 = arith.constant 0 : index
    %c0_54 = arith.constant 0 : index
    %50 = vector.load %arg27[%c0_53, %c0_54] : memref<32x64xf32, #tpu.memory_space<vmem>>, vector<32x64xf32>
    %51 = arith.truncf %50 : vector<32x64xf32> to vector<32x64xbf16>
    %c0_55 = arith.constant 0 : index
    %c0_56 = arith.constant 0 : index
    %52 = vector.load %arg28[%c0_55, %c0_56] : memref<1x64xf32, #tpu.memory_space<vmem>>, vector<1x64xf32>
    %c0_57 = arith.constant 0 : index
    %c0_58 = arith.constant 0 : index
    %53 = vector.load %arg29[%c0_57, %c0_58] : memref<64x32xf32, #tpu.memory_space<vmem>>, vector<64x32xf32>
    %54 = arith.truncf %53 : vector<64x32xf32> to vector<64x32xbf16>
    %c0_59 = arith.constant 0 : index
    %c0_60 = arith.constant 0 : index
    %55 = vector.load %arg30[%c0_59, %c0_60] : memref<1x32xf32, #tpu.memory_space<vmem>>, vector<1x32xf32>
    %56 = arith.truncf %1 : vector<8x32xf32> to vector<8x32xbf16>
    %cst = arith.constant dense<0.000000e+00> : vector<8x32xf32>
    %57 = tpu.matmul %56, %7, %cst {dimension_numbers = #tpu.dot_dimension_numbers<[1], [0], [0], [1], [0, 0, 1, 1], [], []>} : vector<8x32xbf16>, vector<32x32xbf16>, vector<8x32xf32> -> vector<8x32xf32>
    %58 = vector.broadcast %8 : vector<1x32xf32> to vector<8x32xf32>
    %59 = arith.addf %57, %58 : vector<8x32xf32>
    %60 = arith.truncf %1 : vector<8x32xf32> to vector<8x32xbf16>
    %cst_61 = arith.constant dense<0.000000e+00> : vector<8x32xf32>
    %61 = tpu.matmul %60, %10, %cst_61 {dimension_numbers = #tpu.dot_dimension_numbers<[1], [0], [0], [1], [0, 0, 1, 1], [], []>} : vector<8x32xbf16>, vector<32x32xbf16>, vector<8x32xf32> -> vector<8x32xf32>
    %62 = vector.broadcast %11 : vector<1x32xf32> to vector<8x32xf32>
    %63 = arith.addf %61, %62 : vector<8x32xf32>
    %64 = arith.truncf %1 : vector<8x32xf32> to vector<8x32xbf16>
    %cst_62 = arith.constant dense<0.000000e+00> : vector<8x32xf32>
    %65 = tpu.matmul %64, %13, %cst_62 {dimension_numbers = #tpu.dot_dimension_numbers<[1], [0], [0], [1], [0, 0, 1, 1], [], []>} : vector<8x32xbf16>, vector<32x32xbf16>, vector<8x32xf32> -> vector<8x32xf32>
    %66 = vector.broadcast %14 : vector<1x32xf32> to vector<8x32xf32>
    %67 = arith.addf %65, %66 : vector<8x32xf32>
    %cst_63 = arith.constant 0.353553385 : f32
    %68 = vector.broadcast %cst_63 : f32 to vector<8x32xf32>
    %69 = arith.mulf %59, %68 : vector<8x32xf32>
    %70 = vector.extract_strided_slice %69 {offsets = [0, 0], sizes = [8, 8], strides = [1, 1]} : vector<8x32xf32> to vector<8x8xf32>
    %71 = arith.truncf %70 : vector<8x8xf32> to vector<8x8xbf16>
    %72 = vector.extract_strided_slice %63 {offsets = [0, 0], sizes = [8, 8], strides = [1, 1]} : vector<8x32xf32> to vector<8x8xf32>
    %73 = arith.truncf %72 : vector<8x8xf32> to vector<8x8xbf16>
    %74 = vector.extract_strided_slice %67 {offsets = [0, 0], sizes = [8, 8], strides = [1, 1]} : vector<8x32xf32> to vector<8x8xf32>
    %75 = arith.truncf %74 : vector<8x8xf32> to vector<8x8xbf16>
    %cst_64 = arith.constant dense<0.000000e+00> : vector<8x8xf32>
    %76 = tpu.matmul %71, %73, %cst_64 {dimension_numbers = #tpu.dot_dimension_numbers<[1], [1], [0], [0], [0, 0, 1, 0], [], []>} : vector<8x8xbf16>, vector<8x8xbf16>, vector<8x8xf32> -> vector<8x8xf32>
    %77 = arith.addf %76, %4 : vector<8x8xf32>
    %cst_65 = arith.constant dense<0xFF800000> : vector<8xf32>
    %78 = vector.multi_reduction <maximumf>, %77, %cst_65 [1] : vector<8x8xf32> to vector<8xf32>
    %79 = vector.shape_cast %78 : vector<8xf32> to vector<8x1xf32>
    %80 = vector.broadcast %79 : vector<8x1xf32> to vector<8x8xf32>
    %81 = arith.subf %77, %80 : vector<8x8xf32>
    %82 = math.exp %81 : vector<8x8xf32>
    %cst_66 = arith.constant dense<0.000000e+00> : vector<8xf32>
    %83 = vector.multi_reduction <add>, %82, %cst_66 [1] : vector<8x8xf32> to vector<8xf32>
    %84 = vector.shape_cast %83 : vector<8xf32> to vector<8x1xf32>
    %85 = tpu.reciprocal %84 {approx = true} : vector<8x1xf32> -> vector<8x1xf32>
    %86 = vector.broadcast %85 : vector<8x1xf32> to vector<8x8xf32>
    %87 = arith.mulf %82, %86 : vector<8x8xf32>
    %88 = arith.truncf %87 : vector<8x8xf32> to vector<8x8xbf16>
    %cst_67 = arith.constant dense<0.000000e+00> : vector<8x8xf32>
    %89 = tpu.matmul %88, %75, %cst_67 {dimension_numbers = #tpu.dot_dimension_numbers<[1], [0], [0], [1], [0, 0, 1, 1], [], []>} : vector<8x8xbf16>, vector<8x8xbf16>, vector<8x8xf32> -> vector<8x8xf32>
    %90 = arith.truncf %89 : vector<8x8xf32> to vector<8x8xbf16>
    %cst_68 = arith.constant dense<0.000000e+00> : vector<8x32xf32>
    %91 = tpu.matmul %90, %17, %cst_68 {dimension_numbers = #tpu.dot_dimension_numbers<[1], [0], [0], [1], [0, 0, 1, 1], [], []>} : vector<8x8xbf16>, vector<8x32xbf16>, vector<8x32xf32> -> vector<8x32xf32>
    %92 = vector.extract_strided_slice %69 {offsets = [0, 8], sizes = [8, 8], strides = [1, 1]} : vector<8x32xf32> to vector<8x8xf32>
    %93 = arith.truncf %92 : vector<8x8xf32> to vector<8x8xbf16>
    %94 = vector.extract_strided_slice %63 {offsets = [0, 8], sizes = [8, 8], strides = [1, 1]} : vector<8x32xf32> to vector<8x8xf32>
    %95 = arith.truncf %94 : vector<8x8xf32> to vector<8x8xbf16>
    %96 = vector.extract_strided_slice %67 {offsets = [0, 8], sizes = [8, 8], strides = [1, 1]} : vector<8x32xf32> to vector<8x8xf32>
    %97 = arith.truncf %96 : vector<8x8xf32> to vector<8x8xbf16>
    %cst_69 = arith.constant dense<0.000000e+00> : vector<8x8xf32>
    %98 = tpu.matmul %93, %95, %cst_69 {dimension_numbers = #tpu.dot_dimension_numbers<[1], [1], [0], [0], [0, 0, 1, 0], [], []>} : vector<8x8xbf16>, vector<8x8xbf16>, vector<8x8xf32> -> vector<8x8xf32>
    %99 = arith.addf %98, %4 : vector<8x8xf32>
    %cst_70 = arith.constant dense<0xFF800000> : vector<8xf32>
    %100 = vector.multi_reduction <maximumf>, %99, %cst_70 [1] : vector<8x8xf32> to vector<8xf32>
    %101 = vector.shape_cast %100 : vector<8xf32> to vector<8x1xf32>
    %102 = vector.broadcast %101 : vector<8x1xf32> to vector<8x8xf32>
    %103 = arith.subf %99, %102 : vector<8x8xf32>
    %104 = math.exp %103 : vector<8x8xf32>
    %cst_71 = arith.constant dense<0.000000e+00> : vector<8xf32>
    %105 = vector.multi_reduction <add>, %104, %cst_71 [1] : vector<8x8xf32> to vector<8xf32>
    %106 = vector.shape_cast %105 : vector<8xf32> to vector<8x1xf32>
    %107 = tpu.reciprocal %106 {approx = true} : vector<8x1xf32> -> vector<8x1xf32>
    %108 = vector.broadcast %107 : vector<8x1xf32> to vector<8x8xf32>
    %109 = arith.mulf %104, %108 : vector<8x8xf32>
    %110 = arith.truncf %109 : vector<8x8xf32> to vector<8x8xbf16>
    %cst_72 = arith.constant dense<0.000000e+00> : vector<8x8xf32>
    %111 = tpu.matmul %110, %97, %cst_72 {dimension_numbers = #tpu.dot_dimension_numbers<[1], [0], [0], [1], [0, 0, 1, 1], [], []>} : vector<8x8xbf16>, vector<8x8xbf16>, vector<8x8xf32> -> vector<8x8xf32>
    %112 = arith.truncf %111 : vector<8x8xf32> to vector<8x8xbf16>
    %cst_73 = arith.constant dense<0.000000e+00> : vector<8x32xf32>
    %113 = tpu.matmul %112, %19, %cst_73 {dimension_numbers = #tpu.dot_dimension_numbers<[1], [0], [0], [1], [0, 0, 1, 1], [], []>} : vector<8x8xbf16>, vector<8x32xbf16>, vector<8x32xf32> -> vector<8x32xf32>
    %114 = arith.addf %91, %113 : vector<8x32xf32>
    %115 = vector.extract_strided_slice %69 {offsets = [0, 16], sizes = [8, 8], strides = [1, 1]} : vector<8x32xf32> to vector<8x8xf32>
    %116 = arith.truncf %115 : vector<8x8xf32> to vector<8x8xbf16>
    %117 = vector.extract_strided_slice %63 {offsets = [0, 16], sizes = [8, 8], strides = [1, 1]} : vector<8x32xf32> to vector<8x8xf32>
    %118 = arith.truncf %117 : vector<8x8xf32> to vector<8x8xbf16>
    %119 = vector.extract_strided_slice %67 {offsets = [0, 16], sizes = [8, 8], strides = [1, 1]} : vector<8x32xf32> to vector<8x8xf32>
    %120 = arith.truncf %119 : vector<8x8xf32> to vector<8x8xbf16>
    %cst_74 = arith.constant dense<0.000000e+00> : vector<8x8xf32>
    %121 = tpu.matmul %116, %118, %cst_74 {dimension_numbers = #tpu.dot_dimension_numbers<[1], [1], [0], [0], [0, 0, 1, 0], [], []>} : vector<8x8xbf16>, vector<8x8xbf16>, vector<8x8xf32> -> vector<8x8xf32>
    %122 = arith.addf %121, %4 : vector<8x8xf32>
    %cst_75 = arith.constant dense<0xFF800000> : vector<8xf32>
    %123 = vector.multi_reduction <maximumf>, %122, %cst_75 [1] : vector<8x8xf32> to vector<8xf32>
    %124 = vector.shape_cast %123 : vector<8xf32> to vector<8x1xf32>
    %125 = vector.broadcast %124 : vector<8x1xf32> to vector<8x8xf32>
    %126 = arith.subf %122, %125 : vector<8x8xf32>
    %127 = math.exp %126 : vector<8x8xf32>
    %cst_76 = arith.constant dense<0.000000e+00> : vector<8xf32>
    %128 = vector.multi_reduction <add>, %127, %cst_76 [1] : vector<8x8xf32> to vector<8xf32>
    %129 = vector.shape_cast %128 : vector<8xf32> to vector<8x1xf32>
    %130 = tpu.reciprocal %129 {approx = true} : vector<8x1xf32> -> vector<8x1xf32>
    %131 = vector.broadcast %130 : vector<8x1xf32> to vector<8x8xf32>
    %132 = arith.mulf %127, %131 : vector<8x8xf32>
    %133 = arith.truncf %132 : vector<8x8xf32> to vector<8x8xbf16>
    %cst_77 = arith.constant dense<0.000000e+00> : vector<8x8xf32>
    %134 = tpu.matmul %133, %120, %cst_77 {dimension_numbers = #tpu.dot_dimension_numbers<[1], [0], [0], [1], [0, 0, 1, 1], [], []>} : vector<8x8xbf16>, vector<8x8xbf16>, vector<8x8xf32> -> vector<8x8xf32>
    %135 = arith.truncf %134 : vector<8x8xf32> to vector<8x8xbf16>
    %cst_78 = arith.constant dense<0.000000e+00> : vector<8x32xf32>
    %136 = tpu.matmul %135, %21, %cst_78 {dimension_numbers = #tpu.dot_dimension_numbers<[1], [0], [0], [1], [0, 0, 1, 1], [], []>} : vector<8x8xbf16>, vector<8x32xbf16>, vector<8x32xf32> -> vector<8x32xf32>
    %137 = arith.addf %114, %136 : vector<8x32xf32>
    %138 = vector.extract_strided_slice %69 {offsets = [0, 24], sizes = [8, 8], strides = [1, 1]} : vector<8x32xf32> to vector<8x8xf32>
    %139 = arith.truncf %138 : vector<8x8xf32> to vector<8x8xbf16>
    %140 = vector.extract_strided_slice %63 {offsets = [0, 24], sizes = [8, 8], strides = [1, 1]} : vector<8x32xf32> to vector<8x8xf32>
    %141 = arith.truncf %140 : vector<8x8xf32> to vector<8x8xbf16>
    %142 = vector.extract_strided_slice %67 {offsets = [0, 24], sizes = [8, 8], strides = [1, 1]} : vector<8x32xf32> to vector<8x8xf32>
    %143 = arith.truncf %142 : vector<8x8xf32> to vector<8x8xbf16>
    %cst_79 = arith.constant dense<0.000000e+00> : vector<8x8xf32>
    %144 = tpu.matmul %139, %141, %cst_79 {dimension_numbers = #tpu.dot_dimension_numbers<[1], [1], [0], [0], [0, 0, 1, 0], [], []>} : vector<8x8xbf16>, vector<8x8xbf16>, vector<8x8xf32> -> vector<8x8xf32>
    %145 = arith.addf %144, %4 : vector<8x8xf32>
    %cst_80 = arith.constant dense<0xFF800000> : vector<8xf32>
    %146 = vector.multi_reduction <maximumf>, %145, %cst_80 [1] : vector<8x8xf32> to vector<8xf32>
    %147 = vector.shape_cast %146 : vector<8xf32> to vector<8x1xf32>
    %148 = vector.broadcast %147 : vector<8x1xf32> to vector<8x8xf32>
    %149 = arith.subf %145, %148 : vector<8x8xf32>
    %150 = math.exp %149 : vector<8x8xf32>
    %cst_81 = arith.constant dense<0.000000e+00> : vector<8xf32>
    %151 = vector.multi_reduction <add>, %150, %cst_81 [1] : vector<8x8xf32> to vector<8xf32>
    %152 = vector.shape_cast %151 : vector<8xf32> to vector<8x1xf32>
    %153 = tpu.reciprocal %152 {approx = true} : vector<8x1xf32> -> vector<8x1xf32>
    %154 = vector.broadcast %153 : vector<8x1xf32> to vector<8x8xf32>
    %155 = arith.mulf %150, %154 : vector<8x8xf32>
    %156 = arith.truncf %155 : vector<8x8xf32> to vector<8x8xbf16>
    %cst_82 = arith.constant dense<0.000000e+00> : vector<8x8xf32>
    %157 = tpu.matmul %156, %143, %cst_82 {dimension_numbers = #tpu.dot_dimension_numbers<[1], [0], [0], [1], [0, 0, 1, 1], [], []>} : vector<8x8xbf16>, vector<8x8xbf16>, vector<8x8xf32> -> vector<8x8xf32>
    %158 = arith.truncf %157 : vector<8x8xf32> to vector<8x8xbf16>
    %cst_83 = arith.constant dense<0.000000e+00> : vector<8x32xf32>
    %159 = tpu.matmul %158, %23, %cst_83 {dimension_numbers = #tpu.dot_dimension_numbers<[1], [0], [0], [1], [0, 0, 1, 1], [], []>} : vector<8x8xbf16>, vector<8x32xbf16>, vector<8x32xf32> -> vector<8x32xf32>
    %160 = arith.addf %137, %159 : vector<8x32xf32>
    %161 = vector.broadcast %24 : vector<1x32xf32> to vector<8x32xf32>
    %162 = arith.addf %160, %161 : vector<8x32xf32>
    %163 = arith.addf %1, %162 : vector<8x32xf32>
    %cst_84 = arith.constant dense<0.000000e+00> : vector<8xf32>
    %164 = vector.multi_reduction <add>, %163, %cst_84 [1] : vector<8x32xf32> to vector<8xf32>
    %165 = vector.shape_cast %164 : vector<8xf32> to vector<8x1xf32>
    %cst_85 = arith.constant 3.200000e+01 : f32
    %166 = vector.broadcast %cst_85 : f32 to vector<8x1xf32>
    %167 = arith.divf %165, %166 : vector<8x1xf32>
    %168 = vector.broadcast %167 : vector<8x1xf32> to vector<8x32xf32>
    %169 = arith.subf %163, %168 : vector<8x32xf32>
    %170 = arith.mulf %169, %169 : vector<8x32xf32>
    %cst_86 = arith.constant dense<0.000000e+00> : vector<8xf32>
    %171 = vector.multi_reduction <add>, %170, %cst_86 [1] : vector<8x32xf32> to vector<8xf32>
    %172 = vector.shape_cast %171 : vector<8xf32> to vector<8x1xf32>
    %cst_87 = arith.constant 3.200000e+01 : f32
    %173 = vector.broadcast %cst_87 : f32 to vector<8x1xf32>
    %174 = arith.divf %172, %173 : vector<8x1xf32>
    %175 = vector.broadcast %167 : vector<8x1xf32> to vector<8x32xf32>
    %176 = arith.subf %163, %175 : vector<8x32xf32>
    %cst_88 = arith.constant 9.99999974E-6 : f32
    %177 = vector.broadcast %cst_88 : f32 to vector<8x1xf32>
    %178 = arith.addf %174, %177 : vector<8x1xf32>
    %179 = math.rsqrt %178 : vector<8x1xf32>
    %180 = vector.broadcast %179 : vector<8x1xf32> to vector<8x32xf32>
    %181 = arith.mulf %176, %180 : vector<8x32xf32>
    %182 = vector.broadcast %44 : vector<1x32xf32> to vector<8x32xf32>
    %183 = arith.mulf %181, %182 : vector<8x32xf32>
    %184 = vector.broadcast %45 : vector<1x32xf32> to vector<8x32xf32>
    %185 = arith.addf %183, %184 : vector<8x32xf32>
    %186 = arith.truncf %185 : vector<8x32xf32> to vector<8x32xbf16>
    %cst_89 = arith.constant dense<0.000000e+00> : vector<8x32xf32>
    %187 = tpu.matmul %186, %26, %cst_89 {dimension_numbers = #tpu.dot_dimension_numbers<[1], [0], [0], [1], [0, 0, 1, 1], [], []>} : vector<8x32xbf16>, vector<32x32xbf16>, vector<8x32xf32> -> vector<8x32xf32>
    %188 = vector.broadcast %27 : vector<1x32xf32> to vector<8x32xf32>
    %189 = arith.addf %187, %188 : vector<8x32xf32>
    %190 = arith.truncf %3 : vector<8x32xf32> to vector<8x32xbf16>
    %cst_90 = arith.constant dense<0.000000e+00> : vector<8x32xf32>
    %191 = tpu.matmul %190, %29, %cst_90 {dimension_numbers = #tpu.dot_dimension_numbers<[1], [0], [0], [1], [0, 0, 1, 1], [], []>} : vector<8x32xbf16>, vector<32x32xbf16>, vector<8x32xf32> -> vector<8x32xf32>
    %192 = vector.broadcast %30 : vector<1x32xf32> to vector<8x32xf32>
    %193 = arith.addf %191, %192 : vector<8x32xf32>
    %194 = arith.truncf %3 : vector<8x32xf32> to vector<8x32xbf16>
    %cst_91 = arith.constant dense<0.000000e+00> : vector<8x32xf32>
    %195 = tpu.matmul %194, %32, %cst_91 {dimension_numbers = #tpu.dot_dimension_numbers<[1], [0], [0], [1], [0, 0, 1, 1], [], []>} : vector<8x32xbf16>, vector<32x32xbf16>, vector<8x32xf32> -> vector<8x32xf32>
    %196 = vector.broadcast %33 : vector<1x32xf32> to vector<8x32xf32>
    %197 = arith.addf %195, %196 : vector<8x32xf32>
    %cst_92 = arith.constant 0.353553385 : f32
    %198 = vector.broadcast %cst_92 : f32 to vector<8x32xf32>
    %199 = arith.mulf %189, %198 : vector<8x32xf32>
    %200 = vector.extract_strided_slice %199 {offsets = [0, 0], sizes = [8, 8], strides = [1, 1]} : vector<8x32xf32> to vector<8x8xf32>
    %201 = arith.truncf %200 : vector<8x8xf32> to vector<8x8xbf16>
    %202 = vector.extract_strided_slice %193 {offsets = [0, 0], sizes = [8, 8], strides = [1, 1]} : vector<8x32xf32> to vector<8x8xf32>
    %203 = arith.truncf %202 : vector<8x8xf32> to vector<8x8xbf16>
    %204 = vector.extract_strided_slice %197 {offsets = [0, 0], sizes = [8, 8], strides = [1, 1]} : vector<8x32xf32> to vector<8x8xf32>
    %205 = arith.truncf %204 : vector<8x8xf32> to vector<8x8xbf16>
    %cst_93 = arith.constant dense<0.000000e+00> : vector<8x8xf32>
    %206 = tpu.matmul %201, %203, %cst_93 {dimension_numbers = #tpu.dot_dimension_numbers<[1], [1], [0], [0], [0, 0, 1, 0], [], []>} : vector<8x8xbf16>, vector<8x8xbf16>, vector<8x8xf32> -> vector<8x8xf32>
    %207 = arith.addf %206, %5 : vector<8x8xf32>
    %cst_94 = arith.constant dense<0xFF800000> : vector<8xf32>
    %208 = vector.multi_reduction <maximumf>, %207, %cst_94 [1] : vector<8x8xf32> to vector<8xf32>
    %209 = vector.shape_cast %208 : vector<8xf32> to vector<8x1xf32>
    %210 = vector.broadcast %209 : vector<8x1xf32> to vector<8x8xf32>
    %211 = arith.subf %207, %210 : vector<8x8xf32>
    %212 = math.exp %211 : vector<8x8xf32>
    %cst_95 = arith.constant dense<0.000000e+00> : vector<8xf32>
    %213 = vector.multi_reduction <add>, %212, %cst_95 [1] : vector<8x8xf32> to vector<8xf32>
    %214 = vector.shape_cast %213 : vector<8xf32> to vector<8x1xf32>
    %215 = tpu.reciprocal %214 {approx = true} : vector<8x1xf32> -> vector<8x1xf32>
    %216 = vector.broadcast %215 : vector<8x1xf32> to vector<8x8xf32>
    %217 = arith.mulf %212, %216 : vector<8x8xf32>
    %218 = arith.truncf %217 : vector<8x8xf32> to vector<8x8xbf16>
    %cst_96 = arith.constant dense<0.000000e+00> : vector<8x8xf32>
    %219 = tpu.matmul %218, %205, %cst_96 {dimension_numbers = #tpu.dot_dimension_numbers<[1], [0], [0], [1], [0, 0, 1, 1], [], []>} : vector<8x8xbf16>, vector<8x8xbf16>, vector<8x8xf32> -> vector<8x8xf32>
    %220 = arith.truncf %219 : vector<8x8xf32> to vector<8x8xbf16>
    %cst_97 = arith.constant dense<0.000000e+00> : vector<8x32xf32>
    %221 = tpu.matmul %220, %36, %cst_97 {dimension_numbers = #tpu.dot_dimension_numbers<[1], [0], [0], [1], [0, 0, 1, 1], [], []>} : vector<8x8xbf16>, vector<8x32xbf16>, vector<8x32xf32> -> vector<8x32xf32>
    %222 = vector.extract_strided_slice %199 {offsets = [0, 8], sizes = [8, 8], strides = [1, 1]} : vector<8x32xf32> to vector<8x8xf32>
    %223 = arith.truncf %222 : vector<8x8xf32> to vector<8x8xbf16>
    %224 = vector.extract_strided_slice %193 {offsets = [0, 8], sizes = [8, 8], strides = [1, 1]} : vector<8x32xf32> to vector<8x8xf32>
    %225 = arith.truncf %224 : vector<8x8xf32> to vector<8x8xbf16>
    %226 = vector.extract_strided_slice %197 {offsets = [0, 8], sizes = [8, 8], strides = [1, 1]} : vector<8x32xf32> to vector<8x8xf32>
    %227 = arith.truncf %226 : vector<8x8xf32> to vector<8x8xbf16>
    %cst_98 = arith.constant dense<0.000000e+00> : vector<8x8xf32>
    %228 = tpu.matmul %223, %225, %cst_98 {dimension_numbers = #tpu.dot_dimension_numbers<[1], [1], [0], [0], [0, 0, 1, 0], [], []>} : vector<8x8xbf16>, vector<8x8xbf16>, vector<8x8xf32> -> vector<8x8xf32>
    %229 = arith.addf %228, %5 : vector<8x8xf32>
    %cst_99 = arith.constant dense<0xFF800000> : vector<8xf32>
    %230 = vector.multi_reduction <maximumf>, %229, %cst_99 [1] : vector<8x8xf32> to vector<8xf32>
    %231 = vector.shape_cast %230 : vector<8xf32> to vector<8x1xf32>
    %232 = vector.broadcast %231 : vector<8x1xf32> to vector<8x8xf32>
    %233 = arith.subf %229, %232 : vector<8x8xf32>
    %234 = math.exp %233 : vector<8x8xf32>
    %cst_100 = arith.constant dense<0.000000e+00> : vector<8xf32>
    %235 = vector.multi_reduction <add>, %234, %cst_100 [1] : vector<8x8xf32> to vector<8xf32>
    %236 = vector.shape_cast %235 : vector<8xf32> to vector<8x1xf32>
    %237 = tpu.reciprocal %236 {approx = true} : vector<8x1xf32> -> vector<8x1xf32>
    %238 = vector.broadcast %237 : vector<8x1xf32> to vector<8x8xf32>
    %239 = arith.mulf %234, %238 : vector<8x8xf32>
    %240 = arith.truncf %239 : vector<8x8xf32> to vector<8x8xbf16>
    %cst_101 = arith.constant dense<0.000000e+00> : vector<8x8xf32>
    %241 = tpu.matmul %240, %227, %cst_101 {dimension_numbers = #tpu.dot_dimension_numbers<[1], [0], [0], [1], [0, 0, 1, 1], [], []>} : vector<8x8xbf16>, vector<8x8xbf16>, vector<8x8xf32> -> vector<8x8xf32>
    %242 = arith.truncf %241 : vector<8x8xf32> to vector<8x8xbf16>
    %cst_102 = arith.constant dense<0.000000e+00> : vector<8x32xf32>
    %243 = tpu.matmul %242, %38, %cst_102 {dimension_numbers = #tpu.dot_dimension_numbers<[1], [0], [0], [1], [0, 0, 1, 1], [], []>} : vector<8x8xbf16>, vector<8x32xbf16>, vector<8x32xf32> -> vector<8x32xf32>
    %244 = arith.addf %221, %243 : vector<8x32xf32>
    %245 = vector.extract_strided_slice %199 {offsets = [0, 16], sizes = [8, 8], strides = [1, 1]} : vector<8x32xf32> to vector<8x8xf32>
    %246 = arith.truncf %245 : vector<8x8xf32> to vector<8x8xbf16>
    %247 = vector.extract_strided_slice %193 {offsets = [0, 16], sizes = [8, 8], strides = [1, 1]} : vector<8x32xf32> to vector<8x8xf32>
    %248 = arith.truncf %247 : vector<8x8xf32> to vector<8x8xbf16>
    %249 = vector.extract_strided_slice %197 {offsets = [0, 16], sizes = [8, 8], strides = [1, 1]} : vector<8x32xf32> to vector<8x8xf32>
    %250 = arith.truncf %249 : vector<8x8xf32> to vector<8x8xbf16>
    %cst_103 = arith.constant dense<0.000000e+00> : vector<8x8xf32>
    %251 = tpu.matmul %246, %248, %cst_103 {dimension_numbers = #tpu.dot_dimension_numbers<[1], [1], [0], [0], [0, 0, 1, 0], [], []>} : vector<8x8xbf16>, vector<8x8xbf16>, vector<8x8xf32> -> vector<8x8xf32>
    %252 = arith.addf %251, %5 : vector<8x8xf32>
    %cst_104 = arith.constant dense<0xFF800000> : vector<8xf32>
    %253 = vector.multi_reduction <maximumf>, %252, %cst_104 [1] : vector<8x8xf32> to vector<8xf32>
    %254 = vector.shape_cast %253 : vector<8xf32> to vector<8x1xf32>
    %255 = vector.broadcast %254 : vector<8x1xf32> to vector<8x8xf32>
    %256 = arith.subf %252, %255 : vector<8x8xf32>
    %257 = math.exp %256 : vector<8x8xf32>
    %cst_105 = arith.constant dense<0.000000e+00> : vector<8xf32>
    %258 = vector.multi_reduction <add>, %257, %cst_105 [1] : vector<8x8xf32> to vector<8xf32>
    %259 = vector.shape_cast %258 : vector<8xf32> to vector<8x1xf32>
    %260 = tpu.reciprocal %259 {approx = true} : vector<8x1xf32> -> vector<8x1xf32>
    %261 = vector.broadcast %260 : vector<8x1xf32> to vector<8x8xf32>
    %262 = arith.mulf %257, %261 : vector<8x8xf32>
    %263 = arith.truncf %262 : vector<8x8xf32> to vector<8x8xbf16>
    %cst_106 = arith.constant dense<0.000000e+00> : vector<8x8xf32>
    %264 = tpu.matmul %263, %250, %cst_106 {dimension_numbers = #tpu.dot_dimension_numbers<[1], [0], [0], [1], [0, 0, 1, 1], [], []>} : vector<8x8xbf16>, vector<8x8xbf16>, vector<8x8xf32> -> vector<8x8xf32>
    %265 = arith.truncf %264 : vector<8x8xf32> to vector<8x8xbf16>
    %cst_107 = arith.constant dense<0.000000e+00> : vector<8x32xf32>
    %266 = tpu.matmul %265, %40, %cst_107 {dimension_numbers = #tpu.dot_dimension_numbers<[1], [0], [0], [1], [0, 0, 1, 1], [], []>} : vector<8x8xbf16>, vector<8x32xbf16>, vector<8x32xf32> -> vector<8x32xf32>
    %267 = arith.addf %244, %266 : vector<8x32xf32>
    %268 = vector.extract_strided_slice %199 {offsets = [0, 24], sizes = [8, 8], strides = [1, 1]} : vector<8x32xf32> to vector<8x8xf32>
    %269 = arith.truncf %268 : vector<8x8xf32> to vector<8x8xbf16>
    %270 = vector.extract_strided_slice %193 {offsets = [0, 24], sizes = [8, 8], strides = [1, 1]} : vector<8x32xf32> to vector<8x8xf32>
    %271 = arith.truncf %270 : vector<8x8xf32> to vector<8x8xbf16>
    %272 = vector.extract_strided_slice %197 {offsets = [0, 24], sizes = [8, 8], strides = [1, 1]} : vector<8x32xf32> to vector<8x8xf32>
    %273 = arith.truncf %272 : vector<8x8xf32> to vector<8x8xbf16>
    %cst_108 = arith.constant dense<0.000000e+00> : vector<8x8xf32>
    %274 = tpu.matmul %269, %271, %cst_108 {dimension_numbers = #tpu.dot_dimension_numbers<[1], [1], [0], [0], [0, 0, 1, 0], [], []>} : vector<8x8xbf16>, vector<8x8xbf16>, vector<8x8xf32> -> vector<8x8xf32>
    %275 = arith.addf %274, %5 : vector<8x8xf32>
    %cst_109 = arith.constant dense<0xFF800000> : vector<8xf32>
    %276 = vector.multi_reduction <maximumf>, %275, %cst_109 [1] : vector<8x8xf32> to vector<8xf32>
    %277 = vector.shape_cast %276 : vector<8xf32> to vector<8x1xf32>
    %278 = vector.broadcast %277 : vector<8x1xf32> to vector<8x8xf32>
    %279 = arith.subf %275, %278 : vector<8x8xf32>
    %280 = math.exp %279 : vector<8x8xf32>
    %cst_110 = arith.constant dense<0.000000e+00> : vector<8xf32>
    %281 = vector.multi_reduction <add>, %280, %cst_110 [1] : vector<8x8xf32> to vector<8xf32>
    %282 = vector.shape_cast %281 : vector<8xf32> to vector<8x1xf32>
    %283 = tpu.reciprocal %282 {approx = true} : vector<8x1xf32> -> vector<8x1xf32>
    %284 = vector.broadcast %283 : vector<8x1xf32> to vector<8x8xf32>
    %285 = arith.mulf %280, %284 : vector<8x8xf32>
    %286 = arith.truncf %285 : vector<8x8xf32> to vector<8x8xbf16>
    %cst_111 = arith.constant dense<0.000000e+00> : vector<8x8xf32>
    %287 = tpu.matmul %286, %273, %cst_111 {dimension_numbers = #tpu.dot_dimension_numbers<[1], [0], [0], [1], [0, 0, 1, 1], [], []>} : vector<8x8xbf16>, vector<8x8xbf16>, vector<8x8xf32> -> vector<8x8xf32>
    %288 = arith.truncf %287 : vector<8x8xf32> to vector<8x8xbf16>
    %cst_112 = arith.constant dense<0.000000e+00> : vector<8x32xf32>
    %289 = tpu.matmul %288, %42, %cst_112 {dimension_numbers = #tpu.dot_dimension_numbers<[1], [0], [0], [1], [0, 0, 1, 1], [], []>} : vector<8x8xbf16>, vector<8x32xbf16>, vector<8x32xf32> -> vector<8x32xf32>
    %290 = arith.addf %267, %289 : vector<8x32xf32>
    %291 = vector.broadcast %43 : vector<1x32xf32> to vector<8x32xf32>
    %292 = arith.addf %290, %291 : vector<8x32xf32>
    %293 = arith.addf %185, %292 : vector<8x32xf32>
    %cst_113 = arith.constant dense<0.000000e+00> : vector<8xf32>
    %294 = vector.multi_reduction <add>, %293, %cst_113 [1] : vector<8x32xf32> to vector<8xf32>
    %295 = vector.shape_cast %294 : vector<8xf32> to vector<8x1xf32>
    %cst_114 = arith.constant 3.200000e+01 : f32
    %296 = vector.broadcast %cst_114 : f32 to vector<8x1xf32>
    %297 = arith.divf %295, %296 : vector<8x1xf32>
    %298 = vector.broadcast %297 : vector<8x1xf32> to vector<8x32xf32>
    %299 = arith.subf %293, %298 : vector<8x32xf32>
    %300 = arith.mulf %299, %299 : vector<8x32xf32>
    %cst_115 = arith.constant dense<0.000000e+00> : vector<8xf32>
    %301 = vector.multi_reduction <add>, %300, %cst_115 [1] : vector<8x32xf32> to vector<8xf32>
    %302 = vector.shape_cast %301 : vector<8xf32> to vector<8x1xf32>
    %cst_116 = arith.constant 3.200000e+01 : f32
    %303 = vector.broadcast %cst_116 : f32 to vector<8x1xf32>
    %304 = arith.divf %302, %303 : vector<8x1xf32>
    %305 = vector.broadcast %297 : vector<8x1xf32> to vector<8x32xf32>
    %306 = arith.subf %293, %305 : vector<8x32xf32>
    %cst_117 = arith.constant 9.99999974E-6 : f32
    %307 = vector.broadcast %cst_117 : f32 to vector<8x1xf32>
    %308 = arith.addf %304, %307 : vector<8x1xf32>
    %309 = math.rsqrt %308 : vector<8x1xf32>
    %310 = vector.broadcast %309 : vector<8x1xf32> to vector<8x32xf32>
    %311 = arith.mulf %306, %310 : vector<8x32xf32>
    %312 = vector.broadcast %46 : vector<1x32xf32> to vector<8x32xf32>
    %313 = arith.mulf %311, %312 : vector<8x32xf32>
    %314 = vector.broadcast %47 : vector<1x32xf32> to vector<8x32xf32>
    %315 = arith.addf %313, %314 : vector<8x32xf32>
    %316 = arith.truncf %315 : vector<8x32xf32> to vector<8x32xbf16>
    %cst_118 = arith.constant dense<0.000000e+00> : vector<8x64xf32>
    %317 = tpu.matmul %316, %51, %cst_118 {dimension_numbers = #tpu.dot_dimension_numbers<[1], [0], [0], [1], [0, 0, 1, 1], [], []>} : vector<8x32xbf16>, vector<32x64xbf16>, vector<8x64xf32> -> vector<8x64xf32>
    %318 = vector.broadcast %52 : vector<1x64xf32> to vector<8x64xf32>
    %319 = arith.addf %317, %318 : vector<8x64xf32>
    %cst_119 = arith.constant 0.000000e+00 : f32
    %320 = vector.broadcast %cst_119 : f32 to vector<8x64xf32>
    %321 = arith.maximumf %319, %320 : vector<8x64xf32>
    %322 = arith.truncf %321 : vector<8x64xf32> to vector<8x64xbf16>
    %cst_120 = arith.constant dense<0.000000e+00> : vector<8x32xf32>
    %323 = tpu.matmul %322, %54, %cst_120 {dimension_numbers = #tpu.dot_dimension_numbers<[1], [0], [0], [1], [0, 0, 1, 1], [], []>} : vector<8x64xbf16>, vector<64x32xbf16>, vector<8x32xf32> -> vector<8x32xf32>
    %324 = vector.broadcast %55 : vector<1x32xf32> to vector<8x32xf32>
    %325 = arith.addf %323, %324 : vector<8x32xf32>
    %326 = arith.addf %315, %325 : vector<8x32xf32>
    %cst_121 = arith.constant dense<0.000000e+00> : vector<8xf32>
    %327 = vector.multi_reduction <add>, %326, %cst_121 [1] : vector<8x32xf32> to vector<8xf32>
    %328 = vector.shape_cast %327 : vector<8xf32> to vector<8x1xf32>
    %cst_122 = arith.constant 3.200000e+01 : f32
    %329 = vector.broadcast %cst_122 : f32 to vector<8x1xf32>
    %330 = arith.divf %328, %329 : vector<8x1xf32>
    %331 = vector.broadcast %330 : vector<8x1xf32> to vector<8x32xf32>
    %332 = arith.subf %326, %331 : vector<8x32xf32>
    %333 = arith.mulf %332, %332 : vector<8x32xf32>
    %cst_123 = arith.constant dense<0.000000e+00> : vector<8xf32>
    %334 = vector.multi_reduction <add>, %333, %cst_123 [1] : vector<8x32xf32> to vector<8xf32>
    %335 = vector.shape_cast %334 : vector<8xf32> to vector<8x1xf32>
    %cst_124 = arith.constant 3.200000e+01 : f32
    %336 = vector.broadcast %cst_124 : f32 to vector<8x1xf32>
    %337 = arith.divf %335, %336 : vector<8x1xf32>
    %338 = vector.broadcast %330 : vector<8x1xf32> to vector<8x32xf32>
    %339 = arith.subf %326, %338 : vector<8x32xf32>
    %cst_125 = arith.constant 9.99999974E-6 : f32
    %340 = vector.broadcast %cst_125 : f32 to vector<8x1xf32>
    %341 = arith.addf %337, %340 : vector<8x1xf32>
    %342 = math.rsqrt %341 : vector<8x1xf32>
    %343 = vector.broadcast %342 : vector<8x1xf32> to vector<8x32xf32>
    %344 = arith.mulf %339, %343 : vector<8x32xf32>
    %345 = vector.broadcast %48 : vector<1x32xf32> to vector<8x32xf32>
    %346 = arith.mulf %344, %345 : vector<8x32xf32>
    %347 = vector.broadcast %49 : vector<1x32xf32> to vector<8x32xf32>
    %348 = arith.addf %346, %347 : vector<8x32xf32>
    %349 = arith.truncf %348 : vector<8x32xf32> to vector<8x32xbf16>
    %cst_126 = arith.constant dense<0.000000e+00> : vector<8x32xf32>
    %350 = tpu.matmul %349, %7, %cst_126 {dimension_numbers = #tpu.dot_dimension_numbers<[1], [0], [0], [1], [0, 0, 1, 1], [], []>} : vector<8x32xbf16>, vector<32x32xbf16>, vector<8x32xf32> -> vector<8x32xf32>
    %351 = vector.broadcast %8 : vector<1x32xf32> to vector<8x32xf32>
    %352 = arith.addf %350, %351 : vector<8x32xf32>
    %353 = arith.truncf %348 : vector<8x32xf32> to vector<8x32xbf16>
    %cst_127 = arith.constant dense<0.000000e+00> : vector<8x32xf32>
    %354 = tpu.matmul %353, %10, %cst_127 {dimension_numbers = #tpu.dot_dimension_numbers<[1], [0], [0], [1], [0, 0, 1, 1], [], []>} : vector<8x32xbf16>, vector<32x32xbf16>, vector<8x32xf32> -> vector<8x32xf32>
    %355 = vector.broadcast %11 : vector<1x32xf32> to vector<8x32xf32>
    %356 = arith.addf %354, %355 : vector<8x32xf32>
    %357 = arith.truncf %348 : vector<8x32xf32> to vector<8x32xbf16>
    %cst_128 = arith.constant dense<0.000000e+00> : vector<8x32xf32>
    %358 = tpu.matmul %357, %13, %cst_128 {dimension_numbers = #tpu.dot_dimension_numbers<[1], [0], [0], [1], [0, 0, 1, 1], [], []>} : vector<8x32xbf16>, vector<32x32xbf16>, vector<8x32xf32> -> vector<8x32xf32>
    %359 = vector.broadcast %14 : vector<1x32xf32> to vector<8x32xf32>
    %360 = arith.addf %358, %359 : vector<8x32xf32>
    %cst_129 = arith.constant 0.353553385 : f32
    %361 = vector.broadcast %cst_129 : f32 to vector<8x32xf32>
    %362 = arith.mulf %352, %361 : vector<8x32xf32>
    %363 = vector.extract_strided_slice %362 {offsets = [0, 0], sizes = [8, 8], strides = [1, 1]} : vector<8x32xf32> to vector<8x8xf32>
    %364 = arith.truncf %363 : vector<8x8xf32> to vector<8x8xbf16>
    %365 = vector.extract_strided_slice %356 {offsets = [0, 0], sizes = [8, 8], strides = [1, 1]} : vector<8x32xf32> to vector<8x8xf32>
    %366 = arith.truncf %365 : vector<8x8xf32> to vector<8x8xbf16>
    %367 = vector.extract_strided_slice %360 {offsets = [0, 0], sizes = [8, 8], strides = [1, 1]} : vector<8x32xf32> to vector<8x8xf32>
    %368 = arith.truncf %367 : vector<8x8xf32> to vector<8x8xbf16>
    %cst_130 = arith.constant dense<0.000000e+00> : vector<8x8xf32>
    %369 = tpu.matmul %364, %366, %cst_130 {dimension_numbers = #tpu.dot_dimension_numbers<[1], [1], [0], [0], [0, 0, 1, 0], [], []>} : vector<8x8xbf16>, vector<8x8xbf16>, vector<8x8xf32> -> vector<8x8xf32>
    %370 = arith.addf %369, %4 : vector<8x8xf32>
    %cst_131 = arith.constant dense<0xFF800000> : vector<8xf32>
    %371 = vector.multi_reduction <maximumf>, %370, %cst_131 [1] : vector<8x8xf32> to vector<8xf32>
    %372 = vector.shape_cast %371 : vector<8xf32> to vector<8x1xf32>
    %373 = vector.broadcast %372 : vector<8x1xf32> to vector<8x8xf32>
    %374 = arith.subf %370, %373 : vector<8x8xf32>
    %375 = math.exp %374 : vector<8x8xf32>
    %cst_132 = arith.constant dense<0.000000e+00> : vector<8xf32>
    %376 = vector.multi_reduction <add>, %375, %cst_132 [1] : vector<8x8xf32> to vector<8xf32>
    %377 = vector.shape_cast %376 : vector<8xf32> to vector<8x1xf32>
    %378 = tpu.reciprocal %377 {approx = true} : vector<8x1xf32> -> vector<8x1xf32>
    %379 = vector.broadcast %378 : vector<8x1xf32> to vector<8x8xf32>
    %380 = arith.mulf %375, %379 : vector<8x8xf32>
    %381 = arith.truncf %380 : vector<8x8xf32> to vector<8x8xbf16>
    %cst_133 = arith.constant dense<0.000000e+00> : vector<8x8xf32>
    %382 = tpu.matmul %381, %368, %cst_133 {dimension_numbers = #tpu.dot_dimension_numbers<[1], [0], [0], [1], [0, 0, 1, 1], [], []>} : vector<8x8xbf16>, vector<8x8xbf16>, vector<8x8xf32> -> vector<8x8xf32>
    %383 = arith.truncf %382 : vector<8x8xf32> to vector<8x8xbf16>
    %cst_134 = arith.constant dense<0.000000e+00> : vector<8x32xf32>
    %384 = tpu.matmul %383, %17, %cst_134 {dimension_numbers = #tpu.dot_dimension_numbers<[1], [0], [0], [1], [0, 0, 1, 1], [], []>} : vector<8x8xbf16>, vector<8x32xbf16>, vector<8x32xf32> -> vector<8x32xf32>
    %385 = vector.extract_strided_slice %362 {offsets = [0, 8], sizes = [8, 8], strides = [1, 1]} : vector<8x32xf32> to vector<8x8xf32>
    %386 = arith.truncf %385 : vector<8x8xf32> to vector<8x8xbf16>
    %387 = vector.extract_strided_slice %356 {offsets = [0, 8], sizes = [8, 8], strides = [1, 1]} : vector<8x32xf32> to vector<8x8xf32>
    %388 = arith.truncf %387 : vector<8x8xf32> to vector<8x8xbf16>
    %389 = vector.extract_strided_slice %360 {offsets = [0, 8], sizes = [8, 8], strides = [1, 1]} : vector<8x32xf32> to vector<8x8xf32>
    %390 = arith.truncf %389 : vector<8x8xf32> to vector<8x8xbf16>
    %cst_135 = arith.constant dense<0.000000e+00> : vector<8x8xf32>
    %391 = tpu.matmul %386, %388, %cst_135 {dimension_numbers = #tpu.dot_dimension_numbers<[1], [1], [0], [0], [0, 0, 1, 0], [], []>} : vector<8x8xbf16>, vector<8x8xbf16>, vector<8x8xf32> -> vector<8x8xf32>
    %392 = arith.addf %391, %4 : vector<8x8xf32>
    %cst_136 = arith.constant dense<0xFF800000> : vector<8xf32>
    %393 = vector.multi_reduction <maximumf>, %392, %cst_136 [1] : vector<8x8xf32> to vector<8xf32>
    %394 = vector.shape_cast %393 : vector<8xf32> to vector<8x1xf32>
    %395 = vector.broadcast %394 : vector<8x1xf32> to vector<8x8xf32>
    %396 = arith.subf %392, %395 : vector<8x8xf32>
    %397 = math.exp %396 : vector<8x8xf32>
    %cst_137 = arith.constant dense<0.000000e+00> : vector<8xf32>
    %398 = vector.multi_reduction <add>, %397, %cst_137 [1] : vector<8x8xf32> to vector<8xf32>
    %399 = vector.shape_cast %398 : vector<8xf32> to vector<8x1xf32>
    %400 = tpu.reciprocal %399 {approx = true} : vector<8x1xf32> -> vector<8x1xf32>
    %401 = vector.broadcast %400 : vector<8x1xf32> to vector<8x8xf32>
    %402 = arith.mulf %397, %401 : vector<8x8xf32>
    %403 = arith.truncf %402 : vector<8x8xf32> to vector<8x8xbf16>
    %cst_138 = arith.constant dense<0.000000e+00> : vector<8x8xf32>
    %404 = tpu.matmul %403, %390, %cst_138 {dimension_numbers = #tpu.dot_dimension_numbers<[1], [0], [0], [1], [0, 0, 1, 1], [], []>} : vector<8x8xbf16>, vector<8x8xbf16>, vector<8x8xf32> -> vector<8x8xf32>
    %405 = arith.truncf %404 : vector<8x8xf32> to vector<8x8xbf16>
    %cst_139 = arith.constant dense<0.000000e+00> : vector<8x32xf32>
    %406 = tpu.matmul %405, %19, %cst_139 {dimension_numbers = #tpu.dot_dimension_numbers<[1], [0], [0], [1], [0, 0, 1, 1], [], []>} : vector<8x8xbf16>, vector<8x32xbf16>, vector<8x32xf32> -> vector<8x32xf32>
    %407 = arith.addf %384, %406 : vector<8x32xf32>
    %408 = vector.extract_strided_slice %362 {offsets = [0, 16], sizes = [8, 8], strides = [1, 1]} : vector<8x32xf32> to vector<8x8xf32>
    %409 = arith.truncf %408 : vector<8x8xf32> to vector<8x8xbf16>
    %410 = vector.extract_strided_slice %356 {offsets = [0, 16], sizes = [8, 8], strides = [1, 1]} : vector<8x32xf32> to vector<8x8xf32>
    %411 = arith.truncf %410 : vector<8x8xf32> to vector<8x8xbf16>
    %412 = vector.extract_strided_slice %360 {offsets = [0, 16], sizes = [8, 8], strides = [1, 1]} : vector<8x32xf32> to vector<8x8xf32>
    %413 = arith.truncf %412 : vector<8x8xf32> to vector<8x8xbf16>
    %cst_140 = arith.constant dense<0.000000e+00> : vector<8x8xf32>
    %414 = tpu.matmul %409, %411, %cst_140 {dimension_numbers = #tpu.dot_dimension_numbers<[1], [1], [0], [0], [0, 0, 1, 0], [], []>} : vector<8x8xbf16>, vector<8x8xbf16>, vector<8x8xf32> -> vector<8x8xf32>
    %415 = arith.addf %414, %4 : vector<8x8xf32>
    %cst_141 = arith.constant dense<0xFF800000> : vector<8xf32>
    %416 = vector.multi_reduction <maximumf>, %415, %cst_141 [1] : vector<8x8xf32> to vector<8xf32>
    %417 = vector.shape_cast %416 : vector<8xf32> to vector<8x1xf32>
    %418 = vector.broadcast %417 : vector<8x1xf32> to vector<8x8xf32>
    %419 = arith.subf %415, %418 : vector<8x8xf32>
    %420 = math.exp %419 : vector<8x8xf32>
    %cst_142 = arith.constant dense<0.000000e+00> : vector<8xf32>
    %421 = vector.multi_reduction <add>, %420, %cst_142 [1] : vector<8x8xf32> to vector<8xf32>
    %422 = vector.shape_cast %421 : vector<8xf32> to vector<8x1xf32>
    %423 = tpu.reciprocal %422 {approx = true} : vector<8x1xf32> -> vector<8x1xf32>
    %424 = vector.broadcast %423 : vector<8x1xf32> to vector<8x8xf32>
    %425 = arith.mulf %420, %424 : vector<8x8xf32>
    %426 = arith.truncf %425 : vector<8x8xf32> to vector<8x8xbf16>
    %cst_143 = arith.constant dense<0.000000e+00> : vector<8x8xf32>
    %427 = tpu.matmul %426, %413, %cst_143 {dimension_numbers = #tpu.dot_dimension_numbers<[1], [0], [0], [1], [0, 0, 1, 1], [], []>} : vector<8x8xbf16>, vector<8x8xbf16>, vector<8x8xf32> -> vector<8x8xf32>
    %428 = arith.truncf %427 : vector<8x8xf32> to vector<8x8xbf16>
    %cst_144 = arith.constant dense<0.000000e+00> : vector<8x32xf32>
    %429 = tpu.matmul %428, %21, %cst_144 {dimension_numbers = #tpu.dot_dimension_numbers<[1], [0], [0], [1], [0, 0, 1, 1], [], []>} : vector<8x8xbf16>, vector<8x32xbf16>, vector<8x32xf32> -> vector<8x32xf32>
    %430 = arith.addf %407, %429 : vector<8x32xf32>
    %431 = vector.extract_strided_slice %362 {offsets = [0, 24], sizes = [8, 8], strides = [1, 1]} : vector<8x32xf32> to vector<8x8xf32>
    %432 = arith.truncf %431 : vector<8x8xf32> to vector<8x8xbf16>
    %433 = vector.extract_strided_slice %356 {offsets = [0, 24], sizes = [8, 8], strides = [1, 1]} : vector<8x32xf32> to vector<8x8xf32>
    %434 = arith.truncf %433 : vector<8x8xf32> to vector<8x8xbf16>
    %435 = vector.extract_strided_slice %360 {offsets = [0, 24], sizes = [8, 8], strides = [1, 1]} : vector<8x32xf32> to vector<8x8xf32>
    %436 = arith.truncf %435 : vector<8x8xf32> to vector<8x8xbf16>
    %cst_145 = arith.constant dense<0.000000e+00> : vector<8x8xf32>
    %437 = tpu.matmul %432, %434, %cst_145 {dimension_numbers = #tpu.dot_dimension_numbers<[1], [1], [0], [0], [0, 0, 1, 0], [], []>} : vector<8x8xbf16>, vector<8x8xbf16>, vector<8x8xf32> -> vector<8x8xf32>
    %438 = arith.addf %437, %4 : vector<8x8xf32>
    %cst_146 = arith.constant dense<0xFF800000> : vector<8xf32>
    %439 = vector.multi_reduction <maximumf>, %438, %cst_146 [1] : vector<8x8xf32> to vector<8xf32>
    %440 = vector.shape_cast %439 : vector<8xf32> to vector<8x1xf32>
    %441 = vector.broadcast %440 : vector<8x1xf32> to vector<8x8xf32>
    %442 = arith.subf %438, %441 : vector<8x8xf32>
    %443 = math.exp %442 : vector<8x8xf32>
    %cst_147 = arith.constant dense<0.000000e+00> : vector<8xf32>
    %444 = vector.multi_reduction <add>, %443, %cst_147 [1] : vector<8x8xf32> to vector<8xf32>
    %445 = vector.shape_cast %444 : vector<8xf32> to vector<8x1xf32>
    %446 = tpu.reciprocal %445 {approx = true} : vector<8x1xf32> -> vector<8x1xf32>
    %447 = vector.broadcast %446 : vector<8x1xf32> to vector<8x8xf32>
    %448 = arith.mulf %443, %447 : vector<8x8xf32>
    %449 = arith.truncf %448 : vector<8x8xf32> to vector<8x8xbf16>
    %cst_148 = arith.constant dense<0.000000e+00> : vector<8x8xf32>
    %450 = tpu.matmul %449, %436, %cst_148 {dimension_numbers = #tpu.dot_dimension_numbers<[1], [0], [0], [1], [0, 0, 1, 1], [], []>} : vector<8x8xbf16>, vector<8x8xbf16>, vector<8x8xf32> -> vector<8x8xf32>
    %451 = arith.truncf %450 : vector<8x8xf32> to vector<8x8xbf16>
    %cst_149 = arith.constant dense<0.000000e+00> : vector<8x32xf32>
    %452 = tpu.matmul %451, %23, %cst_149 {dimension_numbers = #tpu.dot_dimension_numbers<[1], [0], [0], [1], [0, 0, 1, 1], [], []>} : vector<8x8xbf16>, vector<8x32xbf16>, vector<8x32xf32> -> vector<8x32xf32>
    %453 = arith.addf %430, %452 : vector<8x32xf32>
    %454 = vector.broadcast %24 : vector<1x32xf32> to vector<8x32xf32>
    %455 = arith.addf %453, %454 : vector<8x32xf32>
    %456 = arith.addf %348, %455 : vector<8x32xf32>
    %cst_150 = arith.constant dense<0.000000e+00> : vector<8xf32>
    %457 = vector.multi_reduction <add>, %456, %cst_150 [1] : vector<8x32xf32> to vector<8xf32>
    %458 = vector.shape_cast %457 : vector<8xf32> to vector<8x1xf32>
    %cst_151 = arith.constant 3.200000e+01 : f32
    %459 = vector.broadcast %cst_151 : f32 to vector<8x1xf32>
    %460 = arith.divf %458, %459 : vector<8x1xf32>
    %461 = vector.broadcast %460 : vector<8x1xf32> to vector<8x32xf32>
    %462 = arith.subf %456, %461 : vector<8x32xf32>
    %463 = arith.mulf %462, %462 : vector<8x32xf32>
    %cst_152 = arith.constant dense<0.000000e+00> : vector<8xf32>
    %464 = vector.multi_reduction <add>, %463, %cst_152 [1] : vector<8x32xf32> to vector<8xf32>
    %465 = vector.shape_cast %464 : vector<8xf32> to vector<8x1xf32>
    %cst_153 = arith.constant 3.200000e+01 : f32
    %466 = vector.broadcast %cst_153 : f32 to vector<8x1xf32>
    %467 = arith.divf %465, %466 : vector<8x1xf32>
    %468 = vector.broadcast %460 : vector<8x1xf32> to vector<8x32xf32>
    %469 = arith.subf %456, %468 : vector<8x32xf32>
    %cst_154 = arith.constant 9.99999974E-6 : f32
    %470 = vector.broadcast %cst_154 : f32 to vector<8x1xf32>
    %471 = arith.addf %467, %470 : vector<8x1xf32>
    %472 = math.rsqrt %471 : vector<8x1xf32>
    %473 = vector.broadcast %472 : vector<8x1xf32> to vector<8x32xf32>
    %474 = arith.mulf %469, %473 : vector<8x32xf32>
    %475 = vector.broadcast %44 : vector<1x32xf32> to vector<8x32xf32>
    %476 = arith.mulf %474, %475 : vector<8x32xf32>
    %477 = vector.broadcast %45 : vector<1x32xf32> to vector<8x32xf32>
    %478 = arith.addf %476, %477 : vector<8x32xf32>
    %479 = arith.truncf %478 : vector<8x32xf32> to vector<8x32xbf16>
    %cst_155 = arith.constant dense<0.000000e+00> : vector<8x32xf32>
    %480 = tpu.matmul %479, %26, %cst_155 {dimension_numbers = #tpu.dot_dimension_numbers<[1], [0], [0], [1], [0, 0, 1, 1], [], []>} : vector<8x32xbf16>, vector<32x32xbf16>, vector<8x32xf32> -> vector<8x32xf32>
    %481 = vector.broadcast %27 : vector<1x32xf32> to vector<8x32xf32>
    %482 = arith.addf %480, %481 : vector<8x32xf32>
    %483 = arith.truncf %3 : vector<8x32xf32> to vector<8x32xbf16>
    %cst_156 = arith.constant dense<0.000000e+00> : vector<8x32xf32>
    %484 = tpu.matmul %483, %29, %cst_156 {dimension_numbers = #tpu.dot_dimension_numbers<[1], [0], [0], [1], [0, 0, 1, 1], [], []>} : vector<8x32xbf16>, vector<32x32xbf16>, vector<8x32xf32> -> vector<8x32xf32>
    %485 = vector.broadcast %30 : vector<1x32xf32> to vector<8x32xf32>
    %486 = arith.addf %484, %485 : vector<8x32xf32>
    %487 = arith.truncf %3 : vector<8x32xf32> to vector<8x32xbf16>
    %cst_157 = arith.constant dense<0.000000e+00> : vector<8x32xf32>
    %488 = tpu.matmul %487, %32, %cst_157 {dimension_numbers = #tpu.dot_dimension_numbers<[1], [0], [0], [1], [0, 0, 1, 1], [], []>} : vector<8x32xbf16>, vector<32x32xbf16>, vector<8x32xf32> -> vector<8x32xf32>
    %489 = vector.broadcast %33 : vector<1x32xf32> to vector<8x32xf32>
    %490 = arith.addf %488, %489 : vector<8x32xf32>
    %cst_158 = arith.constant 0.353553385 : f32
    %491 = vector.broadcast %cst_158 : f32 to vector<8x32xf32>
    %492 = arith.mulf %482, %491 : vector<8x32xf32>
    %493 = vector.extract_strided_slice %492 {offsets = [0, 0], sizes = [8, 8], strides = [1, 1]} : vector<8x32xf32> to vector<8x8xf32>
    %494 = arith.truncf %493 : vector<8x8xf32> to vector<8x8xbf16>
    %495 = vector.extract_strided_slice %486 {offsets = [0, 0], sizes = [8, 8], strides = [1, 1]} : vector<8x32xf32> to vector<8x8xf32>
    %496 = arith.truncf %495 : vector<8x8xf32> to vector<8x8xbf16>
    %497 = vector.extract_strided_slice %490 {offsets = [0, 0], sizes = [8, 8], strides = [1, 1]} : vector<8x32xf32> to vector<8x8xf32>
    %498 = arith.truncf %497 : vector<8x8xf32> to vector<8x8xbf16>
    %cst_159 = arith.constant dense<0.000000e+00> : vector<8x8xf32>
    %499 = tpu.matmul %494, %496, %cst_159 {dimension_numbers = #tpu.dot_dimension_numbers<[1], [1], [0], [0], [0, 0, 1, 0], [], []>} : vector<8x8xbf16>, vector<8x8xbf16>, vector<8x8xf32> -> vector<8x8xf32>
    %500 = arith.addf %499, %5 : vector<8x8xf32>
    %cst_160 = arith.constant dense<0xFF800000> : vector<8xf32>
    %501 = vector.multi_reduction <maximumf>, %500, %cst_160 [1] : vector<8x8xf32> to vector<8xf32>
    %502 = vector.shape_cast %501 : vector<8xf32> to vector<8x1xf32>
    %503 = vector.broadcast %502 : vector<8x1xf32> to vector<8x8xf32>
    %504 = arith.subf %500, %503 : vector<8x8xf32>
    %505 = math.exp %504 : vector<8x8xf32>
    %cst_161 = arith.constant dense<0.000000e+00> : vector<8xf32>
    %506 = vector.multi_reduction <add>, %505, %cst_161 [1] : vector<8x8xf32> to vector<8xf32>
    %507 = vector.shape_cast %506 : vector<8xf32> to vector<8x1xf32>
    %508 = tpu.reciprocal %507 {approx = true} : vector<8x1xf32> -> vector<8x1xf32>
    %509 = vector.broadcast %508 : vector<8x1xf32> to vector<8x8xf32>
    %510 = arith.mulf %505, %509 : vector<8x8xf32>
    %511 = arith.truncf %510 : vector<8x8xf32> to vector<8x8xbf16>
    %cst_162 = arith.constant dense<0.000000e+00> : vector<8x8xf32>
    %512 = tpu.matmul %511, %498, %cst_162 {dimension_numbers = #tpu.dot_dimension_numbers<[1], [0], [0], [1], [0, 0, 1, 1], [], []>} : vector<8x8xbf16>, vector<8x8xbf16>, vector<8x8xf32> -> vector<8x8xf32>
    %513 = arith.truncf %512 : vector<8x8xf32> to vector<8x8xbf16>
    %cst_163 = arith.constant dense<0.000000e+00> : vector<8x32xf32>
    %514 = tpu.matmul %513, %36, %cst_163 {dimension_numbers = #tpu.dot_dimension_numbers<[1], [0], [0], [1], [0, 0, 1, 1], [], []>} : vector<8x8xbf16>, vector<8x32xbf16>, vector<8x32xf32> -> vector<8x32xf32>
    %515 = vector.extract_strided_slice %492 {offsets = [0, 8], sizes = [8, 8], strides = [1, 1]} : vector<8x32xf32> to vector<8x8xf32>
    %516 = arith.truncf %515 : vector<8x8xf32> to vector<8x8xbf16>
    %517 = vector.extract_strided_slice %486 {offsets = [0, 8], sizes = [8, 8], strides = [1, 1]} : vector<8x32xf32> to vector<8x8xf32>
    %518 = arith.truncf %517 : vector<8x8xf32> to vector<8x8xbf16>
    %519 = vector.extract_strided_slice %490 {offsets = [0, 8], sizes = [8, 8], strides = [1, 1]} : vector<8x32xf32> to vector<8x8xf32>
    %520 = arith.truncf %519 : vector<8x8xf32> to vector<8x8xbf16>
    %cst_164 = arith.constant dense<0.000000e+00> : vector<8x8xf32>
    %521 = tpu.matmul %516, %518, %cst_164 {dimension_numbers = #tpu.dot_dimension_numbers<[1], [1], [0], [0], [0, 0, 1, 0], [], []>} : vector<8x8xbf16>, vector<8x8xbf16>, vector<8x8xf32> -> vector<8x8xf32>
    %522 = arith.addf %521, %5 : vector<8x8xf32>
    %cst_165 = arith.constant dense<0xFF800000> : vector<8xf32>
    %523 = vector.multi_reduction <maximumf>, %522, %cst_165 [1] : vector<8x8xf32> to vector<8xf32>
    %524 = vector.shape_cast %523 : vector<8xf32> to vector<8x1xf32>
    %525 = vector.broadcast %524 : vector<8x1xf32> to vector<8x8xf32>
    %526 = arith.subf %522, %525 : vector<8x8xf32>
    %527 = math.exp %526 : vector<8x8xf32>
    %cst_166 = arith.constant dense<0.000000e+00> : vector<8xf32>
    %528 = vector.multi_reduction <add>, %527, %cst_166 [1] : vector<8x8xf32> to vector<8xf32>
    %529 = vector.shape_cast %528 : vector<8xf32> to vector<8x1xf32>
    %530 = tpu.reciprocal %529 {approx = true} : vector<8x1xf32> -> vector<8x1xf32>
    %531 = vector.broadcast %530 : vector<8x1xf32> to vector<8x8xf32>
    %532 = arith.mulf %527, %531 : vector<8x8xf32>
    %533 = arith.truncf %532 : vector<8x8xf32> to vector<8x8xbf16>
    %cst_167 = arith.constant dense<0.000000e+00> : vector<8x8xf32>
    %534 = tpu.matmul %533, %520, %cst_167 {dimension_numbers = #tpu.dot_dimension_numbers<[1], [0], [0], [1], [0, 0, 1, 1], [], []>} : vector<8x8xbf16>, vector<8x8xbf16>, vector<8x8xf32> -> vector<8x8xf32>
    %535 = arith.truncf %534 : vector<8x8xf32> to vector<8x8xbf16>
    %cst_168 = arith.constant dense<0.000000e+00> : vector<8x32xf32>
    %536 = tpu.matmul %535, %38, %cst_168 {dimension_numbers = #tpu.dot_dimension_numbers<[1], [0], [0], [1], [0, 0, 1, 1], [], []>} : vector<8x8xbf16>, vector<8x32xbf16>, vector<8x32xf32> -> vector<8x32xf32>
    %537 = arith.addf %514, %536 : vector<8x32xf32>
    %538 = vector.extract_strided_slice %492 {offsets = [0, 16], sizes = [8, 8], strides = [1, 1]} : vector<8x32xf32> to vector<8x8xf32>
    %539 = arith.truncf %538 : vector<8x8xf32> to vector<8x8xbf16>
    %540 = vector.extract_strided_slice %486 {offsets = [0, 16], sizes = [8, 8], strides = [1, 1]} : vector<8x32xf32> to vector<8x8xf32>
    %541 = arith.truncf %540 : vector<8x8xf32> to vector<8x8xbf16>
    %542 = vector.extract_strided_slice %490 {offsets = [0, 16], sizes = [8, 8], strides = [1, 1]} : vector<8x32xf32> to vector<8x8xf32>
    %543 = arith.truncf %542 : vector<8x8xf32> to vector<8x8xbf16>
    %cst_169 = arith.constant dense<0.000000e+00> : vector<8x8xf32>
    %544 = tpu.matmul %539, %541, %cst_169 {dimension_numbers = #tpu.dot_dimension_numbers<[1], [1], [0], [0], [0, 0, 1, 0], [], []>} : vector<8x8xbf16>, vector<8x8xbf16>, vector<8x8xf32> -> vector<8x8xf32>
    %545 = arith.addf %544, %5 : vector<8x8xf32>
    %cst_170 = arith.constant dense<0xFF800000> : vector<8xf32>
    %546 = vector.multi_reduction <maximumf>, %545, %cst_170 [1] : vector<8x8xf32> to vector<8xf32>
    %547 = vector.shape_cast %546 : vector<8xf32> to vector<8x1xf32>
    %548 = vector.broadcast %547 : vector<8x1xf32> to vector<8x8xf32>
    %549 = arith.subf %545, %548 : vector<8x8xf32>
    %550 = math.exp %549 : vector<8x8xf32>
    %cst_171 = arith.constant dense<0.000000e+00> : vector<8xf32>
    %551 = vector.multi_reduction <add>, %550, %cst_171 [1] : vector<8x8xf32> to vector<8xf32>
    %552 = vector.shape_cast %551 : vector<8xf32> to vector<8x1xf32>
    %553 = tpu.reciprocal %552 {approx = true} : vector<8x1xf32> -> vector<8x1xf32>
    %554 = vector.broadcast %553 : vector<8x1xf32> to vector<8x8xf32>
    %555 = arith.mulf %550, %554 : vector<8x8xf32>
    %556 = arith.truncf %555 : vector<8x8xf32> to vector<8x8xbf16>
    %cst_172 = arith.constant dense<0.000000e+00> : vector<8x8xf32>
    %557 = tpu.matmul %556, %543, %cst_172 {dimension_numbers = #tpu.dot_dimension_numbers<[1], [0], [0], [1], [0, 0, 1, 1], [], []>} : vector<8x8xbf16>, vector<8x8xbf16>, vector<8x8xf32> -> vector<8x8xf32>
    %558 = arith.truncf %557 : vector<8x8xf32> to vector<8x8xbf16>
    %cst_173 = arith.constant dense<0.000000e+00> : vector<8x32xf32>
    %559 = tpu.matmul %558, %40, %cst_173 {dimension_numbers = #tpu.dot_dimension_numbers<[1], [0], [0], [1], [0, 0, 1, 1], [], []>} : vector<8x8xbf16>, vector<8x32xbf16>, vector<8x32xf32> -> vector<8x32xf32>
    %560 = arith.addf %537, %559 : vector<8x32xf32>
    %561 = vector.extract_strided_slice %492 {offsets = [0, 24], sizes = [8, 8], strides = [1, 1]} : vector<8x32xf32> to vector<8x8xf32>
    %562 = arith.truncf %561 : vector<8x8xf32> to vector<8x8xbf16>
    %563 = vector.extract_strided_slice %486 {offsets = [0, 24], sizes = [8, 8], strides = [1, 1]} : vector<8x32xf32> to vector<8x8xf32>
    %564 = arith.truncf %563 : vector<8x8xf32> to vector<8x8xbf16>
    %565 = vector.extract_strided_slice %490 {offsets = [0, 24], sizes = [8, 8], strides = [1, 1]} : vector<8x32xf32> to vector<8x8xf32>
    %566 = arith.truncf %565 : vector<8x8xf32> to vector<8x8xbf16>
    %cst_174 = arith.constant dense<0.000000e+00> : vector<8x8xf32>
    %567 = tpu.matmul %562, %564, %cst_174 {dimension_numbers = #tpu.dot_dimension_numbers<[1], [1], [0], [0], [0, 0, 1, 0], [], []>} : vector<8x8xbf16>, vector<8x8xbf16>, vector<8x8xf32> -> vector<8x8xf32>
    %568 = arith.addf %567, %5 : vector<8x8xf32>
    %cst_175 = arith.constant dense<0xFF800000> : vector<8xf32>
    %569 = vector.multi_reduction <maximumf>, %568, %cst_175 [1] : vector<8x8xf32> to vector<8xf32>
    %570 = vector.shape_cast %569 : vector<8xf32> to vector<8x1xf32>
    %571 = vector.broadcast %570 : vector<8x1xf32> to vector<8x8xf32>
    %572 = arith.subf %568, %571 : vector<8x8xf32>
    %573 = math.exp %572 : vector<8x8xf32>
    %cst_176 = arith.constant dense<0.000000e+00> : vector<8xf32>
    %574 = vector.multi_reduction <add>, %573, %cst_176 [1] : vector<8x8xf32> to vector<8xf32>
    %575 = vector.shape_cast %574 : vector<8xf32> to vector<8x1xf32>
    %576 = tpu.reciprocal %575 {approx = true} : vector<8x1xf32> -> vector<8x1xf32>
    %577 = vector.broadcast %576 : vector<8x1xf32> to vector<8x8xf32>
    %578 = arith.mulf %573, %577 : vector<8x8xf32>
    %579 = arith.truncf %578 : vector<8x8xf32> to vector<8x8xbf16>
    %cst_177 = arith.constant dense<0.000000e+00> : vector<8x8xf32>
    %580 = tpu.matmul %579, %566, %cst_177 {dimension_numbers = #tpu.dot_dimension_numbers<[1], [0], [0], [1], [0, 0, 1, 1], [], []>} : vector<8x8xbf16>, vector<8x8xbf16>, vector<8x8xf32> -> vector<8x8xf32>
    %581 = arith.truncf %580 : vector<8x8xf32> to vector<8x8xbf16>
    %cst_178 = arith.constant dense<0.000000e+00> : vector<8x32xf32>
    %582 = tpu.matmul %581, %42, %cst_178 {dimension_numbers = #tpu.dot_dimension_numbers<[1], [0], [0], [1], [0, 0, 1, 1], [], []>} : vector<8x8xbf16>, vector<8x32xbf16>, vector<8x32xf32> -> vector<8x32xf32>
    %583 = arith.addf %560, %582 : vector<8x32xf32>
    %584 = vector.broadcast %43 : vector<1x32xf32> to vector<8x32xf32>
    %585 = arith.addf %583, %584 : vector<8x32xf32>
    %586 = arith.addf %478, %585 : vector<8x32xf32>
    %cst_179 = arith.constant dense<0.000000e+00> : vector<8xf32>
    %587 = vector.multi_reduction <add>, %586, %cst_179 [1] : vector<8x32xf32> to vector<8xf32>
    %588 = vector.shape_cast %587 : vector<8xf32> to vector<8x1xf32>
    %cst_180 = arith.constant 3.200000e+01 : f32
    %589 = vector.broadcast %cst_180 : f32 to vector<8x1xf32>
    %590 = arith.divf %588, %589 : vector<8x1xf32>
    %591 = vector.broadcast %590 : vector<8x1xf32> to vector<8x32xf32>
    %592 = arith.subf %586, %591 : vector<8x32xf32>
    %593 = arith.mulf %592, %592 : vector<8x32xf32>
    %cst_181 = arith.constant dense<0.000000e+00> : vector<8xf32>
    %594 = vector.multi_reduction <add>, %593, %cst_181 [1] : vector<8x32xf32> to vector<8xf32>
    %595 = vector.shape_cast %594 : vector<8xf32> to vector<8x1xf32>
    %cst_182 = arith.constant 3.200000e+01 : f32
    %596 = vector.broadcast %cst_182 : f32 to vector<8x1xf32>
    %597 = arith.divf %595, %596 : vector<8x1xf32>
    %598 = vector.broadcast %590 : vector<8x1xf32> to vector<8x32xf32>
    %599 = arith.subf %586, %598 : vector<8x32xf32>
    %cst_183 = arith.constant 9.99999974E-6 : f32
    %600 = vector.broadcast %cst_183 : f32 to vector<8x1xf32>
    %601 = arith.addf %597, %600 : vector<8x1xf32>
    %602 = math.rsqrt %601 : vector<8x1xf32>
    %603 = vector.broadcast %602 : vector<8x1xf32> to vector<8x32xf32>
    %604 = arith.mulf %599, %603 : vector<8x32xf32>
    %605 = vector.broadcast %46 : vector<1x32xf32> to vector<8x32xf32>
    %606 = arith.mulf %604, %605 : vector<8x32xf32>
    %607 = vector.broadcast %47 : vector<1x32xf32> to vector<8x32xf32>
    %608 = arith.addf %606, %607 : vector<8x32xf32>
    %609 = arith.truncf %608 : vector<8x32xf32> to vector<8x32xbf16>
    %cst_184 = arith.constant dense<0.000000e+00> : vector<8x64xf32>
    %610 = tpu.matmul %609, %51, %cst_184 {dimension_numbers = #tpu.dot_dimension_numbers<[1], [0], [0], [1], [0, 0, 1, 1], [], []>} : vector<8x32xbf16>, vector<32x64xbf16>, vector<8x64xf32> -> vector<8x64xf32>
    %611 = vector.broadcast %52 : vector<1x64xf32> to vector<8x64xf32>
    %612 = arith.addf %610, %611 : vector<8x64xf32>
    %cst_185 = arith.constant 0.000000e+00 : f32
    %613 = vector.broadcast %cst_185 : f32 to vector<8x64xf32>
    %614 = arith.maximumf %612, %613 : vector<8x64xf32>
    %615 = arith.truncf %614 : vector<8x64xf32> to vector<8x64xbf16>
    %cst_186 = arith.constant dense<0.000000e+00> : vector<8x32xf32>
    %616 = tpu.matmul %615, %54, %cst_186 {dimension_numbers = #tpu.dot_dimension_numbers<[1], [0], [0], [1], [0, 0, 1, 1], [], []>} : vector<8x64xbf16>, vector<64x32xbf16>, vector<8x32xf32> -> vector<8x32xf32>
    %617 = vector.broadcast %55 : vector<1x32xf32> to vector<8x32xf32>
    %618 = arith.addf %616, %617 : vector<8x32xf32>
    %619 = arith.addf %608, %618 : vector<8x32xf32>
    %cst_187 = arith.constant dense<0.000000e+00> : vector<8xf32>
    %620 = vector.multi_reduction <add>, %619, %cst_187 [1] : vector<8x32xf32> to vector<8xf32>
    %621 = vector.shape_cast %620 : vector<8xf32> to vector<8x1xf32>
    %cst_188 = arith.constant 3.200000e+01 : f32
    %622 = vector.broadcast %cst_188 : f32 to vector<8x1xf32>
    %623 = arith.divf %621, %622 : vector<8x1xf32>
    %624 = vector.broadcast %623 : vector<8x1xf32> to vector<8x32xf32>
    %625 = arith.subf %619, %624 : vector<8x32xf32>
    %626 = arith.mulf %625, %625 : vector<8x32xf32>
    %cst_189 = arith.constant dense<0.000000e+00> : vector<8xf32>
    %627 = vector.multi_reduction <add>, %626, %cst_189 [1] : vector<8x32xf32> to vector<8xf32>
    %628 = vector.shape_cast %627 : vector<8xf32> to vector<8x1xf32>
    %cst_190 = arith.constant 3.200000e+01 : f32
    %629 = vector.broadcast %cst_190 : f32 to vector<8x1xf32>
    %630 = arith.divf %628, %629 : vector<8x1xf32>
    %631 = vector.broadcast %623 : vector<8x1xf32> to vector<8x32xf32>
    %632 = arith.subf %619, %631 : vector<8x32xf32>
    %cst_191 = arith.constant 9.99999974E-6 : f32
    %633 = vector.broadcast %cst_191 : f32 to vector<8x1xf32>
    %634 = arith.addf %630, %633 : vector<8x1xf32>
    %635 = math.rsqrt %634 : vector<8x1xf32>
    %636 = vector.broadcast %635 : vector<8x1xf32> to vector<8x32xf32>
    %637 = arith.mulf %632, %636 : vector<8x32xf32>
    %638 = vector.broadcast %48 : vector<1x32xf32> to vector<8x32xf32>
    %639 = arith.mulf %637, %638 : vector<8x32xf32>
    %640 = vector.broadcast %49 : vector<1x32xf32> to vector<8x32xf32>
    %641 = arith.addf %639, %640 : vector<8x32xf32>
    %642 = arith.truncf %641 : vector<8x32xf32> to vector<8x32xbf16>
    %cst_192 = arith.constant dense<0.000000e+00> : vector<8x32xf32>
    %643 = tpu.matmul %642, %7, %cst_192 {dimension_numbers = #tpu.dot_dimension_numbers<[1], [0], [0], [1], [0, 0, 1, 1], [], []>} : vector<8x32xbf16>, vector<32x32xbf16>, vector<8x32xf32> -> vector<8x32xf32>
    %644 = vector.broadcast %8 : vector<1x32xf32> to vector<8x32xf32>
    %645 = arith.addf %643, %644 : vector<8x32xf32>
    %646 = arith.truncf %641 : vector<8x32xf32> to vector<8x32xbf16>
    %cst_193 = arith.constant dense<0.000000e+00> : vector<8x32xf32>
    %647 = tpu.matmul %646, %10, %cst_193 {dimension_numbers = #tpu.dot_dimension_numbers<[1], [0], [0], [1], [0, 0, 1, 1], [], []>} : vector<8x32xbf16>, vector<32x32xbf16>, vector<8x32xf32> -> vector<8x32xf32>
    %648 = vector.broadcast %11 : vector<1x32xf32> to vector<8x32xf32>
    %649 = arith.addf %647, %648 : vector<8x32xf32>
    %650 = arith.truncf %641 : vector<8x32xf32> to vector<8x32xbf16>
    %cst_194 = arith.constant dense<0.000000e+00> : vector<8x32xf32>
    %651 = tpu.matmul %650, %13, %cst_194 {dimension_numbers = #tpu.dot_dimension_numbers<[1], [0], [0], [1], [0, 0, 1, 1], [], []>} : vector<8x32xbf16>, vector<32x32xbf16>, vector<8x32xf32> -> vector<8x32xf32>
    %652 = vector.broadcast %14 : vector<1x32xf32> to vector<8x32xf32>
    %653 = arith.addf %651, %652 : vector<8x32xf32>
    %cst_195 = arith.constant 0.353553385 : f32
    %654 = vector.broadcast %cst_195 : f32 to vector<8x32xf32>
    %655 = arith.mulf %645, %654 : vector<8x32xf32>
    %656 = vector.extract_strided_slice %655 {offsets = [0, 0], sizes = [8, 8], strides = [1, 1]} : vector<8x32xf32> to vector<8x8xf32>
    %657 = arith.truncf %656 : vector<8x8xf32> to vector<8x8xbf16>
    %658 = vector.extract_strided_slice %649 {offsets = [0, 0], sizes = [8, 8], strides = [1, 1]} : vector<8x32xf32> to vector<8x8xf32>
    %659 = arith.truncf %658 : vector<8x8xf32> to vector<8x8xbf16>
    %660 = vector.extract_strided_slice %653 {offsets = [0, 0], sizes = [8, 8], strides = [1, 1]} : vector<8x32xf32> to vector<8x8xf32>
    %661 = arith.truncf %660 : vector<8x8xf32> to vector<8x8xbf16>
    %cst_196 = arith.constant dense<0.000000e+00> : vector<8x8xf32>
    %662 = tpu.matmul %657, %659, %cst_196 {dimension_numbers = #tpu.dot_dimension_numbers<[1], [1], [0], [0], [0, 0, 1, 0], [], []>} : vector<8x8xbf16>, vector<8x8xbf16>, vector<8x8xf32> -> vector<8x8xf32>
    %663 = arith.addf %662, %4 : vector<8x8xf32>
    %cst_197 = arith.constant dense<0xFF800000> : vector<8xf32>
    %664 = vector.multi_reduction <maximumf>, %663, %cst_197 [1] : vector<8x8xf32> to vector<8xf32>
    %665 = vector.shape_cast %664 : vector<8xf32> to vector<8x1xf32>
    %666 = vector.broadcast %665 : vector<8x1xf32> to vector<8x8xf32>
    %667 = arith.subf %663, %666 : vector<8x8xf32>
    %668 = math.exp %667 : vector<8x8xf32>
    %cst_198 = arith.constant dense<0.000000e+00> : vector<8xf32>
    %669 = vector.multi_reduction <add>, %668, %cst_198 [1] : vector<8x8xf32> to vector<8xf32>
    %670 = vector.shape_cast %669 : vector<8xf32> to vector<8x1xf32>
    %671 = tpu.reciprocal %670 {approx = true} : vector<8x1xf32> -> vector<8x1xf32>
    %672 = vector.broadcast %671 : vector<8x1xf32> to vector<8x8xf32>
    %673 = arith.mulf %668, %672 : vector<8x8xf32>
    %674 = arith.truncf %673 : vector<8x8xf32> to vector<8x8xbf16>
    %cst_199 = arith.constant dense<0.000000e+00> : vector<8x8xf32>
    %675 = tpu.matmul %674, %661, %cst_199 {dimension_numbers = #tpu.dot_dimension_numbers<[1], [0], [0], [1], [0, 0, 1, 1], [], []>} : vector<8x8xbf16>, vector<8x8xbf16>, vector<8x8xf32> -> vector<8x8xf32>
    %676 = arith.truncf %675 : vector<8x8xf32> to vector<8x8xbf16>
    %cst_200 = arith.constant dense<0.000000e+00> : vector<8x32xf32>
    %677 = tpu.matmul %676, %17, %cst_200 {dimension_numbers = #tpu.dot_dimension_numbers<[1], [0], [0], [1], [0, 0, 1, 1], [], []>} : vector<8x8xbf16>, vector<8x32xbf16>, vector<8x32xf32> -> vector<8x32xf32>
    %678 = vector.extract_strided_slice %655 {offsets = [0, 8], sizes = [8, 8], strides = [1, 1]} : vector<8x32xf32> to vector<8x8xf32>
    %679 = arith.truncf %678 : vector<8x8xf32> to vector<8x8xbf16>
    %680 = vector.extract_strided_slice %649 {offsets = [0, 8], sizes = [8, 8], strides = [1, 1]} : vector<8x32xf32> to vector<8x8xf32>
    %681 = arith.truncf %680 : vector<8x8xf32> to vector<8x8xbf16>
    %682 = vector.extract_strided_slice %653 {offsets = [0, 8], sizes = [8, 8], strides = [1, 1]} : vector<8x32xf32> to vector<8x8xf32>
    %683 = arith.truncf %682 : vector<8x8xf32> to vector<8x8xbf16>
    %cst_201 = arith.constant dense<0.000000e+00> : vector<8x8xf32>
    %684 = tpu.matmul %679, %681, %cst_201 {dimension_numbers = #tpu.dot_dimension_numbers<[1], [1], [0], [0], [0, 0, 1, 0], [], []>} : vector<8x8xbf16>, vector<8x8xbf16>, vector<8x8xf32> -> vector<8x8xf32>
    %685 = arith.addf %684, %4 : vector<8x8xf32>
    %cst_202 = arith.constant dense<0xFF800000> : vector<8xf32>
    %686 = vector.multi_reduction <maximumf>, %685, %cst_202 [1] : vector<8x8xf32> to vector<8xf32>
    %687 = vector.shape_cast %686 : vector<8xf32> to vector<8x1xf32>
    %688 = vector.broadcast %687 : vector<8x1xf32> to vector<8x8xf32>
    %689 = arith.subf %685, %688 : vector<8x8xf32>
    %690 = math.exp %689 : vector<8x8xf32>
    %cst_203 = arith.constant dense<0.000000e+00> : vector<8xf32>
    %691 = vector.multi_reduction <add>, %690, %cst_203 [1] : vector<8x8xf32> to vector<8xf32>
    %692 = vector.shape_cast %691 : vector<8xf32> to vector<8x1xf32>
    %693 = tpu.reciprocal %692 {approx = true} : vector<8x1xf32> -> vector<8x1xf32>
    %694 = vector.broadcast %693 : vector<8x1xf32> to vector<8x8xf32>
    %695 = arith.mulf %690, %694 : vector<8x8xf32>
    %696 = arith.truncf %695 : vector<8x8xf32> to vector<8x8xbf16>
    %cst_204 = arith.constant dense<0.000000e+00> : vector<8x8xf32>
    %697 = tpu.matmul %696, %683, %cst_204 {dimension_numbers = #tpu.dot_dimension_numbers<[1], [0], [0], [1], [0, 0, 1, 1], [], []>} : vector<8x8xbf16>, vector<8x8xbf16>, vector<8x8xf32> -> vector<8x8xf32>
    %698 = arith.truncf %697 : vector<8x8xf32> to vector<8x8xbf16>
    %cst_205 = arith.constant dense<0.000000e+00> : vector<8x32xf32>
    %699 = tpu.matmul %698, %19, %cst_205 {dimension_numbers = #tpu.dot_dimension_numbers<[1], [0], [0], [1], [0, 0, 1, 1], [], []>} : vector<8x8xbf16>, vector<8x32xbf16>, vector<8x32xf32> -> vector<8x32xf32>
    %700 = arith.addf %677, %699 : vector<8x32xf32>
    %701 = vector.extract_strided_slice %655 {offsets = [0, 16], sizes = [8, 8], strides = [1, 1]} : vector<8x32xf32> to vector<8x8xf32>
    %702 = arith.truncf %701 : vector<8x8xf32> to vector<8x8xbf16>
    %703 = vector.extract_strided_slice %649 {offsets = [0, 16], sizes = [8, 8], strides = [1, 1]} : vector<8x32xf32> to vector<8x8xf32>
    %704 = arith.truncf %703 : vector<8x8xf32> to vector<8x8xbf16>
    %705 = vector.extract_strided_slice %653 {offsets = [0, 16], sizes = [8, 8], strides = [1, 1]} : vector<8x32xf32> to vector<8x8xf32>
    %706 = arith.truncf %705 : vector<8x8xf32> to vector<8x8xbf16>
    %cst_206 = arith.constant dense<0.000000e+00> : vector<8x8xf32>
    %707 = tpu.matmul %702, %704, %cst_206 {dimension_numbers = #tpu.dot_dimension_numbers<[1], [1], [0], [0], [0, 0, 1, 0], [], []>} : vector<8x8xbf16>, vector<8x8xbf16>, vector<8x8xf32> -> vector<8x8xf32>
    %708 = arith.addf %707, %4 : vector<8x8xf32>
    %cst_207 = arith.constant dense<0xFF800000> : vector<8xf32>
    %709 = vector.multi_reduction <maximumf>, %708, %cst_207 [1] : vector<8x8xf32> to vector<8xf32>
    %710 = vector.shape_cast %709 : vector<8xf32> to vector<8x1xf32>
    %711 = vector.broadcast %710 : vector<8x1xf32> to vector<8x8xf32>
    %712 = arith.subf %708, %711 : vector<8x8xf32>
    %713 = math.exp %712 : vector<8x8xf32>
    %cst_208 = arith.constant dense<0.000000e+00> : vector<8xf32>
    %714 = vector.multi_reduction <add>, %713, %cst_208 [1] : vector<8x8xf32> to vector<8xf32>
    %715 = vector.shape_cast %714 : vector<8xf32> to vector<8x1xf32>
    %716 = tpu.reciprocal %715 {approx = true} : vector<8x1xf32> -> vector<8x1xf32>
    %717 = vector.broadcast %716 : vector<8x1xf32> to vector<8x8xf32>
    %718 = arith.mulf %713, %717 : vector<8x8xf32>
    %719 = arith.truncf %718 : vector<8x8xf32> to vector<8x8xbf16>
    %cst_209 = arith.constant dense<0.000000e+00> : vector<8x8xf32>
    %720 = tpu.matmul %719, %706, %cst_209 {dimension_numbers = #tpu.dot_dimension_numbers<[1], [0], [0], [1], [0, 0, 1, 1], [], []>} : vector<8x8xbf16>, vector<8x8xbf16>, vector<8x8xf32> -> vector<8x8xf32>
    %721 = arith.truncf %720 : vector<8x8xf32> to vector<8x8xbf16>
    %cst_210 = arith.constant dense<0.000000e+00> : vector<8x32xf32>
    %722 = tpu.matmul %721, %21, %cst_210 {dimension_numbers = #tpu.dot_dimension_numbers<[1], [0], [0], [1], [0, 0, 1, 1], [], []>} : vector<8x8xbf16>, vector<8x32xbf16>, vector<8x32xf32> -> vector<8x32xf32>
    %723 = arith.addf %700, %722 : vector<8x32xf32>
    %724 = vector.extract_strided_slice %655 {offsets = [0, 24], sizes = [8, 8], strides = [1, 1]} : vector<8x32xf32> to vector<8x8xf32>
    %725 = arith.truncf %724 : vector<8x8xf32> to vector<8x8xbf16>
    %726 = vector.extract_strided_slice %649 {offsets = [0, 24], sizes = [8, 8], strides = [1, 1]} : vector<8x32xf32> to vector<8x8xf32>
    %727 = arith.truncf %726 : vector<8x8xf32> to vector<8x8xbf16>
    %728 = vector.extract_strided_slice %653 {offsets = [0, 24], sizes = [8, 8], strides = [1, 1]} : vector<8x32xf32> to vector<8x8xf32>
    %729 = arith.truncf %728 : vector<8x8xf32> to vector<8x8xbf16>
    %cst_211 = arith.constant dense<0.000000e+00> : vector<8x8xf32>
    %730 = tpu.matmul %725, %727, %cst_211 {dimension_numbers = #tpu.dot_dimension_numbers<[1], [1], [0], [0], [0, 0, 1, 0], [], []>} : vector<8x8xbf16>, vector<8x8xbf16>, vector<8x8xf32> -> vector<8x8xf32>
    %731 = arith.addf %730, %4 : vector<8x8xf32>
    %cst_212 = arith.constant dense<0xFF800000> : vector<8xf32>
    %732 = vector.multi_reduction <maximumf>, %731, %cst_212 [1] : vector<8x8xf32> to vector<8xf32>
    %733 = vector.shape_cast %732 : vector<8xf32> to vector<8x1xf32>
    %734 = vector.broadcast %733 : vector<8x1xf32> to vector<8x8xf32>
    %735 = arith.subf %731, %734 : vector<8x8xf32>
    %736 = math.exp %735 : vector<8x8xf32>
    %cst_213 = arith.constant dense<0.000000e+00> : vector<8xf32>
    %737 = vector.multi_reduction <add>, %736, %cst_213 [1] : vector<8x8xf32> to vector<8xf32>
    %738 = vector.shape_cast %737 : vector<8xf32> to vector<8x1xf32>
    %739 = tpu.reciprocal %738 {approx = true} : vector<8x1xf32> -> vector<8x1xf32>
    %740 = vector.broadcast %739 : vector<8x1xf32> to vector<8x8xf32>
    %741 = arith.mulf %736, %740 : vector<8x8xf32>
    %742 = arith.truncf %741 : vector<8x8xf32> to vector<8x8xbf16>
    %cst_214 = arith.constant dense<0.000000e+00> : vector<8x8xf32>
    %743 = tpu.matmul %742, %729, %cst_214 {dimension_numbers = #tpu.dot_dimension_numbers<[1], [0], [0], [1], [0, 0, 1, 1], [], []>} : vector<8x8xbf16>, vector<8x8xbf16>, vector<8x8xf32> -> vector<8x8xf32>
    %744 = arith.truncf %743 : vector<8x8xf32> to vector<8x8xbf16>
    %cst_215 = arith.constant dense<0.000000e+00> : vector<8x32xf32>
    %745 = tpu.matmul %744, %23, %cst_215 {dimension_numbers = #tpu.dot_dimension_numbers<[1], [0], [0], [1], [0, 0, 1, 1], [], []>} : vector<8x8xbf16>, vector<8x32xbf16>, vector<8x32xf32> -> vector<8x32xf32>
    %746 = arith.addf %723, %745 : vector<8x32xf32>
    %747 = vector.broadcast %24 : vector<1x32xf32> to vector<8x32xf32>
    %748 = arith.addf %746, %747 : vector<8x32xf32>
    %749 = arith.addf %641, %748 : vector<8x32xf32>
    %cst_216 = arith.constant dense<0.000000e+00> : vector<8xf32>
    %750 = vector.multi_reduction <add>, %749, %cst_216 [1] : vector<8x32xf32> to vector<8xf32>
    %751 = vector.shape_cast %750 : vector<8xf32> to vector<8x1xf32>
    %cst_217 = arith.constant 3.200000e+01 : f32
    %752 = vector.broadcast %cst_217 : f32 to vector<8x1xf32>
    %753 = arith.divf %751, %752 : vector<8x1xf32>
    %754 = vector.broadcast %753 : vector<8x1xf32> to vector<8x32xf32>
    %755 = arith.subf %749, %754 : vector<8x32xf32>
    %756 = arith.mulf %755, %755 : vector<8x32xf32>
    %cst_218 = arith.constant dense<0.000000e+00> : vector<8xf32>
    %757 = vector.multi_reduction <add>, %756, %cst_218 [1] : vector<8x32xf32> to vector<8xf32>
    %758 = vector.shape_cast %757 : vector<8xf32> to vector<8x1xf32>
    %cst_219 = arith.constant 3.200000e+01 : f32
    %759 = vector.broadcast %cst_219 : f32 to vector<8x1xf32>
    %760 = arith.divf %758, %759 : vector<8x1xf32>
    %761 = vector.broadcast %753 : vector<8x1xf32> to vector<8x32xf32>
    %762 = arith.subf %749, %761 : vector<8x32xf32>
    %cst_220 = arith.constant 9.99999974E-6 : f32
    %763 = vector.broadcast %cst_220 : f32 to vector<8x1xf32>
    %764 = arith.addf %760, %763 : vector<8x1xf32>
    %765 = math.rsqrt %764 : vector<8x1xf32>
    %766 = vector.broadcast %765 : vector<8x1xf32> to vector<8x32xf32>
    %767 = arith.mulf %762, %766 : vector<8x32xf32>
    %768 = vector.broadcast %44 : vector<1x32xf32> to vector<8x32xf32>
    %769 = arith.mulf %767, %768 : vector<8x32xf32>
    %770 = vector.broadcast %45 : vector<1x32xf32> to vector<8x32xf32>
    %771 = arith.addf %769, %770 : vector<8x32xf32>
    %772 = arith.truncf %771 : vector<8x32xf32> to vector<8x32xbf16>
    %cst_221 = arith.constant dense<0.000000e+00> : vector<8x32xf32>
    %773 = tpu.matmul %772, %26, %cst_221 {dimension_numbers = #tpu.dot_dimension_numbers<[1], [0], [0], [1], [0, 0, 1, 1], [], []>} : vector<8x32xbf16>, vector<32x32xbf16>, vector<8x32xf32> -> vector<8x32xf32>
    %774 = vector.broadcast %27 : vector<1x32xf32> to vector<8x32xf32>
    %775 = arith.addf %773, %774 : vector<8x32xf32>
    %776 = arith.truncf %3 : vector<8x32xf32> to vector<8x32xbf16>
    %cst_222 = arith.constant dense<0.000000e+00> : vector<8x32xf32>
    %777 = tpu.matmul %776, %29, %cst_222 {dimension_numbers = #tpu.dot_dimension_numbers<[1], [0], [0], [1], [0, 0, 1, 1], [], []>} : vector<8x32xbf16>, vector<32x32xbf16>, vector<8x32xf32> -> vector<8x32xf32>
    %778 = vector.broadcast %30 : vector<1x32xf32> to vector<8x32xf32>
    %779 = arith.addf %777, %778 : vector<8x32xf32>
    %780 = arith.truncf %3 : vector<8x32xf32> to vector<8x32xbf16>
    %cst_223 = arith.constant dense<0.000000e+00> : vector<8x32xf32>
    %781 = tpu.matmul %780, %32, %cst_223 {dimension_numbers = #tpu.dot_dimension_numbers<[1], [0], [0], [1], [0, 0, 1, 1], [], []>} : vector<8x32xbf16>, vector<32x32xbf16>, vector<8x32xf32> -> vector<8x32xf32>
    %782 = vector.broadcast %33 : vector<1x32xf32> to vector<8x32xf32>
    %783 = arith.addf %781, %782 : vector<8x32xf32>
    %cst_224 = arith.constant 0.353553385 : f32
    %784 = vector.broadcast %cst_224 : f32 to vector<8x32xf32>
    %785 = arith.mulf %775, %784 : vector<8x32xf32>
    %786 = vector.extract_strided_slice %785 {offsets = [0, 0], sizes = [8, 8], strides = [1, 1]} : vector<8x32xf32> to vector<8x8xf32>
    %787 = arith.truncf %786 : vector<8x8xf32> to vector<8x8xbf16>
    %788 = vector.extract_strided_slice %779 {offsets = [0, 0], sizes = [8, 8], strides = [1, 1]} : vector<8x32xf32> to vector<8x8xf32>
    %789 = arith.truncf %788 : vector<8x8xf32> to vector<8x8xbf16>
    %790 = vector.extract_strided_slice %783 {offsets = [0, 0], sizes = [8, 8], strides = [1, 1]} : vector<8x32xf32> to vector<8x8xf32>
    %791 = arith.truncf %790 : vector<8x8xf32> to vector<8x8xbf16>
    %cst_225 = arith.constant dense<0.000000e+00> : vector<8x8xf32>
    %792 = tpu.matmul %787, %789, %cst_225 {dimension_numbers = #tpu.dot_dimension_numbers<[1], [1], [0], [0], [0, 0, 1, 0], [], []>} : vector<8x8xbf16>, vector<8x8xbf16>, vector<8x8xf32> -> vector<8x8xf32>
    %793 = arith.addf %792, %5 : vector<8x8xf32>
    %cst_226 = arith.constant dense<0xFF800000> : vector<8xf32>
    %794 = vector.multi_reduction <maximumf>, %793, %cst_226 [1] : vector<8x8xf32> to vector<8xf32>
    %795 = vector.shape_cast %794 : vector<8xf32> to vector<8x1xf32>
    %796 = vector.broadcast %795 : vector<8x1xf32> to vector<8x8xf32>
    %797 = arith.subf %793, %796 : vector<8x8xf32>
    %798 = math.exp %797 : vector<8x8xf32>
    %cst_227 = arith.constant dense<0.000000e+00> : vector<8xf32>
    %799 = vector.multi_reduction <add>, %798, %cst_227 [1] : vector<8x8xf32> to vector<8xf32>
    %800 = vector.shape_cast %799 : vector<8xf32> to vector<8x1xf32>
    %801 = tpu.reciprocal %800 {approx = true} : vector<8x1xf32> -> vector<8x1xf32>
    %802 = vector.broadcast %801 : vector<8x1xf32> to vector<8x8xf32>
    %803 = arith.mulf %798, %802 : vector<8x8xf32>
    %804 = arith.truncf %803 : vector<8x8xf32> to vector<8x8xbf16>
    %cst_228 = arith.constant dense<0.000000e+00> : vector<8x8xf32>
    %805 = tpu.matmul %804, %791, %cst_228 {dimension_numbers = #tpu.dot_dimension_numbers<[1], [0], [0], [1], [0, 0, 1, 1], [], []>} : vector<8x8xbf16>, vector<8x8xbf16>, vector<8x8xf32> -> vector<8x8xf32>
    %806 = arith.truncf %805 : vector<8x8xf32> to vector<8x8xbf16>
    %cst_229 = arith.constant dense<0.000000e+00> : vector<8x32xf32>
    %807 = tpu.matmul %806, %36, %cst_229 {dimension_numbers = #tpu.dot_dimension_numbers<[1], [0], [0], [1], [0, 0, 1, 1], [], []>} : vector<8x8xbf16>, vector<8x32xbf16>, vector<8x32xf32> -> vector<8x32xf32>
    %808 = vector.extract_strided_slice %785 {offsets = [0, 8], sizes = [8, 8], strides = [1, 1]} : vector<8x32xf32> to vector<8x8xf32>
    %809 = arith.truncf %808 : vector<8x8xf32> to vector<8x8xbf16>
    %810 = vector.extract_strided_slice %779 {offsets = [0, 8], sizes = [8, 8], strides = [1, 1]} : vector<8x32xf32> to vector<8x8xf32>
    %811 = arith.truncf %810 : vector<8x8xf32> to vector<8x8xbf16>
    %812 = vector.extract_strided_slice %783 {offsets = [0, 8], sizes = [8, 8], strides = [1, 1]} : vector<8x32xf32> to vector<8x8xf32>
    %813 = arith.truncf %812 : vector<8x8xf32> to vector<8x8xbf16>
    %cst_230 = arith.constant dense<0.000000e+00> : vector<8x8xf32>
    %814 = tpu.matmul %809, %811, %cst_230 {dimension_numbers = #tpu.dot_dimension_numbers<[1], [1], [0], [0], [0, 0, 1, 0], [], []>} : vector<8x8xbf16>, vector<8x8xbf16>, vector<8x8xf32> -> vector<8x8xf32>
    %815 = arith.addf %814, %5 : vector<8x8xf32>
    %cst_231 = arith.constant dense<0xFF800000> : vector<8xf32>
    %816 = vector.multi_reduction <maximumf>, %815, %cst_231 [1] : vector<8x8xf32> to vector<8xf32>
    %817 = vector.shape_cast %816 : vector<8xf32> to vector<8x1xf32>
    %818 = vector.broadcast %817 : vector<8x1xf32> to vector<8x8xf32>
    %819 = arith.subf %815, %818 : vector<8x8xf32>
    %820 = math.exp %819 : vector<8x8xf32>
    %cst_232 = arith.constant dense<0.000000e+00> : vector<8xf32>
    %821 = vector.multi_reduction <add>, %820, %cst_232 [1] : vector<8x8xf32> to vector<8xf32>
    %822 = vector.shape_cast %821 : vector<8xf32> to vector<8x1xf32>
    %823 = tpu.reciprocal %822 {approx = true} : vector<8x1xf32> -> vector<8x1xf32>
    %824 = vector.broadcast %823 : vector<8x1xf32> to vector<8x8xf32>
    %825 = arith.mulf %820, %824 : vector<8x8xf32>
    %826 = arith.truncf %825 : vector<8x8xf32> to vector<8x8xbf16>
    %cst_233 = arith.constant dense<0.000000e+00> : vector<8x8xf32>
    %827 = tpu.matmul %826, %813, %cst_233 {dimension_numbers = #tpu.dot_dimension_numbers<[1], [0], [0], [1], [0, 0, 1, 1], [], []>} : vector<8x8xbf16>, vector<8x8xbf16>, vector<8x8xf32> -> vector<8x8xf32>
    %828 = arith.truncf %827 : vector<8x8xf32> to vector<8x8xbf16>
    %cst_234 = arith.constant dense<0.000000e+00> : vector<8x32xf32>
    %829 = tpu.matmul %828, %38, %cst_234 {dimension_numbers = #tpu.dot_dimension_numbers<[1], [0], [0], [1], [0, 0, 1, 1], [], []>} : vector<8x8xbf16>, vector<8x32xbf16>, vector<8x32xf32> -> vector<8x32xf32>
    %830 = arith.addf %807, %829 : vector<8x32xf32>
    %831 = vector.extract_strided_slice %785 {offsets = [0, 16], sizes = [8, 8], strides = [1, 1]} : vector<8x32xf32> to vector<8x8xf32>
    %832 = arith.truncf %831 : vector<8x8xf32> to vector<8x8xbf16>
    %833 = vector.extract_strided_slice %779 {offsets = [0, 16], sizes = [8, 8], strides = [1, 1]} : vector<8x32xf32> to vector<8x8xf32>
    %834 = arith.truncf %833 : vector<8x8xf32> to vector<8x8xbf16>
    %835 = vector.extract_strided_slice %783 {offsets = [0, 16], sizes = [8, 8], strides = [1, 1]} : vector<8x32xf32> to vector<8x8xf32>
    %836 = arith.truncf %835 : vector<8x8xf32> to vector<8x8xbf16>
    %cst_235 = arith.constant dense<0.000000e+00> : vector<8x8xf32>
    %837 = tpu.matmul %832, %834, %cst_235 {dimension_numbers = #tpu.dot_dimension_numbers<[1], [1], [0], [0], [0, 0, 1, 0], [], []>} : vector<8x8xbf16>, vector<8x8xbf16>, vector<8x8xf32> -> vector<8x8xf32>
    %838 = arith.addf %837, %5 : vector<8x8xf32>
    %cst_236 = arith.constant dense<0xFF800000> : vector<8xf32>
    %839 = vector.multi_reduction <maximumf>, %838, %cst_236 [1] : vector<8x8xf32> to vector<8xf32>
    %840 = vector.shape_cast %839 : vector<8xf32> to vector<8x1xf32>
    %841 = vector.broadcast %840 : vector<8x1xf32> to vector<8x8xf32>
    %842 = arith.subf %838, %841 : vector<8x8xf32>
    %843 = math.exp %842 : vector<8x8xf32>
    %cst_237 = arith.constant dense<0.000000e+00> : vector<8xf32>
    %844 = vector.multi_reduction <add>, %843, %cst_237 [1] : vector<8x8xf32> to vector<8xf32>
    %845 = vector.shape_cast %844 : vector<8xf32> to vector<8x1xf32>
    %846 = tpu.reciprocal %845 {approx = true} : vector<8x1xf32> -> vector<8x1xf32>
    %847 = vector.broadcast %846 : vector<8x1xf32> to vector<8x8xf32>
    %848 = arith.mulf %843, %847 : vector<8x8xf32>
    %849 = arith.truncf %848 : vector<8x8xf32> to vector<8x8xbf16>
    %cst_238 = arith.constant dense<0.000000e+00> : vector<8x8xf32>
    %850 = tpu.matmul %849, %836, %cst_238 {dimension_numbers = #tpu.dot_dimension_numbers<[1], [0], [0], [1], [0, 0, 1, 1], [], []>} : vector<8x8xbf16>, vector<8x8xbf16>, vector<8x8xf32> -> vector<8x8xf32>
    %851 = arith.truncf %850 : vector<8x8xf32> to vector<8x8xbf16>
    %cst_239 = arith.constant dense<0.000000e+00> : vector<8x32xf32>
    %852 = tpu.matmul %851, %40, %cst_239 {dimension_numbers = #tpu.dot_dimension_numbers<[1], [0], [0], [1], [0, 0, 1, 1], [], []>} : vector<8x8xbf16>, vector<8x32xbf16>, vector<8x32xf32> -> vector<8x32xf32>
    %853 = arith.addf %830, %852 : vector<8x32xf32>
    %854 = vector.extract_strided_slice %785 {offsets = [0, 24], sizes = [8, 8], strides = [1, 1]} : vector<8x32xf32> to vector<8x8xf32>
    %855 = arith.truncf %854 : vector<8x8xf32> to vector<8x8xbf16>
    %856 = vector.extract_strided_slice %779 {offsets = [0, 24], sizes = [8, 8], strides = [1, 1]} : vector<8x32xf32> to vector<8x8xf32>
    %857 = arith.truncf %856 : vector<8x8xf32> to vector<8x8xbf16>
    %858 = vector.extract_strided_slice %783 {offsets = [0, 24], sizes = [8, 8], strides = [1, 1]} : vector<8x32xf32> to vector<8x8xf32>
    %859 = arith.truncf %858 : vector<8x8xf32> to vector<8x8xbf16>
    %cst_240 = arith.constant dense<0.000000e+00> : vector<8x8xf32>
    %860 = tpu.matmul %855, %857, %cst_240 {dimension_numbers = #tpu.dot_dimension_numbers<[1], [1], [0], [0], [0, 0, 1, 0], [], []>} : vector<8x8xbf16>, vector<8x8xbf16>, vector<8x8xf32> -> vector<8x8xf32>
    %861 = arith.addf %860, %5 : vector<8x8xf32>
    %cst_241 = arith.constant dense<0xFF800000> : vector<8xf32>
    %862 = vector.multi_reduction <maximumf>, %861, %cst_241 [1] : vector<8x8xf32> to vector<8xf32>
    %863 = vector.shape_cast %862 : vector<8xf32> to vector<8x1xf32>
    %864 = vector.broadcast %863 : vector<8x1xf32> to vector<8x8xf32>
    %865 = arith.subf %861, %864 : vector<8x8xf32>
    %866 = math.exp %865 : vector<8x8xf32>
    %cst_242 = arith.constant dense<0.000000e+00> : vector<8xf32>
    %867 = vector.multi_reduction <add>, %866, %cst_242 [1] : vector<8x8xf32> to vector<8xf32>
    %868 = vector.shape_cast %867 : vector<8xf32> to vector<8x1xf32>
    %869 = tpu.reciprocal %868 {approx = true} : vector<8x1xf32> -> vector<8x1xf32>
    %870 = vector.broadcast %869 : vector<8x1xf32> to vector<8x8xf32>
    %871 = arith.mulf %866, %870 : vector<8x8xf32>
    %872 = arith.truncf %871 : vector<8x8xf32> to vector<8x8xbf16>
    %cst_243 = arith.constant dense<0.000000e+00> : vector<8x8xf32>
    %873 = tpu.matmul %872, %859, %cst_243 {dimension_numbers = #tpu.dot_dimension_numbers<[1], [0], [0], [1], [0, 0, 1, 1], [], []>} : vector<8x8xbf16>, vector<8x8xbf16>, vector<8x8xf32> -> vector<8x8xf32>
    %874 = arith.truncf %873 : vector<8x8xf32> to vector<8x8xbf16>
    %cst_244 = arith.constant dense<0.000000e+00> : vector<8x32xf32>
    %875 = tpu.matmul %874, %42, %cst_244 {dimension_numbers = #tpu.dot_dimension_numbers<[1], [0], [0], [1], [0, 0, 1, 1], [], []>} : vector<8x8xbf16>, vector<8x32xbf16>, vector<8x32xf32> -> vector<8x32xf32>
    %876 = arith.addf %853, %875 : vector<8x32xf32>
    %877 = vector.broadcast %43 : vector<1x32xf32> to vector<8x32xf32>
    %878 = arith.addf %876, %877 : vector<8x32xf32>
    %879 = arith.addf %771, %878 : vector<8x32xf32>
    %cst_245 = arith.constant dense<0.000000e+00> : vector<8xf32>
    %880 = vector.multi_reduction <add>, %879, %cst_245 [1] : vector<8x32xf32> to vector<8xf32>
    %881 = vector.shape_cast %880 : vector<8xf32> to vector<8x1xf32>
    %cst_246 = arith.constant 3.200000e+01 : f32
    %882 = vector.broadcast %cst_246 : f32 to vector<8x1xf32>
    %883 = arith.divf %881, %882 : vector<8x1xf32>
    %884 = vector.broadcast %883 : vector<8x1xf32> to vector<8x32xf32>
    %885 = arith.subf %879, %884 : vector<8x32xf32>
    %886 = arith.mulf %885, %885 : vector<8x32xf32>
    %cst_247 = arith.constant dense<0.000000e+00> : vector<8xf32>
    %887 = vector.multi_reduction <add>, %886, %cst_247 [1] : vector<8x32xf32> to vector<8xf32>
    %888 = vector.shape_cast %887 : vector<8xf32> to vector<8x1xf32>
    %cst_248 = arith.constant 3.200000e+01 : f32
    %889 = vector.broadcast %cst_248 : f32 to vector<8x1xf32>
    %890 = arith.divf %888, %889 : vector<8x1xf32>
    %891 = vector.broadcast %883 : vector<8x1xf32> to vector<8x32xf32>
    %892 = arith.subf %879, %891 : vector<8x32xf32>
    %cst_249 = arith.constant 9.99999974E-6 : f32
    %893 = vector.broadcast %cst_249 : f32 to vector<8x1xf32>
    %894 = arith.addf %890, %893 : vector<8x1xf32>
    %895 = math.rsqrt %894 : vector<8x1xf32>
    %896 = vector.broadcast %895 : vector<8x1xf32> to vector<8x32xf32>
    %897 = arith.mulf %892, %896 : vector<8x32xf32>
    %898 = vector.broadcast %46 : vector<1x32xf32> to vector<8x32xf32>
    %899 = arith.mulf %897, %898 : vector<8x32xf32>
    %900 = vector.broadcast %47 : vector<1x32xf32> to vector<8x32xf32>
    %901 = arith.addf %899, %900 : vector<8x32xf32>
    %902 = arith.truncf %901 : vector<8x32xf32> to vector<8x32xbf16>
    %cst_250 = arith.constant dense<0.000000e+00> : vector<8x64xf32>
    %903 = tpu.matmul %902, %51, %cst_250 {dimension_numbers = #tpu.dot_dimension_numbers<[1], [0], [0], [1], [0, 0, 1, 1], [], []>} : vector<8x32xbf16>, vector<32x64xbf16>, vector<8x64xf32> -> vector<8x64xf32>
    %904 = vector.broadcast %52 : vector<1x64xf32> to vector<8x64xf32>
    %905 = arith.addf %903, %904 : vector<8x64xf32>
    %cst_251 = arith.constant 0.000000e+00 : f32
    %906 = vector.broadcast %cst_251 : f32 to vector<8x64xf32>
    %907 = arith.maximumf %905, %906 : vector<8x64xf32>
    %908 = arith.truncf %907 : vector<8x64xf32> to vector<8x64xbf16>
    %cst_252 = arith.constant dense<0.000000e+00> : vector<8x32xf32>
    %909 = tpu.matmul %908, %54, %cst_252 {dimension_numbers = #tpu.dot_dimension_numbers<[1], [0], [0], [1], [0, 0, 1, 1], [], []>} : vector<8x64xbf16>, vector<64x32xbf16>, vector<8x32xf32> -> vector<8x32xf32>
    %910 = vector.broadcast %55 : vector<1x32xf32> to vector<8x32xf32>
    %911 = arith.addf %909, %910 : vector<8x32xf32>
    %912 = arith.addf %901, %911 : vector<8x32xf32>
    %cst_253 = arith.constant dense<0.000000e+00> : vector<8xf32>
    %913 = vector.multi_reduction <add>, %912, %cst_253 [1] : vector<8x32xf32> to vector<8xf32>
    %914 = vector.shape_cast %913 : vector<8xf32> to vector<8x1xf32>
    %cst_254 = arith.constant 3.200000e+01 : f32
    %915 = vector.broadcast %cst_254 : f32 to vector<8x1xf32>
    %916 = arith.divf %914, %915 : vector<8x1xf32>
    %917 = vector.broadcast %916 : vector<8x1xf32> to vector<8x32xf32>
    %918 = arith.subf %912, %917 : vector<8x32xf32>
    %919 = arith.mulf %918, %918 : vector<8x32xf32>
    %cst_255 = arith.constant dense<0.000000e+00> : vector<8xf32>
    %920 = vector.multi_reduction <add>, %919, %cst_255 [1] : vector<8x32xf32> to vector<8xf32>
    %921 = vector.shape_cast %920 : vector<8xf32> to vector<8x1xf32>
    %cst_256 = arith.constant 3.200000e+01 : f32
    %922 = vector.broadcast %cst_256 : f32 to vector<8x1xf32>
    %923 = arith.divf %921, %922 : vector<8x1xf32>
    %924 = vector.broadcast %916 : vector<8x1xf32> to vector<8x32xf32>
    %925 = arith.subf %912, %924 : vector<8x32xf32>
    %cst_257 = arith.constant 9.99999974E-6 : f32
    %926 = vector.broadcast %cst_257 : f32 to vector<8x1xf32>
    %927 = arith.addf %923, %926 : vector<8x1xf32>
    %928 = math.rsqrt %927 : vector<8x1xf32>
    %929 = vector.broadcast %928 : vector<8x1xf32> to vector<8x32xf32>
    %930 = arith.mulf %925, %929 : vector<8x32xf32>
    %931 = vector.broadcast %48 : vector<1x32xf32> to vector<8x32xf32>
    %932 = arith.mulf %930, %931 : vector<8x32xf32>
    %933 = vector.broadcast %49 : vector<1x32xf32> to vector<8x32xf32>
    %934 = arith.addf %932, %933 : vector<8x32xf32>
    %935 = arith.truncf %934 : vector<8x32xf32> to vector<8x32xbf16>
    %cst_258 = arith.constant dense<0.000000e+00> : vector<8x32xf32>
    %936 = tpu.matmul %935, %7, %cst_258 {dimension_numbers = #tpu.dot_dimension_numbers<[1], [0], [0], [1], [0, 0, 1, 1], [], []>} : vector<8x32xbf16>, vector<32x32xbf16>, vector<8x32xf32> -> vector<8x32xf32>
    %937 = vector.broadcast %8 : vector<1x32xf32> to vector<8x32xf32>
    %938 = arith.addf %936, %937 : vector<8x32xf32>
    %939 = arith.truncf %934 : vector<8x32xf32> to vector<8x32xbf16>
    %cst_259 = arith.constant dense<0.000000e+00> : vector<8x32xf32>
    %940 = tpu.matmul %939, %10, %cst_259 {dimension_numbers = #tpu.dot_dimension_numbers<[1], [0], [0], [1], [0, 0, 1, 1], [], []>} : vector<8x32xbf16>, vector<32x32xbf16>, vector<8x32xf32> -> vector<8x32xf32>
    %941 = vector.broadcast %11 : vector<1x32xf32> to vector<8x32xf32>
    %942 = arith.addf %940, %941 : vector<8x32xf32>
    %943 = arith.truncf %934 : vector<8x32xf32> to vector<8x32xbf16>
    %cst_260 = arith.constant dense<0.000000e+00> : vector<8x32xf32>
    %944 = tpu.matmul %943, %13, %cst_260 {dimension_numbers = #tpu.dot_dimension_numbers<[1], [0], [0], [1], [0, 0, 1, 1], [], []>} : vector<8x32xbf16>, vector<32x32xbf16>, vector<8x32xf32> -> vector<8x32xf32>
    %945 = vector.broadcast %14 : vector<1x32xf32> to vector<8x32xf32>
    %946 = arith.addf %944, %945 : vector<8x32xf32>
    %cst_261 = arith.constant 0.353553385 : f32
    %947 = vector.broadcast %cst_261 : f32 to vector<8x32xf32>
    %948 = arith.mulf %938, %947 : vector<8x32xf32>
    %949 = vector.extract_strided_slice %948 {offsets = [0, 0], sizes = [8, 8], strides = [1, 1]} : vector<8x32xf32> to vector<8x8xf32>
    %950 = arith.truncf %949 : vector<8x8xf32> to vector<8x8xbf16>
    %951 = vector.extract_strided_slice %942 {offsets = [0, 0], sizes = [8, 8], strides = [1, 1]} : vector<8x32xf32> to vector<8x8xf32>
    %952 = arith.truncf %951 : vector<8x8xf32> to vector<8x8xbf16>
    %953 = vector.extract_strided_slice %946 {offsets = [0, 0], sizes = [8, 8], strides = [1, 1]} : vector<8x32xf32> to vector<8x8xf32>
    %954 = arith.truncf %953 : vector<8x8xf32> to vector<8x8xbf16>
    %cst_262 = arith.constant dense<0.000000e+00> : vector<8x8xf32>
    %955 = tpu.matmul %950, %952, %cst_262 {dimension_numbers = #tpu.dot_dimension_numbers<[1], [1], [0], [0], [0, 0, 1, 0], [], []>} : vector<8x8xbf16>, vector<8x8xbf16>, vector<8x8xf32> -> vector<8x8xf32>
    %956 = arith.addf %955, %4 : vector<8x8xf32>
    %cst_263 = arith.constant dense<0xFF800000> : vector<8xf32>
    %957 = vector.multi_reduction <maximumf>, %956, %cst_263 [1] : vector<8x8xf32> to vector<8xf32>
    %958 = vector.shape_cast %957 : vector<8xf32> to vector<8x1xf32>
    %959 = vector.broadcast %958 : vector<8x1xf32> to vector<8x8xf32>
    %960 = arith.subf %956, %959 : vector<8x8xf32>
    %961 = math.exp %960 : vector<8x8xf32>
    %cst_264 = arith.constant dense<0.000000e+00> : vector<8xf32>
    %962 = vector.multi_reduction <add>, %961, %cst_264 [1] : vector<8x8xf32> to vector<8xf32>
    %963 = vector.shape_cast %962 : vector<8xf32> to vector<8x1xf32>
    %964 = tpu.reciprocal %963 {approx = true} : vector<8x1xf32> -> vector<8x1xf32>
    %965 = vector.broadcast %964 : vector<8x1xf32> to vector<8x8xf32>
    %966 = arith.mulf %961, %965 : vector<8x8xf32>
    %967 = arith.truncf %966 : vector<8x8xf32> to vector<8x8xbf16>
    %cst_265 = arith.constant dense<0.000000e+00> : vector<8x8xf32>
    %968 = tpu.matmul %967, %954, %cst_265 {dimension_numbers = #tpu.dot_dimension_numbers<[1], [0], [0], [1], [0, 0, 1, 1], [], []>} : vector<8x8xbf16>, vector<8x8xbf16>, vector<8x8xf32> -> vector<8x8xf32>
    %969 = arith.truncf %968 : vector<8x8xf32> to vector<8x8xbf16>
    %cst_266 = arith.constant dense<0.000000e+00> : vector<8x32xf32>
    %970 = tpu.matmul %969, %17, %cst_266 {dimension_numbers = #tpu.dot_dimension_numbers<[1], [0], [0], [1], [0, 0, 1, 1], [], []>} : vector<8x8xbf16>, vector<8x32xbf16>, vector<8x32xf32> -> vector<8x32xf32>
    %971 = vector.extract_strided_slice %948 {offsets = [0, 8], sizes = [8, 8], strides = [1, 1]} : vector<8x32xf32> to vector<8x8xf32>
    %972 = arith.truncf %971 : vector<8x8xf32> to vector<8x8xbf16>
    %973 = vector.extract_strided_slice %942 {offsets = [0, 8], sizes = [8, 8], strides = [1, 1]} : vector<8x32xf32> to vector<8x8xf32>
    %974 = arith.truncf %973 : vector<8x8xf32> to vector<8x8xbf16>
    %975 = vector.extract_strided_slice %946 {offsets = [0, 8], sizes = [8, 8], strides = [1, 1]} : vector<8x32xf32> to vector<8x8xf32>
    %976 = arith.truncf %975 : vector<8x8xf32> to vector<8x8xbf16>
    %cst_267 = arith.constant dense<0.000000e+00> : vector<8x8xf32>
    %977 = tpu.matmul %972, %974, %cst_267 {dimension_numbers = #tpu.dot_dimension_numbers<[1], [1], [0], [0], [0, 0, 1, 0], [], []>} : vector<8x8xbf16>, vector<8x8xbf16>, vector<8x8xf32> -> vector<8x8xf32>
    %978 = arith.addf %977, %4 : vector<8x8xf32>
    %cst_268 = arith.constant dense<0xFF800000> : vector<8xf32>
    %979 = vector.multi_reduction <maximumf>, %978, %cst_268 [1] : vector<8x8xf32> to vector<8xf32>
    %980 = vector.shape_cast %979 : vector<8xf32> to vector<8x1xf32>
    %981 = vector.broadcast %980 : vector<8x1xf32> to vector<8x8xf32>
    %982 = arith.subf %978, %981 : vector<8x8xf32>
    %983 = math.exp %982 : vector<8x8xf32>
    %cst_269 = arith.constant dense<0.000000e+00> : vector<8xf32>
    %984 = vector.multi_reduction <add>, %983, %cst_269 [1] : vector<8x8xf32> to vector<8xf32>
    %985 = vector.shape_cast %984 : vector<8xf32> to vector<8x1xf32>
    %986 = tpu.reciprocal %985 {approx = true} : vector<8x1xf32> -> vector<8x1xf32>
    %987 = vector.broadcast %986 : vector<8x1xf32> to vector<8x8xf32>
    %988 = arith.mulf %983, %987 : vector<8x8xf32>
    %989 = arith.truncf %988 : vector<8x8xf32> to vector<8x8xbf16>
    %cst_270 = arith.constant dense<0.000000e+00> : vector<8x8xf32>
    %990 = tpu.matmul %989, %976, %cst_270 {dimension_numbers = #tpu.dot_dimension_numbers<[1], [0], [0], [1], [0, 0, 1, 1], [], []>} : vector<8x8xbf16>, vector<8x8xbf16>, vector<8x8xf32> -> vector<8x8xf32>
    %991 = arith.truncf %990 : vector<8x8xf32> to vector<8x8xbf16>
    %cst_271 = arith.constant dense<0.000000e+00> : vector<8x32xf32>
    %992 = tpu.matmul %991, %19, %cst_271 {dimension_numbers = #tpu.dot_dimension_numbers<[1], [0], [0], [1], [0, 0, 1, 1], [], []>} : vector<8x8xbf16>, vector<8x32xbf16>, vector<8x32xf32> -> vector<8x32xf32>
    %993 = arith.addf %970, %992 : vector<8x32xf32>
    %994 = vector.extract_strided_slice %948 {offsets = [0, 16], sizes = [8, 8], strides = [1, 1]} : vector<8x32xf32> to vector<8x8xf32>
    %995 = arith.truncf %994 : vector<8x8xf32> to vector<8x8xbf16>
    %996 = vector.extract_strided_slice %942 {offsets = [0, 16], sizes = [8, 8], strides = [1, 1]} : vector<8x32xf32> to vector<8x8xf32>
    %997 = arith.truncf %996 : vector<8x8xf32> to vector<8x8xbf16>
    %998 = vector.extract_strided_slice %946 {offsets = [0, 16], sizes = [8, 8], strides = [1, 1]} : vector<8x32xf32> to vector<8x8xf32>
    %999 = arith.truncf %998 : vector<8x8xf32> to vector<8x8xbf16>
    %cst_272 = arith.constant dense<0.000000e+00> : vector<8x8xf32>
    %1000 = tpu.matmul %995, %997, %cst_272 {dimension_numbers = #tpu.dot_dimension_numbers<[1], [1], [0], [0], [0, 0, 1, 0], [], []>} : vector<8x8xbf16>, vector<8x8xbf16>, vector<8x8xf32> -> vector<8x8xf32>
    %1001 = arith.addf %1000, %4 : vector<8x8xf32>
    %cst_273 = arith.constant dense<0xFF800000> : vector<8xf32>
    %1002 = vector.multi_reduction <maximumf>, %1001, %cst_273 [1] : vector<8x8xf32> to vector<8xf32>
    %1003 = vector.shape_cast %1002 : vector<8xf32> to vector<8x1xf32>
    %1004 = vector.broadcast %1003 : vector<8x1xf32> to vector<8x8xf32>
    %1005 = arith.subf %1001, %1004 : vector<8x8xf32>
    %1006 = math.exp %1005 : vector<8x8xf32>
    %cst_274 = arith.constant dense<0.000000e+00> : vector<8xf32>
    %1007 = vector.multi_reduction <add>, %1006, %cst_274 [1] : vector<8x8xf32> to vector<8xf32>
    %1008 = vector.shape_cast %1007 : vector<8xf32> to vector<8x1xf32>
    %1009 = tpu.reciprocal %1008 {approx = true} : vector<8x1xf32> -> vector<8x1xf32>
    %1010 = vector.broadcast %1009 : vector<8x1xf32> to vector<8x8xf32>
    %1011 = arith.mulf %1006, %1010 : vector<8x8xf32>
    %1012 = arith.truncf %1011 : vector<8x8xf32> to vector<8x8xbf16>
    %cst_275 = arith.constant dense<0.000000e+00> : vector<8x8xf32>
    %1013 = tpu.matmul %1012, %999, %cst_275 {dimension_numbers = #tpu.dot_dimension_numbers<[1], [0], [0], [1], [0, 0, 1, 1], [], []>} : vector<8x8xbf16>, vector<8x8xbf16>, vector<8x8xf32> -> vector<8x8xf32>
    %1014 = arith.truncf %1013 : vector<8x8xf32> to vector<8x8xbf16>
    %cst_276 = arith.constant dense<0.000000e+00> : vector<8x32xf32>
    %1015 = tpu.matmul %1014, %21, %cst_276 {dimension_numbers = #tpu.dot_dimension_numbers<[1], [0], [0], [1], [0, 0, 1, 1], [], []>} : vector<8x8xbf16>, vector<8x32xbf16>, vector<8x32xf32> -> vector<8x32xf32>
    %1016 = arith.addf %993, %1015 : vector<8x32xf32>
    %1017 = vector.extract_strided_slice %948 {offsets = [0, 24], sizes = [8, 8], strides = [1, 1]} : vector<8x32xf32> to vector<8x8xf32>
    %1018 = arith.truncf %1017 : vector<8x8xf32> to vector<8x8xbf16>
    %1019 = vector.extract_strided_slice %942 {offsets = [0, 24], sizes = [8, 8], strides = [1, 1]} : vector<8x32xf32> to vector<8x8xf32>
    %1020 = arith.truncf %1019 : vector<8x8xf32> to vector<8x8xbf16>
    %1021 = vector.extract_strided_slice %946 {offsets = [0, 24], sizes = [8, 8], strides = [1, 1]} : vector<8x32xf32> to vector<8x8xf32>
    %1022 = arith.truncf %1021 : vector<8x8xf32> to vector<8x8xbf16>
    %cst_277 = arith.constant dense<0.000000e+00> : vector<8x8xf32>
    %1023 = tpu.matmul %1018, %1020, %cst_277 {dimension_numbers = #tpu.dot_dimension_numbers<[1], [1], [0], [0], [0, 0, 1, 0], [], []>} : vector<8x8xbf16>, vector<8x8xbf16>, vector<8x8xf32> -> vector<8x8xf32>
    %1024 = arith.addf %1023, %4 : vector<8x8xf32>
    %cst_278 = arith.constant dense<0xFF800000> : vector<8xf32>
    %1025 = vector.multi_reduction <maximumf>, %1024, %cst_278 [1] : vector<8x8xf32> to vector<8xf32>
    %1026 = vector.shape_cast %1025 : vector<8xf32> to vector<8x1xf32>
    %1027 = vector.broadcast %1026 : vector<8x1xf32> to vector<8x8xf32>
    %1028 = arith.subf %1024, %1027 : vector<8x8xf32>
    %1029 = math.exp %1028 : vector<8x8xf32>
    %cst_279 = arith.constant dense<0.000000e+00> : vector<8xf32>
    %1030 = vector.multi_reduction <add>, %1029, %cst_279 [1] : vector<8x8xf32> to vector<8xf32>
    %1031 = vector.shape_cast %1030 : vector<8xf32> to vector<8x1xf32>
    %1032 = tpu.reciprocal %1031 {approx = true} : vector<8x1xf32> -> vector<8x1xf32>
    %1033 = vector.broadcast %1032 : vector<8x1xf32> to vector<8x8xf32>
    %1034 = arith.mulf %1029, %1033 : vector<8x8xf32>
    %1035 = arith.truncf %1034 : vector<8x8xf32> to vector<8x8xbf16>
    %cst_280 = arith.constant dense<0.000000e+00> : vector<8x8xf32>
    %1036 = tpu.matmul %1035, %1022, %cst_280 {dimension_numbers = #tpu.dot_dimension_numbers<[1], [0], [0], [1], [0, 0, 1, 1], [], []>} : vector<8x8xbf16>, vector<8x8xbf16>, vector<8x8xf32> -> vector<8x8xf32>
    %1037 = arith.truncf %1036 : vector<8x8xf32> to vector<8x8xbf16>
    %cst_281 = arith.constant dense<0.000000e+00> : vector<8x32xf32>
    %1038 = tpu.matmul %1037, %23, %cst_281 {dimension_numbers = #tpu.dot_dimension_numbers<[1], [0], [0], [1], [0, 0, 1, 1], [], []>} : vector<8x8xbf16>, vector<8x32xbf16>, vector<8x32xf32> -> vector<8x32xf32>
    %1039 = arith.addf %1016, %1038 : vector<8x32xf32>
    %1040 = vector.broadcast %24 : vector<1x32xf32> to vector<8x32xf32>
    %1041 = arith.addf %1039, %1040 : vector<8x32xf32>
    %1042 = arith.addf %934, %1041 : vector<8x32xf32>
    %cst_282 = arith.constant dense<0.000000e+00> : vector<8xf32>
    %1043 = vector.multi_reduction <add>, %1042, %cst_282 [1] : vector<8x32xf32> to vector<8xf32>
    %1044 = vector.shape_cast %1043 : vector<8xf32> to vector<8x1xf32>
    %cst_283 = arith.constant 3.200000e+01 : f32
    %1045 = vector.broadcast %cst_283 : f32 to vector<8x1xf32>
    %1046 = arith.divf %1044, %1045 : vector<8x1xf32>
    %1047 = vector.broadcast %1046 : vector<8x1xf32> to vector<8x32xf32>
    %1048 = arith.subf %1042, %1047 : vector<8x32xf32>
    %1049 = arith.mulf %1048, %1048 : vector<8x32xf32>
    %cst_284 = arith.constant dense<0.000000e+00> : vector<8xf32>
    %1050 = vector.multi_reduction <add>, %1049, %cst_284 [1] : vector<8x32xf32> to vector<8xf32>
    %1051 = vector.shape_cast %1050 : vector<8xf32> to vector<8x1xf32>
    %cst_285 = arith.constant 3.200000e+01 : f32
    %1052 = vector.broadcast %cst_285 : f32 to vector<8x1xf32>
    %1053 = arith.divf %1051, %1052 : vector<8x1xf32>
    %1054 = vector.broadcast %1046 : vector<8x1xf32> to vector<8x32xf32>
    %1055 = arith.subf %1042, %1054 : vector<8x32xf32>
    %cst_286 = arith.constant 9.99999974E-6 : f32
    %1056 = vector.broadcast %cst_286 : f32 to vector<8x1xf32>
    %1057 = arith.addf %1053, %1056 : vector<8x1xf32>
    %1058 = math.rsqrt %1057 : vector<8x1xf32>
    %1059 = vector.broadcast %1058 : vector<8x1xf32> to vector<8x32xf32>
    %1060 = arith.mulf %1055, %1059 : vector<8x32xf32>
    %1061 = vector.broadcast %44 : vector<1x32xf32> to vector<8x32xf32>
    %1062 = arith.mulf %1060, %1061 : vector<8x32xf32>
    %1063 = vector.broadcast %45 : vector<1x32xf32> to vector<8x32xf32>
    %1064 = arith.addf %1062, %1063 : vector<8x32xf32>
    %1065 = arith.truncf %1064 : vector<8x32xf32> to vector<8x32xbf16>
    %cst_287 = arith.constant dense<0.000000e+00> : vector<8x32xf32>
    %1066 = tpu.matmul %1065, %26, %cst_287 {dimension_numbers = #tpu.dot_dimension_numbers<[1], [0], [0], [1], [0, 0, 1, 1], [], []>} : vector<8x32xbf16>, vector<32x32xbf16>, vector<8x32xf32> -> vector<8x32xf32>
    %1067 = vector.broadcast %27 : vector<1x32xf32> to vector<8x32xf32>
    %1068 = arith.addf %1066, %1067 : vector<8x32xf32>
    %1069 = arith.truncf %3 : vector<8x32xf32> to vector<8x32xbf16>
    %cst_288 = arith.constant dense<0.000000e+00> : vector<8x32xf32>
    %1070 = tpu.matmul %1069, %29, %cst_288 {dimension_numbers = #tpu.dot_dimension_numbers<[1], [0], [0], [1], [0, 0, 1, 1], [], []>} : vector<8x32xbf16>, vector<32x32xbf16>, vector<8x32xf32> -> vector<8x32xf32>
    %1071 = vector.broadcast %30 : vector<1x32xf32> to vector<8x32xf32>
    %1072 = arith.addf %1070, %1071 : vector<8x32xf32>
    %1073 = arith.truncf %3 : vector<8x32xf32> to vector<8x32xbf16>
    %cst_289 = arith.constant dense<0.000000e+00> : vector<8x32xf32>
    %1074 = tpu.matmul %1073, %32, %cst_289 {dimension_numbers = #tpu.dot_dimension_numbers<[1], [0], [0], [1], [0, 0, 1, 1], [], []>} : vector<8x32xbf16>, vector<32x32xbf16>, vector<8x32xf32> -> vector<8x32xf32>
    %1075 = vector.broadcast %33 : vector<1x32xf32> to vector<8x32xf32>
    %1076 = arith.addf %1074, %1075 : vector<8x32xf32>
    %cst_290 = arith.constant 0.353553385 : f32
    %1077 = vector.broadcast %cst_290 : f32 to vector<8x32xf32>
    %1078 = arith.mulf %1068, %1077 : vector<8x32xf32>
    %1079 = vector.extract_strided_slice %1078 {offsets = [0, 0], sizes = [8, 8], strides = [1, 1]} : vector<8x32xf32> to vector<8x8xf32>
    %1080 = arith.truncf %1079 : vector<8x8xf32> to vector<8x8xbf16>
    %1081 = vector.extract_strided_slice %1072 {offsets = [0, 0], sizes = [8, 8], strides = [1, 1]} : vector<8x32xf32> to vector<8x8xf32>
    %1082 = arith.truncf %1081 : vector<8x8xf32> to vector<8x8xbf16>
    %1083 = vector.extract_strided_slice %1076 {offsets = [0, 0], sizes = [8, 8], strides = [1, 1]} : vector<8x32xf32> to vector<8x8xf32>
    %1084 = arith.truncf %1083 : vector<8x8xf32> to vector<8x8xbf16>
    %cst_291 = arith.constant dense<0.000000e+00> : vector<8x8xf32>
    %1085 = tpu.matmul %1080, %1082, %cst_291 {dimension_numbers = #tpu.dot_dimension_numbers<[1], [1], [0], [0], [0, 0, 1, 0], [], []>} : vector<8x8xbf16>, vector<8x8xbf16>, vector<8x8xf32> -> vector<8x8xf32>
    %1086 = arith.addf %1085, %5 : vector<8x8xf32>
    %cst_292 = arith.constant dense<0xFF800000> : vector<8xf32>
    %1087 = vector.multi_reduction <maximumf>, %1086, %cst_292 [1] : vector<8x8xf32> to vector<8xf32>
    %1088 = vector.shape_cast %1087 : vector<8xf32> to vector<8x1xf32>
    %1089 = vector.broadcast %1088 : vector<8x1xf32> to vector<8x8xf32>
    %1090 = arith.subf %1086, %1089 : vector<8x8xf32>
    %1091 = math.exp %1090 : vector<8x8xf32>
    %cst_293 = arith.constant dense<0.000000e+00> : vector<8xf32>
    %1092 = vector.multi_reduction <add>, %1091, %cst_293 [1] : vector<8x8xf32> to vector<8xf32>
    %1093 = vector.shape_cast %1092 : vector<8xf32> to vector<8x1xf32>
    %1094 = tpu.reciprocal %1093 {approx = true} : vector<8x1xf32> -> vector<8x1xf32>
    %1095 = vector.broadcast %1094 : vector<8x1xf32> to vector<8x8xf32>
    %1096 = arith.mulf %1091, %1095 : vector<8x8xf32>
    %1097 = arith.truncf %1096 : vector<8x8xf32> to vector<8x8xbf16>
    %cst_294 = arith.constant dense<0.000000e+00> : vector<8x8xf32>
    %1098 = tpu.matmul %1097, %1084, %cst_294 {dimension_numbers = #tpu.dot_dimension_numbers<[1], [0], [0], [1], [0, 0, 1, 1], [], []>} : vector<8x8xbf16>, vector<8x8xbf16>, vector<8x8xf32> -> vector<8x8xf32>
    %1099 = arith.truncf %1098 : vector<8x8xf32> to vector<8x8xbf16>
    %cst_295 = arith.constant dense<0.000000e+00> : vector<8x32xf32>
    %1100 = tpu.matmul %1099, %36, %cst_295 {dimension_numbers = #tpu.dot_dimension_numbers<[1], [0], [0], [1], [0, 0, 1, 1], [], []>} : vector<8x8xbf16>, vector<8x32xbf16>, vector<8x32xf32> -> vector<8x32xf32>
    %1101 = vector.extract_strided_slice %1078 {offsets = [0, 8], sizes = [8, 8], strides = [1, 1]} : vector<8x32xf32> to vector<8x8xf32>
    %1102 = arith.truncf %1101 : vector<8x8xf32> to vector<8x8xbf16>
    %1103 = vector.extract_strided_slice %1072 {offsets = [0, 8], sizes = [8, 8], strides = [1, 1]} : vector<8x32xf32> to vector<8x8xf32>
    %1104 = arith.truncf %1103 : vector<8x8xf32> to vector<8x8xbf16>
    %1105 = vector.extract_strided_slice %1076 {offsets = [0, 8], sizes = [8, 8], strides = [1, 1]} : vector<8x32xf32> to vector<8x8xf32>
    %1106 = arith.truncf %1105 : vector<8x8xf32> to vector<8x8xbf16>
    %cst_296 = arith.constant dense<0.000000e+00> : vector<8x8xf32>
    %1107 = tpu.matmul %1102, %1104, %cst_296 {dimension_numbers = #tpu.dot_dimension_numbers<[1], [1], [0], [0], [0, 0, 1, 0], [], []>} : vector<8x8xbf16>, vector<8x8xbf16>, vector<8x8xf32> -> vector<8x8xf32>
    %1108 = arith.addf %1107, %5 : vector<8x8xf32>
    %cst_297 = arith.constant dense<0xFF800000> : vector<8xf32>
    %1109 = vector.multi_reduction <maximumf>, %1108, %cst_297 [1] : vector<8x8xf32> to vector<8xf32>
    %1110 = vector.shape_cast %1109 : vector<8xf32> to vector<8x1xf32>
    %1111 = vector.broadcast %1110 : vector<8x1xf32> to vector<8x8xf32>
    %1112 = arith.subf %1108, %1111 : vector<8x8xf32>
    %1113 = math.exp %1112 : vector<8x8xf32>
    %cst_298 = arith.constant dense<0.000000e+00> : vector<8xf32>
    %1114 = vector.multi_reduction <add>, %1113, %cst_298 [1] : vector<8x8xf32> to vector<8xf32>
    %1115 = vector.shape_cast %1114 : vector<8xf32> to vector<8x1xf32>
    %1116 = tpu.reciprocal %1115 {approx = true} : vector<8x1xf32> -> vector<8x1xf32>
    %1117 = vector.broadcast %1116 : vector<8x1xf32> to vector<8x8xf32>
    %1118 = arith.mulf %1113, %1117 : vector<8x8xf32>
    %1119 = arith.truncf %1118 : vector<8x8xf32> to vector<8x8xbf16>
    %cst_299 = arith.constant dense<0.000000e+00> : vector<8x8xf32>
    %1120 = tpu.matmul %1119, %1106, %cst_299 {dimension_numbers = #tpu.dot_dimension_numbers<[1], [0], [0], [1], [0, 0, 1, 1], [], []>} : vector<8x8xbf16>, vector<8x8xbf16>, vector<8x8xf32> -> vector<8x8xf32>
    %1121 = arith.truncf %1120 : vector<8x8xf32> to vector<8x8xbf16>
    %cst_300 = arith.constant dense<0.000000e+00> : vector<8x32xf32>
    %1122 = tpu.matmul %1121, %38, %cst_300 {dimension_numbers = #tpu.dot_dimension_numbers<[1], [0], [0], [1], [0, 0, 1, 1], [], []>} : vector<8x8xbf16>, vector<8x32xbf16>, vector<8x32xf32> -> vector<8x32xf32>
    %1123 = arith.addf %1100, %1122 : vector<8x32xf32>
    %1124 = vector.extract_strided_slice %1078 {offsets = [0, 16], sizes = [8, 8], strides = [1, 1]} : vector<8x32xf32> to vector<8x8xf32>
    %1125 = arith.truncf %1124 : vector<8x8xf32> to vector<8x8xbf16>
    %1126 = vector.extract_strided_slice %1072 {offsets = [0, 16], sizes = [8, 8], strides = [1, 1]} : vector<8x32xf32> to vector<8x8xf32>
    %1127 = arith.truncf %1126 : vector<8x8xf32> to vector<8x8xbf16>
    %1128 = vector.extract_strided_slice %1076 {offsets = [0, 16], sizes = [8, 8], strides = [1, 1]} : vector<8x32xf32> to vector<8x8xf32>
    %1129 = arith.truncf %1128 : vector<8x8xf32> to vector<8x8xbf16>
    %cst_301 = arith.constant dense<0.000000e+00> : vector<8x8xf32>
    %1130 = tpu.matmul %1125, %1127, %cst_301 {dimension_numbers = #tpu.dot_dimension_numbers<[1], [1], [0], [0], [0, 0, 1, 0], [], []>} : vector<8x8xbf16>, vector<8x8xbf16>, vector<8x8xf32> -> vector<8x8xf32>
    %1131 = arith.addf %1130, %5 : vector<8x8xf32>
    %cst_302 = arith.constant dense<0xFF800000> : vector<8xf32>
    %1132 = vector.multi_reduction <maximumf>, %1131, %cst_302 [1] : vector<8x8xf32> to vector<8xf32>
    %1133 = vector.shape_cast %1132 : vector<8xf32> to vector<8x1xf32>
    %1134 = vector.broadcast %1133 : vector<8x1xf32> to vector<8x8xf32>
    %1135 = arith.subf %1131, %1134 : vector<8x8xf32>
    %1136 = math.exp %1135 : vector<8x8xf32>
    %cst_303 = arith.constant dense<0.000000e+00> : vector<8xf32>
    %1137 = vector.multi_reduction <add>, %1136, %cst_303 [1] : vector<8x8xf32> to vector<8xf32>
    %1138 = vector.shape_cast %1137 : vector<8xf32> to vector<8x1xf32>
    %1139 = tpu.reciprocal %1138 {approx = true} : vector<8x1xf32> -> vector<8x1xf32>
    %1140 = vector.broadcast %1139 : vector<8x1xf32> to vector<8x8xf32>
    %1141 = arith.mulf %1136, %1140 : vector<8x8xf32>
    %1142 = arith.truncf %1141 : vector<8x8xf32> to vector<8x8xbf16>
    %cst_304 = arith.constant dense<0.000000e+00> : vector<8x8xf32>
    %1143 = tpu.matmul %1142, %1129, %cst_304 {dimension_numbers = #tpu.dot_dimension_numbers<[1], [0], [0], [1], [0, 0, 1, 1], [], []>} : vector<8x8xbf16>, vector<8x8xbf16>, vector<8x8xf32> -> vector<8x8xf32>
    %1144 = arith.truncf %1143 : vector<8x8xf32> to vector<8x8xbf16>
    %cst_305 = arith.constant dense<0.000000e+00> : vector<8x32xf32>
    %1145 = tpu.matmul %1144, %40, %cst_305 {dimension_numbers = #tpu.dot_dimension_numbers<[1], [0], [0], [1], [0, 0, 1, 1], [], []>} : vector<8x8xbf16>, vector<8x32xbf16>, vector<8x32xf32> -> vector<8x32xf32>
    %1146 = arith.addf %1123, %1145 : vector<8x32xf32>
    %1147 = vector.extract_strided_slice %1078 {offsets = [0, 24], sizes = [8, 8], strides = [1, 1]} : vector<8x32xf32> to vector<8x8xf32>
    %1148 = arith.truncf %1147 : vector<8x8xf32> to vector<8x8xbf16>
    %1149 = vector.extract_strided_slice %1072 {offsets = [0, 24], sizes = [8, 8], strides = [1, 1]} : vector<8x32xf32> to vector<8x8xf32>
    %1150 = arith.truncf %1149 : vector<8x8xf32> to vector<8x8xbf16>
    %1151 = vector.extract_strided_slice %1076 {offsets = [0, 24], sizes = [8, 8], strides = [1, 1]} : vector<8x32xf32> to vector<8x8xf32>
    %1152 = arith.truncf %1151 : vector<8x8xf32> to vector<8x8xbf16>
    %cst_306 = arith.constant dense<0.000000e+00> : vector<8x8xf32>
    %1153 = tpu.matmul %1148, %1150, %cst_306 {dimension_numbers = #tpu.dot_dimension_numbers<[1], [1], [0], [0], [0, 0, 1, 0], [], []>} : vector<8x8xbf16>, vector<8x8xbf16>, vector<8x8xf32> -> vector<8x8xf32>
    %1154 = arith.addf %1153, %5 : vector<8x8xf32>
    %cst_307 = arith.constant dense<0xFF800000> : vector<8xf32>
    %1155 = vector.multi_reduction <maximumf>, %1154, %cst_307 [1] : vector<8x8xf32> to vector<8xf32>
    %1156 = vector.shape_cast %1155 : vector<8xf32> to vector<8x1xf32>
    %1157 = vector.broadcast %1156 : vector<8x1xf32> to vector<8x8xf32>
    %1158 = arith.subf %1154, %1157 : vector<8x8xf32>
    %1159 = math.exp %1158 : vector<8x8xf32>
    %cst_308 = arith.constant dense<0.000000e+00> : vector<8xf32>
    %1160 = vector.multi_reduction <add>, %1159, %cst_308 [1] : vector<8x8xf32> to vector<8xf32>
    %1161 = vector.shape_cast %1160 : vector<8xf32> to vector<8x1xf32>
    %1162 = tpu.reciprocal %1161 {approx = true} : vector<8x1xf32> -> vector<8x1xf32>
    %1163 = vector.broadcast %1162 : vector<8x1xf32> to vector<8x8xf32>
    %1164 = arith.mulf %1159, %1163 : vector<8x8xf32>
    %1165 = arith.truncf %1164 : vector<8x8xf32> to vector<8x8xbf16>
    %cst_309 = arith.constant dense<0.000000e+00> : vector<8x8xf32>
    %1166 = tpu.matmul %1165, %1152, %cst_309 {dimension_numbers = #tpu.dot_dimension_numbers<[1], [0], [0], [1], [0, 0, 1, 1], [], []>} : vector<8x8xbf16>, vector<8x8xbf16>, vector<8x8xf32> -> vector<8x8xf32>
    %1167 = arith.truncf %1166 : vector<8x8xf32> to vector<8x8xbf16>
    %cst_310 = arith.constant dense<0.000000e+00> : vector<8x32xf32>
    %1168 = tpu.matmul %1167, %42, %cst_310 {dimension_numbers = #tpu.dot_dimension_numbers<[1], [0], [0], [1], [0, 0, 1, 1], [], []>} : vector<8x8xbf16>, vector<8x32xbf16>, vector<8x32xf32> -> vector<8x32xf32>
    %1169 = arith.addf %1146, %1168 : vector<8x32xf32>
    %1170 = vector.broadcast %43 : vector<1x32xf32> to vector<8x32xf32>
    %1171 = arith.addf %1169, %1170 : vector<8x32xf32>
    %1172 = arith.addf %1064, %1171 : vector<8x32xf32>
    %cst_311 = arith.constant dense<0.000000e+00> : vector<8xf32>
    %1173 = vector.multi_reduction <add>, %1172, %cst_311 [1] : vector<8x32xf32> to vector<8xf32>
    %1174 = vector.shape_cast %1173 : vector<8xf32> to vector<8x1xf32>
    %cst_312 = arith.constant 3.200000e+01 : f32
    %1175 = vector.broadcast %cst_312 : f32 to vector<8x1xf32>
    %1176 = arith.divf %1174, %1175 : vector<8x1xf32>
    %1177 = vector.broadcast %1176 : vector<8x1xf32> to vector<8x32xf32>
    %1178 = arith.subf %1172, %1177 : vector<8x32xf32>
    %1179 = arith.mulf %1178, %1178 : vector<8x32xf32>
    %cst_313 = arith.constant dense<0.000000e+00> : vector<8xf32>
    %1180 = vector.multi_reduction <add>, %1179, %cst_313 [1] : vector<8x32xf32> to vector<8xf32>
    %1181 = vector.shape_cast %1180 : vector<8xf32> to vector<8x1xf32>
    %cst_314 = arith.constant 3.200000e+01 : f32
    %1182 = vector.broadcast %cst_314 : f32 to vector<8x1xf32>
    %1183 = arith.divf %1181, %1182 : vector<8x1xf32>
    %1184 = vector.broadcast %1176 : vector<8x1xf32> to vector<8x32xf32>
    %1185 = arith.subf %1172, %1184 : vector<8x32xf32>
    %cst_315 = arith.constant 9.99999974E-6 : f32
    %1186 = vector.broadcast %cst_315 : f32 to vector<8x1xf32>
    %1187 = arith.addf %1183, %1186 : vector<8x1xf32>
    %1188 = math.rsqrt %1187 : vector<8x1xf32>
    %1189 = vector.broadcast %1188 : vector<8x1xf32> to vector<8x32xf32>
    %1190 = arith.mulf %1185, %1189 : vector<8x32xf32>
    %1191 = vector.broadcast %46 : vector<1x32xf32> to vector<8x32xf32>
    %1192 = arith.mulf %1190, %1191 : vector<8x32xf32>
    %1193 = vector.broadcast %47 : vector<1x32xf32> to vector<8x32xf32>
    %1194 = arith.addf %1192, %1193 : vector<8x32xf32>
    %1195 = arith.truncf %1194 : vector<8x32xf32> to vector<8x32xbf16>
    %cst_316 = arith.constant dense<0.000000e+00> : vector<8x64xf32>
    %1196 = tpu.matmul %1195, %51, %cst_316 {dimension_numbers = #tpu.dot_dimension_numbers<[1], [0], [0], [1], [0, 0, 1, 1], [], []>} : vector<8x32xbf16>, vector<32x64xbf16>, vector<8x64xf32> -> vector<8x64xf32>
    %1197 = vector.broadcast %52 : vector<1x64xf32> to vector<8x64xf32>
    %1198 = arith.addf %1196, %1197 : vector<8x64xf32>
    %cst_317 = arith.constant 0.000000e+00 : f32
    %1199 = vector.broadcast %cst_317 : f32 to vector<8x64xf32>
    %1200 = arith.maximumf %1198, %1199 : vector<8x64xf32>
    %1201 = arith.truncf %1200 : vector<8x64xf32> to vector<8x64xbf16>
    %cst_318 = arith.constant dense<0.000000e+00> : vector<8x32xf32>
    %1202 = tpu.matmul %1201, %54, %cst_318 {dimension_numbers = #tpu.dot_dimension_numbers<[1], [0], [0], [1], [0, 0, 1, 1], [], []>} : vector<8x64xbf16>, vector<64x32xbf16>, vector<8x32xf32> -> vector<8x32xf32>
    %1203 = vector.broadcast %55 : vector<1x32xf32> to vector<8x32xf32>
    %1204 = arith.addf %1202, %1203 : vector<8x32xf32>
    %1205 = arith.addf %1194, %1204 : vector<8x32xf32>
    %cst_319 = arith.constant dense<0.000000e+00> : vector<8xf32>
    %1206 = vector.multi_reduction <add>, %1205, %cst_319 [1] : vector<8x32xf32> to vector<8xf32>
    %1207 = vector.shape_cast %1206 : vector<8xf32> to vector<8x1xf32>
    %cst_320 = arith.constant 3.200000e+01 : f32
    %1208 = vector.broadcast %cst_320 : f32 to vector<8x1xf32>
    %1209 = arith.divf %1207, %1208 : vector<8x1xf32>
    %1210 = vector.broadcast %1209 : vector<8x1xf32> to vector<8x32xf32>
    %1211 = arith.subf %1205, %1210 : vector<8x32xf32>
    %1212 = arith.mulf %1211, %1211 : vector<8x32xf32>
    %cst_321 = arith.constant dense<0.000000e+00> : vector<8xf32>
    %1213 = vector.multi_reduction <add>, %1212, %cst_321 [1] : vector<8x32xf32> to vector<8xf32>
    %1214 = vector.shape_cast %1213 : vector<8xf32> to vector<8x1xf32>
    %cst_322 = arith.constant 3.200000e+01 : f32
    %1215 = vector.broadcast %cst_322 : f32 to vector<8x1xf32>
    %1216 = arith.divf %1214, %1215 : vector<8x1xf32>
    %1217 = vector.broadcast %1209 : vector<8x1xf32> to vector<8x32xf32>
    %1218 = arith.subf %1205, %1217 : vector<8x32xf32>
    %cst_323 = arith.constant 9.99999974E-6 : f32
    %1219 = vector.broadcast %cst_323 : f32 to vector<8x1xf32>
    %1220 = arith.addf %1216, %1219 : vector<8x1xf32>
    %1221 = math.rsqrt %1220 : vector<8x1xf32>
    %1222 = vector.broadcast %1221 : vector<8x1xf32> to vector<8x32xf32>
    %1223 = arith.mulf %1218, %1222 : vector<8x32xf32>
    %1224 = vector.broadcast %48 : vector<1x32xf32> to vector<8x32xf32>
    %1225 = arith.mulf %1223, %1224 : vector<8x32xf32>
    %1226 = vector.broadcast %49 : vector<1x32xf32> to vector<8x32xf32>
    %1227 = arith.addf %1225, %1226 : vector<8x32xf32>
    %1228 = arith.truncf %1227 : vector<8x32xf32> to vector<8x32xbf16>
    %cst_324 = arith.constant dense<0.000000e+00> : vector<8x32xf32>
    %1229 = tpu.matmul %1228, %7, %cst_324 {dimension_numbers = #tpu.dot_dimension_numbers<[1], [0], [0], [1], [0, 0, 1, 1], [], []>} : vector<8x32xbf16>, vector<32x32xbf16>, vector<8x32xf32> -> vector<8x32xf32>
    %1230 = vector.broadcast %8 : vector<1x32xf32> to vector<8x32xf32>
    %1231 = arith.addf %1229, %1230 : vector<8x32xf32>
    %1232 = arith.truncf %1227 : vector<8x32xf32> to vector<8x32xbf16>
    %cst_325 = arith.constant dense<0.000000e+00> : vector<8x32xf32>
    %1233 = tpu.matmul %1232, %10, %cst_325 {dimension_numbers = #tpu.dot_dimension_numbers<[1], [0], [0], [1], [0, 0, 1, 1], [], []>} : vector<8x32xbf16>, vector<32x32xbf16>, vector<8x32xf32> -> vector<8x32xf32>
    %1234 = vector.broadcast %11 : vector<1x32xf32> to vector<8x32xf32>
    %1235 = arith.addf %1233, %1234 : vector<8x32xf32>
    %1236 = arith.truncf %1227 : vector<8x32xf32> to vector<8x32xbf16>
    %cst_326 = arith.constant dense<0.000000e+00> : vector<8x32xf32>
    %1237 = tpu.matmul %1236, %13, %cst_326 {dimension_numbers = #tpu.dot_dimension_numbers<[1], [0], [0], [1], [0, 0, 1, 1], [], []>} : vector<8x32xbf16>, vector<32x32xbf16>, vector<8x32xf32> -> vector<8x32xf32>
    %1238 = vector.broadcast %14 : vector<1x32xf32> to vector<8x32xf32>
    %1239 = arith.addf %1237, %1238 : vector<8x32xf32>
    %cst_327 = arith.constant 0.353553385 : f32
    %1240 = vector.broadcast %cst_327 : f32 to vector<8x32xf32>
    %1241 = arith.mulf %1231, %1240 : vector<8x32xf32>
    %1242 = vector.extract_strided_slice %1241 {offsets = [0, 0], sizes = [8, 8], strides = [1, 1]} : vector<8x32xf32> to vector<8x8xf32>
    %1243 = arith.truncf %1242 : vector<8x8xf32> to vector<8x8xbf16>
    %1244 = vector.extract_strided_slice %1235 {offsets = [0, 0], sizes = [8, 8], strides = [1, 1]} : vector<8x32xf32> to vector<8x8xf32>
    %1245 = arith.truncf %1244 : vector<8x8xf32> to vector<8x8xbf16>
    %1246 = vector.extract_strided_slice %1239 {offsets = [0, 0], sizes = [8, 8], strides = [1, 1]} : vector<8x32xf32> to vector<8x8xf32>
    %1247 = arith.truncf %1246 : vector<8x8xf32> to vector<8x8xbf16>
    %cst_328 = arith.constant dense<0.000000e+00> : vector<8x8xf32>
    %1248 = tpu.matmul %1243, %1245, %cst_328 {dimension_numbers = #tpu.dot_dimension_numbers<[1], [1], [0], [0], [0, 0, 1, 0], [], []>} : vector<8x8xbf16>, vector<8x8xbf16>, vector<8x8xf32> -> vector<8x8xf32>
    %1249 = arith.addf %1248, %4 : vector<8x8xf32>
    %cst_329 = arith.constant dense<0xFF800000> : vector<8xf32>
    %1250 = vector.multi_reduction <maximumf>, %1249, %cst_329 [1] : vector<8x8xf32> to vector<8xf32>
    %1251 = vector.shape_cast %1250 : vector<8xf32> to vector<8x1xf32>
    %1252 = vector.broadcast %1251 : vector<8x1xf32> to vector<8x8xf32>
    %1253 = arith.subf %1249, %1252 : vector<8x8xf32>
    %1254 = math.exp %1253 : vector<8x8xf32>
    %cst_330 = arith.constant dense<0.000000e+00> : vector<8xf32>
    %1255 = vector.multi_reduction <add>, %1254, %cst_330 [1] : vector<8x8xf32> to vector<8xf32>
    %1256 = vector.shape_cast %1255 : vector<8xf32> to vector<8x1xf32>
    %1257 = tpu.reciprocal %1256 {approx = true} : vector<8x1xf32> -> vector<8x1xf32>
    %1258 = vector.broadcast %1257 : vector<8x1xf32> to vector<8x8xf32>
    %1259 = arith.mulf %1254, %1258 : vector<8x8xf32>
    %1260 = arith.truncf %1259 : vector<8x8xf32> to vector<8x8xbf16>
    %cst_331 = arith.constant dense<0.000000e+00> : vector<8x8xf32>
    %1261 = tpu.matmul %1260, %1247, %cst_331 {dimension_numbers = #tpu.dot_dimension_numbers<[1], [0], [0], [1], [0, 0, 1, 1], [], []>} : vector<8x8xbf16>, vector<8x8xbf16>, vector<8x8xf32> -> vector<8x8xf32>
    %1262 = arith.truncf %1261 : vector<8x8xf32> to vector<8x8xbf16>
    %cst_332 = arith.constant dense<0.000000e+00> : vector<8x32xf32>
    %1263 = tpu.matmul %1262, %17, %cst_332 {dimension_numbers = #tpu.dot_dimension_numbers<[1], [0], [0], [1], [0, 0, 1, 1], [], []>} : vector<8x8xbf16>, vector<8x32xbf16>, vector<8x32xf32> -> vector<8x32xf32>
    %1264 = vector.extract_strided_slice %1241 {offsets = [0, 8], sizes = [8, 8], strides = [1, 1]} : vector<8x32xf32> to vector<8x8xf32>
    %1265 = arith.truncf %1264 : vector<8x8xf32> to vector<8x8xbf16>
    %1266 = vector.extract_strided_slice %1235 {offsets = [0, 8], sizes = [8, 8], strides = [1, 1]} : vector<8x32xf32> to vector<8x8xf32>
    %1267 = arith.truncf %1266 : vector<8x8xf32> to vector<8x8xbf16>
    %1268 = vector.extract_strided_slice %1239 {offsets = [0, 8], sizes = [8, 8], strides = [1, 1]} : vector<8x32xf32> to vector<8x8xf32>
    %1269 = arith.truncf %1268 : vector<8x8xf32> to vector<8x8xbf16>
    %cst_333 = arith.constant dense<0.000000e+00> : vector<8x8xf32>
    %1270 = tpu.matmul %1265, %1267, %cst_333 {dimension_numbers = #tpu.dot_dimension_numbers<[1], [1], [0], [0], [0, 0, 1, 0], [], []>} : vector<8x8xbf16>, vector<8x8xbf16>, vector<8x8xf32> -> vector<8x8xf32>
    %1271 = arith.addf %1270, %4 : vector<8x8xf32>
    %cst_334 = arith.constant dense<0xFF800000> : vector<8xf32>
    %1272 = vector.multi_reduction <maximumf>, %1271, %cst_334 [1] : vector<8x8xf32> to vector<8xf32>
    %1273 = vector.shape_cast %1272 : vector<8xf32> to vector<8x1xf32>
    %1274 = vector.broadcast %1273 : vector<8x1xf32> to vector<8x8xf32>
    %1275 = arith.subf %1271, %1274 : vector<8x8xf32>
    %1276 = math.exp %1275 : vector<8x8xf32>
    %cst_335 = arith.constant dense<0.000000e+00> : vector<8xf32>
    %1277 = vector.multi_reduction <add>, %1276, %cst_335 [1] : vector<8x8xf32> to vector<8xf32>
    %1278 = vector.shape_cast %1277 : vector<8xf32> to vector<8x1xf32>
    %1279 = tpu.reciprocal %1278 {approx = true} : vector<8x1xf32> -> vector<8x1xf32>
    %1280 = vector.broadcast %1279 : vector<8x1xf32> to vector<8x8xf32>
    %1281 = arith.mulf %1276, %1280 : vector<8x8xf32>
    %1282 = arith.truncf %1281 : vector<8x8xf32> to vector<8x8xbf16>
    %cst_336 = arith.constant dense<0.000000e+00> : vector<8x8xf32>
    %1283 = tpu.matmul %1282, %1269, %cst_336 {dimension_numbers = #tpu.dot_dimension_numbers<[1], [0], [0], [1], [0, 0, 1, 1], [], []>} : vector<8x8xbf16>, vector<8x8xbf16>, vector<8x8xf32> -> vector<8x8xf32>
    %1284 = arith.truncf %1283 : vector<8x8xf32> to vector<8x8xbf16>
    %cst_337 = arith.constant dense<0.000000e+00> : vector<8x32xf32>
    %1285 = tpu.matmul %1284, %19, %cst_337 {dimension_numbers = #tpu.dot_dimension_numbers<[1], [0], [0], [1], [0, 0, 1, 1], [], []>} : vector<8x8xbf16>, vector<8x32xbf16>, vector<8x32xf32> -> vector<8x32xf32>
    %1286 = arith.addf %1263, %1285 : vector<8x32xf32>
    %1287 = vector.extract_strided_slice %1241 {offsets = [0, 16], sizes = [8, 8], strides = [1, 1]} : vector<8x32xf32> to vector<8x8xf32>
    %1288 = arith.truncf %1287 : vector<8x8xf32> to vector<8x8xbf16>
    %1289 = vector.extract_strided_slice %1235 {offsets = [0, 16], sizes = [8, 8], strides = [1, 1]} : vector<8x32xf32> to vector<8x8xf32>
    %1290 = arith.truncf %1289 : vector<8x8xf32> to vector<8x8xbf16>
    %1291 = vector.extract_strided_slice %1239 {offsets = [0, 16], sizes = [8, 8], strides = [1, 1]} : vector<8x32xf32> to vector<8x8xf32>
    %1292 = arith.truncf %1291 : vector<8x8xf32> to vector<8x8xbf16>
    %cst_338 = arith.constant dense<0.000000e+00> : vector<8x8xf32>
    %1293 = tpu.matmul %1288, %1290, %cst_338 {dimension_numbers = #tpu.dot_dimension_numbers<[1], [1], [0], [0], [0, 0, 1, 0], [], []>} : vector<8x8xbf16>, vector<8x8xbf16>, vector<8x8xf32> -> vector<8x8xf32>
    %1294 = arith.addf %1293, %4 : vector<8x8xf32>
    %cst_339 = arith.constant dense<0xFF800000> : vector<8xf32>
    %1295 = vector.multi_reduction <maximumf>, %1294, %cst_339 [1] : vector<8x8xf32> to vector<8xf32>
    %1296 = vector.shape_cast %1295 : vector<8xf32> to vector<8x1xf32>
    %1297 = vector.broadcast %1296 : vector<8x1xf32> to vector<8x8xf32>
    %1298 = arith.subf %1294, %1297 : vector<8x8xf32>
    %1299 = math.exp %1298 : vector<8x8xf32>
    %cst_340 = arith.constant dense<0.000000e+00> : vector<8xf32>
    %1300 = vector.multi_reduction <add>, %1299, %cst_340 [1] : vector<8x8xf32> to vector<8xf32>
    %1301 = vector.shape_cast %1300 : vector<8xf32> to vector<8x1xf32>
    %1302 = tpu.reciprocal %1301 {approx = true} : vector<8x1xf32> -> vector<8x1xf32>
    %1303 = vector.broadcast %1302 : vector<8x1xf32> to vector<8x8xf32>
    %1304 = arith.mulf %1299, %1303 : vector<8x8xf32>
    %1305 = arith.truncf %1304 : vector<8x8xf32> to vector<8x8xbf16>
    %cst_341 = arith.constant dense<0.000000e+00> : vector<8x8xf32>
    %1306 = tpu.matmul %1305, %1292, %cst_341 {dimension_numbers = #tpu.dot_dimension_numbers<[1], [0], [0], [1], [0, 0, 1, 1], [], []>} : vector<8x8xbf16>, vector<8x8xbf16>, vector<8x8xf32> -> vector<8x8xf32>
    %1307 = arith.truncf %1306 : vector<8x8xf32> to vector<8x8xbf16>
    %cst_342 = arith.constant dense<0.000000e+00> : vector<8x32xf32>
    %1308 = tpu.matmul %1307, %21, %cst_342 {dimension_numbers = #tpu.dot_dimension_numbers<[1], [0], [0], [1], [0, 0, 1, 1], [], []>} : vector<8x8xbf16>, vector<8x32xbf16>, vector<8x32xf32> -> vector<8x32xf32>
    %1309 = arith.addf %1286, %1308 : vector<8x32xf32>
    %1310 = vector.extract_strided_slice %1241 {offsets = [0, 24], sizes = [8, 8], strides = [1, 1]} : vector<8x32xf32> to vector<8x8xf32>
    %1311 = arith.truncf %1310 : vector<8x8xf32> to vector<8x8xbf16>
    %1312 = vector.extract_strided_slice %1235 {offsets = [0, 24], sizes = [8, 8], strides = [1, 1]} : vector<8x32xf32> to vector<8x8xf32>
    %1313 = arith.truncf %1312 : vector<8x8xf32> to vector<8x8xbf16>
    %1314 = vector.extract_strided_slice %1239 {offsets = [0, 24], sizes = [8, 8], strides = [1, 1]} : vector<8x32xf32> to vector<8x8xf32>
    %1315 = arith.truncf %1314 : vector<8x8xf32> to vector<8x8xbf16>
    %cst_343 = arith.constant dense<0.000000e+00> : vector<8x8xf32>
    %1316 = tpu.matmul %1311, %1313, %cst_343 {dimension_numbers = #tpu.dot_dimension_numbers<[1], [1], [0], [0], [0, 0, 1, 0], [], []>} : vector<8x8xbf16>, vector<8x8xbf16>, vector<8x8xf32> -> vector<8x8xf32>
    %1317 = arith.addf %1316, %4 : vector<8x8xf32>
    %cst_344 = arith.constant dense<0xFF800000> : vector<8xf32>
    %1318 = vector.multi_reduction <maximumf>, %1317, %cst_344 [1] : vector<8x8xf32> to vector<8xf32>
    %1319 = vector.shape_cast %1318 : vector<8xf32> to vector<8x1xf32>
    %1320 = vector.broadcast %1319 : vector<8x1xf32> to vector<8x8xf32>
    %1321 = arith.subf %1317, %1320 : vector<8x8xf32>
    %1322 = math.exp %1321 : vector<8x8xf32>
    %cst_345 = arith.constant dense<0.000000e+00> : vector<8xf32>
    %1323 = vector.multi_reduction <add>, %1322, %cst_345 [1] : vector<8x8xf32> to vector<8xf32>
    %1324 = vector.shape_cast %1323 : vector<8xf32> to vector<8x1xf32>
    %1325 = tpu.reciprocal %1324 {approx = true} : vector<8x1xf32> -> vector<8x1xf32>
    %1326 = vector.broadcast %1325 : vector<8x1xf32> to vector<8x8xf32>
    %1327 = arith.mulf %1322, %1326 : vector<8x8xf32>
    %1328 = arith.truncf %1327 : vector<8x8xf32> to vector<8x8xbf16>
    %cst_346 = arith.constant dense<0.000000e+00> : vector<8x8xf32>
    %1329 = tpu.matmul %1328, %1315, %cst_346 {dimension_numbers = #tpu.dot_dimension_numbers<[1], [0], [0], [1], [0, 0, 1, 1], [], []>} : vector<8x8xbf16>, vector<8x8xbf16>, vector<8x8xf32> -> vector<8x8xf32>
    %1330 = arith.truncf %1329 : vector<8x8xf32> to vector<8x8xbf16>
    %cst_347 = arith.constant dense<0.000000e+00> : vector<8x32xf32>
    %1331 = tpu.matmul %1330, %23, %cst_347 {dimension_numbers = #tpu.dot_dimension_numbers<[1], [0], [0], [1], [0, 0, 1, 1], [], []>} : vector<8x8xbf16>, vector<8x32xbf16>, vector<8x32xf32> -> vector<8x32xf32>
    %1332 = arith.addf %1309, %1331 : vector<8x32xf32>
    %1333 = vector.broadcast %24 : vector<1x32xf32> to vector<8x32xf32>
    %1334 = arith.addf %1332, %1333 : vector<8x32xf32>
    %1335 = arith.addf %1227, %1334 : vector<8x32xf32>
    %cst_348 = arith.constant dense<0.000000e+00> : vector<8xf32>
    %1336 = vector.multi_reduction <add>, %1335, %cst_348 [1] : vector<8x32xf32> to vector<8xf32>
    %1337 = vector.shape_cast %1336 : vector<8xf32> to vector<8x1xf32>
    %cst_349 = arith.constant 3.200000e+01 : f32
    %1338 = vector.broadcast %cst_349 : f32 to vector<8x1xf32>
    %1339 = arith.divf %1337, %1338 : vector<8x1xf32>
    %1340 = vector.broadcast %1339 : vector<8x1xf32> to vector<8x32xf32>
    %1341 = arith.subf %1335, %1340 : vector<8x32xf32>
    %1342 = arith.mulf %1341, %1341 : vector<8x32xf32>
    %cst_350 = arith.constant dense<0.000000e+00> : vector<8xf32>
    %1343 = vector.multi_reduction <add>, %1342, %cst_350 [1] : vector<8x32xf32> to vector<8xf32>
    %1344 = vector.shape_cast %1343 : vector<8xf32> to vector<8x1xf32>
    %cst_351 = arith.constant 3.200000e+01 : f32
    %1345 = vector.broadcast %cst_351 : f32 to vector<8x1xf32>
    %1346 = arith.divf %1344, %1345 : vector<8x1xf32>
    %1347 = vector.broadcast %1339 : vector<8x1xf32> to vector<8x32xf32>
    %1348 = arith.subf %1335, %1347 : vector<8x32xf32>
    %cst_352 = arith.constant 9.99999974E-6 : f32
    %1349 = vector.broadcast %cst_352 : f32 to vector<8x1xf32>
    %1350 = arith.addf %1346, %1349 : vector<8x1xf32>
    %1351 = math.rsqrt %1350 : vector<8x1xf32>
    %1352 = vector.broadcast %1351 : vector<8x1xf32> to vector<8x32xf32>
    %1353 = arith.mulf %1348, %1352 : vector<8x32xf32>
    %1354 = vector.broadcast %44 : vector<1x32xf32> to vector<8x32xf32>
    %1355 = arith.mulf %1353, %1354 : vector<8x32xf32>
    %1356 = vector.broadcast %45 : vector<1x32xf32> to vector<8x32xf32>
    %1357 = arith.addf %1355, %1356 : vector<8x32xf32>
    %1358 = arith.truncf %1357 : vector<8x32xf32> to vector<8x32xbf16>
    %cst_353 = arith.constant dense<0.000000e+00> : vector<8x32xf32>
    %1359 = tpu.matmul %1358, %26, %cst_353 {dimension_numbers = #tpu.dot_dimension_numbers<[1], [0], [0], [1], [0, 0, 1, 1], [], []>} : vector<8x32xbf16>, vector<32x32xbf16>, vector<8x32xf32> -> vector<8x32xf32>
    %1360 = vector.broadcast %27 : vector<1x32xf32> to vector<8x32xf32>
    %1361 = arith.addf %1359, %1360 : vector<8x32xf32>
    %1362 = arith.truncf %3 : vector<8x32xf32> to vector<8x32xbf16>
    %cst_354 = arith.constant dense<0.000000e+00> : vector<8x32xf32>
    %1363 = tpu.matmul %1362, %29, %cst_354 {dimension_numbers = #tpu.dot_dimension_numbers<[1], [0], [0], [1], [0, 0, 1, 1], [], []>} : vector<8x32xbf16>, vector<32x32xbf16>, vector<8x32xf32> -> vector<8x32xf32>
    %1364 = vector.broadcast %30 : vector<1x32xf32> to vector<8x32xf32>
    %1365 = arith.addf %1363, %1364 : vector<8x32xf32>
    %1366 = arith.truncf %3 : vector<8x32xf32> to vector<8x32xbf16>
    %cst_355 = arith.constant dense<0.000000e+00> : vector<8x32xf32>
    %1367 = tpu.matmul %1366, %32, %cst_355 {dimension_numbers = #tpu.dot_dimension_numbers<[1], [0], [0], [1], [0, 0, 1, 1], [], []>} : vector<8x32xbf16>, vector<32x32xbf16>, vector<8x32xf32> -> vector<8x32xf32>
    %1368 = vector.broadcast %33 : vector<1x32xf32> to vector<8x32xf32>
    %1369 = arith.addf %1367, %1368 : vector<8x32xf32>
    %cst_356 = arith.constant 0.353553385 : f32
    %1370 = vector.broadcast %cst_356 : f32 to vector<8x32xf32>
    %1371 = arith.mulf %1361, %1370 : vector<8x32xf32>
    %1372 = vector.extract_strided_slice %1371 {offsets = [0, 0], sizes = [8, 8], strides = [1, 1]} : vector<8x32xf32> to vector<8x8xf32>
    %1373 = arith.truncf %1372 : vector<8x8xf32> to vector<8x8xbf16>
    %1374 = vector.extract_strided_slice %1365 {offsets = [0, 0], sizes = [8, 8], strides = [1, 1]} : vector<8x32xf32> to vector<8x8xf32>
    %1375 = arith.truncf %1374 : vector<8x8xf32> to vector<8x8xbf16>
    %1376 = vector.extract_strided_slice %1369 {offsets = [0, 0], sizes = [8, 8], strides = [1, 1]} : vector<8x32xf32> to vector<8x8xf32>
    %1377 = arith.truncf %1376 : vector<8x8xf32> to vector<8x8xbf16>
    %cst_357 = arith.constant dense<0.000000e+00> : vector<8x8xf32>
    %1378 = tpu.matmul %1373, %1375, %cst_357 {dimension_numbers = #tpu.dot_dimension_numbers<[1], [1], [0], [0], [0, 0, 1, 0], [], []>} : vector<8x8xbf16>, vector<8x8xbf16>, vector<8x8xf32> -> vector<8x8xf32>
    %1379 = arith.addf %1378, %5 : vector<8x8xf32>
    %cst_358 = arith.constant dense<0xFF800000> : vector<8xf32>
    %1380 = vector.multi_reduction <maximumf>, %1379, %cst_358 [1] : vector<8x8xf32> to vector<8xf32>
    %1381 = vector.shape_cast %1380 : vector<8xf32> to vector<8x1xf32>
    %1382 = vector.broadcast %1381 : vector<8x1xf32> to vector<8x8xf32>
    %1383 = arith.subf %1379, %1382 : vector<8x8xf32>
    %1384 = math.exp %1383 : vector<8x8xf32>
    %cst_359 = arith.constant dense<0.000000e+00> : vector<8xf32>
    %1385 = vector.multi_reduction <add>, %1384, %cst_359 [1] : vector<8x8xf32> to vector<8xf32>
    %1386 = vector.shape_cast %1385 : vector<8xf32> to vector<8x1xf32>
    %1387 = tpu.reciprocal %1386 {approx = true} : vector<8x1xf32> -> vector<8x1xf32>
    %1388 = vector.broadcast %1387 : vector<8x1xf32> to vector<8x8xf32>
    %1389 = arith.mulf %1384, %1388 : vector<8x8xf32>
    %1390 = arith.truncf %1389 : vector<8x8xf32> to vector<8x8xbf16>
    %cst_360 = arith.constant dense<0.000000e+00> : vector<8x8xf32>
    %1391 = tpu.matmul %1390, %1377, %cst_360 {dimension_numbers = #tpu.dot_dimension_numbers<[1], [0], [0], [1], [0, 0, 1, 1], [], []>} : vector<8x8xbf16>, vector<8x8xbf16>, vector<8x8xf32> -> vector<8x8xf32>
    %1392 = arith.truncf %1391 : vector<8x8xf32> to vector<8x8xbf16>
    %cst_361 = arith.constant dense<0.000000e+00> : vector<8x32xf32>
    %1393 = tpu.matmul %1392, %36, %cst_361 {dimension_numbers = #tpu.dot_dimension_numbers<[1], [0], [0], [1], [0, 0, 1, 1], [], []>} : vector<8x8xbf16>, vector<8x32xbf16>, vector<8x32xf32> -> vector<8x32xf32>
    %1394 = vector.extract_strided_slice %1371 {offsets = [0, 8], sizes = [8, 8], strides = [1, 1]} : vector<8x32xf32> to vector<8x8xf32>
    %1395 = arith.truncf %1394 : vector<8x8xf32> to vector<8x8xbf16>
    %1396 = vector.extract_strided_slice %1365 {offsets = [0, 8], sizes = [8, 8], strides = [1, 1]} : vector<8x32xf32> to vector<8x8xf32>
    %1397 = arith.truncf %1396 : vector<8x8xf32> to vector<8x8xbf16>
    %1398 = vector.extract_strided_slice %1369 {offsets = [0, 8], sizes = [8, 8], strides = [1, 1]} : vector<8x32xf32> to vector<8x8xf32>
    %1399 = arith.truncf %1398 : vector<8x8xf32> to vector<8x8xbf16>
    %cst_362 = arith.constant dense<0.000000e+00> : vector<8x8xf32>
    %1400 = tpu.matmul %1395, %1397, %cst_362 {dimension_numbers = #tpu.dot_dimension_numbers<[1], [1], [0], [0], [0, 0, 1, 0], [], []>} : vector<8x8xbf16>, vector<8x8xbf16>, vector<8x8xf32> -> vector<8x8xf32>
    %1401 = arith.addf %1400, %5 : vector<8x8xf32>
    %cst_363 = arith.constant dense<0xFF800000> : vector<8xf32>
    %1402 = vector.multi_reduction <maximumf>, %1401, %cst_363 [1] : vector<8x8xf32> to vector<8xf32>
    %1403 = vector.shape_cast %1402 : vector<8xf32> to vector<8x1xf32>
    %1404 = vector.broadcast %1403 : vector<8x1xf32> to vector<8x8xf32>
    %1405 = arith.subf %1401, %1404 : vector<8x8xf32>
    %1406 = math.exp %1405 : vector<8x8xf32>
    %cst_364 = arith.constant dense<0.000000e+00> : vector<8xf32>
    %1407 = vector.multi_reduction <add>, %1406, %cst_364 [1] : vector<8x8xf32> to vector<8xf32>
    %1408 = vector.shape_cast %1407 : vector<8xf32> to vector<8x1xf32>
    %1409 = tpu.reciprocal %1408 {approx = true} : vector<8x1xf32> -> vector<8x1xf32>
    %1410 = vector.broadcast %1409 : vector<8x1xf32> to vector<8x8xf32>
    %1411 = arith.mulf %1406, %1410 : vector<8x8xf32>
    %1412 = arith.truncf %1411 : vector<8x8xf32> to vector<8x8xbf16>
    %cst_365 = arith.constant dense<0.000000e+00> : vector<8x8xf32>
    %1413 = tpu.matmul %1412, %1399, %cst_365 {dimension_numbers = #tpu.dot_dimension_numbers<[1], [0], [0], [1], [0, 0, 1, 1], [], []>} : vector<8x8xbf16>, vector<8x8xbf16>, vector<8x8xf32> -> vector<8x8xf32>
    %1414 = arith.truncf %1413 : vector<8x8xf32> to vector<8x8xbf16>
    %cst_366 = arith.constant dense<0.000000e+00> : vector<8x32xf32>
    %1415 = tpu.matmul %1414, %38, %cst_366 {dimension_numbers = #tpu.dot_dimension_numbers<[1], [0], [0], [1], [0, 0, 1, 1], [], []>} : vector<8x8xbf16>, vector<8x32xbf16>, vector<8x32xf32> -> vector<8x32xf32>
    %1416 = arith.addf %1393, %1415 : vector<8x32xf32>
    %1417 = vector.extract_strided_slice %1371 {offsets = [0, 16], sizes = [8, 8], strides = [1, 1]} : vector<8x32xf32> to vector<8x8xf32>
    %1418 = arith.truncf %1417 : vector<8x8xf32> to vector<8x8xbf16>
    %1419 = vector.extract_strided_slice %1365 {offsets = [0, 16], sizes = [8, 8], strides = [1, 1]} : vector<8x32xf32> to vector<8x8xf32>
    %1420 = arith.truncf %1419 : vector<8x8xf32> to vector<8x8xbf16>
    %1421 = vector.extract_strided_slice %1369 {offsets = [0, 16], sizes = [8, 8], strides = [1, 1]} : vector<8x32xf32> to vector<8x8xf32>
    %1422 = arith.truncf %1421 : vector<8x8xf32> to vector<8x8xbf16>
    %cst_367 = arith.constant dense<0.000000e+00> : vector<8x8xf32>
    %1423 = tpu.matmul %1418, %1420, %cst_367 {dimension_numbers = #tpu.dot_dimension_numbers<[1], [1], [0], [0], [0, 0, 1, 0], [], []>} : vector<8x8xbf16>, vector<8x8xbf16>, vector<8x8xf32> -> vector<8x8xf32>
    %1424 = arith.addf %1423, %5 : vector<8x8xf32>
    %cst_368 = arith.constant dense<0xFF800000> : vector<8xf32>
    %1425 = vector.multi_reduction <maximumf>, %1424, %cst_368 [1] : vector<8x8xf32> to vector<8xf32>
    %1426 = vector.shape_cast %1425 : vector<8xf32> to vector<8x1xf32>
    %1427 = vector.broadcast %1426 : vector<8x1xf32> to vector<8x8xf32>
    %1428 = arith.subf %1424, %1427 : vector<8x8xf32>
    %1429 = math.exp %1428 : vector<8x8xf32>
    %cst_369 = arith.constant dense<0.000000e+00> : vector<8xf32>
    %1430 = vector.multi_reduction <add>, %1429, %cst_369 [1] : vector<8x8xf32> to vector<8xf32>
    %1431 = vector.shape_cast %1430 : vector<8xf32> to vector<8x1xf32>
    %1432 = tpu.reciprocal %1431 {approx = true} : vector<8x1xf32> -> vector<8x1xf32>
    %1433 = vector.broadcast %1432 : vector<8x1xf32> to vector<8x8xf32>
    %1434 = arith.mulf %1429, %1433 : vector<8x8xf32>
    %1435 = arith.truncf %1434 : vector<8x8xf32> to vector<8x8xbf16>
    %cst_370 = arith.constant dense<0.000000e+00> : vector<8x8xf32>
    %1436 = tpu.matmul %1435, %1422, %cst_370 {dimension_numbers = #tpu.dot_dimension_numbers<[1], [0], [0], [1], [0, 0, 1, 1], [], []>} : vector<8x8xbf16>, vector<8x8xbf16>, vector<8x8xf32> -> vector<8x8xf32>
    %1437 = arith.truncf %1436 : vector<8x8xf32> to vector<8x8xbf16>
    %cst_371 = arith.constant dense<0.000000e+00> : vector<8x32xf32>
    %1438 = tpu.matmul %1437, %40, %cst_371 {dimension_numbers = #tpu.dot_dimension_numbers<[1], [0], [0], [1], [0, 0, 1, 1], [], []>} : vector<8x8xbf16>, vector<8x32xbf16>, vector<8x32xf32> -> vector<8x32xf32>
    %1439 = arith.addf %1416, %1438 : vector<8x32xf32>
    %1440 = vector.extract_strided_slice %1371 {offsets = [0, 24], sizes = [8, 8], strides = [1, 1]} : vector<8x32xf32> to vector<8x8xf32>
    %1441 = arith.truncf %1440 : vector<8x8xf32> to vector<8x8xbf16>
    %1442 = vector.extract_strided_slice %1365 {offsets = [0, 24], sizes = [8, 8], strides = [1, 1]} : vector<8x32xf32> to vector<8x8xf32>
    %1443 = arith.truncf %1442 : vector<8x8xf32> to vector<8x8xbf16>
    %1444 = vector.extract_strided_slice %1369 {offsets = [0, 24], sizes = [8, 8], strides = [1, 1]} : vector<8x32xf32> to vector<8x8xf32>
    %1445 = arith.truncf %1444 : vector<8x8xf32> to vector<8x8xbf16>
    %cst_372 = arith.constant dense<0.000000e+00> : vector<8x8xf32>
    %1446 = tpu.matmul %1441, %1443, %cst_372 {dimension_numbers = #tpu.dot_dimension_numbers<[1], [1], [0], [0], [0, 0, 1, 0], [], []>} : vector<8x8xbf16>, vector<8x8xbf16>, vector<8x8xf32> -> vector<8x8xf32>
    %1447 = arith.addf %1446, %5 : vector<8x8xf32>
    %cst_373 = arith.constant dense<0xFF800000> : vector<8xf32>
    %1448 = vector.multi_reduction <maximumf>, %1447, %cst_373 [1] : vector<8x8xf32> to vector<8xf32>
    %1449 = vector.shape_cast %1448 : vector<8xf32> to vector<8x1xf32>
    %1450 = vector.broadcast %1449 : vector<8x1xf32> to vector<8x8xf32>
    %1451 = arith.subf %1447, %1450 : vector<8x8xf32>
    %1452 = math.exp %1451 : vector<8x8xf32>
    %cst_374 = arith.constant dense<0.000000e+00> : vector<8xf32>
    %1453 = vector.multi_reduction <add>, %1452, %cst_374 [1] : vector<8x8xf32> to vector<8xf32>
    %1454 = vector.shape_cast %1453 : vector<8xf32> to vector<8x1xf32>
    %1455 = tpu.reciprocal %1454 {approx = true} : vector<8x1xf32> -> vector<8x1xf32>
    %1456 = vector.broadcast %1455 : vector<8x1xf32> to vector<8x8xf32>
    %1457 = arith.mulf %1452, %1456 : vector<8x8xf32>
    %1458 = arith.truncf %1457 : vector<8x8xf32> to vector<8x8xbf16>
    %cst_375 = arith.constant dense<0.000000e+00> : vector<8x8xf32>
    %1459 = tpu.matmul %1458, %1445, %cst_375 {dimension_numbers = #tpu.dot_dimension_numbers<[1], [0], [0], [1], [0, 0, 1, 1], [], []>} : vector<8x8xbf16>, vector<8x8xbf16>, vector<8x8xf32> -> vector<8x8xf32>
    %1460 = arith.truncf %1459 : vector<8x8xf32> to vector<8x8xbf16>
    %cst_376 = arith.constant dense<0.000000e+00> : vector<8x32xf32>
    %1461 = tpu.matmul %1460, %42, %cst_376 {dimension_numbers = #tpu.dot_dimension_numbers<[1], [0], [0], [1], [0, 0, 1, 1], [], []>} : vector<8x8xbf16>, vector<8x32xbf16>, vector<8x32xf32> -> vector<8x32xf32>
    %1462 = arith.addf %1439, %1461 : vector<8x32xf32>
    %1463 = vector.broadcast %43 : vector<1x32xf32> to vector<8x32xf32>
    %1464 = arith.addf %1462, %1463 : vector<8x32xf32>
    %1465 = arith.addf %1357, %1464 : vector<8x32xf32>
    %cst_377 = arith.constant dense<0.000000e+00> : vector<8xf32>
    %1466 = vector.multi_reduction <add>, %1465, %cst_377 [1] : vector<8x32xf32> to vector<8xf32>
    %1467 = vector.shape_cast %1466 : vector<8xf32> to vector<8x1xf32>
    %cst_378 = arith.constant 3.200000e+01 : f32
    %1468 = vector.broadcast %cst_378 : f32 to vector<8x1xf32>
    %1469 = arith.divf %1467, %1468 : vector<8x1xf32>
    %1470 = vector.broadcast %1469 : vector<8x1xf32> to vector<8x32xf32>
    %1471 = arith.subf %1465, %1470 : vector<8x32xf32>
    %1472 = arith.mulf %1471, %1471 : vector<8x32xf32>
    %cst_379 = arith.constant dense<0.000000e+00> : vector<8xf32>
    %1473 = vector.multi_reduction <add>, %1472, %cst_379 [1] : vector<8x32xf32> to vector<8xf32>
    %1474 = vector.shape_cast %1473 : vector<8xf32> to vector<8x1xf32>
    %cst_380 = arith.constant 3.200000e+01 : f32
    %1475 = vector.broadcast %cst_380 : f32 to vector<8x1xf32>
    %1476 = arith.divf %1474, %1475 : vector<8x1xf32>
    %1477 = vector.broadcast %1469 : vector<8x1xf32> to vector<8x32xf32>
    %1478 = arith.subf %1465, %1477 : vector<8x32xf32>
    %cst_381 = arith.constant 9.99999974E-6 : f32
    %1479 = vector.broadcast %cst_381 : f32 to vector<8x1xf32>
    %1480 = arith.addf %1476, %1479 : vector<8x1xf32>
    %1481 = math.rsqrt %1480 : vector<8x1xf32>
    %1482 = vector.broadcast %1481 : vector<8x1xf32> to vector<8x32xf32>
    %1483 = arith.mulf %1478, %1482 : vector<8x32xf32>
    %1484 = vector.broadcast %46 : vector<1x32xf32> to vector<8x32xf32>
    %1485 = arith.mulf %1483, %1484 : vector<8x32xf32>
    %1486 = vector.broadcast %47 : vector<1x32xf32> to vector<8x32xf32>
    %1487 = arith.addf %1485, %1486 : vector<8x32xf32>
    %1488 = arith.truncf %1487 : vector<8x32xf32> to vector<8x32xbf16>
    %cst_382 = arith.constant dense<0.000000e+00> : vector<8x64xf32>
    %1489 = tpu.matmul %1488, %51, %cst_382 {dimension_numbers = #tpu.dot_dimension_numbers<[1], [0], [0], [1], [0, 0, 1, 1], [], []>} : vector<8x32xbf16>, vector<32x64xbf16>, vector<8x64xf32> -> vector<8x64xf32>
    %1490 = vector.broadcast %52 : vector<1x64xf32> to vector<8x64xf32>
    %1491 = arith.addf %1489, %1490 : vector<8x64xf32>
    %cst_383 = arith.constant 0.000000e+00 : f32
    %1492 = vector.broadcast %cst_383 : f32 to vector<8x64xf32>
    %1493 = arith.maximumf %1491, %1492 : vector<8x64xf32>
    %1494 = arith.truncf %1493 : vector<8x64xf32> to vector<8x64xbf16>
    %cst_384 = arith.constant dense<0.000000e+00> : vector<8x32xf32>
    %1495 = tpu.matmul %1494, %54, %cst_384 {dimension_numbers = #tpu.dot_dimension_numbers<[1], [0], [0], [1], [0, 0, 1, 1], [], []>} : vector<8x64xbf16>, vector<64x32xbf16>, vector<8x32xf32> -> vector<8x32xf32>
    %1496 = vector.broadcast %55 : vector<1x32xf32> to vector<8x32xf32>
    %1497 = arith.addf %1495, %1496 : vector<8x32xf32>
    %1498 = arith.addf %1487, %1497 : vector<8x32xf32>
    %cst_385 = arith.constant dense<0.000000e+00> : vector<8xf32>
    %1499 = vector.multi_reduction <add>, %1498, %cst_385 [1] : vector<8x32xf32> to vector<8xf32>
    %1500 = vector.shape_cast %1499 : vector<8xf32> to vector<8x1xf32>
    %cst_386 = arith.constant 3.200000e+01 : f32
    %1501 = vector.broadcast %cst_386 : f32 to vector<8x1xf32>
    %1502 = arith.divf %1500, %1501 : vector<8x1xf32>
    %1503 = vector.broadcast %1502 : vector<8x1xf32> to vector<8x32xf32>
    %1504 = arith.subf %1498, %1503 : vector<8x32xf32>
    %1505 = arith.mulf %1504, %1504 : vector<8x32xf32>
    %cst_387 = arith.constant dense<0.000000e+00> : vector<8xf32>
    %1506 = vector.multi_reduction <add>, %1505, %cst_387 [1] : vector<8x32xf32> to vector<8xf32>
    %1507 = vector.shape_cast %1506 : vector<8xf32> to vector<8x1xf32>
    %cst_388 = arith.constant 3.200000e+01 : f32
    %1508 = vector.broadcast %cst_388 : f32 to vector<8x1xf32>
    %1509 = arith.divf %1507, %1508 : vector<8x1xf32>
    %1510 = vector.broadcast %1502 : vector<8x1xf32> to vector<8x32xf32>
    %1511 = arith.subf %1498, %1510 : vector<8x32xf32>
    %cst_389 = arith.constant 9.99999974E-6 : f32
    %1512 = vector.broadcast %cst_389 : f32 to vector<8x1xf32>
    %1513 = arith.addf %1509, %1512 : vector<8x1xf32>
    %1514 = math.rsqrt %1513 : vector<8x1xf32>
    %1515 = vector.broadcast %1514 : vector<8x1xf32> to vector<8x32xf32>
    %1516 = arith.mulf %1511, %1515 : vector<8x32xf32>
    %1517 = vector.broadcast %48 : vector<1x32xf32> to vector<8x32xf32>
    %1518 = arith.mulf %1516, %1517 : vector<8x32xf32>
    %1519 = vector.broadcast %49 : vector<1x32xf32> to vector<8x32xf32>
    %1520 = arith.addf %1518, %1519 : vector<8x32xf32>
    %1521 = arith.truncf %1520 : vector<8x32xf32> to vector<8x32xbf16>
    %cst_390 = arith.constant dense<0.000000e+00> : vector<8x32xf32>
    %1522 = tpu.matmul %1521, %7, %cst_390 {dimension_numbers = #tpu.dot_dimension_numbers<[1], [0], [0], [1], [0, 0, 1, 1], [], []>} : vector<8x32xbf16>, vector<32x32xbf16>, vector<8x32xf32> -> vector<8x32xf32>
    %1523 = vector.broadcast %8 : vector<1x32xf32> to vector<8x32xf32>
    %1524 = arith.addf %1522, %1523 : vector<8x32xf32>
    %1525 = arith.truncf %1520 : vector<8x32xf32> to vector<8x32xbf16>
    %cst_391 = arith.constant dense<0.000000e+00> : vector<8x32xf32>
    %1526 = tpu.matmul %1525, %10, %cst_391 {dimension_numbers = #tpu.dot_dimension_numbers<[1], [0], [0], [1], [0, 0, 1, 1], [], []>} : vector<8x32xbf16>, vector<32x32xbf16>, vector<8x32xf32> -> vector<8x32xf32>
    %1527 = vector.broadcast %11 : vector<1x32xf32> to vector<8x32xf32>
    %1528 = arith.addf %1526, %1527 : vector<8x32xf32>
    %1529 = arith.truncf %1520 : vector<8x32xf32> to vector<8x32xbf16>
    %cst_392 = arith.constant dense<0.000000e+00> : vector<8x32xf32>
    %1530 = tpu.matmul %1529, %13, %cst_392 {dimension_numbers = #tpu.dot_dimension_numbers<[1], [0], [0], [1], [0, 0, 1, 1], [], []>} : vector<8x32xbf16>, vector<32x32xbf16>, vector<8x32xf32> -> vector<8x32xf32>
    %1531 = vector.broadcast %14 : vector<1x32xf32> to vector<8x32xf32>
    %1532 = arith.addf %1530, %1531 : vector<8x32xf32>
    %cst_393 = arith.constant 0.353553385 : f32
    %1533 = vector.broadcast %cst_393 : f32 to vector<8x32xf32>
    %1534 = arith.mulf %1524, %1533 : vector<8x32xf32>
    %1535 = vector.extract_strided_slice %1534 {offsets = [0, 0], sizes = [8, 8], strides = [1, 1]} : vector<8x32xf32> to vector<8x8xf32>
    %1536 = arith.truncf %1535 : vector<8x8xf32> to vector<8x8xbf16>
    %1537 = vector.extract_strided_slice %1528 {offsets = [0, 0], sizes = [8, 8], strides = [1, 1]} : vector<8x32xf32> to vector<8x8xf32>
    %1538 = arith.truncf %1537 : vector<8x8xf32> to vector<8x8xbf16>
    %1539 = vector.extract_strided_slice %1532 {offsets = [0, 0], sizes = [8, 8], strides = [1, 1]} : vector<8x32xf32> to vector<8x8xf32>
    %1540 = arith.truncf %1539 : vector<8x8xf32> to vector<8x8xbf16>
    %cst_394 = arith.constant dense<0.000000e+00> : vector<8x8xf32>
    %1541 = tpu.matmul %1536, %1538, %cst_394 {dimension_numbers = #tpu.dot_dimension_numbers<[1], [1], [0], [0], [0, 0, 1, 0], [], []>} : vector<8x8xbf16>, vector<8x8xbf16>, vector<8x8xf32> -> vector<8x8xf32>
    %1542 = arith.addf %1541, %4 : vector<8x8xf32>
    %cst_395 = arith.constant dense<0xFF800000> : vector<8xf32>
    %1543 = vector.multi_reduction <maximumf>, %1542, %cst_395 [1] : vector<8x8xf32> to vector<8xf32>
    %1544 = vector.shape_cast %1543 : vector<8xf32> to vector<8x1xf32>
    %1545 = vector.broadcast %1544 : vector<8x1xf32> to vector<8x8xf32>
    %1546 = arith.subf %1542, %1545 : vector<8x8xf32>
    %1547 = math.exp %1546 : vector<8x8xf32>
    %cst_396 = arith.constant dense<0.000000e+00> : vector<8xf32>
    %1548 = vector.multi_reduction <add>, %1547, %cst_396 [1] : vector<8x8xf32> to vector<8xf32>
    %1549 = vector.shape_cast %1548 : vector<8xf32> to vector<8x1xf32>
    %1550 = tpu.reciprocal %1549 {approx = true} : vector<8x1xf32> -> vector<8x1xf32>
    %1551 = vector.broadcast %1550 : vector<8x1xf32> to vector<8x8xf32>
    %1552 = arith.mulf %1547, %1551 : vector<8x8xf32>
    %1553 = arith.truncf %1552 : vector<8x8xf32> to vector<8x8xbf16>
    %cst_397 = arith.constant dense<0.000000e+00> : vector<8x8xf32>
    %1554 = tpu.matmul %1553, %1540, %cst_397 {dimension_numbers = #tpu.dot_dimension_numbers<[1], [0], [0], [1], [0, 0, 1, 1], [], []>} : vector<8x8xbf16>, vector<8x8xbf16>, vector<8x8xf32> -> vector<8x8xf32>
    %1555 = arith.truncf %1554 : vector<8x8xf32> to vector<8x8xbf16>
    %cst_398 = arith.constant dense<0.000000e+00> : vector<8x32xf32>
    %1556 = tpu.matmul %1555, %17, %cst_398 {dimension_numbers = #tpu.dot_dimension_numbers<[1], [0], [0], [1], [0, 0, 1, 1], [], []>} : vector<8x8xbf16>, vector<8x32xbf16>, vector<8x32xf32> -> vector<8x32xf32>
    %1557 = vector.extract_strided_slice %1534 {offsets = [0, 8], sizes = [8, 8], strides = [1, 1]} : vector<8x32xf32> to vector<8x8xf32>
    %1558 = arith.truncf %1557 : vector<8x8xf32> to vector<8x8xbf16>
    %1559 = vector.extract_strided_slice %1528 {offsets = [0, 8], sizes = [8, 8], strides = [1, 1]} : vector<8x32xf32> to vector<8x8xf32>
    %1560 = arith.truncf %1559 : vector<8x8xf32> to vector<8x8xbf16>
    %1561 = vector.extract_strided_slice %1532 {offsets = [0, 8], sizes = [8, 8], strides = [1, 1]} : vector<8x32xf32> to vector<8x8xf32>
    %1562 = arith.truncf %1561 : vector<8x8xf32> to vector<8x8xbf16>
    %cst_399 = arith.constant dense<0.000000e+00> : vector<8x8xf32>
    %1563 = tpu.matmul %1558, %1560, %cst_399 {dimension_numbers = #tpu.dot_dimension_numbers<[1], [1], [0], [0], [0, 0, 1, 0], [], []>} : vector<8x8xbf16>, vector<8x8xbf16>, vector<8x8xf32> -> vector<8x8xf32>
    %1564 = arith.addf %1563, %4 : vector<8x8xf32>
    %cst_400 = arith.constant dense<0xFF800000> : vector<8xf32>
    %1565 = vector.multi_reduction <maximumf>, %1564, %cst_400 [1] : vector<8x8xf32> to vector<8xf32>
    %1566 = vector.shape_cast %1565 : vector<8xf32> to vector<8x1xf32>
    %1567 = vector.broadcast %1566 : vector<8x1xf32> to vector<8x8xf32>
    %1568 = arith.subf %1564, %1567 : vector<8x8xf32>
    %1569 = math.exp %1568 : vector<8x8xf32>
    %cst_401 = arith.constant dense<0.000000e+00> : vector<8xf32>
    %1570 = vector.multi_reduction <add>, %1569, %cst_401 [1] : vector<8x8xf32> to vector<8xf32>
    %1571 = vector.shape_cast %1570 : vector<8xf32> to vector<8x1xf32>
    %1572 = tpu.reciprocal %1571 {approx = true} : vector<8x1xf32> -> vector<8x1xf32>
    %1573 = vector.broadcast %1572 : vector<8x1xf32> to vector<8x8xf32>
    %1574 = arith.mulf %1569, %1573 : vector<8x8xf32>
    %1575 = arith.truncf %1574 : vector<8x8xf32> to vector<8x8xbf16>
    %cst_402 = arith.constant dense<0.000000e+00> : vector<8x8xf32>
    %1576 = tpu.matmul %1575, %1562, %cst_402 {dimension_numbers = #tpu.dot_dimension_numbers<[1], [0], [0], [1], [0, 0, 1, 1], [], []>} : vector<8x8xbf16>, vector<8x8xbf16>, vector<8x8xf32> -> vector<8x8xf32>
    %1577 = arith.truncf %1576 : vector<8x8xf32> to vector<8x8xbf16>
    %cst_403 = arith.constant dense<0.000000e+00> : vector<8x32xf32>
    %1578 = tpu.matmul %1577, %19, %cst_403 {dimension_numbers = #tpu.dot_dimension_numbers<[1], [0], [0], [1], [0, 0, 1, 1], [], []>} : vector<8x8xbf16>, vector<8x32xbf16>, vector<8x32xf32> -> vector<8x32xf32>
    %1579 = arith.addf %1556, %1578 : vector<8x32xf32>
    %1580 = vector.extract_strided_slice %1534 {offsets = [0, 16], sizes = [8, 8], strides = [1, 1]} : vector<8x32xf32> to vector<8x8xf32>
    %1581 = arith.truncf %1580 : vector<8x8xf32> to vector<8x8xbf16>
    %1582 = vector.extract_strided_slice %1528 {offsets = [0, 16], sizes = [8, 8], strides = [1, 1]} : vector<8x32xf32> to vector<8x8xf32>
    %1583 = arith.truncf %1582 : vector<8x8xf32> to vector<8x8xbf16>
    %1584 = vector.extract_strided_slice %1532 {offsets = [0, 16], sizes = [8, 8], strides = [1, 1]} : vector<8x32xf32> to vector<8x8xf32>
    %1585 = arith.truncf %1584 : vector<8x8xf32> to vector<8x8xbf16>
    %cst_404 = arith.constant dense<0.000000e+00> : vector<8x8xf32>
    %1586 = tpu.matmul %1581, %1583, %cst_404 {dimension_numbers = #tpu.dot_dimension_numbers<[1], [1], [0], [0], [0, 0, 1, 0], [], []>} : vector<8x8xbf16>, vector<8x8xbf16>, vector<8x8xf32> -> vector<8x8xf32>
    %1587 = arith.addf %1586, %4 : vector<8x8xf32>
    %cst_405 = arith.constant dense<0xFF800000> : vector<8xf32>
    %1588 = vector.multi_reduction <maximumf>, %1587, %cst_405 [1] : vector<8x8xf32> to vector<8xf32>
    %1589 = vector.shape_cast %1588 : vector<8xf32> to vector<8x1xf32>
    %1590 = vector.broadcast %1589 : vector<8x1xf32> to vector<8x8xf32>
    %1591 = arith.subf %1587, %1590 : vector<8x8xf32>
    %1592 = math.exp %1591 : vector<8x8xf32>
    %cst_406 = arith.constant dense<0.000000e+00> : vector<8xf32>
    %1593 = vector.multi_reduction <add>, %1592, %cst_406 [1] : vector<8x8xf32> to vector<8xf32>
    %1594 = vector.shape_cast %1593 : vector<8xf32> to vector<8x1xf32>
    %1595 = tpu.reciprocal %1594 {approx = true} : vector<8x1xf32> -> vector<8x1xf32>
    %1596 = vector.broadcast %1595 : vector<8x1xf32> to vector<8x8xf32>
    %1597 = arith.mulf %1592, %1596 : vector<8x8xf32>
    %1598 = arith.truncf %1597 : vector<8x8xf32> to vector<8x8xbf16>
    %cst_407 = arith.constant dense<0.000000e+00> : vector<8x8xf32>
    %1599 = tpu.matmul %1598, %1585, %cst_407 {dimension_numbers = #tpu.dot_dimension_numbers<[1], [0], [0], [1], [0, 0, 1, 1], [], []>} : vector<8x8xbf16>, vector<8x8xbf16>, vector<8x8xf32> -> vector<8x8xf32>
    %1600 = arith.truncf %1599 : vector<8x8xf32> to vector<8x8xbf16>
    %cst_408 = arith.constant dense<0.000000e+00> : vector<8x32xf32>
    %1601 = tpu.matmul %1600, %21, %cst_408 {dimension_numbers = #tpu.dot_dimension_numbers<[1], [0], [0], [1], [0, 0, 1, 1], [], []>} : vector<8x8xbf16>, vector<8x32xbf16>, vector<8x32xf32> -> vector<8x32xf32>
    %1602 = arith.addf %1579, %1601 : vector<8x32xf32>
    %1603 = vector.extract_strided_slice %1534 {offsets = [0, 24], sizes = [8, 8], strides = [1, 1]} : vector<8x32xf32> to vector<8x8xf32>
    %1604 = arith.truncf %1603 : vector<8x8xf32> to vector<8x8xbf16>
    %1605 = vector.extract_strided_slice %1528 {offsets = [0, 24], sizes = [8, 8], strides = [1, 1]} : vector<8x32xf32> to vector<8x8xf32>
    %1606 = arith.truncf %1605 : vector<8x8xf32> to vector<8x8xbf16>
    %1607 = vector.extract_strided_slice %1532 {offsets = [0, 24], sizes = [8, 8], strides = [1, 1]} : vector<8x32xf32> to vector<8x8xf32>
    %1608 = arith.truncf %1607 : vector<8x8xf32> to vector<8x8xbf16>
    %cst_409 = arith.constant dense<0.000000e+00> : vector<8x8xf32>
    %1609 = tpu.matmul %1604, %1606, %cst_409 {dimension_numbers = #tpu.dot_dimension_numbers<[1], [1], [0], [0], [0, 0, 1, 0], [], []>} : vector<8x8xbf16>, vector<8x8xbf16>, vector<8x8xf32> -> vector<8x8xf32>
    %1610 = arith.addf %1609, %4 : vector<8x8xf32>
    %cst_410 = arith.constant dense<0xFF800000> : vector<8xf32>
    %1611 = vector.multi_reduction <maximumf>, %1610, %cst_410 [1] : vector<8x8xf32> to vector<8xf32>
    %1612 = vector.shape_cast %1611 : vector<8xf32> to vector<8x1xf32>
    %1613 = vector.broadcast %1612 : vector<8x1xf32> to vector<8x8xf32>
    %1614 = arith.subf %1610, %1613 : vector<8x8xf32>
    %1615 = math.exp %1614 : vector<8x8xf32>
    %cst_411 = arith.constant dense<0.000000e+00> : vector<8xf32>
    %1616 = vector.multi_reduction <add>, %1615, %cst_411 [1] : vector<8x8xf32> to vector<8xf32>
    %1617 = vector.shape_cast %1616 : vector<8xf32> to vector<8x1xf32>
    %1618 = tpu.reciprocal %1617 {approx = true} : vector<8x1xf32> -> vector<8x1xf32>
    %1619 = vector.broadcast %1618 : vector<8x1xf32> to vector<8x8xf32>
    %1620 = arith.mulf %1615, %1619 : vector<8x8xf32>
    %1621 = arith.truncf %1620 : vector<8x8xf32> to vector<8x8xbf16>
    %cst_412 = arith.constant dense<0.000000e+00> : vector<8x8xf32>
    %1622 = tpu.matmul %1621, %1608, %cst_412 {dimension_numbers = #tpu.dot_dimension_numbers<[1], [0], [0], [1], [0, 0, 1, 1], [], []>} : vector<8x8xbf16>, vector<8x8xbf16>, vector<8x8xf32> -> vector<8x8xf32>
    %1623 = arith.truncf %1622 : vector<8x8xf32> to vector<8x8xbf16>
    %cst_413 = arith.constant dense<0.000000e+00> : vector<8x32xf32>
    %1624 = tpu.matmul %1623, %23, %cst_413 {dimension_numbers = #tpu.dot_dimension_numbers<[1], [0], [0], [1], [0, 0, 1, 1], [], []>} : vector<8x8xbf16>, vector<8x32xbf16>, vector<8x32xf32> -> vector<8x32xf32>
    %1625 = arith.addf %1602, %1624 : vector<8x32xf32>
    %1626 = vector.broadcast %24 : vector<1x32xf32> to vector<8x32xf32>
    %1627 = arith.addf %1625, %1626 : vector<8x32xf32>
    %1628 = arith.addf %1520, %1627 : vector<8x32xf32>
    %cst_414 = arith.constant dense<0.000000e+00> : vector<8xf32>
    %1629 = vector.multi_reduction <add>, %1628, %cst_414 [1] : vector<8x32xf32> to vector<8xf32>
    %1630 = vector.shape_cast %1629 : vector<8xf32> to vector<8x1xf32>
    %cst_415 = arith.constant 3.200000e+01 : f32
    %1631 = vector.broadcast %cst_415 : f32 to vector<8x1xf32>
    %1632 = arith.divf %1630, %1631 : vector<8x1xf32>
    %1633 = vector.broadcast %1632 : vector<8x1xf32> to vector<8x32xf32>
    %1634 = arith.subf %1628, %1633 : vector<8x32xf32>
    %1635 = arith.mulf %1634, %1634 : vector<8x32xf32>
    %cst_416 = arith.constant dense<0.000000e+00> : vector<8xf32>
    %1636 = vector.multi_reduction <add>, %1635, %cst_416 [1] : vector<8x32xf32> to vector<8xf32>
    %1637 = vector.shape_cast %1636 : vector<8xf32> to vector<8x1xf32>
    %cst_417 = arith.constant 3.200000e+01 : f32
    %1638 = vector.broadcast %cst_417 : f32 to vector<8x1xf32>
    %1639 = arith.divf %1637, %1638 : vector<8x1xf32>
    %1640 = vector.broadcast %1632 : vector<8x1xf32> to vector<8x32xf32>
    %1641 = arith.subf %1628, %1640 : vector<8x32xf32>
    %cst_418 = arith.constant 9.99999974E-6 : f32
    %1642 = vector.broadcast %cst_418 : f32 to vector<8x1xf32>
    %1643 = arith.addf %1639, %1642 : vector<8x1xf32>
    %1644 = math.rsqrt %1643 : vector<8x1xf32>
    %1645 = vector.broadcast %1644 : vector<8x1xf32> to vector<8x32xf32>
    %1646 = arith.mulf %1641, %1645 : vector<8x32xf32>
    %1647 = vector.broadcast %44 : vector<1x32xf32> to vector<8x32xf32>
    %1648 = arith.mulf %1646, %1647 : vector<8x32xf32>
    %1649 = vector.broadcast %45 : vector<1x32xf32> to vector<8x32xf32>
    %1650 = arith.addf %1648, %1649 : vector<8x32xf32>
    %1651 = arith.truncf %1650 : vector<8x32xf32> to vector<8x32xbf16>
    %cst_419 = arith.constant dense<0.000000e+00> : vector<8x32xf32>
    %1652 = tpu.matmul %1651, %26, %cst_419 {dimension_numbers = #tpu.dot_dimension_numbers<[1], [0], [0], [1], [0, 0, 1, 1], [], []>} : vector<8x32xbf16>, vector<32x32xbf16>, vector<8x32xf32> -> vector<8x32xf32>
    %1653 = vector.broadcast %27 : vector<1x32xf32> to vector<8x32xf32>
    %1654 = arith.addf %1652, %1653 : vector<8x32xf32>
    %1655 = arith.truncf %3 : vector<8x32xf32> to vector<8x32xbf16>
    %cst_420 = arith.constant dense<0.000000e+00> : vector<8x32xf32>
    %1656 = tpu.matmul %1655, %29, %cst_420 {dimension_numbers = #tpu.dot_dimension_numbers<[1], [0], [0], [1], [0, 0, 1, 1], [], []>} : vector<8x32xbf16>, vector<32x32xbf16>, vector<8x32xf32> -> vector<8x32xf32>
    %1657 = vector.broadcast %30 : vector<1x32xf32> to vector<8x32xf32>
    %1658 = arith.addf %1656, %1657 : vector<8x32xf32>
    %1659 = arith.truncf %3 : vector<8x32xf32> to vector<8x32xbf16>
    %cst_421 = arith.constant dense<0.000000e+00> : vector<8x32xf32>
    %1660 = tpu.matmul %1659, %32, %cst_421 {dimension_numbers = #tpu.dot_dimension_numbers<[1], [0], [0], [1], [0, 0, 1, 1], [], []>} : vector<8x32xbf16>, vector<32x32xbf16>, vector<8x32xf32> -> vector<8x32xf32>
    %1661 = vector.broadcast %33 : vector<1x32xf32> to vector<8x32xf32>
    %1662 = arith.addf %1660, %1661 : vector<8x32xf32>
    %cst_422 = arith.constant 0.353553385 : f32
    %1663 = vector.broadcast %cst_422 : f32 to vector<8x32xf32>
    %1664 = arith.mulf %1654, %1663 : vector<8x32xf32>
    %1665 = vector.extract_strided_slice %1664 {offsets = [0, 0], sizes = [8, 8], strides = [1, 1]} : vector<8x32xf32> to vector<8x8xf32>
    %1666 = arith.truncf %1665 : vector<8x8xf32> to vector<8x8xbf16>
    %1667 = vector.extract_strided_slice %1658 {offsets = [0, 0], sizes = [8, 8], strides = [1, 1]} : vector<8x32xf32> to vector<8x8xf32>
    %1668 = arith.truncf %1667 : vector<8x8xf32> to vector<8x8xbf16>
    %1669 = vector.extract_strided_slice %1662 {offsets = [0, 0], sizes = [8, 8], strides = [1, 1]} : vector<8x32xf32> to vector<8x8xf32>
    %1670 = arith.truncf %1669 : vector<8x8xf32> to vector<8x8xbf16>
    %cst_423 = arith.constant dense<0.000000e+00> : vector<8x8xf32>
    %1671 = tpu.matmul %1666, %1668, %cst_423 {dimension_numbers = #tpu.dot_dimension_numbers<[1], [1], [0], [0], [0, 0, 1, 0], [], []>} : vector<8x8xbf16>, vector<8x8xbf16>, vector<8x8xf32> -> vector<8x8xf32>
    %1672 = arith.addf %1671, %5 : vector<8x8xf32>
    %cst_424 = arith.constant dense<0xFF800000> : vector<8xf32>
    %1673 = vector.multi_reduction <maximumf>, %1672, %cst_424 [1] : vector<8x8xf32> to vector<8xf32>
    %1674 = vector.shape_cast %1673 : vector<8xf32> to vector<8x1xf32>
    %1675 = vector.broadcast %1674 : vector<8x1xf32> to vector<8x8xf32>
    %1676 = arith.subf %1672, %1675 : vector<8x8xf32>
    %1677 = math.exp %1676 : vector<8x8xf32>
    %cst_425 = arith.constant dense<0.000000e+00> : vector<8xf32>
    %1678 = vector.multi_reduction <add>, %1677, %cst_425 [1] : vector<8x8xf32> to vector<8xf32>
    %1679 = vector.shape_cast %1678 : vector<8xf32> to vector<8x1xf32>
    %1680 = tpu.reciprocal %1679 {approx = true} : vector<8x1xf32> -> vector<8x1xf32>
    %1681 = vector.broadcast %1680 : vector<8x1xf32> to vector<8x8xf32>
    %1682 = arith.mulf %1677, %1681 : vector<8x8xf32>
    %1683 = arith.truncf %1682 : vector<8x8xf32> to vector<8x8xbf16>
    %cst_426 = arith.constant dense<0.000000e+00> : vector<8x8xf32>
    %1684 = tpu.matmul %1683, %1670, %cst_426 {dimension_numbers = #tpu.dot_dimension_numbers<[1], [0], [0], [1], [0, 0, 1, 1], [], []>} : vector<8x8xbf16>, vector<8x8xbf16>, vector<8x8xf32> -> vector<8x8xf32>
    %1685 = arith.truncf %1684 : vector<8x8xf32> to vector<8x8xbf16>
    %cst_427 = arith.constant dense<0.000000e+00> : vector<8x32xf32>
    %1686 = tpu.matmul %1685, %36, %cst_427 {dimension_numbers = #tpu.dot_dimension_numbers<[1], [0], [0], [1], [0, 0, 1, 1], [], []>} : vector<8x8xbf16>, vector<8x32xbf16>, vector<8x32xf32> -> vector<8x32xf32>
    %1687 = vector.extract_strided_slice %1664 {offsets = [0, 8], sizes = [8, 8], strides = [1, 1]} : vector<8x32xf32> to vector<8x8xf32>
    %1688 = arith.truncf %1687 : vector<8x8xf32> to vector<8x8xbf16>
    %1689 = vector.extract_strided_slice %1658 {offsets = [0, 8], sizes = [8, 8], strides = [1, 1]} : vector<8x32xf32> to vector<8x8xf32>
    %1690 = arith.truncf %1689 : vector<8x8xf32> to vector<8x8xbf16>
    %1691 = vector.extract_strided_slice %1662 {offsets = [0, 8], sizes = [8, 8], strides = [1, 1]} : vector<8x32xf32> to vector<8x8xf32>
    %1692 = arith.truncf %1691 : vector<8x8xf32> to vector<8x8xbf16>
    %cst_428 = arith.constant dense<0.000000e+00> : vector<8x8xf32>
    %1693 = tpu.matmul %1688, %1690, %cst_428 {dimension_numbers = #tpu.dot_dimension_numbers<[1], [1], [0], [0], [0, 0, 1, 0], [], []>} : vector<8x8xbf16>, vector<8x8xbf16>, vector<8x8xf32> -> vector<8x8xf32>
    %1694 = arith.addf %1693, %5 : vector<8x8xf32>
    %cst_429 = arith.constant dense<0xFF800000> : vector<8xf32>
    %1695 = vector.multi_reduction <maximumf>, %1694, %cst_429 [1] : vector<8x8xf32> to vector<8xf32>
    %1696 = vector.shape_cast %1695 : vector<8xf32> to vector<8x1xf32>
    %1697 = vector.broadcast %1696 : vector<8x1xf32> to vector<8x8xf32>
    %1698 = arith.subf %1694, %1697 : vector<8x8xf32>
    %1699 = math.exp %1698 : vector<8x8xf32>
    %cst_430 = arith.constant dense<0.000000e+00> : vector<8xf32>
    %1700 = vector.multi_reduction <add>, %1699, %cst_430 [1] : vector<8x8xf32> to vector<8xf32>
    %1701 = vector.shape_cast %1700 : vector<8xf32> to vector<8x1xf32>
    %1702 = tpu.reciprocal %1701 {approx = true} : vector<8x1xf32> -> vector<8x1xf32>
    %1703 = vector.broadcast %1702 : vector<8x1xf32> to vector<8x8xf32>
    %1704 = arith.mulf %1699, %1703 : vector<8x8xf32>
    %1705 = arith.truncf %1704 : vector<8x8xf32> to vector<8x8xbf16>
    %cst_431 = arith.constant dense<0.000000e+00> : vector<8x8xf32>
    %1706 = tpu.matmul %1705, %1692, %cst_431 {dimension_numbers = #tpu.dot_dimension_numbers<[1], [0], [0], [1], [0, 0, 1, 1], [], []>} : vector<8x8xbf16>, vector<8x8xbf16>, vector<8x8xf32> -> vector<8x8xf32>
    %1707 = arith.truncf %1706 : vector<8x8xf32> to vector<8x8xbf16>
    %cst_432 = arith.constant dense<0.000000e+00> : vector<8x32xf32>
    %1708 = tpu.matmul %1707, %38, %cst_432 {dimension_numbers = #tpu.dot_dimension_numbers<[1], [0], [0], [1], [0, 0, 1, 1], [], []>} : vector<8x8xbf16>, vector<8x32xbf16>, vector<8x32xf32> -> vector<8x32xf32>
    %1709 = arith.addf %1686, %1708 : vector<8x32xf32>
    %1710 = vector.extract_strided_slice %1664 {offsets = [0, 16], sizes = [8, 8], strides = [1, 1]} : vector<8x32xf32> to vector<8x8xf32>
    %1711 = arith.truncf %1710 : vector<8x8xf32> to vector<8x8xbf16>
    %1712 = vector.extract_strided_slice %1658 {offsets = [0, 16], sizes = [8, 8], strides = [1, 1]} : vector<8x32xf32> to vector<8x8xf32>
    %1713 = arith.truncf %1712 : vector<8x8xf32> to vector<8x8xbf16>
    %1714 = vector.extract_strided_slice %1662 {offsets = [0, 16], sizes = [8, 8], strides = [1, 1]} : vector<8x32xf32> to vector<8x8xf32>
    %1715 = arith.truncf %1714 : vector<8x8xf32> to vector<8x8xbf16>
    %cst_433 = arith.constant dense<0.000000e+00> : vector<8x8xf32>
    %1716 = tpu.matmul %1711, %1713, %cst_433 {dimension_numbers = #tpu.dot_dimension_numbers<[1], [1], [0], [0], [0, 0, 1, 0], [], []>} : vector<8x8xbf16>, vector<8x8xbf16>, vector<8x8xf32> -> vector<8x8xf32>
    %1717 = arith.addf %1716, %5 : vector<8x8xf32>
    %cst_434 = arith.constant dense<0xFF800000> : vector<8xf32>
    %1718 = vector.multi_reduction <maximumf>, %1717, %cst_434 [1] : vector<8x8xf32> to vector<8xf32>
    %1719 = vector.shape_cast %1718 : vector<8xf32> to vector<8x1xf32>
    %1720 = vector.broadcast %1719 : vector<8x1xf32> to vector<8x8xf32>
    %1721 = arith.subf %1717, %1720 : vector<8x8xf32>
    %1722 = math.exp %1721 : vector<8x8xf32>
    %cst_435 = arith.constant dense<0.000000e+00> : vector<8xf32>
    %1723 = vector.multi_reduction <add>, %1722, %cst_435 [1] : vector<8x8xf32> to vector<8xf32>
    %1724 = vector.shape_cast %1723 : vector<8xf32> to vector<8x1xf32>
    %1725 = tpu.reciprocal %1724 {approx = true} : vector<8x1xf32> -> vector<8x1xf32>
    %1726 = vector.broadcast %1725 : vector<8x1xf32> to vector<8x8xf32>
    %1727 = arith.mulf %1722, %1726 : vector<8x8xf32>
    %1728 = arith.truncf %1727 : vector<8x8xf32> to vector<8x8xbf16>
    %cst_436 = arith.constant dense<0.000000e+00> : vector<8x8xf32>
    %1729 = tpu.matmul %1728, %1715, %cst_436 {dimension_numbers = #tpu.dot_dimension_numbers<[1], [0], [0], [1], [0, 0, 1, 1], [], []>} : vector<8x8xbf16>, vector<8x8xbf16>, vector<8x8xf32> -> vector<8x8xf32>
    %1730 = arith.truncf %1729 : vector<8x8xf32> to vector<8x8xbf16>
    %cst_437 = arith.constant dense<0.000000e+00> : vector<8x32xf32>
    %1731 = tpu.matmul %1730, %40, %cst_437 {dimension_numbers = #tpu.dot_dimension_numbers<[1], [0], [0], [1], [0, 0, 1, 1], [], []>} : vector<8x8xbf16>, vector<8x32xbf16>, vector<8x32xf32> -> vector<8x32xf32>
    %1732 = arith.addf %1709, %1731 : vector<8x32xf32>
    %1733 = vector.extract_strided_slice %1664 {offsets = [0, 24], sizes = [8, 8], strides = [1, 1]} : vector<8x32xf32> to vector<8x8xf32>
    %1734 = arith.truncf %1733 : vector<8x8xf32> to vector<8x8xbf16>
    %1735 = vector.extract_strided_slice %1658 {offsets = [0, 24], sizes = [8, 8], strides = [1, 1]} : vector<8x32xf32> to vector<8x8xf32>
    %1736 = arith.truncf %1735 : vector<8x8xf32> to vector<8x8xbf16>
    %1737 = vector.extract_strided_slice %1662 {offsets = [0, 24], sizes = [8, 8], strides = [1, 1]} : vector<8x32xf32> to vector<8x8xf32>
    %1738 = arith.truncf %1737 : vector<8x8xf32> to vector<8x8xbf16>
    %cst_438 = arith.constant dense<0.000000e+00> : vector<8x8xf32>
    %1739 = tpu.matmul %1734, %1736, %cst_438 {dimension_numbers = #tpu.dot_dimension_numbers<[1], [1], [0], [0], [0, 0, 1, 0], [], []>} : vector<8x8xbf16>, vector<8x8xbf16>, vector<8x8xf32> -> vector<8x8xf32>
    %1740 = arith.addf %1739, %5 : vector<8x8xf32>
    %cst_439 = arith.constant dense<0xFF800000> : vector<8xf32>
    %1741 = vector.multi_reduction <maximumf>, %1740, %cst_439 [1] : vector<8x8xf32> to vector<8xf32>
    %1742 = vector.shape_cast %1741 : vector<8xf32> to vector<8x1xf32>
    %1743 = vector.broadcast %1742 : vector<8x1xf32> to vector<8x8xf32>
    %1744 = arith.subf %1740, %1743 : vector<8x8xf32>
    %1745 = math.exp %1744 : vector<8x8xf32>
    %cst_440 = arith.constant dense<0.000000e+00> : vector<8xf32>
    %1746 = vector.multi_reduction <add>, %1745, %cst_440 [1] : vector<8x8xf32> to vector<8xf32>
    %1747 = vector.shape_cast %1746 : vector<8xf32> to vector<8x1xf32>
    %1748 = tpu.reciprocal %1747 {approx = true} : vector<8x1xf32> -> vector<8x1xf32>
    %1749 = vector.broadcast %1748 : vector<8x1xf32> to vector<8x8xf32>
    %1750 = arith.mulf %1745, %1749 : vector<8x8xf32>
    %1751 = arith.truncf %1750 : vector<8x8xf32> to vector<8x8xbf16>
    %cst_441 = arith.constant dense<0.000000e+00> : vector<8x8xf32>
    %1752 = tpu.matmul %1751, %1738, %cst_441 {dimension_numbers = #tpu.dot_dimension_numbers<[1], [0], [0], [1], [0, 0, 1, 1], [], []>} : vector<8x8xbf16>, vector<8x8xbf16>, vector<8x8xf32> -> vector<8x8xf32>
    %1753 = arith.truncf %1752 : vector<8x8xf32> to vector<8x8xbf16>
    %cst_442 = arith.constant dense<0.000000e+00> : vector<8x32xf32>
    %1754 = tpu.matmul %1753, %42, %cst_442 {dimension_numbers = #tpu.dot_dimension_numbers<[1], [0], [0], [1], [0, 0, 1, 1], [], []>} : vector<8x8xbf16>, vector<8x32xbf16>, vector<8x32xf32> -> vector<8x32xf32>
    %1755 = arith.addf %1732, %1754 : vector<8x32xf32>
    %1756 = vector.broadcast %43 : vector<1x32xf32> to vector<8x32xf32>
    %1757 = arith.addf %1755, %1756 : vector<8x32xf32>
    %1758 = arith.addf %1650, %1757 : vector<8x32xf32>
    %cst_443 = arith.constant dense<0.000000e+00> : vector<8xf32>
    %1759 = vector.multi_reduction <add>, %1758, %cst_443 [1] : vector<8x32xf32> to vector<8xf32>
    %1760 = vector.shape_cast %1759 : vector<8xf32> to vector<8x1xf32>
    %cst_444 = arith.constant 3.200000e+01 : f32
    %1761 = vector.broadcast %cst_444 : f32 to vector<8x1xf32>
    %1762 = arith.divf %1760, %1761 : vector<8x1xf32>
    %1763 = vector.broadcast %1762 : vector<8x1xf32> to vector<8x32xf32>
    %1764 = arith.subf %1758, %1763 : vector<8x32xf32>
    %1765 = arith.mulf %1764, %1764 : vector<8x32xf32>
    %cst_445 = arith.constant dense<0.000000e+00> : vector<8xf32>
    %1766 = vector.multi_reduction <add>, %1765, %cst_445 [1] : vector<8x32xf32> to vector<8xf32>
    %1767 = vector.shape_cast %1766 : vector<8xf32> to vector<8x1xf32>
    %cst_446 = arith.constant 3.200000e+01 : f32
    %1768 = vector.broadcast %cst_446 : f32 to vector<8x1xf32>
    %1769 = arith.divf %1767, %1768 : vector<8x1xf32>
    %1770 = vector.broadcast %1762 : vector<8x1xf32> to vector<8x32xf32>
    %1771 = arith.subf %1758, %1770 : vector<8x32xf32>
    %cst_447 = arith.constant 9.99999974E-6 : f32
    %1772 = vector.broadcast %cst_447 : f32 to vector<8x1xf32>
    %1773 = arith.addf %1769, %1772 : vector<8x1xf32>
    %1774 = math.rsqrt %1773 : vector<8x1xf32>
    %1775 = vector.broadcast %1774 : vector<8x1xf32> to vector<8x32xf32>
    %1776 = arith.mulf %1771, %1775 : vector<8x32xf32>
    %1777 = vector.broadcast %46 : vector<1x32xf32> to vector<8x32xf32>
    %1778 = arith.mulf %1776, %1777 : vector<8x32xf32>
    %1779 = vector.broadcast %47 : vector<1x32xf32> to vector<8x32xf32>
    %1780 = arith.addf %1778, %1779 : vector<8x32xf32>
    %1781 = arith.truncf %1780 : vector<8x32xf32> to vector<8x32xbf16>
    %cst_448 = arith.constant dense<0.000000e+00> : vector<8x64xf32>
    %1782 = tpu.matmul %1781, %51, %cst_448 {dimension_numbers = #tpu.dot_dimension_numbers<[1], [0], [0], [1], [0, 0, 1, 1], [], []>} : vector<8x32xbf16>, vector<32x64xbf16>, vector<8x64xf32> -> vector<8x64xf32>
    %1783 = vector.broadcast %52 : vector<1x64xf32> to vector<8x64xf32>
    %1784 = arith.addf %1782, %1783 : vector<8x64xf32>
    %cst_449 = arith.constant 0.000000e+00 : f32
    %1785 = vector.broadcast %cst_449 : f32 to vector<8x64xf32>
    %1786 = arith.maximumf %1784, %1785 : vector<8x64xf32>
    %1787 = arith.truncf %1786 : vector<8x64xf32> to vector<8x64xbf16>
    %cst_450 = arith.constant dense<0.000000e+00> : vector<8x32xf32>
    %1788 = tpu.matmul %1787, %54, %cst_450 {dimension_numbers = #tpu.dot_dimension_numbers<[1], [0], [0], [1], [0, 0, 1, 1], [], []>} : vector<8x64xbf16>, vector<64x32xbf16>, vector<8x32xf32> -> vector<8x32xf32>
    %1789 = vector.broadcast %55 : vector<1x32xf32> to vector<8x32xf32>
    %1790 = arith.addf %1788, %1789 : vector<8x32xf32>
    %1791 = arith.addf %1780, %1790 : vector<8x32xf32>
    %cst_451 = arith.constant dense<0.000000e+00> : vector<8xf32>
    %1792 = vector.multi_reduction <add>, %1791, %cst_451 [1] : vector<8x32xf32> to vector<8xf32>
    %1793 = vector.shape_cast %1792 : vector<8xf32> to vector<8x1xf32>
    %cst_452 = arith.constant 3.200000e+01 : f32
    %1794 = vector.broadcast %cst_452 : f32 to vector<8x1xf32>
    %1795 = arith.divf %1793, %1794 : vector<8x1xf32>
    %1796 = vector.broadcast %1795 : vector<8x1xf32> to vector<8x32xf32>
    %1797 = arith.subf %1791, %1796 : vector<8x32xf32>
    %1798 = arith.mulf %1797, %1797 : vector<8x32xf32>
    %cst_453 = arith.constant dense<0.000000e+00> : vector<8xf32>
    %1799 = vector.multi_reduction <add>, %1798, %cst_453 [1] : vector<8x32xf32> to vector<8xf32>
    %1800 = vector.shape_cast %1799 : vector<8xf32> to vector<8x1xf32>
    %cst_454 = arith.constant 3.200000e+01 : f32
    %1801 = vector.broadcast %cst_454 : f32 to vector<8x1xf32>
    %1802 = arith.divf %1800, %1801 : vector<8x1xf32>
    %1803 = vector.broadcast %1795 : vector<8x1xf32> to vector<8x32xf32>
    %1804 = arith.subf %1791, %1803 : vector<8x32xf32>
    %cst_455 = arith.constant 9.99999974E-6 : f32
    %1805 = vector.broadcast %cst_455 : f32 to vector<8x1xf32>
    %1806 = arith.addf %1802, %1805 : vector<8x1xf32>
    %1807 = math.rsqrt %1806 : vector<8x1xf32>
    %1808 = vector.broadcast %1807 : vector<8x1xf32> to vector<8x32xf32>
    %1809 = arith.mulf %1804, %1808 : vector<8x32xf32>
    %1810 = vector.broadcast %48 : vector<1x32xf32> to vector<8x32xf32>
    %1811 = arith.mulf %1809, %1810 : vector<8x32xf32>
    %1812 = vector.broadcast %49 : vector<1x32xf32> to vector<8x32xf32>
    %1813 = arith.addf %1811, %1812 : vector<8x32xf32>
    %c0_456 = arith.constant 0 : index
    %c0_457 = arith.constant 0 : index
    %c0_458 = arith.constant 0 : index
    %1814 = vector.load %arg31[%c0_456, %c0_457, %c0_458] : memref<1x8x32xf32, #tpu.memory_space<vmem>>, vector<1x8x32xf32>
    %1815 = vector.shape_cast %1814 : vector<1x8x32xf32> to vector<8x32xf32>
    %1816 = vector.shape_cast %1813 : vector<8x32xf32> to vector<1x8x32xf32>
    tpu.vector_store %arg31[%c0_456, %c0_457, %c0_458], %1816 {strides = array<i32>} : memref<1x8x32xf32, #tpu.memory_space<vmem>>, vector<1x8x32xf32>,
    return
  }
  func.func @transform_0(%arg0: i32) -> (i32, i32, i32) {
    %c0_i32 = arith.constant 0 : i32
    %c0_i32_0 = arith.constant 0 : i32
    %c0_i32_1 = arith.constant 0 : i32
    return %arg0, %c0_i32, %c0_i32_0 : i32, i32, i32
  }
  func.func @transform_1(%arg0: i32) -> (i32, i32, i32) {
    %c0_i32 = arith.constant 0 : i32
    %c0_i32_0 = arith.constant 0 : i32
    %c0_i32_1 = arith.constant 0 : i32
    return %arg0, %c0_i32, %c0_i32_0 : i32, i32, i32
  }
  func.func @transform_2(%arg0: i32) -> (i32, i32) {
    %c0_i32 = arith.constant 0 : i32
    %c0_i32_0 = arith.constant 0 : i32
    %c0_i32_1 = arith.constant 0 : i32
    return %c0_i32, %c0_i32_0 : i32, i32
  }
  func.func @transform_3(%arg0: i32) -> (i32, i32) {
    %c0_i32 = arith.constant 0 : i32
    %c0_i32_0 = arith.constant 0 : i32
    %c0_i32_1 = arith.constant 0 : i32
    return %c0_i32, %c0_i32_0 : i32, i32
  }
  func.func @transform_4(%arg0: i32) -> (i32, i32) {
    %c0_i32 = arith.constant 0 : i32
    %c0_i32_0 = arith.constant 0 : i32
    %c0_i32_1 = arith.constant 0 : i32
    return %c0_i32, %c0_i32_0 : i32, i32
  }
  func.func @transform_5(%arg0: i32) -> (i32, i32) {
    %c0_i32 = arith.constant 0 : i32
    %c0_i32_0 = arith.constant 0 : i32
    %c0_i32_1 = arith.constant 0 : i32
    return %c0_i32, %c0_i32_0 : i32, i32
  }
  func.func @transform_6(%arg0: i32) -> (i32, i32) {
    %c0_i32 = arith.constant 0 : i32
    %c0_i32_0 = arith.constant 0 : i32
    %c0_i32_1 = arith.constant 0 : i32
    return %c0_i32, %c0_i32_0 : i32, i32
  }
  func.func @transform_7(%arg0: i32) -> (i32, i32) {
    %c0_i32 = arith.constant 0 : i32
    %c0_i32_0 = arith.constant 0 : i32
    %c0_i32_1 = arith.constant 0 : i32
    return %c0_i32, %c0_i32_0 : i32, i32
  }
  func.func @transform_8(%arg0: i32) -> (i32, i32) {
    %c0_i32 = arith.constant 0 : i32
    %c0_i32_0 = arith.constant 0 : i32
    %c0_i32_1 = arith.constant 0 : i32
    return %c0_i32, %c0_i32_0 : i32, i32
  }
  func.func @transform_9(%arg0: i32) -> (i32, i32) {
    %c0_i32 = arith.constant 0 : i32
    %c0_i32_0 = arith.constant 0 : i32
    %c0_i32_1 = arith.constant 0 : i32
    return %c0_i32, %c0_i32_0 : i32, i32
  }
  func.func @transform_10(%arg0: i32) -> (i32, i32) {
    %c0_i32 = arith.constant 0 : i32
    %c0_i32_0 = arith.constant 0 : i32
    %c0_i32_1 = arith.constant 0 : i32
    return %c0_i32, %c0_i32_0 : i32, i32
  }
  func.func @transform_11(%arg0: i32) -> (i32, i32) {
    %c0_i32 = arith.constant 0 : i32
    %c0_i32_0 = arith.constant 0 : i32
    %c0_i32_1 = arith.constant 0 : i32
    return %c0_i32, %c0_i32_0 : i32, i32
  }
  func.func @transform_12(%arg0: i32) -> (i32, i32) {
    %c0_i32 = arith.constant 0 : i32
    %c0_i32_0 = arith.constant 0 : i32
    %c0_i32_1 = arith.constant 0 : i32
    return %c0_i32, %c0_i32_0 : i32, i32
  }
  func.func @transform_13(%arg0: i32) -> (i32, i32) {
    %c0_i32 = arith.constant 0 : i32
    %c0_i32_0 = arith.constant 0 : i32
    %c0_i32_1 = arith.constant 0 : i32
    return %c0_i32, %c0_i32_0 : i32, i32
  }
  func.func @transform_14(%arg0: i32) -> (i32, i32) {
    %c0_i32 = arith.constant 0 : i32
    %c0_i32_0 = arith.constant 0 : i32
    %c0_i32_1 = arith.constant 0 : i32
    return %c0_i32, %c0_i32_0 : i32, i32
  }
  func.func @transform_15(%arg0: i32) -> (i32, i32) {
    %c0_i32 = arith.constant 0 : i32
    %c0_i32_0 = arith.constant 0 : i32
    %c0_i32_1 = arith.constant 0 : i32
    return %c0_i32, %c0_i32_0 : i32, i32
  }
  func.func @transform_16(%arg0: i32) -> (i32, i32) {
    %c0_i32 = arith.constant 0 : i32
    %c0_i32_0 = arith.constant 0 : i32
    %c0_i32_1 = arith.constant 0 : i32
    return %c0_i32, %c0_i32_0 : i32, i32
  }
  func.func @transform_17(%arg0: i32) -> (i32, i32) {
    %c0_i32 = arith.constant 0 : i32
    %c0_i32_0 = arith.constant 0 : i32
    %c0_i32_1 = arith.constant 0 : i32
    return %c0_i32, %c0_i32_0 : i32, i32
  }
  func.func @transform_18(%arg0: i32) -> (i32, i32) {
    %c0_i32 = arith.constant 0 : i32
    %c0_i32_0 = arith.constant 0 : i32
    %c0_i32_1 = arith.constant 0 : i32
    return %c0_i32, %c0_i32_0 : i32, i32
  }
  func.func @transform_19(%arg0: i32) -> (i32, i32) {
    %c0_i32 = arith.constant 0 : i32
    %c0_i32_0 = arith.constant 0 : i32
    %c0_i32_1 = arith.constant 0 : i32
    return %c0_i32, %c0_i32_0 : i32, i32
  }
  func.func @transform_20(%arg0: i32) -> (i32, i32) {
    %c0_i32 = arith.constant 0 : i32
    %c0_i32_0 = arith.constant 0 : i32
    %c0_i32_1 = arith.constant 0 : i32
    return %c0_i32, %c0_i32_0 : i32, i32
  }
  func.func @transform_21(%arg0: i32) -> (i32, i32) {
    %c0_i32 = arith.constant 0 : i32
    %c0_i32_0 = arith.constant 0 : i32
    %c0_i32_1 = arith.constant 0 : i32
    return %c0_i32, %c0_i32_0 : i32, i32
  }
  func.func @transform_22(%arg0: i32) -> (i32, i32) {
    %c0_i32 = arith.constant 0 : i32
    %c0_i32_0 = arith.constant 0 : i32
    %c0_i32_1 = arith.constant 0 : i32
    return %c0_i32, %c0_i32_0 : i32, i32
  }
  func.func @transform_23(%arg0: i32) -> (i32, i32) {
    %c0_i32 = arith.constant 0 : i32
    %c0_i32_0 = arith.constant 0 : i32
    %c0_i32_1 = arith.constant 0 : i32
    return %c0_i32, %c0_i32_0 : i32, i32
  }
  func.func @transform_24(%arg0: i32) -> (i32, i32) {
    %c0_i32 = arith.constant 0 : i32
    %c0_i32_0 = arith.constant 0 : i32
    %c0_i32_1 = arith.constant 0 : i32
    return %c0_i32, %c0_i32_0 : i32, i32
  }
  func.func @transform_25(%arg0: i32) -> (i32, i32) {
    %c0_i32 = arith.constant 0 : i32
    %c0_i32_0 = arith.constant 0 : i32
    %c0_i32_1 = arith.constant 0 : i32
    return %c0_i32, %c0_i32_0 : i32, i32
  }
  func.func @transform_26(%arg0: i32) -> (i32, i32) {
    %c0_i32 = arith.constant 0 : i32
    %c0_i32_0 = arith.constant 0 : i32
    %c0_i32_1 = arith.constant 0 : i32
    return %c0_i32, %c0_i32_0 : i32, i32
  }
  func.func @transform_27(%arg0: i32) -> (i32, i32) {
    %c0_i32 = arith.constant 0 : i32
    %c0_i32_0 = arith.constant 0 : i32
    %c0_i32_1 = arith.constant 0 : i32
    return %c0_i32, %c0_i32_0 : i32, i32
  }
  func.func @transform_28(%arg0: i32) -> (i32, i32) {
    %c0_i32 = arith.constant 0 : i32
    %c0_i32_0 = arith.constant 0 : i32
    %c0_i32_1 = arith.constant 0 : i32
    return %c0_i32, %c0_i32_0 : i32, i32
  }
  func.func @transform_29(%arg0: i32) -> (i32, i32) {
    %c0_i32 = arith.constant 0 : i32
    %c0_i32_0 = arith.constant 0 : i32
    %c0_i32_1 = arith.constant 0 : i32
    return %c0_i32, %c0_i32_0 : i32, i32
  }
  func.func @transform_30(%arg0: i32) -> (i32, i32, i32) {
    %c0_i32 = arith.constant 0 : i32
    %c0_i32_0 = arith.constant 0 : i32
    %c0_i32_1 = arith.constant 0 : i32
    return %arg0, %c0_i32, %c0_i32_0 : i32, i32, i32
  }
}

</mosaic_0001>

<bundles_post_ra>
// kernel: tpu_custom_call.1
= control target key start
LH: loop header
LB: loop body
LE: loop exit
PB: predicated region body
PF: predicated region fallthrough
CT: control target
= control target key end

     0   :  { %s13967_s6 = smov 1   ;;  %s13968_s10 = smov 2   ;;  %s16451_s0 = inlined_call_operand.smem [shape: u32[31], index: -1, kind: input, shape index: {}] }
   0x1   :  { %s14033_s5 = sld [smem:[%s16451_s0]]   ;;  %s13969_s14 = smov 3  }
   0x2   :  { %s14038_s9 = sld [smem:[%s16451_s0 + %s13967_s6]]   ;;  %s13970_s18 = smov 4  }
   0x3   :  { %s14043_s13 = sld [smem:[%s16451_s0 + %s13968_s10]]   ;;  %s13971_s22 = smov 5  }
   0x4   :  { %s14048_s17 = sld [smem:[%s16451_s0 + %s13969_s14]]   ;;  %s13972_s26 = smov 6  }
   0x5   :  { %s14053_s21 = sld [smem:[%s16451_s0 + %s13970_s18]]   ;;  %s13973_s30 = smov 7  }
   0x6   :  { %s14058_s25 = sld [smem:[%s16451_s0 + %s13971_s22]]   ;;  %s13974_s4 = smov 8  }
   0x7   :  { %16496 = sst [smem:[#allocation48_spill]] %s14033_s5  ;;  %s13975_s10 = smov 9  }
   0x8   :  { %16497 = sst [smem:[#allocation49_spill]] %s14038_s9  ;;  %s13976_s15 = smov 10  }
   0x9   :  { %16498 = sst [smem:[#allocation50_spill]] %s14043_s13  ;;  %s13977_s20 = smov 11  }
   0xa   :  { %16499 = sst [smem:[#allocation51_spill]] %s14048_s17  ;;  %s13979_s1 = smov 13  }
   0xb   :  { %16500 = sst [smem:[#allocation52_spill]] %s14053_s21  ;;  %s13980_s7 = smov 14  }
   0xc   :  { %s14063_s29 = sld [smem:[%s16451_s0 + %s13972_s26]]   ;;  %s13978_s26 = smov 12  }
   0xd   :  { %s14068_s3 = sld [smem:[%s16451_s0 + %s13973_s30]]   ;;  %s13982_s22 = smov 16  }
   0xe   :  { %s14073_s8 = sld [smem:[%s16451_s0 + %s13974_s4]]   ;;  %s13983_s28 = smov 17  }
   0xf   :  { %s14078_s14 = sld [smem:[%s16451_s0 + %s13975_s10]]  }
  0x10   :  { %s14083_s19 = sld [smem:[%s16451_s0 + %s13976_s15]]   ;;  %s13981_s15 = smov 15  }
  0x11   :  { %s14088_s24 = sld [smem:[%s16451_s0 + %s13977_s20]]  }
  0x12   :  { %16501 = sst [smem:[#allocation53_spill]] %s14063_s29 }
  0x13   :  { %16502 = sst [smem:[#allocation54_spill]] %s14068_s3 }
  0x14   :  { %16503 = sst [smem:[#allocation55_spill]] %s14073_s8 }
  0x15   :  { %16504 = sst [smem:[#allocation56_spill]] %s14078_s14 }
  0x16   :  { %16505 = sst [smem:[#allocation57_spill]] %s14083_s19 }
  0x17   :  { %s14093_s30 = sld [smem:[%s16451_s0 + %s13978_s26]]  }
  0x18   :  { %s14098_s6 = sld [smem:[%s16451_s0 + %s13979_s1]]  }
  0x19   :  { %s14103_s12 = sld [smem:[%s16451_s0 + %s13980_s7]]   ;;  %s13984_s7 = smov 18  }
  0x1a   :  { %s14108_s20 = sld [smem:[%s16451_s0 + %s13981_s15]]   ;;  %s13985_s15 = smov 19  }
  0x1b   :  { %s14113_s27 = sld [smem:[%s16451_s0 + %s13982_s22]]   ;;  %s13986_s22 = smov 20  }
  0x1c   :  { %s14118_s4 = sld [smem:[%s16451_s0 + %s13983_s28]]   ;;  %s13987_s28 = smov 21  }
  0x1d   :  { %s14123_s19 = sld [smem:[%s16451_s0 + %s13984_s7]]   ;;  %s13988_s7 = smov 22  }
  0x1e   :  { %16506 = sst [smem:[#allocation58_spill]] %s14098_s6 }
  0x1f   :  { %16507 = sst [smem:[#allocation59_spill]] %s14103_s12 }
  0x20   :  { %16508 = sst [smem:[#allocation60_spill]] %s14108_s20 }
  0x21   :  { %s14128_s8 = sld [smem:[%s16451_s0 + %s13985_s15]]   ;;  %s13989_s15 = smov 23  }
  0x22   :  { %16509 = sst [smem:[#allocation61_spill]] %s14118_s4 }
  0x23   :  { %16510 = sst [smem:[#allocation62_spill]] %s14123_s19 }
  0x24   :  { %s14133_s29 = sld [smem:[%s16451_s0 + %s13986_s22]]   ;;  %s13990_s22 = smov 24  }
  0x25   :  { %s14138_s21 = sld [smem:[%s16451_s0 + %s13987_s28]]   ;;  %s13991_s28 = smov 25  }
  0x26   :  { %s14143_s9 = sld [smem:[%s16451_s0 + %s13988_s7]]   ;;  %s13992_s7 = smov 26  }
  0x27   :  { %16511 = sst [smem:[#allocation63_spill]] %s14128_s8 }
  0x28   :  { %s14148_s8 = sld [smem:[%s16451_s0 + %s13989_s15]]   ;;  %s13993_s15 = smov 27  }
  0x29   :  { %s14158_s5 = sld [smem:[%s16451_s0 + %s13991_s28]]   ;;  %s13995_s28 = smov 29  }
  0x2a   :  { %16512 = sst [smem:[#allocation64_spill]] %s14133_s29 }
  0x2b   :  { %16513 = sst [smem:[#allocation65_spill]] %s14138_s21 }
  0x2c   :  { %16514 = sst [smem:[#allocation66_spill]] %s14143_s9 }
  0x2d   :  { %s14153_s29 = sld [smem:[%s16451_s0 + %s13990_s22]]   ;;  %s13994_s22 = smov 28  }
  0x2e   :  { %16515 = sst [smem:[#allocation67_spill]] %s14148_s8 }
  0x2f   :  { %16517 = sst [smem:[#allocation69_spill]] %s14158_s5 }
  0x30   :  { %s14163_s9 = sld [smem:[%s16451_s0 + %s13992_s7]]   ;;  %s13996_s7 = smov 30  }
  0x31   :  { %s14168_s19 = sld [smem:[%s16451_s0 + %s13993_s15]]  }
  0x32   :  { %s14178_s5 = sld [smem:[%s16451_s0 + %s13995_s28]]  }
  0x33   :  { %16516 = sst [smem:[#allocation68_spill]] %s14153_s29 }
  0x34   :  { %s14173_s29 = sld [smem:[%s16451_s0 + %s13994_s22]]  }
  0x36   :  { %16518 = sst [smem:[#allocation70_spill]] %s14163_s9 }
  0x37   :  { %s14183_s9 = sld [smem:[%s16451_s0 + %s13996_s7]]  }
  0x38   :  { %16519 = sst [smem:[#allocation71_spill]] %s14178_s5 }
  0x3d   :  { %16520 = sst [smem:[#allocation72_spill]] %s14183_s9 }
  0x3e   :  { %66 = vsyncpa [#allocation3], 0 }
  0x3f   :  { %68 = vsyncpa [#allocation3 + $0x1], 0 }
  0x40   :  { %69 = vsyncpa [#allocation6], 0 }
  0x41   :  { %71 = vsyncpa [#allocation6 + $0x1], 0 }
  0x42   :  { %72 = vsyncpa [#allocation9], 0 }
  0x43   :  { %73 = vsyncpa [#allocation12], 0 }
  0x44   :  { %74 = vsyncpa [#allocation15], 0 }
  0x45   :  { %75 = vsyncpa [#allocation18], 0 }
  0x46   :  { %76 = vsyncpa [#allocation21], 0 }
  0x47   :  { %77 = vsyncpa [#allocation24], 0 }
  0x48   :  { %78 = vsyncpa [#allocation27], 0 }
  0x49   :  { %79 = vsyncpa [#allocation30], 0 }
  0x4a   :  { %80 = vsyncpa [#allocation33], 0 }
  0x4b   :  { %81 = vsyncpa [#allocation4], 0 }
  0x4c   :  { %83 = vsyncpa [#allocation4 + $0x1], 0  ;;  %s14185_s15 = smov 0   ;;  %s14187_s16 = smov 0  }
  0x4d   :  { %s14189_s0 = smov 0   ;;  %s14191_s18 = smov 0  }
  0x4e LB: > { %s16521_s21 = sld [smem:[#allocation65_spill]]  ;;  %s16522_s20 = sld [smem:[#allocation60_spill]]  ;;  %s13957_s16 = sphi %s14187_s16, %s16588_s16   ;;  %s13953_s15 = sphi %s14185_s15, %s16587_s15   ;;  %s13965_s18 = sphi %s14191_s18, %s16590_s18   ;;  %s13961_s0 = sphi %s14189_s0, %s16589_s0  }
  0x4f   : > { %s16523_s17 = sld [smem:[#allocation51_spill]]  ;;  %s16524_s14 = sld [smem:[#allocation56_spill]] }
  0x50   : > { %s16525_s13 = sld [smem:[#allocation50_spill]]  ;;  %s16526_s12 = sld [smem:[#allocation59_spill]] }
  0x51   : > { %s16527_s8 = sld [smem:[#allocation67_spill]]  ;;  %s16528_s6 = sld [smem:[#allocation58_spill]] }
  0x52   : > { %s16529_s4 = sld [smem:[#allocation61_spill]]  ;;  %s16530_s3 = sld [smem:[#allocation54_spill]] }
  0x53   : > { %s13997_s22 = smov [#allocation7]   ;;  %s14206_s26 = sadd.s32 4294967295, %s13965_s18  }
  0x54   : > { %s773_s23 = sshll.u32 %s13997_s22, 4  ;;  %p10896_p0 = scmp.ge.s32.totalorder %s13965_s18, 1  ;;  %s14211_s23 = int_to_ptr.vmem [resolvable:$true] %s773_s23 }
  0x55   : > { %p16467_p1 = scmp.eq.s32.totalorder %s14206_s26, 0  ;;  %p760_p2 = scmp.lt.s32.totalorder %s13965_s18, 3 }
  0x56   : > { %s13998_s1 = smov [#allocation8]   ;;  %s13999_s7 = smov [#allocation11]  }
  0x57   : > { %p14213_p3 = pnand %p10896_p0, %p760_p2  ;;  %s784_s2 = sshll.u32 %s13998_s1, 4  ;;  %s14220_s2 = int_to_ptr.vmem [resolvable:$true] %s784_s2 }
  0x58   : > { %s812_s10 = sshll.u32 %s13999_s7, 4  ;;  %s14000_s22 = smov [#allocation14]   ;;  %s14228_s10 = int_to_ptr.vmem [resolvable:$true] %s812_s10 }
  0x59   : > { %s16531_s28 = scalar_select %p14213_p3, 1, 0 }
  0x5a   : > { %p12828_p5 = pneg %p14213_p3  ;;  %s14230_s9 = sshll.u32 %s14000_s22, 4  ;;  %s841_s9 = int_to_ptr.vmem [resolvable:$true] %s14230_s9 }
  0x5b   : > { %s13291_s5 = scalar_lea.hbm %s16525_s13, 128 }
  0x5c   : > { %p14224_p6 = pnand %p12828_p5, %p16467_p1  ;;  %p13292_p7 = scmp.ne.s32.totalorder %s16525_s13, %s13291_s5 }
  0x5d   : > { %p13298_p11 = scmp.lt.u32.totalorder %s13291_s5, %s16525_s13 }
  0x5e   : > { %p14236_p8 = pneg %p14224_p6 }
  0x60   : > { %p13294_p9 = pnand %p14236_p8, %p13292_p7 }
  0x62   : > { %p13295_p10 = pneg %p13294_p9 }
  0x64   : > { %p13300_p12 = pnand %p13298_p11, %p13295_p10 }
  0x66   : > { %13303 = shalt.err (!%p13300_p12)
}
  0x67   : > { %s13304_s7 = scalar_lea.vmem %s14211_s23, 128  ;;  %p13312_p5 = scmp.lt.s32.totalorder %s14211_s23, %s14211_s23 }
  0x68   : > { %p13305_p13 = scmp.ne.s32.totalorder %s14211_s23, %s13304_s7  ;;  %p13313_p4 = scmp.lt.s32.totalorder %s13304_s7, %s13304_s7 }
  0x6a   : > { %p13307_p0 = pnand %p13305_p13, %p14236_p8  ;;  %p13314_p1 = por %p13313_p4, %p13312_p5 }
  0x6c   : > { %p13308_p2 = pneg %p13307_p0 }
  0x6e   : > { %p13315_p3 = pnand %p13314_p1, %p13308_p2 }
  0x70   : > { %13318 = shalt.err (!%p13315_p3)
}
  0x71   : > { %12831 = dma.hbm_to_vmem [thread:$0]  (!%p14224_p6), %s16525_s13, 128, %s14211_s23, [#allocation6]  }
  0x72   : > { %s13319_s5 = scalar_lea.hbm %s16523_s17, 128 }
  0x73   : > { %p13320_p7 = scmp.ne.s32.totalorder %s16523_s17, %s13319_s5  ;;  %p13326_p11 = scmp.lt.u32.totalorder %s13319_s5, %s16523_s17 }
  0x75   : > { %p13322_p9 = pnand %p13320_p7, %p14236_p8 }
  0x77   : > { %p13323_p10 = pneg %p13322_p9 }
  0x79   : > { %p13328_p12 = pnand %p13326_p11, %p13323_p10 }
  0x7b   : > { %13331 = shalt.err (!%p13328_p12)
}
  0x7c   : > { %s13332_s22 = scalar_lea.vmem %s14220_s2, 128  ;;  %p13340_p13 = scmp.lt.s32.totalorder %s14220_s2, %s14220_s2 }
  0x7d   : > { %p13333_p1 = scmp.ne.s32.totalorder %s14220_s2, %s13332_s22  ;;  %p13341_p0 = scmp.lt.s32.totalorder %s13332_s22, %s13332_s22 }
  0x7f   : > { %p13335_p3 = pnand %p13333_p1, %p14236_p8  ;;  %p13342_p2 = por %p13341_p0, %p13340_p13 }
  0x81   : > { %p13336_p4 = pneg %p13335_p3 }
  0x83   : > { %p13343_p5 = pnand %p13342_p2, %p13336_p4 }
  0x85   : > { %13346 = shalt.err (!%p13343_p5)
}
  0x86   : > { %12834 = dma.hbm_to_vmem [thread:$0]  (!%p14224_p6), %s16523_s17, 128, %s14220_s2, [#allocation9]  }
  0x87   : > { %s13347_s23 = scalar_lea.hbm %s16530_s3, 16 }
  0x88   : > { %p13348_p7 = scmp.ne.s32.totalorder %s16530_s3, %s13347_s23  ;;  %p13354_p11 = scmp.lt.u32.totalorder %s13347_s23, %s16530_s3 }
  0x8a   : > { %p13350_p9 = pnand %p13348_p7, %p14236_p8 }
  0x8c   : > { %p13351_p10 = pneg %p13350_p9 }
  0x8e   : > { %p13356_p12 = pnand %p13354_p11, %p13351_p10 }
  0x90   : > { %13359 = shalt.err (!%p13356_p12)
}
  0x91   : > { %s13360_s7 = scalar_lea.vmem %s14228_s10, 16  ;;  %s13367_s5 = scalar_lea.vmem %s14228_s10, 32 }
  0x92   : > { %p13361_p1 = scmp.ne.s32.totalorder %s14228_s10, %s13360_s7  ;;  %p13368_p13 = scmp.lt.s32.totalorder %s14228_s10, %s14228_s10 }
  0x93   : > { %p13369_p0 = scmp.lt.s32.totalorder %s13367_s5, %s13360_s7 }
  0x94   : > { %p13363_p3 = pnand %p13361_p1, %p14236_p8 }
  0x95   : > { %p13370_p2 = por %p13369_p0, %p13368_p13 }
  0x96   : > { %p13364_p4 = pneg %p13363_p3 }
  0x98   : > { %p13371_p5 = pnand %p13370_p2, %p13364_p4 }
  0x9a   : > { %13374 = shalt.err (!%p13371_p5)
}
  0x9b   : > { %12840 = dma.hbm_to_vmem [thread:$0]  (!%p14224_p6), %s16530_s3, 16, %s14228_s10, [#allocation12]  }
  0x9c   : > { %s14001_s2 = smov [#allocation17]   ;;  %s13375_s23 = scalar_lea.hbm %s14088_s24, 16 }
  0x9d   : > { %s864_s22 = sshll.u32 %s14001_s2, 4  ;;  %p13376_p7 = scmp.ne.s32.totalorder %s14088_s24, %s13375_s23  ;;  %s865_s22 = int_to_ptr.vmem [resolvable:$true] %s864_s22 }
  0x9e   : > { %p13382_p11 = scmp.lt.u32.totalorder %s13375_s23, %s14088_s24 }
  0x9f   : > { %p13378_p9 = pnand %p13376_p7, %p14236_p8 }
  0xa1   : > { %p13379_p10 = pneg %p13378_p9 }
  0xa3   : > { %p13384_p12 = pnand %p13382_p11, %p13379_p10 }
  0xa5   : > { %13387 = shalt.err (!%p13384_p12)
}
  0xa6   : > { %s13388_s7 = scalar_lea.vmem %s841_s9, 16  ;;  %s13395_s5 = scalar_lea.vmem %s841_s9, 32 }
  0xa7   : > { %p13389_p1 = scmp.ne.s32.totalorder %s841_s9, %s13388_s7  ;;  %p13396_p13 = scmp.lt.s32.totalorder %s841_s9, %s841_s9 }
  0xa8   : > { %p13397_p0 = scmp.lt.s32.totalorder %s13395_s5, %s13388_s7 }
  0xa9   : > { %p13391_p3 = pnand %p13389_p1, %p14236_p8 }
  0xaa   : > { %p13398_p2 = por %p13397_p0, %p13396_p13 }
  0xab   : > { %p13392_p4 = pneg %p13391_p3 }
  0xad   : > { %p13399_p5 = pnand %p13398_p2, %p13392_p4 }
  0xaf   : > { %13402 = shalt.err (!%p13399_p5)
}
  0xb0   : > { %12846 = dma.hbm_to_vmem [thread:$0]  (!%p14224_p6), %s14088_s24, 16, %s841_s9, [#allocation15]  }
  0xb1   : > { %s13403_s10 = scalar_lea.hbm %s16528_s6, 16 }
  0xb2   : > { %p13404_p7 = scmp.ne.s32.totalorder %s16528_s6, %s13403_s10  ;;  %p13410_p11 = scmp.lt.u32.totalorder %s13403_s10, %s16528_s6 }
  0xb4   : > { %p13406_p9 = pnand %p13404_p7, %p14236_p8 }
  0xb6   : > { %p13407_p10 = pneg %p13406_p9 }
  0xb8   : > { %p13412_p12 = pnand %p13410_p11, %p13407_p10 }
  0xba   : > { %13415 = shalt.err (!%p13412_p12)
}
  0xbb   : > { %s13416_s2 = scalar_lea.vmem %s865_s22, 16  ;;  %s13423_s23 = scalar_lea.vmem %s865_s22, 32 }
  0xbc   : > { %p13417_p1 = scmp.ne.s32.totalorder %s865_s22, %s13416_s2  ;;  %p13424_p13 = scmp.lt.s32.totalorder %s865_s22, %s865_s22 }
  0xbd   : > { %p13425_p0 = scmp.lt.s32.totalorder %s13423_s23, %s13416_s2 }
  0xbe   : > { %p13419_p3 = pnand %p13417_p1, %p14236_p8 }
  0xbf   : > { %p13426_p2 = por %p13425_p0, %p13424_p13 }
  0xc0   : > { %p13420_p4 = pneg %p13419_p3 }
  0xc2   : > { %p13427_p5 = pnand %p13426_p2, %p13420_p4 }
  0xc4   : > { %13430 = shalt.err (!%p13427_p5)
}
  0xc5   : > { %12852 = dma.hbm_to_vmem [thread:$0]  (!%p14224_p6), %s16528_s6, 16, %s865_s22, [#allocation18]  }
  0xc6   : > { %s14002_s9 = smov [#allocation20]   ;;  %s14003_s5 = smov [#allocation23]  }
  0xc7   : > { %s888_s7 = sshll.u32 %s14002_s9, 4  ;;  %s912_s10 = sshll.u32 %s14003_s5, 4  ;;  %s889_s7 = int_to_ptr.vmem [resolvable:$true] %s888_s7  ;;  %s913_s10 = int_to_ptr.vmem [resolvable:$true] %s912_s10 }
  0xc8   : > { %s13431_s3 = scalar_lea.hbm %s16522_s20, 16 }
  0xc9   : > { %p13432_p7 = scmp.ne.s32.totalorder %s16522_s20, %s13431_s3  ;;  %p13438_p11 = scmp.lt.u32.totalorder %s13431_s3, %s16522_s20 }
  0xcb   : > { %p13434_p9 = pnand %p13432_p7, %p14236_p8 }
  0xcd   : > { %p13435_p10 = pneg %p13434_p9 }
  0xcf   : > { %p13440_p12 = pnand %p13438_p11, %p13435_p10 }
  0xd1   : > { %13443 = shalt.err (!%p13440_p12)
}
  0xd2   : > { %s13444_s2 = scalar_lea.vmem %s889_s7, 16  ;;  %s13451_s22 = scalar_lea.vmem %s889_s7, 32 }
  0xd3   : > { %p13445_p1 = scmp.ne.s32.totalorder %s889_s7, %s13444_s2  ;;  %p13452_p13 = scmp.lt.s32.totalorder %s889_s7, %s889_s7 }
  0xd4   : > { %p13453_p0 = scmp.lt.s32.totalorder %s13451_s22, %s13444_s2 }
  0xd5   : > { %p13447_p3 = pnand %p13445_p1, %p14236_p8 }
  0xd6   : > { %p13454_p2 = por %p13453_p0, %p13452_p13 }
  0xd7   : > { %p13448_p4 = pneg %p13447_p3 }
  0xd9   : > { %p13455_p5 = pnand %p13454_p2, %p13448_p4 }
  0xdb   : > { %13458 = shalt.err (!%p13455_p5)
}
  0xdc   : > { %12858 = dma.hbm_to_vmem [thread:$0]  (!%p14224_p6), %s16522_s20, 16, %s889_s7, [#allocation21]  }
  0xdd   : > { %s13459_s3 = scalar_lea.hbm %s16529_s4, 16 }
  0xde   : > { %p13460_p7 = scmp.ne.s32.totalorder %s16529_s4, %s13459_s3  ;;  %p13466_p11 = scmp.lt.u32.totalorder %s13459_s3, %s16529_s4 }
  0xe0   : > { %p13462_p9 = pnand %p13460_p7, %p14236_p8 }
  0xe2   : > { %p13463_p10 = pneg %p13462_p9 }
  0xe4   : > { %p13468_p12 = pnand %p13466_p11, %p13463_p10 }
  0xe6   : > { %13471 = shalt.err (!%p13468_p12)
}
  0xe7   : > { %s13472_s23 = scalar_lea.vmem %s913_s10, 16  ;;  %s13479_s9 = scalar_lea.vmem %s913_s10, 32 }
  0xe8   : > { %p13473_p1 = scmp.ne.s32.totalorder %s913_s10, %s13472_s23  ;;  %p13480_p13 = scmp.lt.s32.totalorder %s913_s10, %s913_s10 }
  0xe9   : > { %p13481_p0 = scmp.lt.s32.totalorder %s13479_s9, %s13472_s23 }
  0xea   : > { %p13475_p3 = pnand %p13473_p1, %p14236_p8 }
  0xeb   : > { %p13482_p2 = por %p13481_p0, %p13480_p13 }
  0xec   : > { %p13476_p4 = pneg %p13475_p3 }
  0xee   : > { %p13483_p5 = pnand %p13482_p2, %p13476_p4 }
  0xf0   : > { %13486 = shalt.err (!%p13483_p5)
}
  0xf1   : > { %12864 = dma.hbm_to_vmem [thread:$0]  (!%p14224_p6), %s16529_s4, 16, %s913_s10, [#allocation24]  }
  0xf2   : > { %s14004_s7 = smov [#allocation26]   ;;  %s14005_s2 = smov [#allocation29]  }
  0xf3   : > { %s942_s5 = sshll.u32 %s14004_s7, 4  ;;  %s964_s22 = sshll.u32 %s14005_s2, 4  ;;  %s943_s5 = int_to_ptr.vmem [resolvable:$true] %s942_s5  ;;  %s965_s22 = int_to_ptr.vmem [resolvable:$true] %s964_s22 }
  0xf4   : > { %s13487_s3 = scalar_lea.hbm %s16521_s21, 16 }
  0xf5   : > { %p13488_p7 = scmp.ne.s32.totalorder %s16521_s21, %s13487_s3  ;;  %p13494_p11 = scmp.lt.u32.totalorder %s13487_s3, %s16521_s21 }
  0xf7   : > { %p13490_p9 = pnand %p13488_p7, %p14236_p8 }
  0xf9   : > { %p13491_p10 = pneg %p13490_p9 }
  0xfb   : > { %p13496_p12 = pnand %p13494_p11, %p13491_p10 }
  0xfd   : > { %13499 = shalt.err (!%p13496_p12)
}
  0xfe   : > { %s13500_s23 = scalar_lea.vmem %s943_s5, 16  ;;  %s13507_s10 = scalar_lea.vmem %s943_s5, 32 }
  0xff   : > { %p13501_p1 = scmp.ne.s32.totalorder %s943_s5, %s13500_s23  ;;  %p13508_p13 = scmp.lt.s32.totalorder %s943_s5, %s943_s5 }
 0x100   : > { %p13509_p0 = scmp.lt.s32.totalorder %s13507_s10, %s13500_s23 }
 0x101   : > { %p13503_p3 = pnand %p13501_p1, %p14236_p8 }
 0x102   : > { %p13510_p2 = por %p13509_p0, %p13508_p13 }
 0x103   : > { %p13504_p4 = pneg %p13503_p3 }
 0x105   : > { %p13511_p5 = pnand %p13510_p2, %p13504_p4 }
 0x107   : > { %13514 = shalt.err (!%p13511_p5)
}
 0x108   : > { %12870 = dma.hbm_to_vmem [thread:$0]  (!%p14224_p6), %s16521_s21, 16, %s943_s5, [#allocation27]  }
 0x109   : > { %s13515_s9 = scalar_lea.hbm %s16527_s8, 16 }
 0x10a   : > { %p13516_p7 = scmp.ne.s32.totalorder %s16527_s8, %s13515_s9  ;;  %p13522_p11 = scmp.lt.u32.totalorder %s13515_s9, %s16527_s8 }
 0x10c   : > { %p13518_p9 = pnand %p13516_p7, %p14236_p8 }
 0x10e   : > { %p13519_p10 = pneg %p13518_p9 }
 0x110   : > { %p13524_p12 = pnand %p13522_p11, %p13519_p10 }
 0x112   : > { %13527 = shalt.err (!%p13524_p12)
}
 0x113   : > { %s13528_s7 = scalar_lea.vmem %s965_s22, 16  ;;  %s13535_s2 = scalar_lea.vmem %s965_s22, 32 }
 0x114   : > { %p13529_p1 = scmp.ne.s32.totalorder %s965_s22, %s13528_s7  ;;  %p13536_p13 = scmp.lt.s32.totalorder %s965_s22, %s965_s22 }
 0x115   : > { %p13537_p0 = scmp.lt.s32.totalorder %s13535_s2, %s13528_s7 }
 0x116   : > { %p13531_p3 = pnand %p13529_p1, %p14236_p8 }
 0x117   : > { %p13538_p2 = por %p13537_p0, %p13536_p13 }
 0x118   : > { %p13532_p4 = pneg %p13531_p3 }
 0x11a   : > { %p13539_p5 = pnand %p13538_p2, %p13532_p4 }
 0x11c   : > { %13542 = shalt.err (!%p13539_p5)
}
 0x11d   : > { %12876 = dma.hbm_to_vmem [thread:$0]  (!%p14224_p6), %s16527_s8, 16, %s965_s22, [#allocation30]  }
 0x11e   : > { %s14006_s5 = smov [#allocation10]   ;;  %s14007_s23 = smov [#allocation13]  }
 0x11f   : > { %s798_s3 = sshll.u32 %s14006_s5, 4  ;;  %s826_s10 = sshll.u32 %s14007_s23, 4  ;;  %s799_s3 = int_to_ptr.vmem [resolvable:$true] %s798_s3  ;;  %s827_s10 = int_to_ptr.vmem [resolvable:$true] %s826_s10 }
 0x120   : > { %s13543_s9 = scalar_lea.hbm %s14058_s25, 16 }
 0x121   : > { %p13544_p7 = scmp.ne.s32.totalorder %s14058_s25, %s13543_s9  ;;  %p13550_p11 = scmp.lt.u32.totalorder %s13543_s9, %s14058_s25 }
 0x123   : > { %p13546_p9 = pnand %p13544_p7, %p14236_p8 }
 0x125   : > { %p13547_p10 = pneg %p13546_p9 }
 0x127   : > { %p13552_p12 = pnand %p13550_p11, %p13547_p10 }
 0x129   : > { %13555 = shalt.err (!%p13552_p12)
}
 0x12a   : > { %s13556_s7 = scalar_lea.vmem %s799_s3, 16  ;;  %s13563_s22 = scalar_lea.vmem %s799_s3, 32 }
 0x12b   : > { %p13557_p1 = scmp.ne.s32.totalorder %s799_s3, %s13556_s7  ;;  %p13564_p13 = scmp.lt.s32.totalorder %s799_s3, %s799_s3 }
 0x12c   : > { %p13565_p0 = scmp.lt.s32.totalorder %s13563_s22, %s13556_s7 }
 0x12d   : > { %p13559_p3 = pnand %p13557_p1, %p14236_p8 }
 0x12e   : > { %p13566_p2 = por %p13565_p0, %p13564_p13 }
 0x12f   : > { %p13560_p4 = pneg %p13559_p3 }
 0x131   : > { %p13567_p5 = pnand %p13566_p2, %p13560_p4 }
 0x133   : > { %13570 = shalt.err (!%p13567_p5)
}
 0x134   : > { %12837 = dma.hbm_to_vmem [thread:$0]  (!%p14224_p6), %s14058_s25, 16, %s799_s3, [#allocation9]  }
 0x135   : > { %s13571_s2 = scalar_lea.hbm %s16524_s14, 16 }
 0x136   : > { %p13572_p7 = scmp.ne.s32.totalorder %s16524_s14, %s13571_s2  ;;  %p13578_p11 = scmp.lt.u32.totalorder %s13571_s2, %s16524_s14 }
 0x138   : > { %p13574_p9 = pnand %p13572_p7, %p14236_p8 }
 0x13a   : > { %p13575_p10 = pneg %p13574_p9 }
 0x13c   : > { %p13580_p12 = pnand %p13578_p11, %p13575_p10 }
 0x13e   : > { %13583 = shalt.err (!%p13580_p12)
}
 0x13f   : > { %s13584_s5 = scalar_lea.vmem %s827_s10, 16  ;;  %s13591_s23 = scalar_lea.vmem %s827_s10, 32 }
 0x140   : > { %p13585_p1 = scmp.ne.s32.totalorder %s827_s10, %s13584_s5  ;;  %p13592_p13 = scmp.lt.s32.totalorder %s827_s10, %s827_s10 }
 0x141   : > { %p13593_p0 = scmp.lt.s32.totalorder %s13591_s23, %s13584_s5 }
 0x142   : > { %p13587_p3 = pnand %p13585_p1, %p14236_p8 }
 0x143   : > { %p13594_p2 = por %p13593_p0, %p13592_p13 }
 0x144   : > { %p13588_p4 = pneg %p13587_p3 }
 0x146   : > { %p13595_p5 = pnand %p13594_p2, %p13588_p4 }
 0x148   : > { %13598 = shalt.err (!%p13595_p5)
}
 0x149   : > { %12843 = dma.hbm_to_vmem [thread:$0]  (!%p14224_p6), %s16524_s14, 16, %s827_s10, [#allocation12]  }
 0x14a   : > { %s14008_s3 = smov [#allocation16]   ;;  %s13599_s7 = scalar_lea.hbm %s14093_s30, 512 }
 0x14b   : > { %s850_s9 = sshll.u32 %s14008_s3, 4  ;;  %p13600_p7 = scmp.ne.s32.totalorder %s14093_s30, %s13599_s7  ;;  %s851_s9 = int_to_ptr.vmem [resolvable:$true] %s850_s9 }
 0x14c   : > { %p13606_p11 = scmp.lt.u32.totalorder %s13599_s7, %s14093_s30 }
 0x14d   : > { %p13602_p9 = pnand %p13600_p7, %p14236_p8 }
 0x14f   : > { %p13603_p10 = pneg %p13602_p9 }
 0x151   : > { %p13608_p12 = pnand %p13606_p11, %p13603_p10 }
 0x153   : > { %13611 = shalt.err (!%p13608_p12)
}
 0x154   : > { %s13612_s22 = scalar_lea.vmem %s851_s9, 512  ;;  %p13620_p13 = scmp.lt.s32.totalorder %s851_s9, %s851_s9 }
 0x155   : > { %p13613_p1 = scmp.ne.s32.totalorder %s851_s9, %s13612_s22  ;;  %p13621_p0 = scmp.lt.s32.totalorder %s13612_s22, %s13612_s22 }
 0x157   : > { %p13615_p3 = pnand %p13613_p1, %p14236_p8  ;;  %p13622_p2 = por %p13621_p0, %p13620_p13 }
 0x159   : > { %p13616_p4 = pneg %p13615_p3 }
 0x15b   : > { %p13623_p5 = pnand %p13622_p2, %p13616_p4 }
 0x15d   : > { %13626 = shalt.err (!%p13623_p5)
}
 0x15e   : > { %s14009_s10 = smov 128   ;;  %s14010_s2 = smov 8  }
 0x15f   : > { %12849 = dma.hbm_to_vmem [thread:$0]  (!%p14224_p6), %s14093_s30, 512, %s851_s9, [#allocation15], %s14009_s10, %s14009_s10, %s14010_s2  }
 0x160   : > { %s14011_s5 = smov [#allocation19]   ;;  %s14012_s3 = smov [#allocation22]  }
 0x161   : > { %s874_s23 = sshll.u32 %s14011_s5, 4  ;;  %s898_s7 = sshll.u32 %s14012_s3, 4  ;;  %s875_s23 = int_to_ptr.vmem [resolvable:$true] %s874_s23  ;;  %s14378_s7 = int_to_ptr.vmem [resolvable:$true] %s898_s7 }
 0x162   : > { %s13627_s22 = scalar_lea.hbm %s16526_s12, 512 }
 0x163   : > { %p13628_p7 = scmp.ne.s32.totalorder %s16526_s12, %s13627_s22  ;;  %p13634_p11 = scmp.lt.u32.totalorder %s13627_s22, %s16526_s12 }
 0x165   : > { %p13630_p9 = pnand %p13628_p7, %p14236_p8 }
 0x167   : > { %p13631_p10 = pneg %p13630_p9 }
 0x169   : > { %p13636_p12 = pnand %p13634_p11, %p13631_p10 }
 0x16b   : > { %13639 = shalt.err (!%p13636_p12)
}
 0x16c   : > { %s13640_s4 = scalar_lea.vmem %s875_s23, 512  ;;  %p13648_p13 = scmp.lt.s32.totalorder %s875_s23, %s875_s23 }
 0x16d   : > { %p13641_p1 = scmp.ne.s32.totalorder %s875_s23, %s13640_s4  ;;  %p13649_p0 = scmp.lt.s32.totalorder %s13640_s4, %s13640_s4 }
 0x16f   : > { %p13643_p3 = pnand %p13641_p1, %p14236_p8  ;;  %p13650_p2 = por %p13649_p0, %p13648_p13 }
 0x171   : > { %p13644_p4 = pneg %p13643_p3 }
 0x173   : > { %p13651_p5 = pnand %p13650_p2, %p13644_p4 }
 0x175   : > { %13654 = shalt.err (!%p13651_p5)
}
 0x176   : > { %12855 = dma.hbm_to_vmem [thread:$0]  (!%p14224_p6), %s16526_s12, 512, %s875_s23, [#allocation18], %s14009_s10, %s14009_s10, %s14010_s2  }
 0x177   : > { %s13655_s9 = scalar_lea.hbm %s14113_s27, 512 }
 0x178   : > { %p13656_p7 = scmp.ne.s32.totalorder %s14113_s27, %s13655_s9  ;;  %p13662_p11 = scmp.lt.u32.totalorder %s13655_s9, %s14113_s27 }
 0x17a   : > { %p13658_p9 = pnand %p13656_p7, %p14236_p8 }
 0x17c   : > { %p13659_p10 = pneg %p13658_p9 }
 0x17e   : > { %p13664_p12 = pnand %p13662_p11, %p13659_p10 }
 0x180   : > { %13667 = shalt.err (!%p13664_p12)
}
 0x181   : > { %s13668_s4 = scalar_lea.vmem %s14378_s7, 512  ;;  %p13676_p13 = scmp.lt.s32.totalorder %s14378_s7, %s14378_s7 }
 0x182   : > { %p13669_p1 = scmp.ne.s32.totalorder %s14378_s7, %s13668_s4  ;;  %p13677_p0 = scmp.lt.s32.totalorder %s13668_s4, %s13668_s4 }
 0x184   : > { %p13671_p3 = pnand %p13669_p1, %p14236_p8  ;;  %p13678_p2 = por %p13677_p0, %p13676_p13 }
 0x186   : > { %p13672_p4 = pneg %p13671_p3 }
 0x188   : > { %p13679_p5 = pnand %p13678_p2, %p13672_p4 }
 0x18a   : > { %13682 = shalt.err (!%p13679_p5)
}
 0x18b   : > { %s16534_s5 = sld [smem:[#allocation62_spill]]  ;;  %s14013_s23 = smov [#allocation25]  }
 0x18c   : > { %12861 = dma.hbm_to_vmem [thread:$0]  (!%p14224_p6), %s14113_s27, 512, %s14378_s7, [#allocation21], %s14009_s10, %s14009_s10, %s14010_s2  }
 0x18d   : > { %s922_s3 = sshll.u32 %s14013_s23, 4  ;;  %s14014_s22 = smov [#allocation28]   ;;  %s923_s3 = int_to_ptr.vmem [resolvable:$true] %s922_s3 }
 0x18e   : > { %s953_s9 = sshll.u32 %s14014_s22, 4  ;;  %s14411_s9 = int_to_ptr.vmem [resolvable:$true] %s953_s9 }
 0x191   : > { %s13683_s4 = scalar_lea.hbm %s16534_s5, 512 }
 0x192   : > { %p13684_p7 = scmp.ne.s32.totalorder %s16534_s5, %s13683_s4  ;;  %p13690_p11 = scmp.lt.u32.totalorder %s13683_s4, %s16534_s5 }
 0x194   : > { %p13686_p9 = pnand %p13684_p7, %p14236_p8 }
 0x196   : > { %p13687_p10 = pneg %p13686_p9 }
 0x198   : > { %p13692_p12 = pnand %p13690_p11, %p13687_p10 }
 0x19a   : > { %13695 = shalt.err (!%p13692_p12)
}
 0x19b   : > { %s13696_s6 = scalar_lea.vmem %s923_s3, 512  ;;  %p13704_p13 = scmp.lt.s32.totalorder %s923_s3, %s923_s3 }
 0x19c   : > { %p13697_p1 = scmp.ne.s32.totalorder %s923_s3, %s13696_s6  ;;  %p13705_p0 = scmp.lt.s32.totalorder %s13696_s6, %s13696_s6 }
 0x19e   : > { %p13699_p3 = pnand %p13697_p1, %p14236_p8  ;;  %p13706_p2 = por %p13705_p0, %p13704_p13 }
 0x1a0   : > { %p13700_p4 = pneg %p13699_p3 }
 0x1a2   : > { %p13707_p5 = pnand %p13706_p2, %p13700_p4 }
 0x1a4   : > { %13710 = shalt.err (!%p13707_p5)
}
 0x1a5   : > { %s16535_s7 = sld [smem:[#allocation66_spill]] }
 0x1a6   : > { %12867 = dma.hbm_to_vmem [thread:$0]  (!%p14224_p6), %s16534_s5, 512, %s923_s3, [#allocation24], %s14009_s10, %s14009_s10, %s14010_s2  }
 0x1ab   : > { %s13711_s23 = scalar_lea.hbm %s16535_s7, 16 }
 0x1ac   : > { %p13712_p7 = scmp.ne.s32.totalorder %s16535_s7, %s13711_s23  ;;  %p13718_p11 = scmp.lt.u32.totalorder %s13711_s23, %s16535_s7 }
 0x1ae   : > { %p13714_p9 = pnand %p13712_p7, %p14236_p8 }
 0x1b0   : > { %p13715_p10 = pneg %p13714_p9 }
 0x1b2   : > { %p13720_p12 = pnand %p13718_p11, %p13715_p10 }
 0x1b4   : > { %13723 = shalt.err (!%p13720_p12)
}
 0x1b5   : > { %s13724_s6 = scalar_lea.vmem %s14411_s9, 16  ;;  %s13731_s22 = scalar_lea.vmem %s14411_s9, 32 }
 0x1b6   : > { %p13725_p1 = scmp.ne.s32.totalorder %s14411_s9, %s13724_s6  ;;  %p13732_p13 = scmp.lt.s32.totalorder %s14411_s9, %s14411_s9 }
 0x1b7   : > { %p13733_p0 = scmp.lt.s32.totalorder %s13731_s22, %s13724_s6 }
 0x1b8   : > { %p13727_p3 = pnand %p13725_p1, %p14236_p8 }
 0x1b9   : > { %p13734_p2 = por %p13733_p0, %p13732_p13 }
 0x1ba   : > { %p13728_p4 = pneg %p13727_p3 }
 0x1bc   : > { %p13735_p5 = pnand %p13734_p2, %p13728_p4 }
 0x1be   : > { %13738 = shalt.err (!%p13735_p5)
}
 0x1bf   : > { %s16536_s10 = sld [smem:[#allocation68_spill]]  ;;  %s14015_s2 = smov [#allocation31]  }
 0x1c0   : > { %12873 = dma.hbm_to_vmem [thread:$0]  (!%p14224_p6), %s16535_s7, 16, %s14411_s9, [#allocation27]  }
 0x1c1   : > { %s975_s3 = sshll.u32 %s14015_s2, 4  ;;  %s14016_s4 = smov [#allocation32]   ;;  %s976_s3 = int_to_ptr.vmem [resolvable:$true] %s975_s3 }
 0x1c2   : > { %s986_s23 = sshll.u32 %s14016_s4, 4  ;;  %s14442_s23 = int_to_ptr.vmem [resolvable:$true] %s986_s23 }
 0x1c5   : > { %s13739_s6 = scalar_lea.hbm %s16536_s10, 16 }
 0x1c6   : > { %p13740_p7 = scmp.ne.s32.totalorder %s16536_s10, %s13739_s6  ;;  %p13746_p11 = scmp.lt.u32.totalorder %s13739_s6, %s16536_s10 }
 0x1c8   : > { %p13742_p9 = pnand %p13740_p7, %p14236_p8 }
 0x1ca   : > { %p13743_p10 = pneg %p13742_p9 }
 0x1cc   : > { %p13748_p12 = pnand %p13746_p11, %p13743_p10 }
 0x1ce   : > { %13751 = shalt.err (!%p13748_p12)
}
 0x1cf   : > { %s13752_s22 = scalar_lea.vmem %s976_s3, 16  ;;  %s13759_s9 = scalar_lea.vmem %s976_s3, 32 }
 0x1d0   : > { %p13753_p1 = scmp.ne.s32.totalorder %s976_s3, %s13752_s22  ;;  %p13760_p13 = scmp.lt.s32.totalorder %s976_s3, %s976_s3 }
 0x1d1   : > { %p13761_p0 = scmp.lt.s32.totalorder %s13759_s9, %s13752_s22 }
 0x1d2   : > { %p13755_p3 = pnand %p13753_p1, %p14236_p8 }
 0x1d3   : > { %p13762_p2 = por %p13761_p0, %p13760_p13 }
 0x1d4   : > { %p13756_p4 = pneg %p13755_p3 }
 0x1d6   : > { %p13763_p5 = pnand %p13762_p2, %p13756_p4 }
 0x1d8   : > { %13766 = shalt.err (!%p13763_p5)
}
 0x1d9   : > { %s16537_s2 = sld [smem:[#allocation69_spill]] }
 0x1da   : > { %12879 = dma.hbm_to_vmem [thread:$0]  (!%p14224_p6), %s16536_s10, 16, %s976_s3, [#allocation30]  }
 0x1df   : > { %s13767_s4 = scalar_lea.hbm %s16537_s2, 16 }
 0x1e0   : > { %p13768_p7 = scmp.ne.s32.totalorder %s16537_s2, %s13767_s4  ;;  %p13774_p11 = scmp.lt.u32.totalorder %s13767_s4, %s16537_s2 }
 0x1e2   : > { %p13770_p9 = pnand %p13768_p7, %p14236_p8 }
 0x1e4   : > { %p13771_p10 = pneg %p13770_p9 }
 0x1e6   : > { %p13776_p12 = pnand %p13774_p11, %p13771_p10 }
 0x1e8   : > { %13779 = shalt.err (!%p13776_p12)
}
 0x1e9   : > { %s13780_s6 = scalar_lea.vmem %s14442_s23, 16  ;;  %s13787_s22 = scalar_lea.vmem %s14442_s23, 32 }
 0x1ea   : > { %p13781_p1 = scmp.ne.s32.totalorder %s14442_s23, %s13780_s6  ;;  %p13788_p13 = scmp.lt.s32.totalorder %s14442_s23, %s14442_s23 }
 0x1eb   : > { %p13789_p0 = scmp.lt.s32.totalorder %s13787_s22, %s13780_s6 }
 0x1ec   : > { %p13783_p3 = pnand %p13781_p1, %p14236_p8 }
 0x1ed   : > { %p13790_p2 = por %p13789_p0, %p13788_p13 }
 0x1ee   : > { %p13784_p4 = pneg %p13783_p3 }
 0x1f0   : > { %p13791_p5 = pnand %p13790_p2, %p13784_p4 }
 0x1f2   : > { %13794 = shalt.err (!%p13791_p5)
}
 0x1f3   : > { %12882 = dma.hbm_to_vmem [thread:$0]  (!%p14224_p6), %s16537_s2, 16, %s14442_s23, [#allocation33]  }
 0x1f4   : > { %s10895_s1 = sadd.s32 4294967294, %s13965_s18   ;;  %s14472_s3 = sadd.s32 1, %s13965_s18  }
 0x1f5   : > { %s93_s11 = ssub.s32 %s13965_s18, %s14472_s3  ;;  %s96_s9 = sadd.s32 1, %s13961_s0 }
 0x1f6   : > { %s16538_s4 = sld [smem:[#allocation48_spill]]  ;;  %p94_p8 = scmp.eq.s32.totalorder %s93_s11, 0 }
 0x1f7   : > { %p103_p7 = scmp.ne.s32.totalorder %s13961_s0, %s13957_s16  ;;  %p104_p9 = scmp.eq.s32.totalorder %s13965_s18, 0 }
 0x1f8   : > { %p109_p10 = scmp.ne.s32.totalorder %s13957_s16, %s13953_s15  ;;  %s16539_s22 = sld [smem:[#allocation49_spill]] }
 0x1f9   : > { %s14483_s6 = scalar_select %p94_p8, %s13961_s0, %s96_s9  }
 0x1fa   : > { %p14485_p11 = por %p104_p9, %p103_p7  ;;  %p16541_p6 = scmp.eq.s32.totalorder %s14206_s26, 0 }
 0x1fb   : > { %p747_p1 = scmp.eq.s32.totalorder %s14206_s26, 1  ;;  %p753_p3 = scmp.eq.s32.totalorder %s10895_s1, 1 }
 0x1fc   : > { %p14491_p12 = por %p16541_p6, %p109_p10  ;;  %p12912_p4 = scmp.lt.s32.totalorder %s13965_s18, 2 }
 0x1fd   : > { %s1009_s11 = sand.u32 1, %s13961_s0   ;;  %p14498_p13 = por %p747_p1, %p103_p7 }
 0x1fe   : > { %s16542_s23 = scalar_select %p14491_p12, 1, 0 }
 0x1ff   : > { %s16543_s2 = scalar_select %p14498_p13, 1, 0 }
 0x200   : > { %p14502_p0 = por %p753_p3, %p109_p10  ;;  %s14506_s7 = sshll.u32 %s1009_s11, 3 }
 0x201   : > { %s10917_s8 = sshll.u32 %s13965_s18, 7  ;;  %s1013_s1 = scalar_lea.vmem [#allocation2], %s14506_s7 }
 0x202   : > { %s16544_s9 = scalar_select %p14502_p0, 1, 0 }
 0x203   : > { %s14510_s10 = scalar_lea.hbm %s16538_s4, %s10917_s8  ;;  %s1020_s12 = sshll.u32 %s1013_s1, 4  ;;  %s14513_s12 = int_to_ptr.vmem [resolvable:$true] %s1020_s12 }
 0x204   : > { %p14517_p2 = pnand %p12912_p4, %p14485_p11  ;;  %s14522_s14 = scalar_lea.hbm %s16539_s22, %s10917_s8 }
 0x205   : > { %s1010_s20 = scalar_lea.sflag [#allocation3], %s1009_s11  ;;  %s13795_s21 = scalar_lea.hbm %s14510_s10, 128 }
 0x206   : > { %p13796_p5 = scmp.ne.s32.totalorder %s14510_s10, %s13795_s21  ;;  %p13797_p8 = pneg %p14517_p2 }
 0x207   : > { %s13800_s1 = scalar_lea.hbm %s16538_s4, 256  ;;  %p13801_p10 = scmp.lt.u32.totalorder %s14510_s10, %s16538_s4 }
 0x208   : > { %p13798_p7 = pnand %p13797_p8, %p13796_p5  ;;  %p13802_p11 = scmp.lt.u32.totalorder %s13800_s1, %s13795_s21 }
 0x209   : > { %p13804_p1 = scmp.lt.u32.totalorder %s13795_s21, %s14510_s10 }
 0x20a   : > { %p13799_p9 = pneg %p13798_p7  ;;  %p13803_p6 = por %p13802_p11, %p13801_p10 }
 0x20c   : > { %p13805_p3 = por %p13804_p1, %p13803_p6 }
 0x20e   : > { %p13806_p4 = pnand %p13805_p3, %p13799_p9 }
 0x210   : > { %13809 = shalt.err (!%p13806_p4)
}
 0x211   : > { %s13810_s8 = scalar_lea.vmem %s14513_s12, 128  ;;  %s14017_s5 = smov [#allocation2]  }
 0x212   : > { %p13811_p0 = scmp.ne.s32.totalorder %s14513_s12, %s13810_s8  ;;  %s13815_s11 = sshll.u32 %s14017_s5, 4  ;;  %s13816_s11 = int_to_ptr.vmem [resolvable:$false] %s13815_s11 }
 0x213   : > { %s13817_s17 = scalar_lea.vmem %s13816_s11, 256  ;;  %p13818_p5 = scmp.lt.s32.totalorder %s14513_s12, %s13816_s11 }
 0x214   : > { %p13813_p13 = pnand %p13811_p0, %p13797_p8  ;;  %p13819_p7 = scmp.lt.s32.totalorder %s13817_s17, %s13810_s8 }
 0x216   : > { %p13814_p12 = pneg %p13813_p13  ;;  %p13820_p10 = por %p13819_p7, %p13818_p5 }
 0x218   : > { %p13821_p11 = pnand %p13820_p10, %p13814_p12 }
 0x21a   : > { %13824 = shalt.err (!%p13821_p11)
}
 0x21b   : > { %12886 = dma.hbm_to_vmem [thread:$0]  (!%p14517_p2), %s14510_s10, 128, %s14513_s12, %s1010_s20  }
 0x21c   : > { %s1031_s21 = scalar_lea.vmem [#allocation5], %s14506_s7  ;;  %s16546_s17 = sand.u32 1, %s13965_s18  }
 0x21d   : > { %s1038_s1 = sshll.u32 %s1031_s21, 4  ;;  %s1028_s8 = scalar_lea.sflag [#allocation6], %s16546_s17  ;;  %s1039_s1 = int_to_ptr.vmem [resolvable:$true] %s1038_s1 }
 0x21e   : > { %s13825_s5 = scalar_lea.hbm %s14522_s14, 128  ;;  %s13830_s11 = scalar_lea.hbm %s16539_s22, 256 }
 0x21f   : > { %p13826_p12 = scmp.ne.s32.totalorder %s14522_s14, %s13825_s5  ;;  %p13831_p9 = scmp.lt.u32.totalorder %s14522_s14, %s16539_s22 }
 0x220   : > { %p13832_p6 = scmp.lt.u32.totalorder %s13830_s11, %s13825_s5  ;;  %p13834_p3 = scmp.lt.u32.totalorder %s13825_s5, %s14522_s14 }
 0x221   : > { %p13828_p13 = pnand %p13826_p12, %p13797_p8 }
 0x222   : > { %p13833_p1 = por %p13832_p6, %p13831_p9 }
 0x223   : > { %p13829_p0 = pneg %p13828_p13 }
 0x224   : > { %p13835_p4 = por %p13834_p3, %p13833_p1 }
 0x226   : > { %p13836_p5 = pnand %p13835_p4, %p13829_p0 }
 0x228   : > { %13839 = shalt.err (!%p13836_p5)
}
 0x229   : > { %s13840_s12 = scalar_lea.vmem %s1039_s1, 128  ;;  %s14018_s20 = smov [#allocation5]  }
 0x22a   : > { %p13841_p7 = scmp.ne.s32.totalorder %s1039_s1, %s13840_s12  ;;  %s13845_s7 = sshll.u32 %s14018_s20, 4  ;;  %s13846_s7 = int_to_ptr.vmem [resolvable:$false] %s13845_s7 }
 0x22b   : > { %s13847_s10 = scalar_lea.vmem %s13846_s7, 256  ;;  %p13848_p12 = scmp.lt.s32.totalorder %s1039_s1, %s13846_s7 }
 0x22c   : > { %p13843_p10 = pnand %p13841_p7, %p13797_p8  ;;  %p13849_p13 = scmp.lt.s32.totalorder %s13847_s10, %s13840_s12 }
 0x22e   : > { %p13844_p11 = pneg %p13843_p10  ;;  %p13850_p6 = por %p13849_p13, %p13848_p12 }
 0x230   : > { %p13851_p9 = pnand %p13850_p6, %p13844_p11 }
 0x232   : > { %13854 = shalt.err (!%p13851_p9)
}
 0x233   : > { %12889 = dma.hbm_to_vmem [thread:$0]  (!%p14517_p2), %s14522_s14, 128, %s1039_s1, %s1028_s8  }
 0x234   : > { %p16547_p0 = scmp.ne.s32.totalorder %s16531_s28, 0 }
 0x236   : > { %1047 = sbr.rel (%p16547_p0) target bundleno = 40017 (0x9c51), region = 140 }
 0x23d   : > { %s14567_s21 = sand.u32 1, %s13957_s16   ;;  %p16548_p8 = scmp.ne.s32.totalorder %s16542_s23, 0 }
 0x23e   : > { %s14570_s17 = sshll.u32 %s14567_s21, 3  ;;  %s1050_s5 = scalar_lea.sflag [#allocation3], %s14567_s21 }
 0x23f   : > { %s1053_s11 = scalar_lea.vmem [#allocation2], %s14570_s17 }
 0x240   : > { %13900 = dma.done.wait (%p16548_p8), %s1050_s5, 128  }
 0x241   : > { %13902 = vsyncadd (%p16548_p8), %s1050_s5, 4294967168  ;;  %s1058_s13 = sand.u32 1, %s14206_s26   ;;  %s1062_s28 = scalar_lea.vmem [#allocation5], %s14570_s17 }
 0x242   : > { %s1059_s14 = scalar_lea.sflag [#allocation6], %s1058_s13 }
 0x243   : > { %13904 = dma.done.wait (%p16548_p8), %s1059_s14, 128  }
 0x244   : > { %13906 = vsyncadd (%p16548_p8), %s1059_s14, 4294967168  ;;  %p16549_p2 = scmp.eq.s32.totalorder %s14206_s26, 0 }
 0x246   : > { %13908 = dma.done.wait (%p16549_p2), [#allocation6], 128   ;;  %p16550_p1 = pmov %p16549_p2 }
 0x248   : > { %13910 = vsyncadd (%p16550_p1), [#allocation6], 4294967168  ;;  %p16551_p3 = pmov %p16550_p1 }
 0x249   : > { %p16552_p4 = pmov %p16550_p1 }
 0x24a   : > { %13912 = dma.done.wait (%p16551_p3), [#allocation9], 144  }
 0x24b   : > { %13914 = vsyncadd (%p16552_p4), [#allocation9], 4294967152  ;;  %p16553_p5 = pmov %p16550_p1 }
 0x24c   : > { %p16554_p7 = pmov %p16550_p1 }
 0x24d   : > { %13916 = dma.done.wait (%p16553_p5), [#allocation12], 32  }
 0x24e   : > { %13918 = vsyncadd (%p16554_p7), [#allocation12], 4294967264  ;;  %p16555_p10 = pmov %p16550_p1 }
 0x24f   : > { %p16556_p11 = pmov %p16550_p1 }
 0x250   : > { %13920 = dma.done.wait (%p16555_p10), [#allocation15], 528  }
 0x251   : > { %13922 = vsyncadd (%p16556_p11), [#allocation15], 4294966768  ;;  %p16557_p12 = pmov %p16550_p1 }
 0x252   : > { %p16558_p13 = pmov %p16550_p1 }
 0x253   : > { %13924 = dma.done.wait (%p16557_p12), [#allocation18], 528  }
 0x254   : > { %13926 = vsyncadd (%p16558_p13), [#allocation18], 4294966768  ;;  %p16559_p6 = pmov %p16550_p1 }
 0x255   : > { %p16560_p9 = pmov %p16550_p1 }
 0x256   : > { %13928 = dma.done.wait (%p16559_p6), [#allocation21], 528  }
 0x257   : > { %13930 = vsyncadd (%p16560_p9), [#allocation21], 4294966768  ;;  %p16561_p0 = pmov %p16550_p1 }
 0x259   : > { %13932 = dma.done.wait (%p16561_p0), [#allocation24], 528   ;;  %p16562_p8 = pmov %p16561_p0 }
 0x25a   : > { %p16563_p2 = pmov %p16561_p0 }
 0x25b   : > { %13934 = vsyncadd (%p16562_p8), [#allocation24], 4294966768 }
 0x25c   : > { %13936 = dma.done.wait (%p16563_p2), [#allocation27], 32   ;;  %p16564_p1 = pmov %p16561_p0 }
 0x25d   : > { %p16565_p3 = pmov %p16561_p0 }
 0x25e   : > { %13938 = vsyncadd (%p16564_p1), [#allocation27], 4294967264 }
 0x25f   : > { %13940 = dma.done.wait (%p16565_p3), [#allocation30], 32   ;;  %p16566_p4 = pmov %p16561_p0 }
 0x260   : > { %p16567_p5 = pmov %p16561_p0 }
 0x261   : > { %13942 = vsyncadd (%p16566_p4), [#allocation30], 4294967264 }
 0x262   : > { %13944 = dma.done.wait (%p16567_p5), [#allocation33], 16   ;;  %p16568_p7 = pmov %p16561_p0 }
 0x263   : > { %s16569_s23 = sld [smem:[#allocation52_spill]]  ;;  %s16570_s1 = sld [smem:[#allocation53_spill]]  ;;  %v16485_v0 = vmov 0.0   ;;  %vm14020_vm0 = vmmov 0   ;;  %v14641_v7 = vld [vmem:[%s1053_s11] sm:$0xff]  ;;  %vm1314_vm1 = vcmask 261120  }
 0x264   : > { %13946 = vsyncadd (%p16568_p7), [#allocation33], 4294967280  ;;  %11558 = vmatprep.subr.bf16.mxu1 %v16485_v0  ;;  %11562 = vmatprep.mubr.msk.bf16.mxu1 %vm14020_vm0, %v16485_v0  ;;  %v1307_v10 = vpack.c.bf16 %v14641_v7, %v14641_v7  ;;  %v10942_v19 = vld [vmem:[#allocation10] ss:$0 sm:$0xff]  ;;  %v10944_v20 = vld [vmem:[#allocation11] ss:$0 sm:$0xff] }
 0x265   : > { %11574 = vmatprep.subr.bf16.mxu0 %v16485_v0  ;;  %11578 = vmatprep.mubr.msk.bf16.mxu0 %vm14020_vm0, %v16485_v0  ;;  %s16571_s8 = sld [smem:[#allocation55_spill]]  ;;  %vm1454_vm2 = vcmask 64512   ;;  %s14021_s12 = smov 120   ;;  %v14701_v40 = vld [vmem:[#allocation7] sm:$0xff]  ;;  %v10946_v62 = vld [vmem:[#allocation13] ss:$0 sm:$0xff] }
 0x266   : > { %vm1516_vm3 = vcmask 1043456   ;;  %s14022_s20 = smov 112   ;;  %s16572_s7 = sld [smem:[#allocation57_spill]]  ;;  %vm2989_vm4 = vcmask 523264  }
 0x267   : > { %s14023_s10 = smov 104   ;;  %s16573_s5 = sld [smem:[#allocation64_spill]] }
 0x268   : > { %s16576_s11 = sld [smem:[#allocation63_spill]]  ;;  %s16577_s13 = sld [smem:[#allocation70_spill]] }
 0x269   : > { %v1221_v1 = vld [vmem:[%s16569_s23] sm:$0xff]  ;;  %v1222_v2 = vld [vmem:[%s16569_s23 + $0x8] sm:$0xff]  ;;  %v1223_v3 = vld [vmem:[%s16569_s23 + $0x10] sm:$0xff]  ;;  %s16578_s14 = sld [smem:[#allocation71_spill]]  ;;  %s10588_s4 = scalar_lea.sflag [#allocation4], %s14567_s21 }
 0x26a   : > { %v14633_v4 = vpack.c.bf16 %v1222_v2, %v1221_v1  ;;  %v1224_v5 = vld [vmem:[%s16569_s23 + $0x18] sm:$0xff]  ;;  %v1228_v8 = vld [vmem:[%s16570_s1] sm:$0xff]  ;;  %v1229_v9 = vld [vmem:[%s16570_s1 + $0x8] sm:$0xff]  ;;  %p16584_p11 = scmp.ne.s32.totalorder %s16543_s2, 0 }
 0x26b   : > { %v14637_v6 = vpack.c.bf16 %v1224_v5, %v1223_v3  ;;  %v14649_v11 = vpack.c.bf16 %v1229_v9, %v1228_v8  ;;  %v1230_v12 = vld [vmem:[%s16570_s1 + $0x10] sm:$0xff]  ;;  %v1231_v13 = vld [vmem:[%s16570_s1 + $0x18] sm:$0xff]  ;;  %v1235_v31 = vld [vmem:[%s16571_s8] sm:$0xff] }
 0x26c   : > { %11559 = vmatpush3.bf16.msra.mxu1 %v14633_v4  ;;  %v14656_v14 = vpack.c.bf16 %v1231_v13, %v1230_v12  ;;  %v1236_v32 = vld [vmem:[%s16571_s8 + $0x8] sm:$0xff]  ;;  %v1237_v33 = vld [vmem:[%s16571_s8 + $0x10] sm:$0xff]  ;;  %v1238_v35 = vld [vmem:[%s16571_s8 + $0x18] sm:$0xff] }
 0x26d   : > { %11560 = vmatprep.subr.bf16.mxu1 %v16485_v0  ;;  %v14684_v34 = vpack.c.bf16 %v1236_v32, %v1235_v31  ;;  %v14688_v36 = vpack.c.bf16 %v1238_v35, %v1237_v33 }
 0x26f   : > { %11575 = vmatpush3.bf16.msra.mxu0 %v14684_v34 }
 0x270   : > { %11561 = vmatpush3.bf16.msra.mxu1 %v14637_v6  ;;  %11576 = vmatprep.subr.bf16.mxu0 %v16485_v0 }
 0x271   : > { %11566 = vmatprep.subr.bf16.mxu1 %v16485_v0 }
 0x273   : > { %11563 = vmatmul.mubr.msk.bf16.vlgmr.msra.gmra.mrb[0].mxu1 %vm1314_vm1, %v1307_v10  ;;  %11577 = vmatpush3.bf16.msra.mxu0 %v14688_v36 }
 0x274   : > { %11567 = vmatpush3.bf16.msra.mxu1 %v14649_v11  ;;  %11570 = vmatprep.mubr.msk.bf16.mxu1 %vm14020_vm0, %v16485_v0 }
 0x275   : > { %11568 = vmatprep.subr.bf16.mxu1 %v16485_v0  ;;  %11588 = vmatprep.subr.bf16.mxu0 %v16485_v0 }
 0x276   : > { %11579 = vmatmul.mubr.msk.bf16.vlgmr.msra.gmra.mrb[0].mxu0 %vm1314_vm1, %v1307_v10 }
 0x277   : > { %11590 = vmatprep.mubr.msk.bf16.mxu0 %vm14020_vm0, %v16485_v0 }
 0x278   : > { %11569 = vmatpush3.bf16.msra.mxu1 %v14656_v14 }
 0x279   : > { %11582 = vmatprep.subr.bf16.mxu1 %v16485_v0 }
 0x27b   : > { %11571 = vmatmul.mubr.msk.bf16.vlgmr.msra.gmra.mrb[4].mxu1 %vm1314_vm1, %v1307_v10 }
 0x27c   : > { %11584 = vmatprep.mubr.msk.bf16.mxu1 %vm14020_vm0, %v16485_v0 }
 0x346   : > { %v1352_v15 = vpop.f32.mrb[0].mxu1 }
 0x347   : > { %v11564_v16 = vpop.f32.mrb[1].mxu1  ;;  %v1353_v21 = vadd.f32 %v10942_v19, %v1352_v15 }
 0x348   : > { %v1355_v17 = vpop.f32.mrb[2].mxu1 }
 0x349   : > { %v11565_v18 = vpop.f32.mrb[3].mxu1  ;;  %v1450_v26 = vmul.f32 0.35355338, %v1353_v21  ;;  %v1444_v56 = vpop.f32.mrb[0].mxu0  ;;  %v1243_v17 = vld [vmem:[%s16572_s7 + $0x8] sm:$0xff] }
 0x34a   : > { %v11580_v57 = vpop.f32.mrb[1].mxu0  ;;  %v1445_v63 = vadd.f32 %v10946_v62, %v1444_v56  ;;  %v1247_v18 = vpack.c.bf16 %v1243_v17, %v1243_v17 }
 0x34b   : > { %v14672_v30 = vpack.c.bf16 %v1450_v26, %v1450_v26  ;;  %v1447_v58 = vpop.f32.mrb[2].mxu0 }
 0x34c   : > { %v11581_v59 = vpop.f32.mrb[3].mxu0  ;;  %v14708_v1 = vpack.c.bf16 %v1445_v63, %v1445_v63  ;;  %v14727_v19 = vsel %vm1516_vm3, %v1247_v18, 0 }
 0x34e   : > { %v1398_v22 = vpop.f32.mrb[4].mxu1  ;;  %v1518_v2 = vsel %vm1516_vm3, %v14708_v1, 0 }
 0x34f   : > { %v1399_v23 = vadd.f32 %v10944_v20, %v1398_v22  ;;  %v11572_v24 = vpop.f32.mrb[5].mxu1  ;;  %11589 = vmatpush3.bf16.msra.mxu0 %v1518_v2 }
 0x350   : > { %v1401_v25 = vpop.f32.mrb[6].mxu1  ;;  %11600 = vmatprep.subr.bf16.mxu0 %v16485_v0 }
 0x351   : > { %v14666_v27 = vpack.c.bf16 %v1399_v23, %v1399_v23  ;;  %v11573_v28 = vpop.f32.mrb[7].mxu1  ;;  %v1242_v23 = vld [vmem:[%s16572_s7] sm:$0xff] }
 0x352   : > { %v1246_v24 = vpack.c.bf16 %v1242_v23, %v1242_v23 }
 0x353   : > { %1565 = vrot.lane.b32.xlu0 %v14666_v27, %s14021_s12  ;;  %v1459_v29 = vsel %vm1454_vm2, %v14666_v27, 0 }
 0x354   : > { %11583 = vmatpush3.bf16.xpose.msra.mxu1 %v1459_v29  ;;  %v14735_v29 = vsel %vm1516_vm3, %v1246_v24, 0 }
 0x355   : > { %11594 = vmatprep.subr.bf16.mxu1 %v16485_v0 }
 0x357   : > { %1562 = vrot.lane.b32.xlu0 %v14672_v30, %s14021_s12 }
 0x35b   : > { %11585 = vmatmul.mubr.msk.bf16.vlgmr.msra.gmra.mrb[8].mxu1 %vm1454_vm2, %v14672_v30 }
 0x35c   : > { %11596 = vmatprep.mubr.msk.bf16.mxu1 %vm14020_vm0, %v16485_v0 }
 0x3c5   : > { %v1566_v37 = vpop.permute.xlu0 %1565 }
 0x3c6   : > { %v1571_v38 = vsel %vm1454_vm2, %v1566_v37, 0 }
 0x3c7   : > { %11595 = vmatpush3.bf16.xpose.msra.mxu1 %v1571_v38 }
 0x3c8   : > { %11606 = vmatprep.subr.bf16.mxu1 %v16485_v0 }
 0x3c9   : > { %v1563_v39 = vpop.permute.xlu0 %1562 }
 0x3ce   : > { %11597 = vmatmul.mubr.msk.bf16.vlgmr.msra.gmra.mrb[12].mxu1 %vm1454_vm2, %v1563_v39 }
 0x3cf   : > { %11608 = vmatprep.mubr.msk.bf16.mxu1 %vm14020_vm0, %v16485_v0  ;;  %11607 = vmatpush3.bf16.msra.mxu1 %v14727_v19 }
 0x3d0   : > { %11618 = vmatprep.subr.bf16.mxu1 %v16485_v0 }
 0x42e   : > { %v1495_v41 = vpop.f32.mrb[8].mxu1 }
 0x42f   : > { %v11586_v42 = vpop.f32.mrb[9].mxu1  ;;  %v1496_v43 = vadd.f32 %v1495_v41, %v14701_v40 }
 0x430   : > { %v1498_v44 = vpop.f32.mrb[10].mxu1 }
 0x431   : > { %v11587_v45 = vpop.f32.mrb[11].mxu1  ;;  %v1501_v46 = vsel %vm1454_vm2, %v1496_v43, -inf }
 0x432   : > { %1502 = vmax.xlane.f32.xlu1 %v1501_v46 }
 0x4a1   : > { %v1607_v47 = vpop.f32.mrb[12].mxu1 }
 0x4a2   : > { %v11598_v48 = vpop.f32.mrb[13].mxu1  ;;  %v1608_v49 = vadd.f32 %v1607_v47, %v14701_v40 }
 0x4a3   : > { %v1610_v50 = vpop.f32.mrb[14].mxu1 }
 0x4a4   : > { %v11599_v51 = vpop.f32.mrb[15].mxu1  ;;  %v1613_v52 = vsel %vm1454_vm2, %v1608_v49, -inf }
 0x4a5   : > { %1614 = vmax.xlane.f32.xlu1 %v1613_v52 }
 0x4bf   : > { %v1503_v53 = vpop.xlane.xlu1 %1502 }
 0x4c0   : > { %v1504_v54 = vsub.f32 %v1496_v43, %v1503_v53 }
 0x4c2   : > { %v1505_v55 = vmul.f32 1.442695, %v1504_v54 }
 0x4c4   : > { %13019 = vpow2.f32 %v1505_v55 }
 0x4ce   : > { %v13020_v60 = vpop.eup %13019 }
 0x4cf   : > { %v1507_v61 = vsel %vm1454_vm2, %v13020_v60, 0.0 }
 0x4d0   : > { %1508 = vadd.xlane.f32.xlu0 %v1507_v61 }
 0x4e6   : > { %1829 = vrot.lane.b32.xlu0 %v14708_v1, %s14022_s20 }
 0x532   : > { %v1615_v3 = vpop.xlane.xlu1 %1614 }
 0x533   : > { %v1616_v5 = vsub.f32 %v1608_v49, %v1615_v3 }
 0x535   : > { %v1617_v8 = vmul.f32 1.442695, %v1616_v5 }
 0x537   : > { %13021 = vpow2.f32 %v1617_v8 }
 0x541   : > { %v13022_v9 = vpop.eup %13021 }
 0x542   : > { %v1619_v10 = vsel %vm1454_vm2, %v13022_v9, 0.0 }
 0x543   : > { %1620 = vadd.xlane.f32.xlu1 %v1619_v10 }
 0x554   : > { %1626 = vrot.lane.b32.xlu1 %v14708_v1, %s14021_s12 }
 0x558   : > { %1769 = vrot.lane.b32.xlu1 %v14666_v27, %s14022_s20 }
 0x55c   : > { %1767 = vrot.lane.b32.xlu1 %v14672_v30, %s14022_s20 }
 0x55d   : > { %v1509_v12 = vpop.xlane.xlu0 %1508 }
 0x55e   : > { %13023 = vrcp.f32 %v1509_v12 }
 0x561   : > { %v1830_v31 = vpop.permute.xlu0 %1829 }
 0x562   : > { %v1835_v38 = vsel %vm1516_vm3, %v1830_v31, 0 }
 0x568   : > { %v13024_v13 = vpop.eup %13023 }
 0x569   : > { %v1511_v15 = vmul.f32 %v13024_v13, %v13020_v60 }
 0x56b   : > { %v1512_v16 = vpack.c.bf16 %v1511_v15, %v1511_v15 }
 0x56d   : > { %11591 = vmatmul.mubr.msk.bf16.vlgmr.msra.gmra.mrb[4].mxu0 %vm1454_vm2, %v1512_v16 }
 0x56e   : > { %11602 = vmatprep.mubr.msk.bf16.mxu0 %vm14020_vm0, %v16485_v0 }
 0x5d0   : > { %v1621_v20 = vpop.xlane.xlu1 %1620 }
 0x5d1   : > { %13025 = vrcp.f32 %v1621_v20 }
 0x5d4   : > { %v1627_v21 = vpop.permute.xlu1 %1626 }
 0x5d5   : > { %v1632_v22 = vsel %vm1516_vm3, %v1627_v21, 0 }
 0x5d6   : > { %11601 = vmatpush3.bf16.msra.mxu0 %v1632_v22 }
 0x5d7   : > { %11612 = vmatprep.subr.bf16.mxu0 %v16485_v0 }
 0x5d8   : > { %v1770_v41 = vpop.permute.xlu1 %1769 }
 0x5d9   : > { %v1775_v46 = vsel %vm1454_vm2, %v1770_v41, 0 }
 0x5db   : > { %v13026_v25 = vpop.eup %13025 }
 0x5dc   : > { %v1623_v26 = vmul.f32 %v13026_v25, %v13022_v9  ;;  %v1768_v48 = vpop.permute.xlu1 %1767 }
 0x5de   : > { %v1624_v28 = vpack.c.bf16 %v1623_v26, %v1623_v26 }
 0x5e0   : > { %11603 = vmatmul.mubr.msk.bf16.vlgmr.msra.gmra.mrb[8].mxu0 %vm1454_vm2, %v1624_v28 }
 0x5e1   : > { %11613 = vmatpush3.bf16.msra.mxu0 %v14735_v29  ;;  %11614 = vmatprep.mubr.msk.bf16.mxu0 %vm14020_vm0, %v16485_v0 }
 0x5e2   : > { %11624 = vmatprep.subr.bf16.mxu0 %v16485_v0 }
 0x640   : > { %v1554_v32 = vpop.f32.mrb[4].mxu0 }
 0x641   : > { %v1560_v33 = vpack.c.bf16 %v1554_v32, %v1554_v32  ;;  %v11592_v35 = vpop.f32.mrb[5].mxu0 }
 0x642   : > { %v1557_v37 = vpop.f32.mrb[6].mxu0 }
 0x643   : > { %v11593_v39 = vpop.f32.mrb[7].mxu0  ;;  %11615 = vmatmul.mubr.msk.bf16.vlgmr.msra.gmra.mrb[12].mxu0 %vm1454_vm2, %v1560_v33 }
 0x644   : > { %11625 = vmatpush3.bf16.msra.mxu0 %v1835_v38  ;;  %11626 = vmatprep.mubr.msk.bf16.mxu0 %vm14020_vm0, %v16485_v0 }
 0x645   : > { %11636 = vmatprep.subr.bf16.mxu0 %v16485_v0 }
 0x6b3   : > { %v1668_v42 = vpop.f32.mrb[8].mxu0 }
 0x6b4   : > { %v1674_v43 = vpack.c.bf16 %v1668_v42, %v1668_v42  ;;  %v11604_v44 = vpop.f32.mrb[9].mxu0 }
 0x6b5   : > { %v1671_v45 = vpop.f32.mrb[10].mxu0 }
 0x6b6   : > { %v11605_v47 = vpop.f32.mrb[11].mxu0  ;;  %11609 = vmatmul.mubr.msk.bf16.vlgmr.msra.gmra.mrb[16].mxu1 %vm1454_vm2, %v1674_v43  ;;  %v1245_v43 = vld [vmem:[%s16572_s7 + $0x18] sm:$0xff] }
 0x6b7   : > { %11619 = vmatpush3.bf16.xpose.msra.mxu1 %v1775_v46  ;;  %11620 = vmatprep.mubr.msk.bf16.mxu1 %vm14020_vm0, %v16485_v0  ;;  %v1249_v44 = vpack.c.bf16 %v1245_v43, %v1245_v43 }
 0x6b8   : > { %11630 = vmatprep.subr.bf16.mxu1 %v16485_v0 }
 0x6be   : > { %11621 = vmatmul.mubr.msk.bf16.vlgmr.msra.gmra.mrb[20].mxu1 %vm1454_vm2, %v1768_v48 }
 0x6bf   : > { %11632 = vmatprep.mubr.msk.bf16.mxu1 %vm14020_vm0, %v16485_v0 }
 0x716   : > { %v1761_v49 = vpop.f32.mrb[12].mxu0 }
 0x717   : > { %v11616_v50 = vpop.f32.mrb[13].mxu0 }
 0x718   : > { %v1764_v51 = vpop.f32.mrb[14].mxu0 }
 0x719   : > { %v11617_v52 = vpop.f32.mrb[15].mxu0 }
 0x789   : > { %v1715_v53 = vpop.f32.mrb[16].mxu1 }
 0x78a   : > { %v14755_v54 = vadd.f32 %v1761_v49, %v1715_v53  ;;  %v11610_v55 = vpop.f32.mrb[17].mxu1 }
 0x78b   : > { %v1718_v56 = vpop.f32.mrb[18].mxu1 }
 0x78c   : > { %v11611_v57 = vpop.f32.mrb[19].mxu1 }
 0x791   : > { %v1811_v58 = vpop.f32.mrb[20].mxu1 }
 0x792   : > { %v11622_v59 = vpop.f32.mrb[21].mxu1  ;;  %v1812_v60 = vadd.f32 %v1811_v58, %v14701_v40 }
 0x793   : > { %v1814_v61 = vpop.f32.mrb[22].mxu1 }
 0x794   : > { %v11623_v62 = vpop.f32.mrb[23].mxu1  ;;  %v1817_v63 = vsel %vm1454_vm2, %v1812_v60, -inf  ;;  %v10960_v61 = vld [vmem:[#allocation14] ss:$0 sm:$0xff] }
 0x795   : > { %1818 = vmax.xlane.f32.xlu1 %v1817_v63 }
 0x822   : > { %v1819_v2 = vpop.xlane.xlu1 %1818 }
 0x823   : > { %v1820_v3 = vsub.f32 %v1812_v60, %v1819_v2 }
 0x825   : > { %v1821_v5 = vmul.f32 1.442695, %v1820_v3 }
 0x827   : > { %13027 = vpow2.f32 %v1821_v5 }
 0x831   : > { %v13028_v8 = vpop.eup %13027 }
 0x832   : > { %v1823_v9 = vsel %vm1454_vm2, %v13028_v8, 0.0 }
 0x833   : > { %1824 = vadd.xlane.f32.xlu0 %v1823_v9 }
 0x849   : > { %1927 = vrot.lane.b32.xlu0 %v14666_v27, %s14023_s10 }
 0x84d   : > { %1925 = vrot.lane.b32.xlu0 %v14672_v30, %s14023_s10  ;;  %v1244_v30 = vld [vmem:[%s16572_s7 + $0x10] sm:$0xff] }
 0x84e   : > { %v1248_v18 = vpack.c.bf16 %v1244_v30, %v1244_v30 }
 0x850   : > { %v14774_v20 = vsel %vm1516_vm3, %v1248_v18, 0  ;;  %v1260_v18 = vld [vmem:[#allocation19 + $0x10] sm:$0xff] }
 0x851   : > { %11631 = vmatpush3.bf16.msra.mxu1 %v14774_v20 }
 0x852   : > { %11642 = vmatprep.subr.bf16.mxu1 %v16485_v0 }
 0x8c0   : > { %v1825_v10 = vpop.xlane.xlu0 %1824 }
 0x8c1   : > { %13029 = vrcp.f32 %v1825_v10 }
 0x8c4   : > { %v1928_v15 = vpop.permute.xlu0 %1927 }
 0x8c5   : > { %v1933_v17 = vsel %vm1454_vm2, %v1928_v15, 0 }
 0x8c8   : > { %v1926_v27 = vpop.permute.xlu0 %1925 }
 0x8cb   : > { %v13030_v12 = vpop.eup %13029 }
 0x8cc   : > { %v1827_v13 = vmul.f32 %v13030_v12, %v13028_v8 }
 0x8ce   : > { %v1828_v16 = vpack.c.bf16 %v1827_v13, %v1827_v13 }
 0x8d0   : > { %11627 = vmatmul.mubr.msk.bf16.vlgmr.msra.gmra.mrb[16].mxu0 %vm1454_vm2, %v1828_v16 }
 0x8d1   : > { %11637 = vmatpush3.bf16.xpose.msra.mxu0 %v1933_v17  ;;  %11638 = vmatprep.mubr.msk.bf16.mxu0 %vm14020_vm0, %v16485_v0  ;;  %v1258_v17 = vld [vmem:[#allocation19] sm:$0xff] }
 0x8d2   : > { %11648 = vmatprep.subr.bf16.mxu0 %v16485_v0 }
 0x8d8   : > { %11639 = vmatmul.mubr.msk.bf16.vlgmr.msra.gmra.mrb[20].mxu0 %vm1454_vm2, %v1926_v27  ;;  %v1259_v27 = vld [vmem:[#allocation19 + $0x8] sm:$0xff] }
 0x8d9   : > { %11650 = vmatprep.mubr.msk.bf16.mxu0 %vm14020_vm0, %v16485_v0  ;;  %v1262_v30 = vpack.c.bf16 %v1259_v27, %v1258_v17 }
 0x9a3   : > { %v1871_v21 = vpop.f32.mrb[16].mxu0 }
 0x9a4   : > { %v1877_v22 = vpack.c.bf16 %v1871_v21, %v1871_v21  ;;  %v11628_v23 = vpop.f32.mrb[17].mxu0  ;;  %v1261_v21 = vld [vmem:[#allocation19 + $0x18] sm:$0xff] }
 0x9a5   : > { %v1874_v24 = vpop.f32.mrb[18].mxu0 }
 0x9a6   : > { %v11629_v25 = vpop.f32.mrb[19].mxu0  ;;  %11633 = vmatmul.mubr.msk.bf16.vlgmr.msra.gmra.mrb[24].mxu1 %vm1454_vm2, %v1877_v22  ;;  %v1218_v22 = vld [vmem:[%s1062_s28] sm:$0xff]  ;;  %s16583_s28 = sld [smem:[#allocation72_spill]] }
 0x9a7   : > { %11644 = vmatprep.mubr.msk.bf16.mxu1 %vm14020_vm0, %v16485_v0  ;;  %v14807_v23 = vpack.c.bf16 %v1218_v22, %v1218_v22  ;;  %v1251_v24 = vld [vmem:[#allocation16] sm:$0xff]  ;;  %v1252_v25 = vld [vmem:[#allocation16 + $0x8] sm:$0xff] }
 0x9ab   : > { %v1969_v26 = vpop.f32.mrb[20].mxu0 }
 0x9ac   : > { %v11640_v28 = vpop.f32.mrb[21].mxu0  ;;  %v1970_v31 = vadd.f32 %v1969_v26, %v14701_v40  ;;  %v14788_v40 = vsel %vm1516_vm3, %v1249_v44, 0  ;;  %v14812_v26 = vpack.c.bf16 %v1252_v25, %v1251_v24 }
 0x9ad   : > { %v1972_v32 = vpop.f32.mrb[22].mxu0  ;;  %11649 = vmatpush3.bf16.msra.mxu0 %v14788_v40  ;;  %v1253_v28 = vld [vmem:[#allocation16 + $0x10] sm:$0xff] }
 0x9ae   : > { %v11641_v33 = vpop.f32.mrb[23].mxu0  ;;  %v1975_v35 = vsel %vm1454_vm2, %v1970_v31, -inf  ;;  %11662 = vmatprep.subr.bf16.mxu0 %v16485_v0 }
 0x9af   : > { %1976 = vmax.xlane.f32.xlu0 %v1975_v35 }
 0xa3c   : > { %v1977_v37 = vpop.xlane.xlu0 %1976 }
 0xa3d   : > { %v1978_v38 = vsub.f32 %v1970_v31, %v1977_v37  ;;  %v1254_v31 = vld [vmem:[#allocation16 + $0x18] sm:$0xff] }
 0xa3e   : > { %v14818_v32 = vpack.c.bf16 %v1254_v31, %v1253_v28 }
 0xa3f   : > { %v1979_v39 = vmul.f32 1.442695, %v1978_v38 }
 0xa41   : > { %13031 = vpow2.f32 %v1979_v39  ;;  %v10961_v39 = vld [vmem:[%s16573_s5] ss:$0 sm:$0xff] }
 0xa4b   : > { %v13032_v41 = vpop.eup %13031 }
 0xa4c   : > { %v1981_v42 = vsel %vm1454_vm2, %v13032_v41, 0.0 }
 0xa4d   : > { %1982 = vadd.xlane.f32.xlu1 %v1981_v42  ;;  %v10962_v42 = vld [vmem:[#allocation26] ss:$0 sm:$0xff] }
 0xa5e   : > { %1987 = vrot.lane.b32.xlu1 %v14708_v1, %s14023_s10 }
 0xa79   : > { %v1918_v45 = vpop.f32.mrb[24].mxu1 }
 0xa7a   : > { %v1924_v46 = vadd.f32 %v1918_v45, %v14755_v54  ;;  %v11634_v47 = vpop.f32.mrb[25].mxu1 }
 0xa7b   : > { %v1921_v48 = vpop.f32.mrb[26].mxu1 }
 0xa7c   : > { %v11635_v49 = vpop.f32.mrb[27].mxu1 }
 0xada   : > { %v1983_v50 = vpop.xlane.xlu1 %1982 }
 0xadb   : > { %13033 = vrcp.f32 %v1983_v50 }
 0xade   : > { %v1988_v51 = vpop.permute.xlu1 %1987 }
 0xadf   : > { %v1993_v1 = vsel %vm1516_vm3, %v1988_v51, 0 }
 0xae0   : > { %11643 = vmatpush3.bf16.msra.mxu1 %v1993_v1 }
 0xae1   : > { %11654 = vmatprep.subr.bf16.mxu1 %v16485_v0 }
 0xae5   : > { %v13034_v52 = vpop.eup %13033 }
 0xae6   : > { %v1985_v53 = vmul.f32 %v13034_v52, %v13032_v41 }
 0xae8   : > { %v1986_v55 = vpack.c.bf16 %v1985_v53, %v1985_v53  ;;  %v10963_v53 = vld [vmem:[#allocation17] ss:$0 sm:$0xff] }
 0xaea   : > { %11645 = vmatmul.mubr.msk.bf16.vlgmr.msra.gmra.mrb[28].mxu1 %vm1454_vm2, %v1986_v55 }
 0xaeb   : > { %11658 = vmatprep.mubr.msk.bf16.mxu1 %vm14020_vm0, %v16485_v0  ;;  %11655 = vmatpush3.bf16.msra.mxu1 %v14812_v26 }
 0xaec   : > { %11656 = vmatprep.subr.bf16.mxu1 %v16485_v0 }
 0xaef   : > { %11657 = vmatpush3.bf16.msra.mxu1 %v14818_v32 }
 0xaf0   : > { %11670 = vmatprep.subr.bf16.mxu1 %v16485_v0 }
 0xbbd   : > { %v2029_v54 = vpop.f32.mrb[28].mxu1 }
 0xbbe   : > { %v2035_v56 = vpack.c.bf16 %v2029_v54, %v2029_v54  ;;  %v11646_v57 = vpop.f32.mrb[29].mxu1 }
 0xbbf   : > { %v2032_v58 = vpop.f32.mrb[30].mxu1 }
 0xbc0   : > { %v11647_v59 = vpop.f32.mrb[31].mxu1  ;;  %11651 = vmatmul.mubr.msk.bf16.vlgmr.msra.gmra.mrb[24].mxu0 %vm1454_vm2, %v2035_v56 }
 0xbc1   : > { %11666 = vmatprep.mubr.msk.bf16.mxu0 %vm14020_vm0, %v16485_v0  ;;  %11663 = vmatpush3.bf16.msra.mxu0 %v1262_v30 }
 0xbc2   : > { %11664 = vmatprep.subr.bf16.mxu0 %v16485_v0 }
 0xc93   : > { %v2076_v60 = vpop.f32.mrb[24].mxu0 }
 0xc94   : > { %v2082_v62 = vadd.f32 %v2076_v60, %v1924_v46  ;;  %v11652_v63 = vpop.f32.mrb[25].mxu0  ;;  %v10965_v46 = vld [vmem:[#allocation20] ss:$0 sm:$0xff] }
 0xc95   : > { %v2079_v2 = vpop.f32.mrb[26].mxu0  ;;  %v1265_v63 = vld [vmem:[#allocation22] sm:$0xff] }
 0xc96   : > { %v11653_v3 = vpop.f32.mrb[27].mxu0  ;;  %v2089_v5 = vadd.f32 %v10960_v61, %v2082_v62  ;;  %v1266_v2 = vld [vmem:[#allocation22 + $0x8] sm:$0xff] }
 0xc97   : > { %v1267_v3 = vld [vmem:[#allocation22 + $0x10] sm:$0xff] }
 0xc98   : > { %v2090_v8 = vadd.f32 %v2089_v5, %v14641_v7  ;;  %v1263_v7 = vpack.c.bf16 %v1261_v21, %v1260_v18  ;;  %v1269_v5 = vpack.c.bf16 %v1266_v2, %v1265_v63 }
 0xc9a   : > { %v2091_v9 = vsel %vm1314_vm1, %v2090_v8, 0.0  ;;  %11665 = vmatpush3.bf16.msra.mxu0 %v1263_v7 }
 0xc9b   : > { %2092 = vadd.xlane.f32.xlu1 %v2091_v9  ;;  %11678 = vmatprep.subr.bf16.mxu0 %v16485_v0 }
 0xc9d   : > { %11667 = vmatmul.mubr.msk.bf16.vlgmr.msra.gmra.mrb[28].mxu0 %vm1314_vm1, %v14807_v23 }
 0xc9e   : > { %11680 = vmatprep.mubr.msk.bf16.mxu0 %vm14020_vm0, %v16485_v0 }
 0xd28   : > { %v2093_v10 = vpop.xlane.xlu1 %2092 }
 0xd29   : > { %v2095_v12 = vmul.f32 0.03125, %v2093_v10 }
 0xd2b   : > { %v2096_v13 = vsub.f32 %v2090_v8, %v2095_v12  ;;  %v1268_v8 = vld [vmem:[#allocation22 + $0x18] sm:$0xff]  ;;  %v14862_v12 = vld [vmem:[#allocation8] sm:$0xff] }
 0xd2c   : > { %v1270_v9 = vpack.c.bf16 %v1268_v8, %v1267_v3  ;;  %v1272_v3 = vld [vmem:[#allocation25] sm:$0xff] }
 0xd2d   : > { %v2097_v15 = vmul.f32 %v2096_v13, %v2096_v13 }
 0xd2f   : > { %v2098_v16 = vsel %vm1314_vm1, %v2097_v15, 0.0 }
 0xd30   : > { %2099 = vadd.xlane.f32.xlu0 %v2098_v16 }
 0xd70   : > { %v2213_v47 = vpop.f32.mrb[28].mxu0 }
 0xd71   : > { %v2214_v48 = vadd.f32 %v10965_v46, %v2213_v47  ;;  %v11668_v49 = vpop.f32.mrb[29].mxu0 }
 0xd72   : > { %v2216_v50 = vpop.f32.mrb[30].mxu0 }
 0xd73   : > { %v14830_v51 = vpack.c.bf16 %v2214_v48, %v2214_v48  ;;  %v11669_v1 = vpop.f32.mrb[31].mxu0 }
 0xd75   : > { %2378 = vrot.lane.b32.xlu0 %v14830_v51, %s14021_s12  ;;  %v14836_v52 = vsel %vm1454_vm2, %v14830_v51, 0 }
 0xd76   : > { %11679 = vmatpush3.bf16.xpose.msra.mxu0 %v14836_v52 }
 0xd77   : > { %11690 = vmatprep.subr.bf16.mxu0 %v16485_v0 }
 0xdbd   : > { %v2100_v33 = vpop.xlane.xlu0 %2099 }
 0xdbe   : > { %v2101_v35 = vmul.f32 0.03125, %v2100_v33 }
 0xdc0   : > { %v2102_v37 = vadd.f32 1e-05, %v2101_v35 }
 0xdc2   : > { %13035 = vrsqrt.f32 %v2102_v37 }
 0xdcc   : > { %v13036_v38 = vpop.eup %13035 }
 0xdcd   : > { %v2104_v41 = vmul.f32 %v13036_v38, %v2096_v13 }
 0xdcf   : > { %v2111_v43 = vmul.f32 %v10961_v39, %v2104_v41 }
 0xdd1   : > { %v14823_v44 = vadd.f32 %v10962_v42, %v2111_v43  ;;  %v10967_v42 = vld [vmem:[#allocation23] ss:$0 sm:$0xff] }
 0xdd3   : > { %v2119_v45 = vpack.c.bf16 %v14823_v44, %v14823_v44 }
 0xdd5   : > { %11659 = vmatmul.mubr.msk.bf16.vlgmr.msra.gmra.mrb[32].mxu1 %vm1314_vm1, %v2119_v45 }
 0xdd6   : > { %11674 = vmatprep.mubr.msk.bf16.mxu1 %vm14020_vm0, %v16485_v0  ;;  %11671 = vmatpush3.bf16.msra.mxu1 %v1269_v5  ;;  %v1276_v5 = vpack.c.bf16 %v1272_v3, %v1272_v3 }
 0xdd7   : > { %11672 = vmatprep.subr.bf16.mxu1 %v16485_v0 }
 0xdda   : > { %11673 = vmatpush3.bf16.msra.mxu1 %v1270_v9 }
 0xddb   : > { %11684 = vmatprep.subr.bf16.mxu1 %v16485_v0 }
 0xddd   : > { %11675 = vmatmul.mubr.msk.bf16.vlgmr.msra.gmra.mrb[36].mxu1 %vm1314_vm1, %v14807_v23 }
 0xdde   : > { %11686 = vmatprep.mubr.msk.bf16.mxu1 %vm14020_vm0, %v16485_v0 }
 0xde7   : > { %v2379_v58 = vpop.permute.xlu0 %2378 }
 0xde8   : > { %v14843_v62 = vsel %vm1454_vm2, %v2379_v58, 0 }
 0xea8   : > { %v2163_v55 = vpop.f32.mrb[32].mxu1 }
 0xea9   : > { %v2164_v54 = vadd.f32 %v10963_v53, %v2163_v55  ;;  %v11660_v56 = vpop.f32.mrb[33].mxu1 }
 0xeaa   : > { %v2166_v57 = vpop.f32.mrb[34].mxu1 }
 0xeab   : > { %v2265_v59 = vmul.f32 0.35355338, %v2164_v54  ;;  %v11661_v60 = vpop.f32.mrb[35].mxu1  ;;  %v1273_v57 = vld [vmem:[#allocation25 + $0x8] sm:$0xff] }
 0xeac   : > { %v1277_v58 = vpack.c.bf16 %v1273_v57, %v1273_v57 }
 0xead   : > { %v14840_v61 = vpack.c.bf16 %v2265_v59, %v2265_v59 }
 0xeae   : > { %v14888_v59 = vsel %vm1516_vm3, %v1277_v58, 0 }
 0xeaf   : > { %2375 = vrot.lane.b32.xlu0 %v14840_v61, %s14021_s12  ;;  %11681 = vmatmul.mubr.msk.bf16.vlgmr.msra.gmra.mrb[32].mxu0 %vm1454_vm2, %v14840_v61 }
 0xeb0   : > { %11691 = vmatpush3.bf16.xpose.msra.mxu0 %v14843_v62  ;;  %11692 = vmatprep.mubr.msk.bf16.mxu0 %vm14020_vm0, %v16485_v0  ;;  %v2259_v33 = vpop.f32.mrb[36].mxu1 }
 0xeb1   : > { %11702 = vmatprep.subr.bf16.mxu0 %v16485_v0  ;;  %v11676_v35 = vpop.f32.mrb[37].mxu1  ;;  %v2260_v43 = vadd.f32 %v10967_v42, %v2259_v33 }
 0xeb2   : > { %v2262_v37 = vpop.f32.mrb[38].mxu1 }
 0xeb3   : > { %v11677_v38 = vpop.f32.mrb[39].mxu1  ;;  %v14869_v45 = vpack.c.bf16 %v2260_v43, %v2260_v43 }
 0xeb5   : > { %v14873_v46 = vsel %vm1516_vm3, %v14869_v45, 0 }
 0xeb6   : > { %11685 = vmatpush3.bf16.msra.mxu1 %v14873_v46 }
 0xeb7   : > { %11696 = vmatprep.subr.bf16.mxu1 %v16485_v0 }
 0xf21   : > { %v2376_v10 = vpop.permute.xlu0 %2375 }
 0xf22   : > { %11693 = vmatmul.mubr.msk.bf16.vlgmr.msra.gmra.mrb[36].mxu0 %vm1454_vm2, %v2376_v10 }
 0xf23   : > { %11704 = vmatprep.mubr.msk.bf16.mxu0 %vm14020_vm0, %v16485_v0  ;;  %11703 = vmatpush3.bf16.msra.mxu0 %v14888_v59 }
 0xf24   : > { %11714 = vmatprep.subr.bf16.mxu0 %v16485_v0 }
 0xf82   : > { %v2309_v13 = vpop.f32.mrb[32].mxu0 }
 0xf83   : > { %v11682_v15 = vpop.f32.mrb[33].mxu0  ;;  %v2310_v16 = vadd.f32 %v2309_v13, %v14862_v12  ;;  %v14898_v13 = vsel %vm1516_vm3, %v1276_v5, 0 }
 0xf84   : > { %v2312_v17 = vpop.f32.mrb[34].mxu0 }
 0xf85   : > { %v11683_v27 = vpop.f32.mrb[35].mxu0  ;;  %v2315_v30 = vsel %vm1454_vm2, %v2310_v16, -inf }
 0xf86   : > { %2316 = vmax.xlane.f32.xlu1 %v2315_v30 }
 0xff5   : > { %v2420_v18 = vpop.f32.mrb[36].mxu0 }
 0xff6   : > { %v11694_v21 = vpop.f32.mrb[37].mxu0  ;;  %v2421_v7 = vadd.f32 %v2420_v18, %v14862_v12 }
 0xff7   : > { %v2423_v22 = vpop.f32.mrb[38].mxu0 }
 0xff8   : > { %v11695_v23 = vpop.f32.mrb[39].mxu0  ;;  %v2426_v24 = vsel %vm1454_vm2, %v2421_v7, -inf }
 0xff9   : > { %2427 = vmax.xlane.f32.xlu0 %v2426_v24 }
0x1013   : > { %v2317_v25 = vpop.xlane.xlu1 %2316 }
0x1014   : > { %v2318_v28 = vsub.f32 %v2310_v16, %v2317_v25 }
0x1016   : > { %v2319_v31 = vmul.f32 1.442695, %v2318_v28 }
0x1018   : > { %13037 = vpow2.f32 %v2319_v31 }
0x1022   : > { %v13038_v39 = vpop.eup %13037 }
0x1023   : > { %v2321_v41 = vsel %vm1454_vm2, %v13038_v39, 0.0 }
0x1024   : > { %2322 = vadd.xlane.f32.xlu1 %v2321_v41 }
0x1086   : > { %v2428_v47 = vpop.xlane.xlu0 %2427 }
0x1087   : > { %v2429_v48 = vsub.f32 %v2421_v7, %v2428_v47 }
0x1089   : > { %v2430_v49 = vmul.f32 1.442695, %v2429_v48 }
0x108b   : > { %13039 = vpow2.f32 %v2430_v49 }
0x1095   : > { %v13040_v50 = vpop.eup %13039 }
0x1096   : > { %v2432_v1 = vsel %vm1454_vm2, %v13040_v50, 0.0 }
0x1097   : > { %2433 = vadd.xlane.f32.xlu1 %v2432_v1 }
0x10a8   : > { %2439 = vrot.lane.b32.xlu1 %v14869_v45, %s14021_s12 }
0x10ac   : > { %2582 = vrot.lane.b32.xlu1 %v14830_v51, %s14022_s20 }
0x10b0   : > { %2580 = vrot.lane.b32.xlu1 %v14840_v61, %s14022_s20 }
0x10b1   : > { %v2323_v53 = vpop.xlane.xlu1 %2322 }
0x10b2   : > { %13041 = vrcp.f32 %v2323_v53 }
0x10bc   : > { %v13042_v55 = vpop.eup %13041 }
0x10bd   : > { %v2325_v54 = vmul.f32 %v13042_v55, %v13038_v39 }
0x10bf   : > { %v2326_v56 = vpack.c.bf16 %v2325_v54, %v2325_v54 }
0x10c1   : > { %11687 = vmatmul.mubr.msk.bf16.vlgmr.msra.gmra.mrb[40].mxu1 %vm1454_vm2, %v2326_v56 }
0x10c2   : > { %11698 = vmatprep.mubr.msk.bf16.mxu1 %vm14020_vm0, %v16485_v0 }
0x1124   : > { %v2434_v60 = vpop.xlane.xlu1 %2433 }
0x1125   : > { %13043 = vrcp.f32 %v2434_v60 }
0x1128   : > { %v2440_v63 = vpop.permute.xlu1 %2439 }
0x1129   : > { %v14893_v2 = vsel %vm1516_vm3, %v2440_v63, 0 }
0x112a   : > { %11697 = vmatpush3.bf16.msra.mxu1 %v14893_v2 }
0x112b   : > { %11708 = vmatprep.subr.bf16.mxu1 %v16485_v0 }
0x112c   : > { %v2583_v18 = vpop.permute.xlu1 %2582 }
0x112d   : > { %v14909_v24 = vsel %vm1454_vm2, %v2583_v18, 0 }
0x112e   : > { %16574 = vst [vmem:[#allocation73_spill] sm:$0xff] %v14909_v24 }
0x112f   : > { %v13044_v8 = vpop.eup %13043 }
0x1130   : > { %v2436_v9 = vmul.f32 %v13044_v8, %v13040_v50  ;;  %v2581_v28 = vpop.permute.xlu1 %2580 }
0x1132   : > { %v2437_v10 = vpack.c.bf16 %v2436_v9, %v2436_v9 }
0x1134   : > { %11699 = vmatmul.mubr.msk.bf16.vlgmr.msra.gmra.mrb[44].mxu1 %vm1454_vm2, %v2437_v10 }
0x1135   : > { %11709 = vmatpush3.bf16.msra.mxu1 %v14898_v13  ;;  %11710 = vmatprep.mubr.msk.bf16.mxu1 %vm14020_vm0, %v16485_v0 }
0x1136   : > { %11720 = vmatprep.subr.bf16.mxu1 %v16485_v0 }
0x1194   : > { %v2367_v15 = vpop.f32.mrb[40].mxu1 }
0x1195   : > { %v2373_v16 = vpack.c.bf16 %v2367_v15, %v2367_v15  ;;  %v11688_v17 = vpop.f32.mrb[41].mxu1  ;;  %v1274_v15 = vld [vmem:[#allocation25 + $0x10] sm:$0xff] }
0x1196   : > { %v2370_v27 = vpop.f32.mrb[42].mxu1 }
0x1197   : > { %v11689_v30 = vpop.f32.mrb[43].mxu1  ;;  %11711 = vmatmul.mubr.msk.bf16.vlgmr.msra.gmra.mrb[48].mxu1 %vm1454_vm2, %v2373_v16  ;;  %v1278_v16 = vpack.c.bf16 %v1274_v15, %v1274_v15 }
0x1198   : > { %11722 = vmatprep.mubr.msk.bf16.mxu1 %vm14020_vm0, %v16485_v0 }
0x1199   : > { %v14947_v17 = vsel %vm1516_vm3, %v1278_v16, 0 }
0x119a   : > { %16575 = vst [vmem:[#allocation74_spill] sm:$0xff] %v14947_v17 }
0x1207   : > { %v2481_v21 = vpop.f32.mrb[44].mxu1 }
0x1208   : > { %v2487_v7 = vpack.c.bf16 %v2481_v21, %v2481_v21  ;;  %v11700_v22 = vpop.f32.mrb[45].mxu1 }
0x1209   : > { %v2484_v23 = vpop.f32.mrb[46].mxu1 }
0x120a   : > { %v11701_v25 = vpop.f32.mrb[47].mxu1  ;;  %11705 = vmatmul.mubr.msk.bf16.vlgmr.msra.gmra.mrb[40].mxu0 %vm1454_vm2, %v2487_v7 }
0x120b   : > { %11715 = vmatpush3.bf16.xpose.msra.mxu0 %v14909_v24  ;;  %11716 = vmatprep.mubr.msk.bf16.mxu0 %vm14020_vm0, %v16485_v0 }
0x120c   : > { %11726 = vmatprep.subr.bf16.mxu0 %v16485_v0 }
0x1212   : > { %11717 = vmatmul.mubr.msk.bf16.vlgmr.msra.gmra.mrb[44].mxu0 %vm1454_vm2, %v2581_v28 }
0x1213   : > { %11728 = vmatprep.mubr.msk.bf16.mxu0 %vm14020_vm0, %v16485_v0  ;;  %11727 = vmatpush3.bf16.msra.mxu0 %v14947_v17 }
0x1214   : > { %11738 = vmatprep.subr.bf16.mxu0 %v16485_v0 }
0x126a   : > { %v2574_v31 = vpop.f32.mrb[48].mxu1 }
0x126b   : > { %v11712_v33 = vpop.f32.mrb[49].mxu1 }
0x126c   : > { %v2577_v35 = vpop.f32.mrb[50].mxu1 }
0x126d   : > { %v11713_v37 = vpop.f32.mrb[51].mxu1 }
0x12dd   : > { %v2528_v38 = vpop.f32.mrb[40].mxu0 }
0x12de   : > { %v14919_v39 = vadd.f32 %v2574_v31, %v2528_v38  ;;  %v11706_v41 = vpop.f32.mrb[41].mxu0 }
0x12df   : > { %v2531_v42 = vpop.f32.mrb[42].mxu0 }
0x12e0   : > { %v11707_v43 = vpop.f32.mrb[43].mxu0 }
0x12e1   : > { %v1275_v43 = vld [vmem:[#allocation25 + $0x18] sm:$0xff] }
0x12e5   : > { %v2624_v47 = vpop.f32.mrb[44].mxu0 }
0x12e6   : > { %v11718_v48 = vpop.f32.mrb[45].mxu0  ;;  %v2625_v49 = vadd.f32 %v2624_v47, %v14862_v12  ;;  %v1279_v47 = vpack.c.bf16 %v1275_v43, %v1275_v43  ;;  %v1296_v43 = vld [vmem:[%s14173_s29 + $0x10] sm:$0xff] }
0x12e7   : > { %v2627_v50 = vpop.f32.mrb[46].mxu0 }
0x12e8   : > { %v11719_v1 = vpop.f32.mrb[47].mxu0  ;;  %v2630_v53 = vsel %vm1454_vm2, %v2625_v49, -inf }
0x12e9   : > { %2631 = vmax.xlane.f32.xlu0 %v2630_v53 }
0x12ff   : > { %2642 = vrot.lane.b32.xlu0 %v14869_v45, %s14022_s20 }
0x1303   : > { %2740 = vrot.lane.b32.xlu0 %v14830_v51, %s14023_s10 }
0x1307   : > { %2738 = vrot.lane.b32.xlu0 %v14840_v61, %s14023_s10 }
0x1376   : > { %v2632_v55 = vpop.xlane.xlu0 %2631 }
0x1377   : > { %v2633_v54 = vsub.f32 %v2625_v49, %v2632_v55 }
0x1379   : > { %v2634_v56 = vmul.f32 1.442695, %v2633_v54 }
0x137a   : > { %v2643_v57 = vpop.permute.xlu0 %2642 }
0x137b   : > { %13045 = vpow2.f32 %v2634_v56  ;;  %v14930_v58 = vsel %vm1516_vm3, %v2643_v57, 0 }
0x137c   : > { %11721 = vmatpush3.bf16.msra.mxu1 %v14930_v58 }
0x137d   : > { %11732 = vmatprep.subr.bf16.mxu1 %v16485_v0 }
0x137e   : > { %v2741_v5 = vpop.permute.xlu0 %2740 }
0x137f   : > { %v14936_v9 = vsel %vm1454_vm2, %v2741_v5, 0 }
0x1382   : > { %v2739_v10 = vpop.permute.xlu0 %2738 }
0x1385   : > { %v13046_v60 = vpop.eup %13045 }
0x1386   : > { %v2636_v63 = vsel %vm1454_vm2, %v13046_v60, 0.0 }
0x1387   : > { %2637 = vadd.xlane.f32.xlu1 %v2636_v63 }
0x1414   : > { %v2638_v51 = vpop.xlane.xlu1 %2637 }
0x1415   : > { %13047 = vrcp.f32 %v2638_v51 }
0x141f   : > { %v13048_v3 = vpop.eup %13047 }
0x1420   : > { %v2640_v61 = vmul.f32 %v13048_v3, %v13046_v60 }
0x1422   : > { %v2641_v8 = vpack.c.bf16 %v2640_v61, %v2640_v61 }
0x1424   : > { %11723 = vmatmul.mubr.msk.bf16.vlgmr.msra.gmra.mrb[52].mxu1 %vm1454_vm2, %v2641_v8  ;;  %v10981_v8 = vld [vmem:[%s16576_s11] ss:$0 sm:$0xff] }
0x1425   : > { %11733 = vmatpush3.bf16.xpose.msra.mxu1 %v14936_v9  ;;  %11734 = vmatprep.mubr.msk.bf16.mxu1 %vm14020_vm0, %v16485_v0 }
0x1426   : > { %11744 = vmatprep.subr.bf16.mxu1 %v16485_v0 }
0x142c   : > { %11735 = vmatmul.mubr.msk.bf16.vlgmr.msra.gmra.mrb[56].mxu1 %vm1454_vm2, %v2739_v10 }
0x142d   : > { %11746 = vmatprep.mubr.msk.bf16.mxu1 %vm14020_vm0, %v16485_v0 }
0x14f7   : > { %v2684_v27 = vpop.f32.mrb[52].mxu1 }
0x14f8   : > { %v2690_v30 = vpack.c.bf16 %v2684_v27, %v2684_v27  ;;  %v11724_v18 = vpop.f32.mrb[53].mxu1 }
0x14f9   : > { %v2687_v21 = vpop.f32.mrb[54].mxu1 }
0x14fa   : > { %v11725_v7 = vpop.f32.mrb[55].mxu1  ;;  %11729 = vmatmul.mubr.msk.bf16.vlgmr.msra.gmra.mrb[48].mxu0 %vm1454_vm2, %v2690_v30 }
0x14fb   : > { %11740 = vmatprep.mubr.msk.bf16.mxu0 %vm14020_vm0, %v16485_v0 }
0x14ff   : > { %v2782_v22 = vpop.f32.mrb[56].mxu1 }
0x1500   : > { %v11736_v23 = vpop.f32.mrb[57].mxu1  ;;  %v2783_v25 = vadd.f32 %v2782_v22, %v14862_v12  ;;  %v14960_v12 = vsel %vm1516_vm3, %v1279_v47, 0 }
0x1501   : > { %v2785_v28 = vpop.f32.mrb[58].mxu1  ;;  %11745 = vmatpush3.bf16.msra.mxu1 %v14960_v12 }
0x1502   : > { %v11737_v31 = vpop.f32.mrb[59].mxu1  ;;  %v2788_v33 = vsel %vm1454_vm2, %v2783_v25, -inf  ;;  %11758 = vmatprep.subr.bf16.mxu1 %v16485_v0 }
0x1503   : > { %2789 = vmax.xlane.f32.xlu0 %v2788_v33  ;;  %v1287_v31 = vld [vmem:[%s16577_s13] sm:$0xff]  ;;  %v1288_v33 = vld [vmem:[%s16577_s13 + $0x8] sm:$0xff] }
0x1590   : > { %v2790_v35 = vpop.xlane.xlu0 %2789 }
0x1591   : > { %v2791_v37 = vsub.f32 %v2783_v25, %v2790_v35  ;;  %v14982_v35 = vpack.c.bf16 %v1288_v33, %v1287_v31 }
0x1593   : > { %v2792_v38 = vmul.f32 1.442695, %v2791_v37  ;;  %v1290_v37 = vld [vmem:[%s16577_s13 + $0x18] sm:$0xff] }
0x1595   : > { %13049 = vpow2.f32 %v2792_v38 }
0x159f   : > { %v13050_v41 = vpop.eup %13049 }
0x15a0   : > { %v2794_v42 = vsel %vm1454_vm2, %v13050_v41, 0.0 }
0x15a1   : > { %2795 = vadd.xlane.f32.xlu1 %v2794_v42  ;;  %v1295_v42 = vld [vmem:[%s14173_s29 + $0x8] sm:$0xff] }
0x15b2   : > { %2800 = vrot.lane.b32.xlu1 %v14869_v45, %s14023_s10 }
0x15cd   : > { %v2731_v48 = vpop.f32.mrb[48].mxu0 }
0x15ce   : > { %v2737_v49 = vadd.f32 %v2731_v48, %v14919_v39  ;;  %v11730_v50 = vpop.f32.mrb[49].mxu0  ;;  %v1297_v48 = vld [vmem:[%s14173_s29 + $0x18] sm:$0xff] }
0x15cf   : > { %v2734_v1 = vpop.f32.mrb[50].mxu0 }
0x15d0   : > { %v11731_v53 = vpop.f32.mrb[51].mxu0 }
0x162e   : > { %v2796_v55 = vpop.xlane.xlu1 %2795 }
0x162f   : > { %13051 = vrcp.f32 %v2796_v55 }
0x1632   : > { %v2801_v54 = vpop.permute.xlu1 %2800 }
0x1633   : > { %v14966_v45 = vsel %vm1516_vm3, %v2801_v54, 0  ;;  %v15004_v54 = vld [vmem:[#allocation28] ss:$0 sm:$0xff] }
0x1634   : > { %11739 = vmatpush3.bf16.msra.mxu0 %v14966_v45 }
0x1635   : > { %11750 = vmatprep.subr.bf16.mxu0 %v16485_v0 }
0x1639   : > { %v13052_v56 = vpop.eup %13051 }
0x163a   : > { %v2798_v57 = vmul.f32 %v13052_v56, %v13050_v41  ;;  %v1294_v41 = vld [vmem:[%s14173_s29] sm:$0xff] }
0x163b   : > { %v14995_v47 = vpack.c.bf16 %v1295_v42, %v1294_v41 }
0x163c   : > { %v2799_v60 = vpack.c.bf16 %v2798_v57, %v2798_v57  ;;  %v15006_v57 = vld [vmem:[#allocation29] ss:$0 sm:$0xff] }
0x163e   : > { %11741 = vmatmul.mubr.msk.bf16.vlgmr.msra.gmra.mrb[52].mxu0 %vm1454_vm2, %v2799_v60 }
0x163f   : > { %11754 = vmatprep.mubr.msk.bf16.mxu0 %vm14020_vm0, %v16485_v0  ;;  %11751 = vmatpush3.bf16.msra.mxu0 %v14982_v35 }
0x1640   : > { %11752 = vmatprep.subr.bf16.mxu0 %v16485_v0 }
0x1711   : > { %v2842_v39 = vpop.f32.mrb[52].mxu0 }
0x1712   : > { %v2848_v63 = vpack.c.bf16 %v2842_v39, %v2842_v39  ;;  %v11742_v51 = vpop.f32.mrb[53].mxu0 }
0x1713   : > { %v2845_v3 = vpop.f32.mrb[54].mxu0  ;;  %v1298_v51 = vld [vmem:[%s14173_s29 + $0x20] sm:$0xff] }
0x1714   : > { %v11743_v61 = vpop.f32.mrb[55].mxu0  ;;  %11747 = vmatmul.mubr.msk.bf16.vlgmr.msra.gmra.mrb[60].mxu1 %vm1454_vm2, %v2848_v63  ;;  %v1299_v3 = vld [vmem:[%s14173_s29 + $0x28] sm:$0xff] }
0x1715   : > { %11766 = vmatprep.mubr.msk.bf16.mxu1 %vm14020_vm0, %v16485_v0  ;;  %11759 = vmatpush3.bf16.msra.mxu1 %v14995_v47  ;;  %v15019_v61 = vpack.c.bf16 %v1299_v3, %v1298_v51  ;;  %v15048_v3 = vld [vmem:[#allocation32] ss:$0 sm:$0xff] }
0x1716   : > { %11760 = vmatprep.subr.bf16.mxu1 %v16485_v0 }
0x17e7   : > { %v2889_v5 = vpop.f32.mrb[60].mxu1 }
0x17e8   : > { %v2895_v10 = vadd.f32 %v2889_v5, %v2737_v49  ;;  %v11748_v15 = vpop.f32.mrb[61].mxu1  ;;  %v14999_v49 = vpack.c.bf16 %v1297_v48, %v1296_v43  ;;  %v1300_v5 = vld [vmem:[%s14173_s29 + $0x30] sm:$0xff] }
0x17e9   : > { %v2892_v16 = vpop.f32.mrb[62].mxu1  ;;  %v15030_v15 = vld [vmem:[%s14168_s19] ss:$0 sm:$0xff] }
0x17ea   : > { %v11749_v27 = vpop.f32.mrb[63].mxu1  ;;  %v2902_v30 = vadd.f32 %v10981_v8, %v2895_v10  ;;  %11761 = vmatpush3.bf16.msra.mxu1 %v14999_v49  ;;  %v1301_v8 = vld [vmem:[%s14173_s29 + $0x38] sm:$0xff] }
0x17eb   : > { %11762 = vmatprep.subr.bf16.mxu1 %v16485_v0  ;;  %v15025_v10 = vpack.c.bf16 %v1301_v8, %v1300_v5 }
0x17ec   : > { %v2903_v18 = vadd.f32 %v2902_v30, %v14823_v44  ;;  %v1289_v44 = vld [vmem:[%s16577_s13 + $0x10] sm:$0xff] }
0x17ed   : > { %v14988_v38 = vpack.c.bf16 %v1290_v37, %v1289_v44 }
0x17ee   : > { %v2904_v21 = vsel %vm1314_vm1, %v2903_v18, 0.0  ;;  %11763 = vmatpush3.bf16.msra.mxu1 %v15019_v61 }
0x17ef   : > { %2905 = vadd.xlane.f32.xlu1 %v2904_v21  ;;  %11753 = vmatpush3.bf16.msra.mxu0 %v14988_v38 }
0x17f0   : > { %11770 = vmatprep.subr.bf16.mxu0 %v16485_v0  ;;  %11764 = vmatprep.subr.bf16.mxu1 %v16485_v0 }
0x17f2   : > { %11765 = vmatpush3.bf16.msra.mxu1 %v15025_v10 }
0x17f3   : > { %11786 = vmatprep.subr.bf16.mxu1 %v16485_v0 }
0x187c   : > { %v2906_v7 = vpop.xlane.xlu1 %2905 }
0x187d   : > { %v2907_v22 = vmul.f32 0.03125, %v2906_v7 }
0x187f   : > { %v2908_v23 = vsub.f32 %v2903_v18, %v2907_v22 }
0x1881   : > { %v2909_v25 = vmul.f32 %v2908_v23, %v2908_v23 }
0x1883   : > { %v2910_v28 = vsel %vm1314_vm1, %v2909_v25, 0.0 }
0x1884   : > { %2911 = vadd.xlane.f32.xlu0 %v2910_v28 }
0x1911   : > { %v2912_v50 = vpop.xlane.xlu0 %2911 }
0x1912   : > { %v2913_v1 = vmul.f32 0.03125, %v2912_v50 }
0x1914   : > { %v2914_v53 = vadd.f32 1e-05, %v2913_v1 }
0x1916   : > { %13053 = vrsqrt.f32 %v2914_v53 }
0x1920   : > { %v13054_v55 = vpop.eup %13053 }
0x1921   : > { %v2916_v56 = vmul.f32 %v13054_v55, %v2908_v23  ;;  %v15041_v23 = vld [vmem:[%s16578_s14] ss:$0 sm:$0xff] }
0x1923   : > { %v2923_v60 = vmul.f32 %v15004_v54, %v2916_v56 }
0x1925   : > { %v2930_v39 = vadd.f32 %v15006_v57, %v2923_v60 }
0x1927   : > { %v2931_v63 = vpack.c.bf16 %v2930_v39, %v2930_v39 }
0x1929   : > { %11755 = vmatmul.mubr.msk.bf16.vlgmr.msra.gmra.mrb[56].mxu0 %vm1314_vm1, %v2931_v63  ;;  %v15046_v63 = vld [vmem:[#allocation31] ss:$0 sm:$0xff] }
0x192a   : > { %11771 = vmatpush3.bf16.msra.mxu0 %v14633_v4  ;;  %11774 = vmatprep.mubr.msk.bf16.mxu0 %vm14020_vm0, %v16485_v0 }
0x192b   : > { %11772 = vmatprep.subr.bf16.mxu0 %v16485_v0 }
0x192e   : > { %11773 = vmatpush3.bf16.msra.mxu0 %v14637_v6 }
0x192f   : > { %11778 = vmatprep.subr.bf16.mxu0 %v16485_v0 }
0x19fc   : > { %v2975_v16 = vpop.f32.mrb[56].mxu0 }
0x19fd   : > { %v2976_v27 = vadd.f32 %v15030_v15, %v2975_v16  ;;  %v11756_v30 = vpop.f32.mrb[57].mxu0 }
0x19fe   : > { %v2978_v18 = vpop.f32.mrb[58].mxu0  ;;  %v15069_v30 = vld [vmem:[#allocation10] ss:$0 sm:$0xff] }
0x19ff   : > { %v2981_v21 = vmax.f32 %v2976_v27, 0.0  ;;  %v11757_v7 = vpop.f32.mrb[59].mxu0 }
0x1a01   : > { %v2982_v22 = vpack.c.bf16 %v2981_v21, %v2981_v21  ;;  %v15072_v21 = vld [vmem:[#allocation13] ss:$0 sm:$0xff] }
0x1a03   : > { %11767 = vmatmul.mubr.msk.bf16.vlgmr.msra.gmra.mrb[64].mxu1 %vm2989_vm4, %v2982_v22 }
0x1a04   : > { %11787 = vmatpush3.bf16.msra.mxu1 %v14684_v34  ;;  %11790 = vmatprep.mubr.msk.bf16.mxu1 %vm14020_vm0, %v16485_v0 }
0x1a05   : > { %11788 = vmatprep.subr.bf16.mxu1 %v16485_v0 }
0x1a08   : > { %11789 = vmatpush3.bf16.msra.mxu1 %v14688_v36 }
0x1a09   : > { %11800 = vmatprep.subr.bf16.mxu1 %v16485_v0 }
0x1ad6   : > { %v3027_v25 = vpop.f32.mrb[64].mxu1 }
0x1ad7   : > { %v3028_v28 = vadd.f32 %v15041_v23, %v3027_v25  ;;  %v11768_v31 = vpop.f32.mrb[65].mxu1 }
0x1ad8   : > { %v3030_v33 = vpop.f32.mrb[66].mxu1 }
0x1ad9   : > { %v11769_v44 = vpop.f32.mrb[67].mxu1  ;;  %v3033_v37 = vadd.f32 %v3028_v28, %v2930_v39 }
0x1adb   : > { %v3034_v41 = vsel %vm1314_vm1, %v3033_v37, 0.0 }
0x1adc   : > { %3035 = vadd.xlane.f32.xlu0 %v3034_v41 }
0x1b69   : > { %v3036_v42 = vpop.xlane.xlu0 %3035 }
0x1b6a   : > { %v3037_v43 = vmul.f32 0.03125, %v3036_v42 }
0x1b6c   : > { %v3038_v48 = vsub.f32 %v3033_v37, %v3037_v43 }
0x1b6e   : > { %v3039_v50 = vmul.f32 %v3038_v48, %v3038_v48 }
0x1b70   : > { %v3040_v1 = vsel %vm1314_vm1, %v3039_v50, 0.0  ;;  %v15084_v50 = vld [vmem:[#allocation11] ss:$0 sm:$0xff] }
0x1b71   : > { %3041 = vadd.xlane.f32.xlu0 %v3040_v1 }
0x1bfe   : > { %v3042_v53 = vpop.xlane.xlu0 %3041 }
0x1bff   : > { %v3043_v55 = vmul.f32 0.03125, %v3042_v53 }
0x1c01   : > { %v3044_v56 = vadd.f32 1e-05, %v3043_v55 }
0x1c03   : > { %13055 = vrsqrt.f32 %v3044_v56 }
0x1c0d   : > { %v13056_v60 = vpop.eup %13055 }
0x1c0e   : > { %v3046_v51 = vmul.f32 %v13056_v60, %v3038_v48 }
0x1c10   : > { %v3053_v39 = vmul.f32 %v15046_v63, %v3046_v51 }
0x1c12   : > { %v15052_v5 = vadd.f32 %v15048_v3, %v3053_v39 }
0x1c14   : > { %v3061_v8 = vpack.c.bf16 %v15052_v5, %v15052_v5 }
0x1c16   : > { %11775 = vmatmul.mubr.msk.bf16.vlgmr.msra.gmra.mrb[60].mxu0 %vm1314_vm1, %v3061_v8  ;;  %11791 = vmatmul.mubr.msk.bf16.vlgmr.msra.gmra.mrb[68].mxu1 %vm1314_vm1, %v3061_v8 }
0x1c17   : > { %11779 = vmatpush3.bf16.msra.mxu0 %v14649_v11  ;;  %11782 = vmatprep.mubr.msk.bf16.mxu0 %vm14020_vm0, %v16485_v0 }
0x1c18   : > { %11780 = vmatprep.subr.bf16.mxu0 %v16485_v0  ;;  %11802 = vmatprep.mubr.msk.bf16.mxu1 %vm14020_vm0, %v16485_v0 }
0x1c1b   : > { %11781 = vmatpush3.bf16.msra.mxu0 %v14656_v14 }
0x1c1c   : > { %11794 = vmatprep.subr.bf16.mxu0 %v16485_v0 }
0x1c1e   : > { %11783 = vmatmul.mubr.msk.bf16.vlgmr.msra.gmra.mrb[64].mxu0 %vm1314_vm1, %v3061_v8 }
0x1c1f   : > { %11796 = vmatprep.mubr.msk.bf16.mxu0 %vm14020_vm0, %v16485_v0 }
0x1ce9   : > { %v3099_v16 = vpop.f32.mrb[60].mxu0  ;;  %v3179_v27 = vpop.f32.mrb[68].mxu1 }
0x1cea   : > { %v3100_v18 = vadd.f32 %v15069_v30, %v3099_v16  ;;  %v3180_v7 = vadd.f32 %v15072_v21, %v3179_v27  ;;  %v11776_v22 = vpop.f32.mrb[61].mxu0  ;;  %v11792_v25 = vpop.f32.mrb[69].mxu1 }
0x1ceb   : > { %v3102_v28 = vpop.f32.mrb[62].mxu0  ;;  %v3182_v31 = vpop.f32.mrb[70].mxu1 }
0x1cec   : > { %v3185_v33 = vmul.f32 0.35355338, %v3100_v18  ;;  %v15075_v44 = vpack.c.bf16 %v3180_v7, %v3180_v7  ;;  %v11777_v37 = vpop.f32.mrb[63].mxu0  ;;  %v11793_v41 = vpop.f32.mrb[71].mxu1  ;;  %v15105_v7 = vld [vmem:[#allocation7] sm:$0xff] }
0x1cee   : > { %v15077_v42 = vpack.c.bf16 %v3185_v33, %v3185_v33  ;;  %v3251_v43 = vsel %vm1516_vm3, %v15075_v44, 0 }
0x1cef   : > { %11801 = vmatpush3.bf16.msra.mxu1 %v3251_v43 }
0x1cf0   : > { %3295 = vrot.lane.b32.xlu1 %v15077_v42, %s14021_s12  ;;  %11812 = vmatprep.subr.bf16.mxu1 %v16485_v0 }
0x1cf1   : > { %v3139_v48 = vpop.f32.mrb[64].mxu0 }
0x1cf2   : > { %v3140_v1 = vadd.f32 %v15084_v50, %v3139_v48  ;;  %v11784_v53 = vpop.f32.mrb[65].mxu0 }
0x1cf3   : > { %v3142_v55 = vpop.f32.mrb[66].mxu0 }
0x1cf4   : > { %v15087_v56 = vpack.c.bf16 %v3140_v1, %v3140_v1  ;;  %v11785_v60 = vpop.f32.mrb[67].mxu0 }
0x1cf6   : > { %3298 = vrot.lane.b32.xlu0 %v15087_v56, %s14021_s12  ;;  %v3193_v51 = vsel %vm1454_vm2, %v15087_v56, 0 }
0x1cf7   : > { %11795 = vmatpush3.bf16.xpose.msra.mxu0 %v3193_v51 }
0x1cf8   : > { %11806 = vmatprep.subr.bf16.mxu0 %v16485_v0 }
0x1cfe   : > { %11797 = vmatmul.mubr.msk.bf16.vlgmr.msra.gmra.mrb[68].mxu0 %vm1454_vm2, %v15077_v42 }
0x1cff   : > { %11808 = vmatprep.mubr.msk.bf16.mxu0 %vm14020_vm0, %v16485_v0 }
0x1d62   : > { %v3296_v16 = vpop.permute.xlu1 %3295 }
0x1d68   : > { %v3299_v39 = vpop.permute.xlu0 %3298 }
0x1d69   : > { %v3304_v8 = vsel %vm1454_vm2, %v3299_v39, 0 }
0x1d6a   : > { %11807 = vmatpush3.bf16.xpose.msra.mxu0 %v3304_v8 }
0x1d6b   : > { %11818 = vmatprep.subr.bf16.mxu0 %v16485_v0 }
0x1d71   : > { %11809 = vmatmul.mubr.msk.bf16.vlgmr.msra.gmra.mrb[72].mxu0 %vm1454_vm2, %v3296_v16 }
0x1d72   : > { %11819 = vmatpush3.bf16.msra.mxu0 %v14727_v19  ;;  %11820 = vmatprep.mubr.msk.bf16.mxu0 %vm14020_vm0, %v16485_v0 }
0x1d73   : > { %11830 = vmatprep.subr.bf16.mxu0 %v16485_v0 }
0x1dd1   : > { %v3229_v27 = vpop.f32.mrb[68].mxu0 }
0x1dd2   : > { %v11798_v18 = vpop.f32.mrb[69].mxu0  ;;  %v3230_v22 = vadd.f32 %v15105_v7, %v3229_v27 }
0x1dd3   : > { %v3232_v25 = vpop.f32.mrb[70].mxu0 }
0x1dd4   : > { %v11799_v28 = vpop.f32.mrb[71].mxu0  ;;  %v3235_v31 = vsel %vm1454_vm2, %v3230_v22, -inf }
0x1dd5   : > { %3236 = vmax.xlane.f32.xlu0 %v3235_v31 }
0x1e44   : > { %v3340_v33 = vpop.f32.mrb[72].mxu0 }
0x1e45   : > { %v11810_v37 = vpop.f32.mrb[73].mxu0  ;;  %v3341_v41 = vadd.f32 %v15105_v7, %v3340_v33 }
0x1e46   : > { %v3343_v43 = vpop.f32.mrb[74].mxu0 }
0x1e47   : > { %v11811_v48 = vpop.f32.mrb[75].mxu0  ;;  %v3346_v1 = vsel %vm1454_vm2, %v3341_v41, -inf }
0x1e48   : > { %3347 = vmax.xlane.f32.xlu1 %v3346_v1 }
0x1e59   : > { %3496 = vrot.lane.b32.xlu1 %v15087_v56, %s14022_s20 }
0x1e62   : > { %v3237_v53 = vpop.xlane.xlu0 %3236 }
0x1e63   : > { %v3238_v55 = vsub.f32 %v3230_v22, %v3237_v53 }
0x1e65   : > { %v3239_v60 = vmul.f32 1.442695, %v3238_v55 }
0x1e67   : > { %13057 = vpow2.f32 %v3239_v60 }
0x1e71   : > { %v13058_v51 = vpop.eup %13057 }
0x1e72   : > { %v3241_v39 = vsel %vm1454_vm2, %v13058_v51, 0.0 }
0x1e73   : > { %3242 = vadd.xlane.f32.xlu0 %v3241_v39 }
0x1ed5   : > { %v3348_v8 = vpop.xlane.xlu1 %3347 }
0x1ed6   : > { %v3349_v16 = vsub.f32 %v3341_v41, %v3348_v8 }
0x1ed8   : > { %v3350_v27 = vmul.f32 1.442695, %v3349_v16 }
0x1ed9   : > { %v3497_v16 = vpop.permute.xlu1 %3496 }
0x1eda   : > { %13059 = vpow2.f32 %v3350_v27 }
0x1ee4   : > { %v13060_v18 = vpop.eup %13059 }
0x1ee5   : > { %v3352_v25 = vsel %vm1454_vm2, %v13060_v18, 0.0 }
0x1ee6   : > { %3353 = vadd.xlane.f32.xlu0 %v3352_v25 }
0x1efc   : > { %3359 = vrot.lane.b32.xlu0 %v15075_v44, %s14021_s12 }
0x1f00   : > { %v3243_v28 = vpop.xlane.xlu0 %3242  ;;  %3494 = vrot.lane.b32.xlu0 %v15077_v42, %s14022_s20 }
0x1f01   : > { %13061 = vrcp.f32 %v3243_v28 }
0x1f0b   : > { %v13062_v22 = vpop.eup %13061 }
0x1f0c   : > { %v3245_v31 = vmul.f32 %v13062_v22, %v13058_v51  ;;  %v3502_v22 = vsel %vm1454_vm2, %v3497_v16, 0 }
0x1f0e   : > { %v3246_v33 = vpack.c.bf16 %v3245_v31, %v3245_v31 }
0x1f10   : > { %11803 = vmatmul.mubr.msk.bf16.vlgmr.msra.gmra.mrb[72].mxu1 %vm1454_vm2, %v3246_v33 }
0x1f11   : > { %11814 = vmatprep.mubr.msk.bf16.mxu1 %vm14020_vm0, %v16485_v0 }
0x1f73   : > { %v3354_v37 = vpop.xlane.xlu0 %3353 }
0x1f74   : > { %13063 = vrcp.f32 %v3354_v37 }
0x1f77   : > { %v3360_v41 = vpop.permute.xlu0 %3359 }
0x1f78   : > { %v3365_v43 = vsel %vm1516_vm3, %v3360_v41, 0 }
0x1f79   : > { %11813 = vmatpush3.bf16.msra.mxu1 %v3365_v43 }
0x1f7a   : > { %11824 = vmatprep.subr.bf16.mxu1 %v16485_v0 }
0x1f7b   : > { %v3495_v33 = vpop.permute.xlu0 %3494 }
0x1f7e   : > { %v13064_v48 = vpop.eup %13063 }
0x1f7f   : > { %v3356_v1 = vmul.f32 %v13064_v48, %v13060_v18 }
0x1f81   : > { %v3357_v53 = vpack.c.bf16 %v3356_v1, %v3356_v1 }
0x1f83   : > { %11815 = vmatmul.mubr.msk.bf16.vlgmr.msra.gmra.mrb[76].mxu1 %vm1454_vm2, %v3357_v53 }
0x1f84   : > { %11825 = vmatpush3.bf16.msra.mxu1 %v14735_v29  ;;  %11826 = vmatprep.mubr.msk.bf16.mxu1 %vm14020_vm0, %v16485_v0 }
0x1f85   : > { %11836 = vmatprep.subr.bf16.mxu1 %v16485_v0 }
0x1fe3   : > { %v3287_v55 = vpop.f32.mrb[72].mxu1 }
0x1fe4   : > { %v3293_v60 = vpack.c.bf16 %v3287_v55, %v3287_v55  ;;  %v11804_v51 = vpop.f32.mrb[73].mxu1 }
0x1fe5   : > { %v3290_v39 = vpop.f32.mrb[74].mxu1 }
0x1fe6   : > { %v11805_v8 = vpop.f32.mrb[75].mxu1  ;;  %11827 = vmatmul.mubr.msk.bf16.vlgmr.msra.gmra.mrb[80].mxu1 %vm1454_vm2, %v3293_v60 }
0x1fe7   : > { %11838 = vmatprep.mubr.msk.bf16.mxu1 %vm14020_vm0, %v16485_v0 }
0x2056   : > { %v3401_v27 = vpop.f32.mrb[76].mxu1 }
0x2057   : > { %v3407_v18 = vpack.c.bf16 %v3401_v27, %v3401_v27  ;;  %v11816_v25 = vpop.f32.mrb[77].mxu1 }
0x2058   : > { %v3404_v28 = vpop.f32.mrb[78].mxu1 }
0x2059   : > { %v11817_v31 = vpop.f32.mrb[79].mxu1  ;;  %11821 = vmatmul.mubr.msk.bf16.vlgmr.msra.gmra.mrb[76].mxu0 %vm1454_vm2, %v3407_v18 }
0x205a   : > { %11831 = vmatpush3.bf16.xpose.msra.mxu0 %v3502_v22  ;;  %11832 = vmatprep.mubr.msk.bf16.mxu0 %vm14020_vm0, %v16485_v0 }
0x205b   : > { %11842 = vmatprep.subr.bf16.mxu0 %v16485_v0 }
0x2061   : > { %11833 = vmatmul.mubr.msk.bf16.vlgmr.msra.gmra.mrb[80].mxu0 %vm1454_vm2, %v3495_v33 }
0x2062   : > { %11843 = vmatpush3.bf16.msra.mxu0 %v14774_v20  ;;  %11844 = vmatprep.mubr.msk.bf16.mxu0 %vm14020_vm0, %v16485_v0 }
0x2063   : > { %11854 = vmatprep.subr.bf16.mxu0 %v16485_v0 }
0x20b9   : > { %v3488_v37 = vpop.f32.mrb[80].mxu1 }
0x20ba   : > { %v11828_v41 = vpop.f32.mrb[81].mxu1 }
0x20bb   : > { %v3491_v43 = vpop.f32.mrb[82].mxu1 }
0x20bc   : > { %v11829_v48 = vpop.f32.mrb[83].mxu1 }
0x212c   : > { %v3445_v1 = vpop.f32.mrb[76].mxu0 }
0x212d   : > { %v15142_v53 = vadd.f32 %v3488_v37, %v3445_v1  ;;  %v11822_v55 = vpop.f32.mrb[77].mxu0 }
0x212e   : > { %v3448_v60 = vpop.f32.mrb[78].mxu0 }
0x212f   : > { %v11823_v51 = vpop.f32.mrb[79].mxu0 }
0x2134   : > { %v3538_v39 = vpop.f32.mrb[80].mxu0 }
0x2135   : > { %v11834_v8 = vpop.f32.mrb[81].mxu0  ;;  %v3539_v16 = vadd.f32 %v15105_v7, %v3538_v39 }
0x2136   : > { %v3541_v27 = vpop.f32.mrb[82].mxu0 }
0x2137   : > { %v11835_v18 = vpop.f32.mrb[83].mxu0  ;;  %v3544_v25 = vsel %vm1454_vm2, %v3539_v16, -inf }
0x2138   : > { %3545 = vmax.xlane.f32.xlu0 %v3544_v25 }
0x214e   : > { %3556 = vrot.lane.b32.xlu0 %v15075_v44, %s14022_s20 }
0x2152   : > { %3649 = vrot.lane.b32.xlu0 %v15077_v42, %s14023_s10 }
0x21c5   : > { %v3546_v28 = vpop.xlane.xlu0 %3545 }
0x21c6   : > { %v3547_v22 = vsub.f32 %v3539_v16, %v3546_v28 }
0x21c8   : > { %v3548_v31 = vmul.f32 1.442695, %v3547_v22 }
0x21c9   : > { %v3557_v33 = vpop.permute.xlu0 %3556 }
0x21ca   : > { %13065 = vpow2.f32 %v3548_v31  ;;  %v3562_v37 = vsel %vm1516_vm3, %v3557_v33, 0 }
0x21cb   : > { %11837 = vmatpush3.bf16.msra.mxu1 %v3562_v37 }
0x21cc   : > { %11848 = vmatprep.subr.bf16.mxu1 %v16485_v0 }
0x21cd   : > { %v3650_v39 = vpop.permute.xlu0 %3649 }
0x21d4   : > { %v13066_v41 = vpop.eup %13065 }
0x21d5   : > { %v3550_v43 = vsel %vm1454_vm2, %v13066_v41, 0.0 }
0x21d6   : > { %3551 = vadd.xlane.f32.xlu1 %v3550_v43 }
0x21e7   : > { %3651 = vrot.lane.b32.xlu1 %v15087_v56, %s14023_s10 }
0x2263   : > { %v3552_v48 = vpop.xlane.xlu1 %3551 }
0x2264   : > { %13067 = vrcp.f32 %v3552_v48 }
0x2267   : > { %v3652_v55 = vpop.permute.xlu1 %3651 }
0x2268   : > { %v3657_v51 = vsel %vm1454_vm2, %v3652_v55, 0 }
0x226e   : > { %v13068_v42 = vpop.eup %13067 }
0x226f   : > { %v3554_v1 = vmul.f32 %v13068_v42, %v13066_v41 }
0x2271   : > { %v3555_v60 = vpack.c.bf16 %v3554_v1, %v3554_v1 }
0x2273   : > { %11839 = vmatmul.mubr.msk.bf16.vlgmr.msra.gmra.mrb[84].mxu1 %vm1454_vm2, %v3555_v60 }
0x2274   : > { %11849 = vmatpush3.bf16.xpose.msra.mxu1 %v3657_v51  ;;  %11850 = vmatprep.mubr.msk.bf16.mxu1 %vm14020_vm0, %v16485_v0 }
0x2275   : > { %11860 = vmatprep.subr.bf16.mxu1 %v16485_v0 }
0x227b   : > { %11851 = vmatmul.mubr.msk.bf16.vlgmr.msra.gmra.mrb[88].mxu1 %vm1454_vm2, %v3650_v39 }
0x227c   : > { %11861 = vmatpush3.bf16.msra.mxu1 %v14788_v40  ;;  %11862 = vmatprep.mubr.msk.bf16.mxu1 %vm14020_vm0, %v16485_v0 }
0x227d   : > { %11874 = vmatprep.subr.bf16.mxu1 %v16485_v0 }
0x2346   : > { %v3598_v56 = vpop.f32.mrb[84].mxu1 }
0x2347   : > { %v3604_v8 = vpack.c.bf16 %v3598_v56, %v3598_v56  ;;  %v11840_v16 = vpop.f32.mrb[85].mxu1 }
0x2348   : > { %v3601_v27 = vpop.f32.mrb[86].mxu1 }
0x2349   : > { %v11841_v18 = vpop.f32.mrb[87].mxu1  ;;  %11845 = vmatmul.mubr.msk.bf16.vlgmr.msra.gmra.mrb[84].mxu0 %vm1454_vm2, %v3604_v8 }
0x234a   : > { %11856 = vmatprep.mubr.msk.bf16.mxu0 %vm14020_vm0, %v16485_v0 }
0x234e   : > { %v3693_v25 = vpop.f32.mrb[88].mxu1 }
0x234f   : > { %v11852_v28 = vpop.f32.mrb[89].mxu1  ;;  %v3694_v22 = vadd.f32 %v15105_v7, %v3693_v25 }
0x2350   : > { %v3696_v31 = vpop.f32.mrb[90].mxu1 }
0x2351   : > { %v11853_v33 = vpop.f32.mrb[91].mxu1  ;;  %v3699_v37 = vsel %vm1454_vm2, %v3694_v22, -inf }
0x2352   : > { %3700 = vmax.xlane.f32.xlu1 %v3699_v37 }
0x23df   : > { %v3701_v41 = vpop.xlane.xlu1 %3700 }
0x23e0   : > { %v3702_v43 = vsub.f32 %v3694_v22, %v3701_v41 }
0x23e2   : > { %v3703_v48 = vmul.f32 1.442695, %v3702_v43 }
0x23e4   : > { %13069 = vpow2.f32 %v3703_v48 }
0x23ee   : > { %v13070_v42 = vpop.eup %13069 }
0x23ef   : > { %v3705_v1 = vsel %vm1454_vm2, %v13070_v42, 0.0 }
0x23f0   : > { %3706 = vadd.xlane.f32.xlu0 %v3705_v1  ;;  %v15188_v1 = vld [vmem:[#allocation14] ss:$0 sm:$0xff] }
0x2406   : > { %3711 = vrot.lane.b32.xlu0 %v15075_v44, %s14023_s10 }
0x241c   : > { %v3642_v55 = vpop.f32.mrb[84].mxu0 }
0x241d   : > { %v3648_v60 = vadd.f32 %v3642_v55, %v15142_v53  ;;  %v11846_v51 = vpop.f32.mrb[85].mxu0 }
0x241e   : > { %v3645_v39 = vpop.f32.mrb[86].mxu0 }
0x241f   : > { %v11847_v56 = vpop.f32.mrb[87].mxu0 }
0x247d   : > { %v3707_v8 = vpop.xlane.xlu0 %3706 }
0x247e   : > { %13071 = vrcp.f32 %v3707_v8 }
0x2481   : > { %v3712_v16 = vpop.permute.xlu0 %3711 }
0x2482   : > { %v3717_v27 = vsel %vm1516_vm3, %v3712_v16, 0 }
0x2483   : > { %11855 = vmatpush3.bf16.msra.mxu0 %v3717_v27 }
0x2484   : > { %11866 = vmatprep.subr.bf16.mxu0 %v16485_v0 }
0x2488   : > { %v13072_v18 = vpop.eup %13071 }
0x2489   : > { %v3709_v25 = vmul.f32 %v13072_v18, %v13070_v42 }
0x248b   : > { %v3710_v28 = vpack.c.bf16 %v3709_v25, %v3709_v25 }
0x248d   : > { %11857 = vmatmul.mubr.msk.bf16.vlgmr.msra.gmra.mrb[88].mxu0 %vm1454_vm2, %v3710_v28 }
0x248e   : > { %11867 = vmatpush3.bf16.msra.mxu0 %v14812_v26  ;;  %11870 = vmatprep.mubr.msk.bf16.mxu0 %vm14020_vm0, %v16485_v0 }
0x248f   : > { %11868 = vmatprep.subr.bf16.mxu0 %v16485_v0 }
0x2492   : > { %11869 = vmatpush3.bf16.msra.mxu0 %v14818_v32 }
0x2493   : > { %11880 = vmatprep.subr.bf16.mxu0 %v16485_v0 }
0x2560   : > { %v3753_v44 = vpop.f32.mrb[88].mxu0 }
0x2561   : > { %v3759_v53 = vpack.c.bf16 %v3753_v44, %v3753_v44  ;;  %v11858_v22 = vpop.f32.mrb[89].mxu0 }
0x2562   : > { %v3756_v31 = vpop.f32.mrb[90].mxu0  ;;  %v15195_v22 = vld [vmem:[%s16573_s5] ss:$0 sm:$0xff] }
0x2563   : > { %v11859_v33 = vpop.f32.mrb[91].mxu0  ;;  %11863 = vmatmul.mubr.msk.bf16.vlgmr.msra.gmra.mrb[92].mxu1 %vm1454_vm2, %v3759_v53  ;;  %v15198_v31 = vld [vmem:[#allocation26] ss:$0 sm:$0xff] }
0x2564   : > { %11875 = vmatpush3.bf16.xpose.msra.mxu1 %v14836_v52  ;;  %11876 = vmatprep.mubr.msk.bf16.mxu1 %vm14020_vm0, %v16485_v0 }
0x2565   : > { %11886 = vmatprep.subr.bf16.mxu1 %v16485_v0 }
0x2636   : > { %v3797_v37 = vpop.f32.mrb[92].mxu1 }
0x2637   : > { %v3803_v41 = vadd.f32 %v3797_v37, %v3648_v60  ;;  %v11864_v43 = vpop.f32.mrb[93].mxu1 }
0x2638   : > { %v3800_v48 = vpop.f32.mrb[94].mxu1  ;;  %v15210_v43 = vld [vmem:[#allocation17] ss:$0 sm:$0xff] }
0x2639   : > { %v11865_v42 = vpop.f32.mrb[95].mxu1  ;;  %v3804_v55 = vadd.f32 %v15188_v1, %v3803_v41 }
0x263b   : > { %v3805_v51 = vadd.f32 %v3804_v55, %v15052_v5 }
0x263d   : > { %v3806_v39 = vsel %vm1314_vm1, %v3805_v51, 0.0 }
0x263e   : > { %3807 = vadd.xlane.f32.xlu1 %v3806_v39 }
0x26cb   : > { %v3808_v56 = vpop.xlane.xlu1 %3807 }
0x26cc   : > { %v3809_v8 = vmul.f32 0.03125, %v3808_v56 }
0x26ce   : > { %v3810_v16 = vsub.f32 %v3805_v51, %v3809_v8 }
0x26d0   : > { %v3811_v27 = vmul.f32 %v3810_v16, %v3810_v16 }
0x26d2   : > { %v3812_v18 = vsel %vm1314_vm1, %v3811_v27, 0.0 }
0x26d3   : > { %3813 = vadd.xlane.f32.xlu1 %v3812_v18  ;;  %v15228_v18 = vld [vmem:[#allocation8] sm:$0xff] }
0x2760   : > { %v3814_v60 = vpop.xlane.xlu1 %3813 }
0x2761   : > { %v3815_v25 = vmul.f32 0.03125, %v3814_v60 }
0x2763   : > { %v3816_v28 = vadd.f32 1e-05, %v3815_v25 }
0x2765   : > { %13073 = vrsqrt.f32 %v3816_v28 }
0x276f   : > { %v13074_v44 = vpop.eup %13073 }
0x2770   : > { %v3818_v53 = vmul.f32 %v13074_v44, %v3810_v16 }
0x2772   : > { %v3819_v5 = vmul.f32 %v15195_v22, %v3818_v53 }
0x2774   : > { %v15201_v33 = vadd.f32 %v15198_v31, %v3819_v5 }
0x2776   : > { %v3821_v37 = vpack.c.bf16 %v15201_v33, %v15201_v33 }
0x2778   : > { %11871 = vmatmul.mubr.msk.bf16.vlgmr.msra.gmra.mrb[92].mxu0 %vm1314_vm1, %v3821_v37 }
0x2779   : > { %11881 = vmatpush3.bf16.msra.mxu0 %v14873_v46  ;;  %11882 = vmatprep.mubr.msk.bf16.mxu0 %vm14020_vm0, %v16485_v0 }
0x277a   : > { %11892 = vmatprep.subr.bf16.mxu0 %v16485_v0 }
0x284b   : > { %v3859_v41 = vpop.f32.mrb[92].mxu0 }
0x284c   : > { %v3860_v48 = vadd.f32 %v15210_v43, %v3859_v41  ;;  %v11872_v42 = vpop.f32.mrb[93].mxu0 }
0x284d   : > { %v3862_v55 = vpop.f32.mrb[94].mxu0 }
0x284e   : > { %v3865_v51 = vmul.f32 0.35355338, %v3860_v48  ;;  %v11873_v39 = vpop.f32.mrb[95].mxu0 }
0x2850   : > { %v15213_v56 = vpack.c.bf16 %v3865_v51, %v3865_v51 }
0x2852   : > { %3967 = vrot.lane.b32.xlu1 %v15213_v56, %s14021_s12  ;;  %11877 = vmatmul.mubr.msk.bf16.vlgmr.msra.gmra.mrb[96].mxu1 %vm1454_vm2, %v15213_v56 }
0x2853   : > { %11887 = vmatpush3.bf16.xpose.msra.mxu1 %v14843_v62  ;;  %11888 = vmatprep.mubr.msk.bf16.mxu1 %vm14020_vm0, %v16485_v0 }
0x2854   : > { %11898 = vmatprep.subr.bf16.mxu1 %v16485_v0 }
0x28c4   : > { %v3968_v8 = vpop.permute.xlu1 %3967 }
0x28c5   : > { %11889 = vmatmul.mubr.msk.bf16.vlgmr.msra.gmra.mrb[100].mxu1 %vm1454_vm2, %v3968_v8 }
0x28c6   : > { %11899 = vmatpush3.bf16.msra.mxu1 %v14888_v59  ;;  %11900 = vmatprep.mubr.msk.bf16.mxu1 %vm14020_vm0, %v16485_v0 }
0x28c7   : > { %11910 = vmatprep.subr.bf16.mxu1 %v16485_v0 }
0x2925   : > { %v3904_v16 = vpop.f32.mrb[96].mxu1 }
0x2926   : > { %v11878_v27 = vpop.f32.mrb[97].mxu1  ;;  %v3905_v60 = vadd.f32 %v15228_v18, %v3904_v16 }
0x2927   : > { %v3907_v25 = vpop.f32.mrb[98].mxu1 }
0x2928   : > { %v11879_v28 = vpop.f32.mrb[99].mxu1  ;;  %v3910_v44 = vsel %vm1454_vm2, %v3905_v60, -inf }
0x2929   : > { %3911 = vmax.xlane.f32.xlu0 %v3910_v44 }
0x2998   : > { %v4006_v53 = vpop.f32.mrb[100].mxu1 }
0x2999   : > { %v11890_v5 = vpop.f32.mrb[101].mxu1  ;;  %v4007_v37 = vadd.f32 %v15228_v18, %v4006_v53 }
0x299a   : > { %v4009_v41 = vpop.f32.mrb[102].mxu1 }
0x299b   : > { %v11891_v48 = vpop.f32.mrb[103].mxu1  ;;  %v4012_v42 = vsel %vm1454_vm2, %v4007_v37, -inf }
0x299c   : > { %4013 = vmax.xlane.f32.xlu1 %v4012_v42 }
0x29b6   : > { %v3912_v55 = vpop.xlane.xlu0 %3911 }
0x29b7   : > { %v3913_v51 = vsub.f32 %v3905_v60, %v3912_v55 }
0x29b9   : > { %v3914_v39 = vmul.f32 1.442695, %v3913_v51 }
0x29bb   : > { %13075 = vpow2.f32 %v3914_v39 }
0x29c5   : > { %v13076_v8 = vpop.eup %13075 }
0x29c6   : > { %v3916_v16 = vsel %vm1454_vm2, %v13076_v8, 0.0 }
0x29c7   : > { %3917 = vadd.xlane.f32.xlu0 %v3916_v16 }
0x2a29   : > { %v4014_v27 = vpop.xlane.xlu1 %4013 }
0x2a2a   : > { %v4015_v25 = vsub.f32 %v4007_v37, %v4014_v27 }
0x2a2c   : > { %v4016_v28 = vmul.f32 1.442695, %v4015_v25 }
0x2a2e   : > { %13077 = vpow2.f32 %v4016_v28 }
0x2a38   : > { %v13078_v44 = vpop.eup %13077 }
0x2a39   : > { %v4018_v53 = vsel %vm1454_vm2, %v13078_v44, 0.0 }
0x2a3a   : > { %4019 = vadd.xlane.f32.xlu0 %v4018_v53 }
0x2a50   : > { %4154 = vrot.lane.b32.xlu0 %v15213_v56, %s14022_s20 }
0x2a54   : > { %v3918_v5 = vpop.xlane.xlu0 %3917 }
0x2a55   : > { %13079 = vrcp.f32 %v3918_v5 }
0x2a5f   : > { %v13080_v60 = vpop.eup %13079 }
0x2a60   : > { %v3920_v41 = vmul.f32 %v13080_v60, %v13076_v8 }
0x2a62   : > { %v3921_v48 = vpack.c.bf16 %v3920_v41, %v3920_v41 }
0x2a64   : > { %11883 = vmatmul.mubr.msk.bf16.vlgmr.msra.gmra.mrb[96].mxu0 %vm1454_vm2, %v3921_v48 }
0x2a65   : > { %11893 = vmatpush3.bf16.msra.mxu0 %v14893_v2  ;;  %11894 = vmatprep.mubr.msk.bf16.mxu0 %vm14020_vm0, %v16485_v0 }
0x2a66   : > { %11904 = vmatprep.subr.bf16.mxu0 %v16485_v0 }
0x2ac7   : > { %v4020_v37 = vpop.xlane.xlu0 %4019 }
0x2ac8   : > { %13081 = vrcp.f32 %v4020_v37 }
0x2acb   : > { %v4155_v41 = vpop.permute.xlu0 %4154 }
0x2ad2   : > { %v13082_v42 = vpop.eup %13081 }
0x2ad3   : > { %v4022_v55 = vmul.f32 %v13082_v42, %v13078_v44 }
0x2ad5   : > { %v4023_v51 = vpack.c.bf16 %v4022_v55, %v4022_v55 }
0x2ad7   : > { %11895 = vmatmul.mubr.msk.bf16.vlgmr.msra.gmra.mrb[100].mxu0 %vm1454_vm2, %v4023_v51 }
0x2ad8   : > { %11905 = vmatpush3.bf16.msra.mxu0 %v14898_v13  ;;  %11906 = vmatprep.mubr.msk.bf16.mxu0 %vm14020_vm0, %v16485_v0 }
0x2ad9   : > { %11916 = vmatprep.subr.bf16.mxu0 %v16485_v0 }
0x2b37   : > { %v3959_v39 = vpop.f32.mrb[96].mxu0 }
0x2b38   : > { %v3965_v8 = vpack.c.bf16 %v3959_v39, %v3959_v39  ;;  %v11884_v16 = vpop.f32.mrb[97].mxu0 }
0x2b39   : > { %v3962_v27 = vpop.f32.mrb[98].mxu0 }
0x2b3a   : > { %v11885_v25 = vpop.f32.mrb[99].mxu0  ;;  %11907 = vmatmul.mubr.msk.bf16.vlgmr.msra.gmra.mrb[104].mxu0 %vm1454_vm2, %v3965_v8 }
0x2b3b   : > { %11917 = vmatpush3.bf16.msra.mxu0 %v14930_v58  ;;  %11918 = vmatprep.mubr.msk.bf16.mxu0 %vm14020_vm0, %v16485_v0 }
0x2b3c   : > { %11928 = vmatprep.subr.bf16.mxu0 %v16485_v0 }
0x2baa   : > { %v4061_v28 = vpop.f32.mrb[100].mxu0 }
0x2bab   : > { %v4067_v44 = vpack.c.bf16 %v4061_v28, %v4061_v28  ;;  %v11896_v53 = vpop.f32.mrb[101].mxu0 }
0x2bac   : > { %v4064_v5 = vpop.f32.mrb[102].mxu0 }
0x2bad   : > { %v11897_v60 = vpop.f32.mrb[103].mxu0  ;;  %11901 = vmatmul.mubr.msk.bf16.vlgmr.msra.gmra.mrb[104].mxu1 %vm1454_vm2, %v4067_v44 }
0x2bae   : > { %11911 = vmatpush3.bf16.xpose.msra.mxu1 %v14909_v24  ;;  %11912 = vmatprep.mubr.msk.bf16.mxu1 %vm14020_vm0, %v16485_v0 }
0x2baf   : > { %11922 = vmatprep.subr.bf16.mxu1 %v16485_v0 }
0x2bb5   : > { %11913 = vmatmul.mubr.msk.bf16.vlgmr.msra.gmra.mrb[108].mxu1 %vm1454_vm2, %v4155_v41 }
0x2bb6   : > { %11923 = vmatpush3.bf16.msra.mxu1 %v14947_v17  ;;  %11924 = vmatprep.mubr.msk.bf16.mxu1 %vm14020_vm0, %v16485_v0 }
0x2bb7   : > { %11934 = vmatprep.subr.bf16.mxu1 %v16485_v0 }
0x2c0d   : > { %v4148_v48 = vpop.f32.mrb[104].mxu0 }
0x2c0e   : > { %v11908_v37 = vpop.f32.mrb[105].mxu0 }
0x2c0f   : > { %v4151_v42 = vpop.f32.mrb[106].mxu0 }
0x2c10   : > { %v11909_v55 = vpop.f32.mrb[107].mxu0 }
0x2c80   : > { %v4105_v51 = vpop.f32.mrb[104].mxu1 }
0x2c81   : > { %v11902_v39 = vpop.f32.mrb[105].mxu1  ;;  %v4149_v8 = vadd.f32 %v4148_v48, %v4105_v51 }
0x2c82   : > { %v4108_v16 = vpop.f32.mrb[106].mxu1 }
0x2c83   : > { %v11903_v27 = vpop.f32.mrb[107].mxu1  ;;  %v16579_v16 = vmov 0.0  }
0x2c88   : > { %v4193_v25 = vpop.f32.mrb[108].mxu1 }
0x2c89   : > { %v4194_v28 = vadd.f32 %v15228_v18, %v4193_v25  ;;  %v11914_v44 = vpop.f32.mrb[109].mxu1 }
0x2c8a   : > { %v4196_v53 = vpop.f32.mrb[110].mxu1 }
0x2c8b   : > { %v11915_v5 = vpop.f32.mrb[111].mxu1  ;;  %v4199_v60 = vsel %vm1454_vm2, %v4194_v28, -inf }
0x2c8c   : > { %4200 = vmax.xlane.f32.xlu1 %v4199_v60 }
0x2d19   : > { %v4201_v41 = vpop.xlane.xlu1 %4200 }
0x2d1a   : > { %v4202_v0 = vsub.f32 %v4194_v28, %v4201_v41 }
0x2d1c   : > { %v4203_v17 = vmul.f32 1.442695, %v4202_v0 }
0x2d1e   : > { %13083 = vpow2.f32 %v4203_v17 }
0x2d28   : > { %v13084_v37 = vpop.eup %13083 }
0x2d29   : > { %v4205_v42 = vsel %vm1454_vm2, %v13084_v37, 0.0 }
0x2d2a   : > { %4206 = vadd.xlane.f32.xlu1 %v4205_v42 }
0x2d3b   : > { %4299 = vrot.lane.b32.xlu1 %v15213_v56, %s14023_s10 }
0x2db7   : > { %v4207_v48 = vpop.xlane.xlu1 %4206 }
0x2db8   : > { %13085 = vrcp.f32 %v4207_v48 }
0x2dbb   : > { %v4300_v0 = vpop.permute.xlu1 %4299 }
0x2dc2   : > { %v13086_v55 = vpop.eup %13085 }
0x2dc3   : > { %v4209_v51 = vmul.f32 %v13086_v55, %v13084_v37 }
0x2dc5   : > { %v4210_v39 = vpack.c.bf16 %v4209_v51, %v4209_v51 }
0x2dc7   : > { %11919 = vmatmul.mubr.msk.bf16.vlgmr.msra.gmra.mrb[108].mxu0 %vm1454_vm2, %v4210_v39 }
0x2dc8   : > { %11929 = vmatpush3.bf16.xpose.msra.mxu0 %v14936_v9  ;;  %11930 = vmatprep.mubr.msk.bf16.mxu0 %vm14020_vm0, %v16579_v16 }
0x2dc9   : > { %11940 = vmatprep.subr.bf16.mxu0 %v16579_v16 }
0x2dcf   : > { %11931 = vmatmul.mubr.msk.bf16.vlgmr.msra.gmra.mrb[112].mxu0 %vm1454_vm2, %v4300_v0 }
0x2dd0   : > { %11941 = vmatpush3.bf16.msra.mxu0 %v14960_v12  ;;  %11942 = vmatprep.mubr.msk.bf16.mxu0 %vm14020_vm0, %v16579_v16 }
0x2dd1   : > { %11954 = vmatprep.subr.bf16.mxu0 %v16579_v16 }
0x2e9a   : > { %v4248_v17 = vpop.f32.mrb[108].mxu0 }
0x2e9b   : > { %v4254_v56 = vpack.c.bf16 %v4248_v17, %v4248_v17  ;;  %v11920_v27 = vpop.f32.mrb[109].mxu0 }
0x2e9c   : > { %v4251_v25 = vpop.f32.mrb[110].mxu0 }
0x2e9d   : > { %v11921_v28 = vpop.f32.mrb[111].mxu0  ;;  %11925 = vmatmul.mubr.msk.bf16.vlgmr.msra.gmra.mrb[112].mxu1 %vm1454_vm2, %v4254_v56 }
0x2e9e   : > { %11935 = vmatpush3.bf16.msra.mxu1 %v14966_v45  ;;  %11936 = vmatprep.mubr.msk.bf16.mxu1 %vm14020_vm0, %v16579_v16 }
0x2e9f   : > { %11946 = vmatprep.subr.bf16.mxu1 %v16579_v16 }
0x2ea2   : > { %v4338_v44 = vpop.f32.mrb[112].mxu0 }
0x2ea3   : > { %v4339_v53 = vadd.f32 %v15228_v18, %v4338_v44  ;;  %v11932_v5 = vpop.f32.mrb[113].mxu0 }
0x2ea4   : > { %v4341_v60 = vpop.f32.mrb[114].mxu0 }
0x2ea5   : > { %v11933_v41 = vpop.f32.mrb[115].mxu0  ;;  %v4344_v37 = vsel %vm1454_vm2, %v4339_v53, -inf }
0x2ea6   : > { %4345 = vmax.xlane.f32.xlu0 %v4344_v37 }
0x2f33   : > { %v4346_v42 = vpop.xlane.xlu0 %4345 }
0x2f34   : > { %v4347_v48 = vsub.f32 %v4339_v53, %v4346_v42 }
0x2f36   : > { %v4348_v55 = vmul.f32 1.442695, %v4347_v48 }
0x2f38   : > { %13087 = vpow2.f32 %v4348_v55 }
0x2f42   : > { %v13088_v51 = vpop.eup %13087 }
0x2f43   : > { %v4350_v39 = vsel %vm1454_vm2, %v13088_v51, 0.0 }
0x2f44   : > { %4351 = vadd.xlane.f32.xlu1 %v4350_v39 }
0x2f70   : > { %v4292_v0 = vpop.f32.mrb[112].mxu1 }
0x2f71   : > { %v4298_v17 = vadd.f32 %v4292_v0, %v4149_v8  ;;  %v11926_v56 = vpop.f32.mrb[113].mxu1  ;;  %v15305_v0 = vld [vmem:[%s16576_s11] ss:$0 sm:$0xff] }
0x2f72   : > { %v4295_v27 = vpop.f32.mrb[114].mxu1 }
0x2f73   : > { %v11927_v25 = vpop.f32.mrb[115].mxu1 }
0x2fd1   : > { %v4352_v28 = vpop.xlane.xlu1 %4351 }
0x2fd2   : > { %13089 = vrcp.f32 %v4352_v28 }
0x2fdc   : > { %v13090_v44 = vpop.eup %13089 }
0x2fdd   : > { %v4354_v5 = vmul.f32 %v13090_v44, %v13088_v51 }
0x2fdf   : > { %v4355_v60 = vpack.c.bf16 %v4354_v5, %v4354_v5 }
0x2fe1   : > { %11937 = vmatmul.mubr.msk.bf16.vlgmr.msra.gmra.mrb[116].mxu1 %vm1454_vm2, %v4355_v60 }
0x2fe2   : > { %11947 = vmatpush3.bf16.msra.mxu1 %v14982_v35  ;;  %11950 = vmatprep.mubr.msk.bf16.mxu1 %vm14020_vm0, %v16579_v16 }
0x2fe3   : > { %11948 = vmatprep.subr.bf16.mxu1 %v16579_v16 }
0x2fe6   : > { %11949 = vmatpush3.bf16.msra.mxu1 %v14988_v38 }
0x2fe7   : > { %11966 = vmatprep.subr.bf16.mxu1 %v16579_v16 }
0x30b4   : > { %v4393_v8 = vpop.f32.mrb[116].mxu1 }
0x30b5   : > { %v4399_v53 = vpack.c.bf16 %v4393_v8, %v4393_v8  ;;  %v11938_v41 = vpop.f32.mrb[117].mxu1 }
0x30b6   : > { %v4396_v37 = vpop.f32.mrb[118].mxu1 }
0x30b7   : > { %v11939_v42 = vpop.f32.mrb[119].mxu1  ;;  %11943 = vmatmul.mubr.msk.bf16.vlgmr.msra.gmra.mrb[116].mxu0 %vm1454_vm2, %v4399_v53 }
0x30b8   : > { %11955 = vmatpush3.bf16.msra.mxu0 %v14995_v47  ;;  %11962 = vmatprep.mubr.msk.bf16.mxu0 %vm14020_vm0, %v16579_v16 }
0x30b9   : > { %11956 = vmatprep.subr.bf16.mxu0 %v16579_v16 }
0x30bc   : > { %11957 = vmatpush3.bf16.msra.mxu0 %v14999_v49 }
0x30bd   : > { %11958 = vmatprep.subr.bf16.mxu0 %v16579_v16 }
0x30c0   : > { %11959 = vmatpush3.bf16.msra.mxu0 %v15019_v61 }
0x30c1   : > { %11960 = vmatprep.subr.bf16.mxu0 %v16579_v16 }
0x30c4   : > { %11961 = vmatpush3.bf16.msra.mxu0 %v15025_v10 }
0x30c5   : > { %11982 = vmatprep.subr.bf16.mxu0 %v16579_v16 }
0x318a   : > { %v4437_v48 = vpop.f32.mrb[116].mxu0 }
0x318b   : > { %v4443_v55 = vadd.f32 %v4437_v48, %v4298_v17  ;;  %v11944_v51 = vpop.f32.mrb[117].mxu0 }
0x318c   : > { %v4440_v39 = vpop.f32.mrb[118].mxu0 }
0x318d   : > { %v4444_v56 = vadd.f32 %v15305_v0, %v4443_v55  ;;  %v11945_v27 = vpop.f32.mrb[119].mxu0 }
0x318f   : > { %v4445_v25 = vadd.f32 %v4444_v56, %v15201_v33 }
0x3191   : > { %v4446_v28 = vsel %vm1314_vm1, %v4445_v25, 0.0 }
0x3192   : > { %4447 = vadd.xlane.f32.xlu0 %v4446_v28 }
0x321f   : > { %v4448_v44 = vpop.xlane.xlu0 %4447 }
0x3220   : > { %v4449_v5 = vmul.f32 0.03125, %v4448_v44 }
0x3222   : > { %v4450_v60 = vsub.f32 %v4445_v25, %v4449_v5 }
0x3224   : > { %v4451_v8 = vmul.f32 %v4450_v60, %v4450_v60 }
0x3226   : > { %v4452_v53 = vsel %vm1314_vm1, %v4451_v8, 0.0 }
0x3227   : > { %4453 = vadd.xlane.f32.xlu0 %v4452_v53 }
0x32b4   : > { %v4454_v17 = vpop.xlane.xlu0 %4453 }
0x32b5   : > { %v4455_v41 = vmul.f32 0.03125, %v4454_v17 }
0x32b7   : > { %v4456_v37 = vadd.f32 1e-05, %v4455_v41 }
0x32b9   : > { %13091 = vrsqrt.f32 %v4456_v37 }
0x32c3   : > { %v13092_v42 = vpop.eup %13091 }
0x32c4   : > { %v4458_v48 = vmul.f32 %v13092_v42, %v4450_v60 }
0x32c6   : > { %v4459_v55 = vmul.f32 %v15004_v54, %v4458_v48 }
0x32c8   : > { %v4460_v33 = vadd.f32 %v15006_v57, %v4459_v55 }
0x32ca   : > { %v4461_v51 = vpack.c.bf16 %v4460_v33, %v4460_v33 }
0x32cc   : > { %11951 = vmatmul.mubr.msk.bf16.vlgmr.msra.gmra.mrb[120].mxu1 %vm1314_vm1, %v4461_v51 }
0x32cd   : > { %11967 = vmatpush3.bf16.msra.mxu1 %v14633_v4  ;;  %11970 = vmatprep.mubr.msk.bf16.mxu1 %vm14020_vm0, %v16579_v16 }
0x32ce   : > { %11968 = vmatprep.subr.bf16.mxu1 %v16579_v16 }
0x32d1   : > { %11969 = vmatpush3.bf16.msra.mxu1 %v14637_v6 }
0x32d2   : > { %11974 = vmatprep.subr.bf16.mxu1 %v16579_v16 }
0x339f   : > { %v4499_v39 = vpop.f32.mrb[120].mxu1 }
0x33a0   : > { %v4500_v56 = vadd.f32 %v15030_v15, %v4499_v39  ;;  %v11952_v54 = vpop.f32.mrb[121].mxu1 }
0x33a1   : > { %v4502_v27 = vpop.f32.mrb[122].mxu1 }
0x33a2   : > { %v4505_v57 = vmax.f32 %v4500_v56, 0.0  ;;  %v11953_v25 = vpop.f32.mrb[123].mxu1 }
0x33a4   : > { %v4506_v28 = vpack.c.bf16 %v4505_v57, %v4505_v57 }
0x33a6   : > { %11963 = vmatmul.mubr.msk.bf16.vlgmr.msra.gmra.mrb[120].mxu0 %vm2989_vm4, %v4506_v28 }
0x33a7   : > { %11983 = vmatpush3.bf16.msra.mxu0 %v14684_v34  ;;  %11986 = vmatprep.mubr.msk.bf16.mxu0 %vm14020_vm0, %v16579_v16 }
0x33a8   : > { %11984 = vmatprep.subr.bf16.mxu0 %v16579_v16 }
0x33ab   : > { %11985 = vmatpush3.bf16.msra.mxu0 %v14688_v36 }
0x33ac   : > { %11996 = vmatprep.subr.bf16.mxu0 %v16579_v16 }
0x3479   : > { %v4544_v44 = vpop.f32.mrb[120].mxu0 }
0x347a   : > { %v4545_v15 = vadd.f32 %v15041_v23, %v4544_v44  ;;  %v11964_v5 = vpop.f32.mrb[121].mxu0 }
0x347b   : > { %v4547_v60 = vpop.f32.mrb[122].mxu0 }
0x347c   : > { %v11965_v8 = vpop.f32.mrb[123].mxu0  ;;  %v4550_v53 = vadd.f32 %v4545_v15, %v4460_v33 }
0x347e   : > { %v4551_v17 = vsel %vm1314_vm1, %v4550_v53, 0.0 }
0x347f   : > { %4552 = vadd.xlane.f32.xlu0 %v4551_v17 }
0x350c   : > { %v4553_v41 = vpop.xlane.xlu0 %4552 }
0x350d   : > { %v4554_v37 = vmul.f32 0.03125, %v4553_v41 }
0x350f   : > { %v4555_v42 = vsub.f32 %v4550_v53, %v4554_v37 }
0x3511   : > { %v4556_v48 = vmul.f32 %v4555_v42, %v4555_v42 }
0x3513   : > { %v4557_v55 = vsel %vm1314_vm1, %v4556_v48, 0.0 }
0x3514   : > { %4558 = vadd.xlane.f32.xlu1 %v4557_v55 }
0x35a1   : > { %v4559_v51 = vpop.xlane.xlu1 %4558 }
0x35a2   : > { %v4560_v39 = vmul.f32 0.03125, %v4559_v51 }
0x35a4   : > { %v4561_v56 = vadd.f32 1e-05, %v4560_v39 }
0x35a6   : > { %13093 = vrsqrt.f32 %v4561_v56 }
0x35b0   : > { %v13094_v54 = vpop.eup %13093 }
0x35b1   : > { %v4563_v23 = vmul.f32 %v13094_v54, %v4555_v42 }
0x35b3   : > { %v4564_v27 = vmul.f32 %v15046_v63, %v4563_v23 }
0x35b5   : > { %v15333_v33 = vadd.f32 %v15048_v3, %v4564_v27 }
0x35b7   : > { %v4566_v57 = vpack.c.bf16 %v15333_v33, %v15333_v33 }
0x35b9   : > { %11971 = vmatmul.mubr.msk.bf16.vlgmr.msra.gmra.mrb[124].mxu1 %vm1314_vm1, %v4566_v57  ;;  %11987 = vmatmul.mubr.msk.bf16.vlgmr.msra.gmra.mrb[124].mxu0 %vm1314_vm1, %v4566_v57 }
0x35ba   : > { %11975 = vmatpush3.bf16.msra.mxu1 %v14649_v11  ;;  %11978 = vmatprep.mubr.msk.bf16.mxu1 %vm14020_vm0, %v16579_v16 }
0x35bb   : > { %11976 = vmatprep.subr.bf16.mxu1 %v16579_v16  ;;  %11998 = vmatprep.mubr.msk.bf16.mxu0 %vm14020_vm0, %v16579_v16 }
0x35be   : > { %11977 = vmatpush3.bf16.msra.mxu1 %v14656_v14 }
0x35bf   : > { %11990 = vmatprep.subr.bf16.mxu1 %v16579_v16 }
0x35c1   : > { %11979 = vmatmul.mubr.msk.bf16.vlgmr.msra.gmra.mrb[128].mxu1 %vm1314_vm1, %v4566_v57 }
0x35c2   : > { %11992 = vmatprep.mubr.msk.bf16.mxu1 %vm14020_vm0, %v16579_v16 }
0x368c   : > { %v4604_v63 = vpop.f32.mrb[124].mxu1  ;;  %v4684_v3 = vpop.f32.mrb[124].mxu0 }
0x368d   : > { %v4605_v25 = vadd.f32 %v15069_v30, %v4604_v63  ;;  %v4685_v28 = vadd.f32 %v15072_v21, %v4684_v3  ;;  %v11972_v44 = vpop.f32.mrb[125].mxu1  ;;  %v11988_v15 = vpop.f32.mrb[125].mxu0 }
0x368e   : > { %v4607_v5 = vpop.f32.mrb[126].mxu1  ;;  %v4687_v60 = vpop.f32.mrb[126].mxu0 }
0x368f   : > { %v4690_v8 = vmul.f32 0.35355338, %v4605_v25  ;;  %v15352_v53 = vpack.c.bf16 %v4685_v28, %v4685_v28  ;;  %v11973_v17 = vpop.f32.mrb[127].mxu1  ;;  %v11989_v41 = vpop.f32.mrb[127].mxu0 }
0x3691   : > { %v15354_v37 = vpack.c.bf16 %v4690_v8, %v4690_v8  ;;  %v4756_v42 = vsel %vm1516_vm3, %v15352_v53, 0 }
0x3692   : > { %11997 = vmatpush3.bf16.msra.mxu0 %v4756_v42 }
0x3693   : > { %4800 = vrot.lane.b32.xlu1 %v15354_v37, %s14021_s12  ;;  %12008 = vmatprep.subr.bf16.mxu0 %v16579_v16 }
0x3694   : > { %v4644_v30 = vpop.f32.mrb[128].mxu1 }
0x3695   : > { %v4645_v21 = vadd.f32 %v15084_v50, %v4644_v30  ;;  %v11980_v48 = vpop.f32.mrb[129].mxu1 }
0x3696   : > { %v4647_v55 = vpop.f32.mrb[130].mxu1 }
0x3697   : > { %v15362_v51 = vpack.c.bf16 %v4645_v21, %v4645_v21  ;;  %v11981_v39 = vpop.f32.mrb[131].mxu1 }
0x3699   : > { %4803 = vrot.lane.b32.xlu0 %v15362_v51, %s14021_s12  ;;  %v4698_v56 = vsel %vm1454_vm2, %v15362_v51, 0 }
0x369a   : > { %11991 = vmatpush3.bf16.xpose.msra.mxu1 %v4698_v56 }
0x369b   : > { %12002 = vmatprep.subr.bf16.mxu1 %v16579_v16 }
0x36a1   : > { %11993 = vmatmul.mubr.msk.bf16.vlgmr.msra.gmra.mrb[132].mxu1 %vm1454_vm2, %v15354_v37 }
0x36a2   : > { %12004 = vmatprep.mubr.msk.bf16.mxu1 %vm14020_vm0, %v16579_v16 }
0x3705   : > { %v4801_v23 = vpop.permute.xlu1 %4800 }
0x370b   : > { %v4804_v50 = vpop.permute.xlu0 %4803 }
0x370c   : > { %v4809_v54 = vsel %vm1454_vm2, %v4804_v50, 0 }
0x370d   : > { %12003 = vmatpush3.bf16.xpose.msra.mxu1 %v4809_v54 }
0x370e   : > { %12014 = vmatprep.subr.bf16.mxu1 %v16579_v16 }
0x3714   : > { %12005 = vmatmul.mubr.msk.bf16.vlgmr.msra.gmra.mrb[136].mxu1 %vm1454_vm2, %v4801_v23 }
0x3715   : > { %12015 = vmatpush3.bf16.msra.mxu1 %v14727_v19  ;;  %12016 = vmatprep.mubr.msk.bf16.mxu1 %vm14020_vm0, %v16579_v16 }
0x3716   : > { %12026 = vmatprep.subr.bf16.mxu1 %v16579_v16 }
0x3774   : > { %v4734_v27 = vpop.f32.mrb[132].mxu1 }
0x3775   : > { %v4735_v57 = vadd.f32 %v15105_v7, %v4734_v27  ;;  %v11994_v63 = vpop.f32.mrb[133].mxu1 }
0x3776   : > { %v4737_v3 = vpop.f32.mrb[134].mxu1 }
0x3777   : > { %v11995_v25 = vpop.f32.mrb[135].mxu1  ;;  %v4740_v28 = vsel %vm1454_vm2, %v4735_v57, -inf }
0x3778   : > { %4741 = vmax.xlane.f32.xlu1 %v4740_v28 }
0x37e7   : > { %v4845_v44 = vpop.f32.mrb[136].mxu1 }
0x37e8   : > { %v4846_v15 = vadd.f32 %v15105_v7, %v4845_v44  ;;  %v12006_v5 = vpop.f32.mrb[137].mxu1 }
0x37e9   : > { %v4848_v60 = vpop.f32.mrb[138].mxu1 }
0x37ea   : > { %v12007_v8 = vpop.f32.mrb[139].mxu1  ;;  %v4851_v17 = vsel %vm1454_vm2, %v4846_v15, -inf }
0x37eb   : > { %4852 = vmax.xlane.f32.xlu0 %v4851_v17 }
0x3805   : > { %v4742_v41 = vpop.xlane.xlu1 %4741 }
0x3806   : > { %v4743_v42 = vsub.f32 %v4735_v57, %v4742_v41 }
0x3808   : > { %v4744_v30 = vmul.f32 1.442695, %v4743_v42 }
0x380a   : > { %13095 = vpow2.f32 %v4744_v30 }
0x3814   : > { %v13096_v21 = vpop.eup %13095 }
0x3815   : > { %v4746_v48 = vsel %vm1454_vm2, %v13096_v21, 0.0 }
0x3816   : > { %4747 = vadd.xlane.f32.xlu0 %v4746_v48 }
0x382c   : > { %4864 = vrot.lane.b32.xlu0 %v15352_v53, %s14021_s12 }
0x3878   : > { %v4853_v55 = vpop.xlane.xlu0 %4852 }
0x3879   : > { %v4854_v39 = vsub.f32 %v4846_v15, %v4853_v55 }
0x387b   : > { %v4855_v7 = vmul.f32 1.442695, %v4854_v39 }
0x387d   : > { %13097 = vpow2.f32 %v4855_v7 }
0x3887   : > { %v13098_v56 = vpop.eup %13097 }
0x3888   : > { %v4857_v50 = vsel %vm1454_vm2, %v13098_v56, 0.0 }
0x3889   : > { %4858 = vadd.xlane.f32.xlu1 %v4857_v50 }
0x389a   : > { %5001 = vrot.lane.b32.xlu1 %v15362_v51, %s14022_s20 }
0x389e   : > { %4999 = vrot.lane.b32.xlu1 %v15354_v37, %s14022_s20 }
0x38a3   : > { %v4748_v54 = vpop.xlane.xlu0 %4747 }
0x38a4   : > { %13099 = vrcp.f32 %v4748_v54 }
0x38a7   : > { %v4865_v57 = vpop.permute.xlu0 %4864 }
0x38a8   : > { %v4870_v3 = vsel %vm1516_vm3, %v4865_v57, 0 }
0x38ae   : > { %v13100_v23 = vpop.eup %13099 }
0x38af   : > { %v4750_v27 = vmul.f32 %v13100_v23, %v13096_v21 }
0x38b1   : > { %v4751_v63 = vpack.c.bf16 %v4750_v27, %v4750_v27 }
0x38b3   : > { %11999 = vmatmul.mubr.msk.bf16.vlgmr.msra.gmra.mrb[128].mxu0 %vm1454_vm2, %v4751_v63 }
0x38b4   : > { %12009 = vmatpush3.bf16.msra.mxu0 %v4870_v3  ;;  %12010 = vmatprep.mubr.msk.bf16.mxu0 %vm14020_vm0, %v16579_v16 }
0x38b5   : > { %12020 = vmatprep.subr.bf16.mxu0 %v16579_v16 }
0x3916   : > { %v4859_v25 = vpop.xlane.xlu1 %4858 }
0x3917   : > { %13101 = vrcp.f32 %v4859_v25 }
0x391a   : > { %v5002_v42 = vpop.permute.xlu1 %5001 }
0x391b   : > { %v5007_v39 = vsel %vm1454_vm2, %v5002_v42, 0 }
0x3921   : > { %v13102_v28 = vpop.eup %13101 }
0x3922   : > { %v4861_v44 = vmul.f32 %v13102_v28, %v13098_v56  ;;  %v5000_v56 = vpop.permute.xlu1 %4999 }
0x3924   : > { %v4862_v15 = vpack.c.bf16 %v4861_v44, %v4861_v44 }
0x3926   : > { %12011 = vmatmul.mubr.msk.bf16.vlgmr.msra.gmra.mrb[132].mxu0 %vm1454_vm2, %v4862_v15  ;;  %v15417_v15 = vld [vmem:[#allocation7] sm:$0xff] }
0x3927   : > { %12021 = vmatpush3.bf16.msra.mxu0 %v14735_v29  ;;  %12022 = vmatprep.mubr.msk.bf16.mxu0 %vm14020_vm0, %v16579_v16 }
0x3928   : > { %12032 = vmatprep.subr.bf16.mxu0 %v16579_v16 }
0x3986   : > { %v4792_v5 = vpop.f32.mrb[128].mxu0 }
0x3987   : > { %v4798_v60 = vpack.c.bf16 %v4792_v5, %v4792_v5  ;;  %v12000_v8 = vpop.f32.mrb[129].mxu0 }
0x3988   : > { %v4795_v17 = vpop.f32.mrb[130].mxu0 }
0x3989   : > { %v12001_v41 = vpop.f32.mrb[131].mxu0  ;;  %12023 = vmatmul.mubr.msk.bf16.vlgmr.msra.gmra.mrb[136].mxu0 %vm1454_vm2, %v4798_v60 }
0x398a   : > { %12034 = vmatprep.mubr.msk.bf16.mxu0 %vm14020_vm0, %v16579_v16 }
0x39f9   : > { %v4906_v30 = vpop.f32.mrb[132].mxu0 }
0x39fa   : > { %v4912_v21 = vpack.c.bf16 %v4906_v30, %v4906_v30  ;;  %v12012_v48 = vpop.f32.mrb[133].mxu0 }
0x39fb   : > { %v4909_v55 = vpop.f32.mrb[134].mxu0 }
0x39fc   : > { %v12013_v7 = vpop.f32.mrb[135].mxu0  ;;  %12017 = vmatmul.mubr.msk.bf16.vlgmr.msra.gmra.mrb[140].mxu1 %vm1454_vm2, %v4912_v21 }
0x39fd   : > { %12027 = vmatpush3.bf16.xpose.msra.mxu1 %v5007_v39  ;;  %12028 = vmatprep.mubr.msk.bf16.mxu1 %vm14020_vm0, %v16579_v16 }
0x39fe   : > { %12038 = vmatprep.subr.bf16.mxu1 %v16579_v16 }
0x3a04   : > { %12029 = vmatmul.mubr.msk.bf16.vlgmr.msra.gmra.mrb[144].mxu1 %vm1454_vm2, %v5000_v56 }
0x3a05   : > { %12039 = vmatpush3.bf16.msra.mxu1 %v14774_v20  ;;  %12040 = vmatprep.mubr.msk.bf16.mxu1 %vm14020_vm0, %v16579_v16 }
0x3a06   : > { %12050 = vmatprep.subr.bf16.mxu1 %v16579_v16 }
0x3a5c   : > { %v4993_v50 = vpop.f32.mrb[136].mxu0 }
0x3a5d   : > { %v12024_v54 = vpop.f32.mrb[137].mxu0 }
0x3a5e   : > { %v4996_v23 = vpop.f32.mrb[138].mxu0 }
0x3a5f   : > { %v12025_v27 = vpop.f32.mrb[139].mxu0 }
0x3acf   : > { %v4950_v57 = vpop.f32.mrb[140].mxu1 }
0x3ad0   : > { %v15415_v63 = vadd.f32 %v4993_v50, %v4950_v57  ;;  %v12018_v3 = vpop.f32.mrb[141].mxu1 }
0x3ad1   : > { %v4953_v25 = vpop.f32.mrb[142].mxu1 }
0x3ad2   : > { %v12019_v28 = vpop.f32.mrb[143].mxu1 }
0x3ad7   : > { %v5043_v44 = vpop.f32.mrb[144].mxu1 }
0x3ad8   : > { %v5044_v5 = vadd.f32 %v15417_v15, %v5043_v44  ;;  %v12030_v60 = vpop.f32.mrb[145].mxu1 }
0x3ad9   : > { %v5046_v8 = vpop.f32.mrb[146].mxu1 }
0x3ada   : > { %v12031_v17 = vpop.f32.mrb[147].mxu1  ;;  %v5049_v41 = vsel %vm1454_vm2, %v5044_v5, -inf }
0x3adb   : > { %5050 = vmax.xlane.f32.xlu0 %v5049_v41 }
0x3af1   : > { %5061 = vrot.lane.b32.xlu0 %v15352_v53, %s14022_s20 }
0x3af5   : > { %5154 = vrot.lane.b32.xlu0 %v15354_v37, %s14023_s10 }
0x3b68   : > { %v5051_v42 = vpop.xlane.xlu0 %5050 }
0x3b69   : > { %v5052_v30 = vsub.f32 %v5044_v5, %v5051_v42 }
0x3b6b   : > { %v5053_v21 = vmul.f32 1.442695, %v5052_v30 }
0x3b6c   : > { %v5062_v48 = vpop.permute.xlu0 %5061 }
0x3b6d   : > { %13103 = vpow2.f32 %v5053_v21  ;;  %v5067_v55 = vsel %vm1516_vm3, %v5062_v48, 0 }
0x3b6e   : > { %12033 = vmatpush3.bf16.msra.mxu0 %v5067_v55 }
0x3b6f   : > { %12044 = vmatprep.subr.bf16.mxu0 %v16579_v16 }
0x3b70   : > { %v5155_v57 = vpop.permute.xlu0 %5154 }
0x3b77   : > { %v13104_v39 = vpop.eup %13103 }
0x3b78   : > { %v5055_v7 = vsel %vm1454_vm2, %v13104_v39, 0.0 }
0x3b79   : > { %5056 = vadd.xlane.f32.xlu1 %v5055_v7 }
0x3b8a   : > { %5156 = vrot.lane.b32.xlu1 %v15362_v51, %s14023_s10 }
0x3c06   : > { %v5057_v56 = vpop.xlane.xlu1 %5056 }
0x3c07   : > { %13105 = vrcp.f32 %v5057_v56 }
0x3c0a   : > { %v5157_v54 = vpop.permute.xlu1 %5156 }
0x3c0b   : > { %v5162_v27 = vsel %vm1454_vm2, %v5157_v54, 0 }
0x3c11   : > { %v13106_v37 = vpop.eup %13105 }
0x3c12   : > { %v5059_v50 = vmul.f32 %v13106_v37, %v13104_v39 }
0x3c14   : > { %v5060_v23 = vpack.c.bf16 %v5059_v50, %v5059_v50 }
0x3c16   : > { %12035 = vmatmul.mubr.msk.bf16.vlgmr.msra.gmra.mrb[140].mxu0 %vm1454_vm2, %v5060_v23 }
0x3c17   : > { %12045 = vmatpush3.bf16.xpose.msra.mxu0 %v5162_v27  ;;  %12046 = vmatprep.mubr.msk.bf16.mxu0 %vm14020_vm0, %v16579_v16 }
0x3c18   : > { %12056 = vmatprep.subr.bf16.mxu0 %v16579_v16 }
0x3c1e   : > { %12047 = vmatmul.mubr.msk.bf16.vlgmr.msra.gmra.mrb[144].mxu0 %vm1454_vm2, %v5155_v57 }
0x3c1f   : > { %12057 = vmatpush3.bf16.msra.mxu0 %v14788_v40  ;;  %12058 = vmatprep.mubr.msk.bf16.mxu0 %vm14020_vm0, %v16579_v16 }
0x3c20   : > { %12070 = vmatprep.subr.bf16.mxu0 %v16579_v16 }
0x3ce9   : > { %v5103_v51 = vpop.f32.mrb[140].mxu0 }
0x3cea   : > { %v5109_v3 = vpack.c.bf16 %v5103_v51, %v5103_v51  ;;  %v12036_v25 = vpop.f32.mrb[141].mxu0 }
0x3ceb   : > { %v5106_v28 = vpop.f32.mrb[142].mxu0 }
0x3cec   : > { %v12037_v44 = vpop.f32.mrb[143].mxu0  ;;  %12041 = vmatmul.mubr.msk.bf16.vlgmr.msra.gmra.mrb[148].mxu1 %vm1454_vm2, %v5109_v3 }
0x3ced   : > { %12052 = vmatprep.mubr.msk.bf16.mxu1 %vm14020_vm0, %v16579_v16 }
0x3cf1   : > { %v5198_v5 = vpop.f32.mrb[144].mxu0 }
0x3cf2   : > { %v5199_v60 = vadd.f32 %v15417_v15, %v5198_v5  ;;  %v12048_v8 = vpop.f32.mrb[145].mxu0 }
0x3cf3   : > { %v5201_v17 = vpop.f32.mrb[146].mxu0 }
0x3cf4   : > { %v12049_v41 = vpop.f32.mrb[147].mxu0  ;;  %v5204_v42 = vsel %vm1454_vm2, %v5199_v60, -inf }
0x3cf5   : > { %5205 = vmax.xlane.f32.xlu1 %v5204_v42 }
0x3d82   : > { %v5206_v30 = vpop.xlane.xlu1 %5205 }
0x3d83   : > { %v5207_v21 = vsub.f32 %v5199_v60, %v5206_v30 }
0x3d85   : > { %v5208_v48 = vmul.f32 1.442695, %v5207_v21 }
0x3d87   : > { %13107 = vpow2.f32 %v5208_v48 }
0x3d91   : > { %v13108_v55 = vpop.eup %13107 }
0x3d92   : > { %v5210_v39 = vsel %vm1454_vm2, %v13108_v55, 0.0 }
0x3d93   : > { %5211 = vadd.xlane.f32.xlu0 %v5210_v39 }
0x3da9   : > { %5216 = vrot.lane.b32.xlu0 %v15352_v53, %s14023_s10 }
0x3dbf   : > { %v5147_v7 = vpop.f32.mrb[148].mxu1 }
0x3dc0   : > { %v5153_v56 = vadd.f32 %v5147_v7, %v15415_v63  ;;  %v12042_v37 = vpop.f32.mrb[149].mxu1 }
0x3dc1   : > { %v5150_v50 = vpop.f32.mrb[150].mxu1 }
0x3dc2   : > { %v12043_v54 = vpop.f32.mrb[151].mxu1 }
0x3e20   : > { %v5212_v23 = vpop.xlane.xlu0 %5211 }
0x3e21   : > { %13109 = vrcp.f32 %v5212_v23 }
0x3e24   : > { %v5217_v27 = vpop.permute.xlu0 %5216 }
0x3e25   : > { %v5222_v57 = vsel %vm1516_vm3, %v5217_v27, 0 }
0x3e26   : > { %12051 = vmatpush3.bf16.msra.mxu1 %v5222_v57 }
0x3e27   : > { %12062 = vmatprep.subr.bf16.mxu1 %v16579_v16 }
0x3e2b   : > { %v13110_v51 = vpop.eup %13109 }
0x3e2c   : > { %v5214_v3 = vmul.f32 %v13110_v51, %v13108_v55 }
0x3e2e   : > { %v5215_v25 = vpack.c.bf16 %v5214_v3, %v5214_v3 }
0x3e30   : > { %12053 = vmatmul.mubr.msk.bf16.vlgmr.msra.gmra.mrb[152].mxu1 %vm1454_vm2, %v5215_v25 }
0x3e31   : > { %12063 = vmatpush3.bf16.msra.mxu1 %v14812_v26  ;;  %12066 = vmatprep.mubr.msk.bf16.mxu1 %vm14020_vm0, %v16579_v16 }
0x3e32   : > { %12064 = vmatprep.subr.bf16.mxu1 %v16579_v16 }
0x3e35   : > { %12065 = vmatpush3.bf16.msra.mxu1 %v14818_v32 }
0x3e36   : > { %12076 = vmatprep.subr.bf16.mxu1 %v16579_v16 }
0x3f03   : > { %v5258_v53 = vpop.f32.mrb[152].mxu1 }
0x3f04   : > { %v5264_v63 = vpack.c.bf16 %v5258_v53, %v5258_v53  ;;  %v12054_v28 = vpop.f32.mrb[153].mxu1 }
0x3f05   : > { %v5261_v44 = vpop.f32.mrb[154].mxu1 }
0x3f06   : > { %v12055_v5 = vpop.f32.mrb[155].mxu1  ;;  %12059 = vmatmul.mubr.msk.bf16.vlgmr.msra.gmra.mrb[148].mxu0 %vm1454_vm2, %v5264_v63 }
0x3f07   : > { %12071 = vmatpush3.bf16.xpose.msra.mxu0 %v14836_v52  ;;  %12072 = vmatprep.mubr.msk.bf16.mxu0 %vm14020_vm0, %v16579_v16 }
0x3f08   : > { %12082 = vmatprep.subr.bf16.mxu0 %v16579_v16 }
0x3fd9   : > { %v5302_v60 = vpop.f32.mrb[148].mxu0 }
0x3fda   : > { %v5308_v8 = vadd.f32 %v5302_v60, %v5153_v56  ;;  %v12060_v17 = vpop.f32.mrb[149].mxu0 }
0x3fdb   : > { %v5305_v41 = vpop.f32.mrb[150].mxu0 }
0x3fdc   : > { %v5309_v42 = vadd.f32 %v15188_v1, %v5308_v8  ;;  %v12061_v30 = vpop.f32.mrb[151].mxu0 }
0x3fde   : > { %v5310_v21 = vadd.f32 %v5309_v42, %v15333_v33 }
0x3fe0   : > { %v5311_v48 = vsel %vm1314_vm1, %v5310_v21, 0.0 }
0x3fe1   : > { %5312 = vadd.xlane.f32.xlu1 %v5311_v48 }
0x406e   : > { %v5313_v55 = vpop.xlane.xlu1 %5312 }
0x406f   : > { %v5314_v39 = vmul.f32 0.03125, %v5313_v55 }
0x4071   : > { %v5315_v7 = vsub.f32 %v5310_v21, %v5314_v39 }
0x4073   : > { %v5316_v37 = vmul.f32 %v5315_v7, %v5315_v7 }
0x4075   : > { %v5317_v50 = vsel %vm1314_vm1, %v5316_v37, 0.0 }
0x4076   : > { %5318 = vadd.xlane.f32.xlu1 %v5317_v50 }
0x4103   : > { %v5319_v54 = vpop.xlane.xlu1 %5318 }
0x4104   : > { %v5320_v23 = vmul.f32 0.03125, %v5319_v54 }
0x4106   : > { %v5321_v56 = vadd.f32 1e-05, %v5320_v23 }
0x4108   : > { %13111 = vrsqrt.f32 %v5321_v56 }
0x4112   : > { %v13112_v27 = vpop.eup %13111 }
0x4113   : > { %v5323_v57 = vmul.f32 %v13112_v27, %v5315_v7 }
0x4115   : > { %v5324_v1 = vmul.f32 %v15195_v22, %v5323_v57 }
0x4117   : > { %v15469_v33 = vadd.f32 %v15198_v31, %v5324_v1 }
0x4119   : > { %v5326_v51 = vpack.c.bf16 %v15469_v33, %v15469_v33 }
0x411b   : > { %12067 = vmatmul.mubr.msk.bf16.vlgmr.msra.gmra.mrb[156].mxu1 %vm1314_vm1, %v5326_v51 }
0x411c   : > { %12077 = vmatpush3.bf16.msra.mxu1 %v14873_v46  ;;  %12078 = vmatprep.mubr.msk.bf16.mxu1 %vm14020_vm0, %v16579_v16 }
0x411d   : > { %12088 = vmatprep.subr.bf16.mxu1 %v16579_v16 }
0x41ee   : > { %v5364_v3 = vpop.f32.mrb[156].mxu1 }
0x41ef   : > { %v5365_v25 = vadd.f32 %v15210_v43, %v5364_v3  ;;  %v12068_v53 = vpop.f32.mrb[157].mxu1 }
0x41f0   : > { %v5367_v22 = vpop.f32.mrb[158].mxu1 }
0x41f1   : > { %v5370_v63 = vmul.f32 0.35355338, %v5365_v25  ;;  %v12069_v31 = vpop.f32.mrb[159].mxu1 }
0x41f3   : > { %v15479_v28 = vpack.c.bf16 %v5370_v63, %v5370_v63 }
0x41f5   : > { %5472 = vrot.lane.b32.xlu1 %v15479_v28, %s14021_s12  ;;  %12073 = vmatmul.mubr.msk.bf16.vlgmr.msra.gmra.mrb[152].mxu0 %vm1454_vm2, %v15479_v28 }
0x41f6   : > { %12083 = vmatpush3.bf16.xpose.msra.mxu0 %v14843_v62  ;;  %12084 = vmatprep.mubr.msk.bf16.mxu0 %vm14020_vm0, %v16579_v16 }
0x41f7   : > { %12094 = vmatprep.subr.bf16.mxu0 %v16579_v16 }
0x4267   : > { %v5473_v43 = vpop.permute.xlu1 %5472 }
0x4268   : > { %12085 = vmatmul.mubr.msk.bf16.vlgmr.msra.gmra.mrb[156].mxu0 %vm1454_vm2, %v5473_v43 }
0x4269   : > { %12095 = vmatpush3.bf16.msra.mxu0 %v14888_v59  ;;  %12096 = vmatprep.mubr.msk.bf16.mxu0 %vm14020_vm0, %v16579_v16 }
0x426a   : > { %12106 = vmatprep.subr.bf16.mxu0 %v16579_v16 }
0x42c8   : > { %v5409_v44 = vpop.f32.mrb[152].mxu0 }
0x42c9   : > { %v5410_v5 = vadd.f32 %v15228_v18, %v5409_v44  ;;  %v12074_v60 = vpop.f32.mrb[153].mxu0 }
0x42ca   : > { %v5412_v8 = vpop.f32.mrb[154].mxu0 }
0x42cb   : > { %v12075_v17 = vpop.f32.mrb[155].mxu0  ;;  %v5415_v41 = vsel %vm1454_vm2, %v5410_v5, -inf }
0x42cc   : > { %5416 = vmax.xlane.f32.xlu0 %v5415_v41 }
0x433b   : > { %v5511_v42 = vpop.f32.mrb[156].mxu0 }
0x433c   : > { %v5512_v30 = vadd.f32 %v15228_v18, %v5511_v42  ;;  %v12086_v21 = vpop.f32.mrb[157].mxu0 }
0x433d   : > { %v5514_v48 = vpop.f32.mrb[158].mxu0 }
0x433e   : > { %v12087_v55 = vpop.f32.mrb[159].mxu0  ;;  %v5517_v39 = vsel %vm1454_vm2, %v5512_v30, -inf }
0x433f   : > { %5518 = vmax.xlane.f32.xlu1 %v5517_v39  ;;  %v16580_v39 = vld [vmem:[#allocation74_spill] sm:$0xff] }
0x4359   : > { %v5417_v7 = vpop.xlane.xlu0 %5416 }
0x435a   : > { %v5418_v37 = vsub.f32 %v5410_v5, %v5417_v7 }
0x435c   : > { %v5419_v50 = vmul.f32 1.442695, %v5418_v37 }
0x435e   : > { %13113 = vpow2.f32 %v5419_v50 }
0x4368   : > { %v13114_v54 = vpop.eup %13113 }
0x4369   : > { %v5421_v23 = vsel %vm1454_vm2, %v13114_v54, 0.0 }
0x436a   : > { %5422 = vadd.xlane.f32.xlu0 %v5421_v23 }
0x43cc   : > { %v5519_v56 = vpop.xlane.xlu1 %5518 }
0x43cd   : > { %v5520_v27 = vsub.f32 %v5512_v30, %v5519_v56 }
0x43cf   : > { %v5521_v57 = vmul.f32 1.442695, %v5520_v27 }
0x43d1   : > { %13115 = vpow2.f32 %v5521_v57 }
0x43db   : > { %v13116_v1 = vpop.eup %13115 }
0x43dc   : > { %v5523_v18 = vsel %vm1454_vm2, %v13116_v1, 0.0 }
0x43dd   : > { %5524 = vadd.xlane.f32.xlu0 %v5523_v18 }
0x43f3   : > { %5659 = vrot.lane.b32.xlu0 %v15479_v28, %s14022_s20 }
0x43f7   : > { %v5423_v51 = vpop.xlane.xlu0 %5422 }
0x43f8   : > { %13117 = vrcp.f32 %v5423_v51  ;;  %v15527_v51 = vld [vmem:[#allocation8] sm:$0xff] }
0x4402   : > { %v13118_v3 = vpop.eup %13117 }
0x4403   : > { %v5425_v25 = vmul.f32 %v13118_v3, %v13114_v54 }
0x4405   : > { %v5426_v53 = vpack.c.bf16 %v5425_v25, %v5425_v25 }
0x4407   : > { %12079 = vmatmul.mubr.msk.bf16.vlgmr.msra.gmra.mrb[160].mxu1 %vm1454_vm2, %v5426_v53 }
0x4408   : > { %12089 = vmatpush3.bf16.msra.mxu1 %v14893_v2  ;;  %12090 = vmatprep.mubr.msk.bf16.mxu1 %vm14020_vm0, %v16579_v16 }
0x4409   : > { %12100 = vmatprep.subr.bf16.mxu1 %v16579_v16 }
0x446a   : > { %v5525_v22 = vpop.xlane.xlu0 %5524 }
0x446b   : > { %13119 = vrcp.f32 %v5525_v22 }
0x446e   : > { %v5660_v55 = vpop.permute.xlu0 %5659 }
0x4475   : > { %v13120_v63 = vpop.eup %13119 }
0x4476   : > { %v5527_v31 = vmul.f32 %v13120_v63, %v13116_v1 }
0x4478   : > { %v5528_v43 = vpack.c.bf16 %v5527_v31, %v5527_v31 }
0x447a   : > { %12091 = vmatmul.mubr.msk.bf16.vlgmr.msra.gmra.mrb[164].mxu1 %vm1454_vm2, %v5528_v43 }
0x447b   : > { %12101 = vmatpush3.bf16.msra.mxu1 %v14898_v13  ;;  %12102 = vmatprep.mubr.msk.bf16.mxu1 %vm14020_vm0, %v16579_v16 }
0x447c   : > { %12112 = vmatprep.subr.bf16.mxu1 %v16579_v16 }
0x44da   : > { %v5464_v44 = vpop.f32.mrb[160].mxu1 }
0x44db   : > { %v5470_v5 = vpack.c.bf16 %v5464_v44, %v5464_v44  ;;  %v12080_v60 = vpop.f32.mrb[161].mxu1 }
0x44dc   : > { %v5467_v8 = vpop.f32.mrb[162].mxu1 }
0x44dd   : > { %v12081_v17 = vpop.f32.mrb[163].mxu1  ;;  %12103 = vmatmul.mubr.msk.bf16.vlgmr.msra.gmra.mrb[168].mxu1 %vm1454_vm2, %v5470_v5 }
0x44de   : > { %12113 = vmatpush3.bf16.msra.mxu1 %v14930_v58  ;;  %12114 = vmatprep.mubr.msk.bf16.mxu1 %vm14020_vm0, %v16579_v16 }
0x44df   : > { %12124 = vmatprep.subr.bf16.mxu1 %v16579_v16 }
0x454d   : > { %v5566_v41 = vpop.f32.mrb[164].mxu1 }
0x454e   : > { %v5572_v42 = vpack.c.bf16 %v5566_v41, %v5566_v41  ;;  %v12092_v30 = vpop.f32.mrb[165].mxu1 }
0x454f   : > { %v5569_v21 = vpop.f32.mrb[166].mxu1 }
0x4550   : > { %v12093_v48 = vpop.f32.mrb[167].mxu1  ;;  %12097 = vmatmul.mubr.msk.bf16.vlgmr.msra.gmra.mrb[160].mxu0 %vm1454_vm2, %v5572_v42 }
0x4551   : > { %12107 = vmatpush3.bf16.xpose.msra.mxu0 %v14909_v24  ;;  %12108 = vmatprep.mubr.msk.bf16.mxu0 %vm14020_vm0, %v16579_v16 }
0x4552   : > { %12118 = vmatprep.subr.bf16.mxu0 %v16579_v16 }
0x4558   : > { %12109 = vmatmul.mubr.msk.bf16.vlgmr.msra.gmra.mrb[164].mxu0 %vm1454_vm2, %v5660_v55 }
0x4559   : > { %12119 = vmatpush3.bf16.msra.mxu0 %v16580_v39  ;;  %12120 = vmatprep.mubr.msk.bf16.mxu0 %vm14020_vm0, %v16579_v16 }
0x455a   : > { %12130 = vmatprep.subr.bf16.mxu0 %v16579_v16 }
0x45b0   : > { %v5653_v7 = vpop.f32.mrb[168].mxu1 }
0x45b1   : > { %v12104_v37 = vpop.f32.mrb[169].mxu1 }
0x45b2   : > { %v5656_v50 = vpop.f32.mrb[170].mxu1 }
0x45b3   : > { %v12105_v54 = vpop.f32.mrb[171].mxu1 }
0x4623   : > { %v5610_v23 = vpop.f32.mrb[160].mxu0 }
0x4624   : > { %v5654_v56 = vadd.f32 %v5653_v7, %v5610_v23  ;;  %v12098_v27 = vpop.f32.mrb[161].mxu0 }
0x4625   : > { %v5613_v57 = vpop.f32.mrb[162].mxu0 }
0x4626   : > { %v12099_v1 = vpop.f32.mrb[163].mxu0 }
0x462b   : > { %v5698_v18 = vpop.f32.mrb[164].mxu0 }
0x462c   : > { %v5699_v3 = vadd.f32 %v15527_v51, %v5698_v18  ;;  %v12110_v25 = vpop.f32.mrb[165].mxu0 }
0x462d   : > { %v5701_v53 = vpop.f32.mrb[166].mxu0 }
0x462e   : > { %v12111_v22 = vpop.f32.mrb[167].mxu0  ;;  %v5704_v63 = vsel %vm1454_vm2, %v5699_v3, -inf }
0x462f   : > { %5705 = vmax.xlane.f32.xlu1 %v5704_v63 }
0x46bc   : > { %v5706_v31 = vpop.xlane.xlu1 %5705 }
0x46bd   : > { %v5707_v43 = vsub.f32 %v5699_v3, %v5706_v31 }
0x46bf   : > { %v5708_v44 = vmul.f32 1.442695, %v5707_v43 }
0x46c1   : > { %13121 = vpow2.f32 %v5708_v44 }
0x46cb   : > { %v13122_v5 = vpop.eup %13121 }
0x46cc   : > { %v5710_v60 = vsel %vm1454_vm2, %v13122_v5, 0.0 }
0x46cd   : > { %5711 = vadd.xlane.f32.xlu1 %v5710_v60 }
0x46de   : > { %5804 = vrot.lane.b32.xlu1 %v15479_v28, %s14023_s10 }
0x475a   : > { %v5712_v8 = vpop.xlane.xlu1 %5711 }
0x475b   : > { %13123 = vrcp.f32 %v5712_v8 }
0x475e   : > { %v5805_v30 = vpop.permute.xlu1 %5804 }
0x4765   : > { %v13124_v17 = vpop.eup %13123 }
0x4766   : > { %v5714_v41 = vmul.f32 %v13124_v17, %v13122_v5 }
0x4768   : > { %v5715_v42 = vpack.c.bf16 %v5714_v41, %v5714_v41 }
0x476a   : > { %12115 = vmatmul.mubr.msk.bf16.vlgmr.msra.gmra.mrb[172].mxu1 %vm1454_vm2, %v5715_v42 }
0x476b   : > { %12125 = vmatpush3.bf16.xpose.msra.mxu1 %v14936_v9  ;;  %12126 = vmatprep.mubr.msk.bf16.mxu1 %vm14020_vm0, %v16579_v16 }
0x476c   : > { %12136 = vmatprep.subr.bf16.mxu1 %v16579_v16 }
0x4772   : > { %12127 = vmatmul.mubr.msk.bf16.vlgmr.msra.gmra.mrb[176].mxu1 %vm1454_vm2, %v5805_v30 }
0x4773   : > { %12137 = vmatpush3.bf16.msra.mxu1 %v14960_v12  ;;  %12138 = vmatprep.mubr.msk.bf16.mxu1 %vm14020_vm0, %v16579_v16 }
0x4774   : > { %12150 = vmatprep.subr.bf16.mxu1 %v16579_v16 }
0x483d   : > { %v5753_v28 = vpop.f32.mrb[172].mxu1 }
0x483e   : > { %v5759_v21 = vpack.c.bf16 %v5753_v28, %v5753_v28  ;;  %v12116_v48 = vpop.f32.mrb[173].mxu1 }
0x483f   : > { %v5756_v55 = vpop.f32.mrb[174].mxu1 }
0x4840   : > { %v12117_v7 = vpop.f32.mrb[175].mxu1  ;;  %12121 = vmatmul.mubr.msk.bf16.vlgmr.msra.gmra.mrb[168].mxu0 %vm1454_vm2, %v5759_v21 }
0x4841   : > { %12131 = vmatpush3.bf16.msra.mxu0 %v14966_v45  ;;  %12132 = vmatprep.mubr.msk.bf16.mxu0 %vm14020_vm0, %v16579_v16 }
0x4842   : > { %12142 = vmatprep.subr.bf16.mxu0 %v16579_v16 }
0x4845   : > { %v5843_v37 = vpop.f32.mrb[176].mxu1 }
0x4846   : > { %v5844_v50 = vadd.f32 %v15527_v51, %v5843_v37  ;;  %v12128_v54 = vpop.f32.mrb[177].mxu1 }
0x4847   : > { %v5846_v23 = vpop.f32.mrb[178].mxu1 }
0x4848   : > { %v12129_v27 = vpop.f32.mrb[179].mxu1  ;;  %v5849_v57 = vsel %vm1454_vm2, %v5844_v50, -inf }
0x4849   : > { %5850 = vmax.xlane.f32.xlu0 %v5849_v57 }
0x48d6   : > { %v5851_v1 = vpop.xlane.xlu0 %5850 }
0x48d7   : > { %v5852_v18 = vsub.f32 %v5844_v50, %v5851_v1 }
0x48d9   : > { %v5853_v3 = vmul.f32 1.442695, %v5852_v18 }
0x48db   : > { %13125 = vpow2.f32 %v5853_v3 }
0x48e5   : > { %v13126_v25 = vpop.eup %13125 }
0x48e6   : > { %v5855_v53 = vsel %vm1454_vm2, %v13126_v25, 0.0 }
0x48e7   : > { %5856 = vadd.xlane.f32.xlu1 %v5855_v53 }
0x4913   : > { %v5797_v22 = vpop.f32.mrb[168].mxu0 }
0x4914   : > { %v5803_v63 = vadd.f32 %v5797_v22, %v5654_v56  ;;  %v12122_v31 = vpop.f32.mrb[169].mxu0 }
0x4915   : > { %v5800_v43 = vpop.f32.mrb[170].mxu0  ;;  %v15574_v31 = vld [vmem:[#allocation28] ss:$0 sm:$0xff] }
0x4916   : > { %v12123_v44 = vpop.f32.mrb[171].mxu0  ;;  %v15577_v43 = vld [vmem:[#allocation29] ss:$0 sm:$0xff] }
0x4974   : > { %v5857_v5 = vpop.xlane.xlu1 %5856 }
0x4975   : > { %13127 = vrcp.f32 %v5857_v5 }
0x497f   : > { %v13128_v60 = vpop.eup %13127 }
0x4980   : > { %v5859_v8 = vmul.f32 %v13128_v60, %v13126_v25 }
0x4982   : > { %v5860_v17 = vpack.c.bf16 %v5859_v8, %v5859_v8  ;;  %v15588_v8 = vld [vmem:[%s14168_s19] ss:$0 sm:$0xff] }
0x4984   : > { %12133 = vmatmul.mubr.msk.bf16.vlgmr.msra.gmra.mrb[172].mxu0 %vm1454_vm2, %v5860_v17 }
0x4985   : > { %12143 = vmatpush3.bf16.msra.mxu0 %v14982_v35  ;;  %12146 = vmatprep.mubr.msk.bf16.mxu0 %vm14020_vm0, %v16579_v16 }
0x4986   : > { %12144 = vmatprep.subr.bf16.mxu0 %v16579_v16 }
0x4989   : > { %12145 = vmatpush3.bf16.msra.mxu0 %v14988_v38 }
0x498a   : > { %12162 = vmatprep.subr.bf16.mxu0 %v16579_v16 }
0x4a57   : > { %v5898_v56 = vpop.f32.mrb[172].mxu0 }
0x4a58   : > { %v5904_v41 = vpack.c.bf16 %v5898_v56, %v5898_v56  ;;  %v12134_v42 = vpop.f32.mrb[173].mxu0 }
0x4a59   : > { %v5901_v30 = vpop.f32.mrb[174].mxu0 }
0x4a5a   : > { %v12135_v28 = vpop.f32.mrb[175].mxu0  ;;  %12139 = vmatmul.mubr.msk.bf16.vlgmr.msra.gmra.mrb[180].mxu1 %vm1454_vm2, %v5904_v41 }
0x4a5b   : > { %12151 = vmatpush3.bf16.msra.mxu1 %v14995_v47  ;;  %12158 = vmatprep.mubr.msk.bf16.mxu1 %vm14020_vm0, %v16579_v16 }
0x4a5c   : > { %12152 = vmatprep.subr.bf16.mxu1 %v16579_v16 }
0x4a5f   : > { %12153 = vmatpush3.bf16.msra.mxu1 %v14999_v49 }
0x4a60   : > { %12154 = vmatprep.subr.bf16.mxu1 %v16579_v16 }
0x4a63   : > { %12155 = vmatpush3.bf16.msra.mxu1 %v15019_v61 }
0x4a64   : > { %12156 = vmatprep.subr.bf16.mxu1 %v16579_v16 }
0x4a67   : > { %12157 = vmatpush3.bf16.msra.mxu1 %v15025_v10 }
0x4a68   : > { %12178 = vmatprep.subr.bf16.mxu1 %v16579_v16 }
0x4b2d   : > { %v5942_v21 = vpop.f32.mrb[180].mxu1 }
0x4b2e   : > { %v5948_v48 = vadd.f32 %v5942_v21, %v5803_v63  ;;  %v12140_v55 = vpop.f32.mrb[181].mxu1 }
0x4b2f   : > { %v5945_v7 = vpop.f32.mrb[182].mxu1 }
0x4b30   : > { %v5949_v37 = vadd.f32 %v15305_v0, %v5948_v48  ;;  %v12141_v50 = vpop.f32.mrb[183].mxu1  ;;  %v15599_v48 = vld [vmem:[%s16578_s14] ss:$0 sm:$0xff] }
0x4b32   : > { %v5950_v54 = vadd.f32 %v5949_v37, %v15469_v33 }
0x4b34   : > { %v5951_v23 = vsel %vm1314_vm1, %v5950_v54, 0.0 }
0x4b35   : > { %5952 = vadd.xlane.f32.xlu0 %v5951_v23 }
0x4bc2   : > { %v5953_v27 = vpop.xlane.xlu0 %5952 }
0x4bc3   : > { %v5954_v57 = vmul.f32 0.03125, %v5953_v27 }
0x4bc5   : > { %v5955_v1 = vsub.f32 %v5950_v54, %v5954_v57 }
0x4bc7   : > { %v5956_v18 = vmul.f32 %v5955_v1, %v5955_v1 }
0x4bc9   : > { %v5957_v3 = vsel %vm1314_vm1, %v5956_v18, 0.0 }
0x4bca   : > { %5958 = vadd.xlane.f32.xlu0 %v5957_v3 }
0x4c57   : > { %v5959_v25 = vpop.xlane.xlu0 %5958 }
0x4c58   : > { %v5960_v53 = vmul.f32 0.03125, %v5959_v25 }
0x4c5a   : > { %v5961_v22 = vadd.f32 1e-05, %v5960_v53 }
0x4c5c   : > { %13129 = vrsqrt.f32 %v5961_v22 }
0x4c66   : > { %v13130_v63 = vpop.eup %13129 }
0x4c67   : > { %v5963_v0 = vmul.f32 %v13130_v63, %v5955_v1 }
0x4c69   : > { %v5964_v33 = vmul.f32 %v15574_v31, %v5963_v0 }
0x4c6b   : > { %v5965_v44 = vadd.f32 %v15577_v43, %v5964_v33  ;;  %v15604_v33 = vld [vmem:[#allocation31] ss:$0 sm:$0xff] }
0x4c6d   : > { %v5966_v5 = vpack.c.bf16 %v5965_v44, %v5965_v44 }
0x4c6f   : > { %12147 = vmatmul.mubr.msk.bf16.vlgmr.msra.gmra.mrb[176].mxu0 %vm1314_vm1, %v5966_v5  ;;  %v15607_v5 = vld [vmem:[#allocation32] ss:$0 sm:$0xff] }
0x4c70   : > { %12163 = vmatpush3.bf16.msra.mxu0 %v14633_v4  ;;  %12166 = vmatprep.mubr.msk.bf16.mxu0 %vm14020_vm0, %v16579_v16 }
0x4c71   : > { %12164 = vmatprep.subr.bf16.mxu0 %v16579_v16 }
0x4c74   : > { %12165 = vmatpush3.bf16.msra.mxu0 %v14637_v6 }
0x4c75   : > { %12170 = vmatprep.subr.bf16.mxu0 %v16579_v16 }
0x4d42   : > { %v6004_v60 = vpop.f32.mrb[176].mxu0 }
0x4d43   : > { %v6005_v17 = vadd.f32 %v15588_v8, %v6004_v60  ;;  %v12148_v56 = vpop.f32.mrb[177].mxu0 }
0x4d44   : > { %v6007_v41 = vpop.f32.mrb[178].mxu0 }
0x4d45   : > { %v6010_v42 = vmax.f32 %v6005_v17, 0.0  ;;  %v12149_v30 = vpop.f32.mrb[179].mxu0 }
0x4d47   : > { %v6011_v28 = vpack.c.bf16 %v6010_v42, %v6010_v42  ;;  %v15627_v42 = vld [vmem:[#allocation10] ss:$0 sm:$0xff] }
0x4d49   : > { %12159 = vmatmul.mubr.msk.bf16.vlgmr.msra.gmra.mrb[184].mxu1 %vm2989_vm4, %v6011_v28  ;;  %v15630_v28 = vld [vmem:[#allocation13] ss:$0 sm:$0xff] }
0x4d4a   : > { %12179 = vmatpush3.bf16.msra.mxu1 %v14684_v34  ;;  %12182 = vmatprep.mubr.msk.bf16.mxu1 %vm14020_vm0, %v16579_v16 }
0x4d4b   : > { %12180 = vmatprep.subr.bf16.mxu1 %v16579_v16 }
0x4d4e   : > { %12181 = vmatpush3.bf16.msra.mxu1 %v14688_v36 }
0x4d4f   : > { %12192 = vmatprep.subr.bf16.mxu1 %v16579_v16 }
0x4e1c   : > { %v6049_v21 = vpop.f32.mrb[184].mxu1 }
0x4e1d   : > { %v6050_v55 = vadd.f32 %v15599_v48, %v6049_v21  ;;  %v12160_v7 = vpop.f32.mrb[185].mxu1 }
0x4e1e   : > { %v6052_v37 = vpop.f32.mrb[186].mxu1 }
0x4e1f   : > { %v6055_v50 = vadd.f32 %v6050_v55, %v5965_v44  ;;  %v12161_v54 = vpop.f32.mrb[187].mxu1 }
0x4e21   : > { %v6056_v23 = vsel %vm1314_vm1, %v6055_v50, 0.0 }
0x4e22   : > { %6057 = vadd.xlane.f32.xlu0 %v6056_v23 }
0x4eaf   : > { %v6058_v27 = vpop.xlane.xlu0 %6057 }
0x4eb0   : > { %v6059_v57 = vmul.f32 0.03125, %v6058_v27 }
0x4eb2   : > { %v6060_v1 = vsub.f32 %v6055_v50, %v6059_v57 }
0x4eb4   : > { %v6061_v18 = vmul.f32 %v6060_v1, %v6060_v1 }
0x4eb6   : > { %v6062_v3 = vsel %vm1314_vm1, %v6061_v18, 0.0 }
0x4eb7   : > { %6063 = vadd.xlane.f32.xlu1 %v6062_v3 }
0x4f44   : > { %v6064_v25 = vpop.xlane.xlu1 %6063 }
0x4f45   : > { %v6065_v53 = vmul.f32 0.03125, %v6064_v25  ;;  %v15642_v25 = vld [vmem:[#allocation11] ss:$0 sm:$0xff] }
0x4f47   : > { %v6066_v22 = vadd.f32 1e-05, %v6065_v53 }
0x4f49   : > { %13131 = vrsqrt.f32 %v6066_v22 }
0x4f53   : > { %v13132_v63 = vpop.eup %13131 }
0x4f54   : > { %v6068_v0 = vmul.f32 %v13132_v63, %v6060_v1 }
0x4f56   : > { %v6069_v44 = vmul.f32 %v15604_v33, %v6068_v0 }
0x4f58   : > { %v15610_v60 = vadd.f32 %v15607_v5, %v6069_v44 }
0x4f5a   : > { %v6071_v17 = vpack.c.bf16 %v15610_v60, %v15610_v60 }
0x4f5c   : > { %12167 = vmatmul.mubr.msk.bf16.vlgmr.msra.gmra.mrb[180].mxu0 %vm1314_vm1, %v6071_v17  ;;  %12183 = vmatmul.mubr.msk.bf16.vlgmr.msra.gmra.mrb[188].mxu1 %vm1314_vm1, %v6071_v17 }
0x4f5d   : > { %12171 = vmatpush3.bf16.msra.mxu0 %v14649_v11  ;;  %12174 = vmatprep.mubr.msk.bf16.mxu0 %vm14020_vm0, %v16579_v16 }
0x4f5e   : > { %12172 = vmatprep.subr.bf16.mxu0 %v16579_v16  ;;  %12194 = vmatprep.mubr.msk.bf16.mxu1 %vm14020_vm0, %v16579_v16 }
0x4f61   : > { %12173 = vmatpush3.bf16.msra.mxu0 %v14656_v14 }
0x4f62   : > { %12186 = vmatprep.subr.bf16.mxu0 %v16579_v16 }
0x4f64   : > { %12175 = vmatmul.mubr.msk.bf16.vlgmr.msra.gmra.mrb[184].mxu0 %vm1314_vm1, %v6071_v17 }
0x4f65   : > { %12188 = vmatprep.mubr.msk.bf16.mxu0 %vm14020_vm0, %v16579_v16 }
0x502f   : > { %v6109_v56 = vpop.f32.mrb[180].mxu0  ;;  %v6189_v41 = vpop.f32.mrb[188].mxu1 }
0x5030   : > { %v6110_v30 = vadd.f32 %v15627_v42, %v6109_v56  ;;  %v6190_v21 = vadd.f32 %v15630_v28, %v6189_v41  ;;  %v12168_v55 = vpop.f32.mrb[181].mxu0  ;;  %v12184_v7 = vpop.f32.mrb[189].mxu1 }
0x5031   : > { %v6112_v37 = vpop.f32.mrb[182].mxu0  ;;  %v6192_v50 = vpop.f32.mrb[190].mxu1 }
0x5032   : > { %v6195_v54 = vmul.f32 0.35355338, %v6110_v30  ;;  %v15633_v23 = vpack.c.bf16 %v6190_v21, %v6190_v21  ;;  %v12169_v27 = vpop.f32.mrb[183].mxu0  ;;  %v12185_v57 = vpop.f32.mrb[191].mxu1 }
0x5034   : > { %v15635_v1 = vpack.c.bf16 %v6195_v54, %v6195_v54  ;;  %v6261_v18 = vsel %vm1516_vm3, %v15633_v23, 0 }
0x5035   : > { %12193 = vmatpush3.bf16.msra.mxu1 %v6261_v18 }
0x5036   : > { %6305 = vrot.lane.b32.xlu1 %v15635_v1, %s14021_s12  ;;  %12204 = vmatprep.subr.bf16.mxu1 %v16579_v16 }
0x5037   : > { %v6149_v3 = vpop.f32.mrb[184].mxu0 }
0x5038   : > { %v6150_v53 = vadd.f32 %v15642_v25, %v6149_v3  ;;  %v12176_v22 = vpop.f32.mrb[185].mxu0 }
0x5039   : > { %v6152_v63 = vpop.f32.mrb[186].mxu0 }
0x503a   : > { %v15645_v0 = vpack.c.bf16 %v6150_v53, %v6150_v53  ;;  %v12177_v44 = vpop.f32.mrb[187].mxu0 }
0x503c   : > { %6308 = vrot.lane.b32.xlu0 %v15645_v0, %s14021_s12  ;;  %v6203_v17 = vsel %vm1454_vm2, %v15645_v0, 0 }
0x503d   : > { %12187 = vmatpush3.bf16.xpose.msra.mxu0 %v6203_v17 }
0x503e   : > { %12198 = vmatprep.subr.bf16.mxu0 %v16579_v16 }
0x5044   : > { %12189 = vmatmul.mubr.msk.bf16.vlgmr.msra.gmra.mrb[188].mxu0 %vm1454_vm2, %v15635_v1 }
0x5045   : > { %12200 = vmatprep.mubr.msk.bf16.mxu0 %vm14020_vm0, %v16579_v16 }
0x50a8   : > { %v6306_v30 = vpop.permute.xlu1 %6305 }
0x50ae   : > { %v6309_v56 = vpop.permute.xlu0 %6308 }
0x50af   : > { %v6314_v41 = vsel %vm1454_vm2, %v6309_v56, 0 }
0x50b0   : > { %12199 = vmatpush3.bf16.xpose.msra.mxu0 %v6314_v41 }
0x50b1   : > { %12210 = vmatprep.subr.bf16.mxu0 %v16579_v16 }
0x50b7   : > { %12201 = vmatmul.mubr.msk.bf16.vlgmr.msra.gmra.mrb[192].mxu0 %vm1454_vm2, %v6306_v30 }
0x50b8   : > { %12211 = vmatpush3.bf16.msra.mxu0 %v14727_v19  ;;  %12212 = vmatprep.mubr.msk.bf16.mxu0 %vm14020_vm0, %v16579_v16 }
0x50b9   : > { %12222 = vmatprep.subr.bf16.mxu0 %v16579_v16 }
0x5117   : > { %v6239_v21 = vpop.f32.mrb[188].mxu0 }
0x5118   : > { %v6240_v55 = vadd.f32 %v15417_v15, %v6239_v21  ;;  %v12190_v7 = vpop.f32.mrb[189].mxu0 }
0x5119   : > { %v6242_v37 = vpop.f32.mrb[190].mxu0 }
0x511a   : > { %v12191_v50 = vpop.f32.mrb[191].mxu0  ;;  %v6245_v54 = vsel %vm1454_vm2, %v6240_v55, -inf }
0x511b   : > { %6246 = vmax.xlane.f32.xlu1 %v6245_v54 }
0x518a   : > { %v6350_v27 = vpop.f32.mrb[192].mxu0 }
0x518b   : > { %v6351_v57 = vadd.f32 %v15417_v15, %v6350_v27  ;;  %v12202_v18 = vpop.f32.mrb[193].mxu0 }
0x518c   : > { %v6353_v3 = vpop.f32.mrb[194].mxu0 }
0x518d   : > { %v12203_v53 = vpop.f32.mrb[195].mxu0  ;;  %v6356_v22 = vsel %vm1454_vm2, %v6351_v57, -inf }
0x518e   : > { %6357 = vmax.xlane.f32.xlu0 %v6356_v22 }
0x51a8   : > { %v6247_v63 = vpop.xlane.xlu1 %6246 }
0x51a9   : > { %v6248_v44 = vsub.f32 %v6240_v55, %v6247_v63 }
0x51ab   : > { %v6249_v17 = vmul.f32 1.442695, %v6248_v44 }
0x51ad   : > { %13133 = vpow2.f32 %v6249_v17 }
0x51b7   : > { %v13134_v56 = vpop.eup %13133 }
0x51b8   : > { %v6251_v41 = vsel %vm1454_vm2, %v13134_v56, 0.0 }
0x51b9   : > { %6252 = vadd.xlane.f32.xlu0 %v6251_v41 }
0x51cf   : > { %6369 = vrot.lane.b32.xlu0 %v15633_v23, %s14021_s12 }
0x521b   : > { %v6358_v30 = vpop.xlane.xlu0 %6357 }
0x521c   : > { %v6359_v21 = vsub.f32 %v6351_v57, %v6358_v30 }
0x521e   : > { %v6360_v7 = vmul.f32 1.442695, %v6359_v21 }
0x5220   : > { %13135 = vpow2.f32 %v6360_v7 }
0x522a   : > { %v13136_v37 = vpop.eup %13135 }
0x522b   : > { %v6362_v50 = vsel %vm1454_vm2, %v13136_v37, 0.0 }
0x522c   : > { %6363 = vadd.xlane.f32.xlu1 %v6362_v50 }
0x523d   : > { %6506 = vrot.lane.b32.xlu1 %v15645_v0, %s14022_s20 }
0x5241   : > { %6504 = vrot.lane.b32.xlu1 %v15635_v1, %s14022_s20 }
0x5246   : > { %v6253_v55 = vpop.xlane.xlu0 %6252 }
0x5247   : > { %13137 = vrcp.f32 %v6253_v55 }
0x524a   : > { %v6370_v18 = vpop.permute.xlu0 %6369 }
0x524b   : > { %v6375_v57 = vsel %vm1516_vm3, %v6370_v18, 0 }
0x5251   : > { %v13138_v54 = vpop.eup %13137 }
0x5252   : > { %v6255_v27 = vmul.f32 %v13138_v54, %v13134_v56 }
0x5254   : > { %v6256_v3 = vpack.c.bf16 %v6255_v27, %v6255_v27 }
0x5256   : > { %12195 = vmatmul.mubr.msk.bf16.vlgmr.msra.gmra.mrb[192].mxu1 %vm1454_vm2, %v6256_v3 }
0x5257   : > { %12205 = vmatpush3.bf16.msra.mxu1 %v6375_v57  ;;  %12206 = vmatprep.mubr.msk.bf16.mxu1 %vm14020_vm0, %v16579_v16 }
0x5258   : > { %12216 = vmatprep.subr.bf16.mxu1 %v16579_v16 }
0x52b9   : > { %v6364_v53 = vpop.xlane.xlu1 %6363 }
0x52ba   : > { %13139 = vrcp.f32 %v6364_v53 }
0x52bd   : > { %v6507_v7 = vpop.permute.xlu1 %6506 }
0x52be   : > { %v6512_v27 = vsel %vm1454_vm2, %v6507_v7, 0 }
0x52c1   : > { %v6505_v3 = vpop.permute.xlu1 %6504 }
0x52c4   : > { %v13140_v22 = vpop.eup %13139 }
0x52c5   : > { %v6366_v63 = vmul.f32 %v13140_v22, %v13136_v37 }
0x52c7   : > { %v6367_v44 = vpack.c.bf16 %v6366_v63, %v6366_v63 }
0x52c9   : > { %12207 = vmatmul.mubr.msk.bf16.vlgmr.msra.gmra.mrb[196].mxu1 %vm1454_vm2, %v6367_v44 }
0x52ca   : > { %12217 = vmatpush3.bf16.msra.mxu1 %v14735_v29  ;;  %12218 = vmatprep.mubr.msk.bf16.mxu1 %vm14020_vm0, %v16579_v16 }
0x52cb   : > { %12228 = vmatprep.subr.bf16.mxu1 %v16579_v16 }
0x5329   : > { %v6297_v17 = vpop.f32.mrb[192].mxu1 }
0x532a   : > { %v6303_v56 = vpack.c.bf16 %v6297_v17, %v6297_v17  ;;  %v12196_v41 = vpop.f32.mrb[193].mxu1 }
0x532b   : > { %v6300_v30 = vpop.f32.mrb[194].mxu1 }
0x532c   : > { %v12197_v21 = vpop.f32.mrb[195].mxu1  ;;  %12219 = vmatmul.mubr.msk.bf16.vlgmr.msra.gmra.mrb[200].mxu1 %vm1454_vm2, %v6303_v56 }
0x532d   : > { %12230 = vmatprep.mubr.msk.bf16.mxu1 %vm14020_vm0, %v16579_v16 }
0x539c   : > { %v6411_v37 = vpop.f32.mrb[196].mxu1 }
0x539d   : > { %v6417_v50 = vpack.c.bf16 %v6411_v37, %v6411_v37  ;;  %v12208_v55 = vpop.f32.mrb[197].mxu1 }
0x539e   : > { %v6414_v54 = vpop.f32.mrb[198].mxu1 }
0x539f   : > { %v12209_v18 = vpop.f32.mrb[199].mxu1  ;;  %12213 = vmatmul.mubr.msk.bf16.vlgmr.msra.gmra.mrb[196].mxu0 %vm1454_vm2, %v6417_v50 }
0x53a0   : > { %12223 = vmatpush3.bf16.xpose.msra.mxu0 %v6512_v27  ;;  %12224 = vmatprep.mubr.msk.bf16.mxu0 %vm14020_vm0, %v16579_v16 }
0x53a1   : > { %12234 = vmatprep.subr.bf16.mxu0 %v16579_v16 }
0x53a7   : > { %12225 = vmatmul.mubr.msk.bf16.vlgmr.msra.gmra.mrb[200].mxu0 %vm1454_vm2, %v6505_v3 }
0x53a8   : > { %12235 = vmatpush3.bf16.msra.mxu0 %v14774_v20  ;;  %12236 = vmatprep.mubr.msk.bf16.mxu0 %vm14020_vm0, %v16579_v16 }
0x53a9   : > { %12246 = vmatprep.subr.bf16.mxu0 %v16579_v16 }
0x53ff   : > { %v6498_v57 = vpop.f32.mrb[200].mxu1 }
0x5400   : > { %v12220_v53 = vpop.f32.mrb[201].mxu1 }
0x5401   : > { %v6501_v22 = vpop.f32.mrb[202].mxu1 }
0x5402   : > { %v12221_v63 = vpop.f32.mrb[203].mxu1 }
0x5472   : > { %v6455_v44 = vpop.f32.mrb[196].mxu0 }
0x5473   : > { %v15698_v17 = vadd.f32 %v6498_v57, %v6455_v44  ;;  %v12214_v56 = vpop.f32.mrb[197].mxu0 }
0x5474   : > { %v6458_v41 = vpop.f32.mrb[198].mxu0 }
0x5475   : > { %v12215_v30 = vpop.f32.mrb[199].mxu0 }
0x547a   : > { %v6548_v21 = vpop.f32.mrb[200].mxu0 }
0x547b   : > { %v6549_v7 = vadd.f32 %v15417_v15, %v6548_v21  ;;  %v12226_v37 = vpop.f32.mrb[201].mxu0 }
0x547c   : > { %v6551_v50 = vpop.f32.mrb[202].mxu0 }
0x547d   : > { %v12227_v55 = vpop.f32.mrb[203].mxu0  ;;  %v6554_v54 = vsel %vm1454_vm2, %v6549_v7, -inf }
0x547e   : > { %6555 = vmax.xlane.f32.xlu0 %v6554_v54 }
0x5494   : > { %6566 = vrot.lane.b32.xlu0 %v15633_v23, %s14022_s20 }
0x5498   : > { %6659 = vrot.lane.b32.xlu0 %v15635_v1, %s14023_s10 }
0x550b   : > { %v6556_v27 = vpop.xlane.xlu0 %6555 }
0x550c   : > { %v6557_v18 = vsub.f32 %v6549_v7, %v6556_v27  ;;  %v15724_v27 = vld [vmem:[#allocation7] sm:$0xff] }
0x550e   : > { %v6558_v3 = vmul.f32 1.442695, %v6557_v18 }
0x550f   : > { %v6567_v57 = vpop.permute.xlu0 %6566 }
0x5510   : > { %13141 = vpow2.f32 %v6558_v3  ;;  %v6572_v53 = vsel %vm1516_vm3, %v6567_v57, 0 }
0x5511   : > { %12229 = vmatpush3.bf16.msra.mxu1 %v6572_v53 }
0x5512   : > { %12240 = vmatprep.subr.bf16.mxu1 %v16579_v16 }
0x5513   : > { %v6660_v21 = vpop.permute.xlu0 %6659 }
0x551a   : > { %v13142_v15 = vpop.eup %13141 }
0x551b   : > { %v6560_v22 = vsel %vm1454_vm2, %v13142_v15, 0.0 }
0x551c   : > { %6561 = vadd.xlane.f32.xlu1 %v6560_v22 }
0x552d   : > { %6661 = vrot.lane.b32.xlu1 %v15645_v0, %s14023_s10 }
0x55a9   : > { %v6562_v63 = vpop.xlane.xlu1 %6561 }
0x55aa   : > { %13143 = vrcp.f32 %v6562_v63 }
0x55ad   : > { %v6662_v56 = vpop.permute.xlu1 %6661 }
0x55ae   : > { %v6667_v30 = vsel %vm1454_vm2, %v6662_v56, 0 }
0x55b4   : > { %v13144_v1 = vpop.eup %13143 }
0x55b5   : > { %v6564_v44 = vmul.f32 %v13144_v1, %v13142_v15 }
0x55b7   : > { %v6565_v41 = vpack.c.bf16 %v6564_v44, %v6564_v44 }
0x55b9   : > { %12231 = vmatmul.mubr.msk.bf16.vlgmr.msra.gmra.mrb[204].mxu1 %vm1454_vm2, %v6565_v41 }
0x55ba   : > { %12241 = vmatpush3.bf16.xpose.msra.mxu1 %v6667_v30  ;;  %12242 = vmatprep.mubr.msk.bf16.mxu1 %vm14020_vm0, %v16579_v16 }
0x55bb   : > { %12252 = vmatprep.subr.bf16.mxu1 %v16579_v16 }
0x55c1   : > { %12243 = vmatmul.mubr.msk.bf16.vlgmr.msra.gmra.mrb[208].mxu1 %vm1454_vm2, %v6660_v21 }
0x55c2   : > { %12253 = vmatpush3.bf16.msra.mxu1 %v14788_v40  ;;  %12254 = vmatprep.mubr.msk.bf16.mxu1 %vm14020_vm0, %v16579_v16 }
0x55c3   : > { %12266 = vmatprep.subr.bf16.mxu1 %v16579_v16 }
0x568c   : > { %v6608_v0 = vpop.f32.mrb[204].mxu1 }
0x568d   : > { %v6614_v7 = vpack.c.bf16 %v6608_v0, %v6608_v0  ;;  %v12232_v37 = vpop.f32.mrb[205].mxu1 }
0x568e   : > { %v6611_v50 = vpop.f32.mrb[206].mxu1 }
0x568f   : > { %v12233_v55 = vpop.f32.mrb[207].mxu1  ;;  %12237 = vmatmul.mubr.msk.bf16.vlgmr.msra.gmra.mrb[204].mxu0 %vm1454_vm2, %v6614_v7 }
0x5690   : > { %12248 = vmatprep.mubr.msk.bf16.mxu0 %vm14020_vm0, %v16579_v16 }
0x5694   : > { %v6703_v54 = vpop.f32.mrb[208].mxu1 }
0x5695   : > { %v6704_v18 = vadd.f32 %v15724_v27, %v6703_v54  ;;  %v12244_v3 = vpop.f32.mrb[209].mxu1 }
0x5696   : > { %v6706_v57 = vpop.f32.mrb[210].mxu1 }
0x5697   : > { %v12245_v53 = vpop.f32.mrb[211].mxu1  ;;  %v6709_v15 = vsel %vm1454_vm2, %v6704_v18, -inf }
0x5698   : > { %6710 = vmax.xlane.f32.xlu1 %v6709_v15 }
0x5725   : > { %v6711_v22 = vpop.xlane.xlu1 %6710 }
0x5726   : > { %v6712_v63 = vsub.f32 %v6704_v18, %v6711_v22 }
0x5728   : > { %v6713_v1 = vmul.f32 1.442695, %v6712_v63 }
0x572a   : > { %13145 = vpow2.f32 %v6713_v1 }
0x5734   : > { %v13146_v44 = vpop.eup %13145 }
0x5735   : > { %v6715_v56 = vsel %vm1454_vm2, %v13146_v44, 0.0 }
0x5736   : > { %6716 = vadd.xlane.f32.xlu0 %v6715_v56  ;;  %v15746_v56 = vld [vmem:[#allocation14] ss:$0 sm:$0xff] }
0x574c   : > { %6721 = vrot.lane.b32.xlu0 %v15633_v23, %s14023_s10 }
0x5762   : > { %v6652_v41 = vpop.f32.mrb[204].mxu0 }
0x5763   : > { %v6658_v30 = vadd.f32 %v6652_v41, %v15698_v17  ;;  %v12238_v21 = vpop.f32.mrb[205].mxu0 }
0x5764   : > { %v6655_v0 = vpop.f32.mrb[206].mxu0 }
0x5765   : > { %v12239_v7 = vpop.f32.mrb[207].mxu0 }
0x57c3   : > { %v6717_v37 = vpop.xlane.xlu0 %6716 }
0x57c4   : > { %13147 = vrcp.f32 %v6717_v37 }
0x57c7   : > { %v6722_v50 = vpop.permute.xlu0 %6721 }
0x57c8   : > { %v6727_v55 = vsel %vm1516_vm3, %v6722_v50, 0 }
0x57c9   : > { %12247 = vmatpush3.bf16.msra.mxu0 %v6727_v55 }
0x57ca   : > { %12258 = vmatprep.subr.bf16.mxu0 %v16579_v16 }
0x57ce   : > { %v13148_v54 = vpop.eup %13147 }
0x57cf   : > { %v6719_v18 = vmul.f32 %v13148_v54, %v13146_v44 }
0x57d1   : > { %v6720_v3 = vpack.c.bf16 %v6719_v18, %v6719_v18 }
0x57d3   : > { %12249 = vmatmul.mubr.msk.bf16.vlgmr.msra.gmra.mrb[208].mxu0 %vm1454_vm2, %v6720_v3 }
0x57d4   : > { %12259 = vmatpush3.bf16.msra.mxu0 %v14812_v26  ;;  %12262 = vmatprep.mubr.msk.bf16.mxu0 %vm14020_vm0, %v16579_v16 }
0x57d5   : > { %12260 = vmatprep.subr.bf16.mxu0 %v16579_v16 }
0x57d8   : > { %12261 = vmatpush3.bf16.msra.mxu0 %v14818_v32 }
0x57d9   : > { %12272 = vmatprep.subr.bf16.mxu0 %v16579_v16 }
0x58a6   : > { %v6763_v23 = vpop.f32.mrb[208].mxu0 }
0x58a7   : > { %v6769_v17 = vpack.c.bf16 %v6763_v23, %v6763_v23  ;;  %v12250_v57 = vpop.f32.mrb[209].mxu0 }
0x58a8   : > { %v6766_v53 = vpop.f32.mrb[210].mxu0 }
0x58a9   : > { %v12251_v15 = vpop.f32.mrb[211].mxu0  ;;  %12255 = vmatmul.mubr.msk.bf16.vlgmr.msra.gmra.mrb[212].mxu1 %vm1454_vm2, %v6769_v17  ;;  %v15753_v53 = vld [vmem:[%s16573_s5] ss:$0 sm:$0xff] }
0x58aa   : > { %12267 = vmatpush3.bf16.xpose.msra.mxu1 %v14836_v52  ;;  %12268 = vmatprep.mubr.msk.bf16.mxu1 %vm14020_vm0, %v16579_v16  ;;  %v15756_v15 = vld [vmem:[#allocation26] ss:$0 sm:$0xff] }
0x58ab   : > { %12278 = vmatprep.subr.bf16.mxu1 %v16579_v16 }
0x597c   : > { %v6807_v22 = vpop.f32.mrb[212].mxu1 }
0x597d   : > { %v6813_v63 = vadd.f32 %v6807_v22, %v6658_v30  ;;  %v12256_v1 = vpop.f32.mrb[213].mxu1 }
0x597e   : > { %v6810_v44 = vpop.f32.mrb[214].mxu1 }
0x597f   : > { %v6814_v41 = vadd.f32 %v15746_v56, %v6813_v63  ;;  %v12257_v21 = vpop.f32.mrb[215].mxu1  ;;  %v15768_v44 = vld [vmem:[#allocation17] ss:$0 sm:$0xff] }
0x5981   : > { %v6815_v0 = vadd.f32 %v6814_v41, %v15610_v60 }
0x5983   : > { %v6816_v7 = vsel %vm1314_vm1, %v6815_v0, 0.0 }
0x5984   : > { %6817 = vadd.xlane.f32.xlu1 %v6816_v7 }
0x5a11   : > { %v6818_v37 = vpop.xlane.xlu1 %6817 }
0x5a12   : > { %v6819_v50 = vmul.f32 0.03125, %v6818_v37 }
0x5a14   : > { %v6820_v55 = vsub.f32 %v6815_v0, %v6819_v50 }
0x5a16   : > { %v6821_v54 = vmul.f32 %v6820_v55, %v6820_v55 }
0x5a18   : > { %v6822_v18 = vsel %vm1314_vm1, %v6821_v54, 0.0 }
0x5a19   : > { %6823 = vadd.xlane.f32.xlu1 %v6822_v18 }
0x5aa6   : > { %v6824_v30 = vpop.xlane.xlu1 %6823 }
0x5aa7   : > { %v6825_v3 = vmul.f32 0.03125, %v6824_v30 }
0x5aa9   : > { %v6826_v23 = vadd.f32 1e-05, %v6825_v3 }
0x5aab   : > { %13149 = vrsqrt.f32 %v6826_v23 }
0x5ab5   : > { %v13150_v17 = vpop.eup %13149 }
0x5ab6   : > { %v6828_v57 = vmul.f32 %v13150_v17, %v6820_v55 }
0x5ab8   : > { %v6829_v60 = vmul.f32 %v15753_v53, %v6828_v57 }
0x5aba   : > { %v15759_v22 = vadd.f32 %v15756_v15, %v6829_v60 }
0x5abc   : > { %v6831_v63 = vpack.c.bf16 %v15759_v22, %v15759_v22 }
0x5abe   : > { %12263 = vmatmul.mubr.msk.bf16.vlgmr.msra.gmra.mrb[212].mxu0 %vm1314_vm1, %v6831_v63 }
0x5abf   : > { %12273 = vmatpush3.bf16.msra.mxu0 %v14873_v46  ;;  %12274 = vmatprep.mubr.msk.bf16.mxu0 %vm14020_vm0, %v16579_v16 }
0x5ac0   : > { %12284 = vmatprep.subr.bf16.mxu0 %v16579_v16 }
0x5b91   : > { %v6869_v1 = vpop.f32.mrb[212].mxu0 }
0x5b92   : > { %v6870_v41 = vadd.f32 %v15768_v44, %v6869_v1  ;;  %v12264_v21 = vpop.f32.mrb[213].mxu0 }
0x5b93   : > { %v6872_v0 = vpop.f32.mrb[214].mxu0 }
0x5b94   : > { %v6875_v7 = vmul.f32 0.35355338, %v6870_v41  ;;  %v12265_v37 = vpop.f32.mrb[215].mxu0 }
0x5b96   : > { %v15771_v50 = vpack.c.bf16 %v6875_v7, %v6875_v7 }
0x5b98   : > { %6977 = vrot.lane.b32.xlu1 %v15771_v50, %s14021_s12  ;;  %12269 = vmatmul.mubr.msk.bf16.vlgmr.msra.gmra.mrb[216].mxu1 %vm1454_vm2, %v15771_v50 }
0x5b99   : > { %12279 = vmatpush3.bf16.xpose.msra.mxu1 %v14843_v62  ;;  %12280 = vmatprep.mubr.msk.bf16.mxu1 %vm14020_vm0, %v16579_v16 }
0x5b9a   : > { %12290 = vmatprep.subr.bf16.mxu1 %v16579_v16 }
0x5c0a   : > { %v6978_v55 = vpop.permute.xlu1 %6977 }
0x5c0b   : > { %12281 = vmatmul.mubr.msk.bf16.vlgmr.msra.gmra.mrb[220].mxu1 %vm1454_vm2, %v6978_v55 }
0x5c0c   : > { %12291 = vmatpush3.bf16.msra.mxu1 %v14888_v59  ;;  %12292 = vmatprep.mubr.msk.bf16.mxu1 %vm14020_vm0, %v16579_v16 }
0x5c0d   : > { %12302 = vmatprep.subr.bf16.mxu1 %v16579_v16 }
0x5c6b   : > { %v6914_v54 = vpop.f32.mrb[216].mxu1 }
0x5c6c   : > { %v6915_v18 = vadd.f32 %v15527_v51, %v6914_v54  ;;  %v12270_v30 = vpop.f32.mrb[217].mxu1 }
0x5c6d   : > { %v6917_v3 = vpop.f32.mrb[218].mxu1 }
0x5c6e   : > { %v12271_v23 = vpop.f32.mrb[219].mxu1  ;;  %v6920_v17 = vsel %vm1454_vm2, %v6915_v18, -inf }
0x5c6f   : > { %6921 = vmax.xlane.f32.xlu0 %v6920_v17 }
0x5cde   : > { %v7016_v57 = vpop.f32.mrb[220].mxu1 }
0x5cdf   : > { %v7017_v60 = vadd.f32 %v15527_v51, %v7016_v57  ;;  %v12282_v63 = vpop.f32.mrb[221].mxu1 }
0x5ce0   : > { %v7019_v1 = vpop.f32.mrb[222].mxu1 }
0x5ce1   : > { %v12283_v41 = vpop.f32.mrb[223].mxu1  ;;  %v7022_v21 = vsel %vm1454_vm2, %v7017_v60, -inf }
0x5ce2   : > { %7023 = vmax.xlane.f32.xlu1 %v7022_v21 }
0x5cfc   : > { %v6922_v0 = vpop.xlane.xlu0 %6921 }
0x5cfd   : > { %v6923_v7 = vsub.f32 %v6915_v18, %v6922_v0 }
0x5cff   : > { %v6924_v37 = vmul.f32 1.442695, %v6923_v7 }
0x5d01   : > { %13151 = vpow2.f32 %v6924_v37 }
0x5d0b   : > { %v13152_v55 = vpop.eup %13151 }
0x5d0c   : > { %v6926_v54 = vsel %vm1454_vm2, %v13152_v55, 0.0 }
0x5d0d   : > { %6927 = vadd.xlane.f32.xlu0 %v6926_v54 }
0x5d6f   : > { %v7024_v30 = vpop.xlane.xlu1 %7023 }
0x5d70   : > { %v7025_v3 = vsub.f32 %v7017_v60, %v7024_v30 }
0x5d72   : > { %v7026_v23 = vmul.f32 1.442695, %v7025_v3 }
0x5d74   : > { %13153 = vpow2.f32 %v7026_v23 }
0x5d7e   : > { %v13154_v17 = vpop.eup %13153 }
0x5d7f   : > { %v7028_v57 = vsel %vm1454_vm2, %v13154_v17, 0.0 }
0x5d80   : > { %7029 = vadd.xlane.f32.xlu0 %v7028_v57 }
0x5d96   : > { %7164 = vrot.lane.b32.xlu0 %v15771_v50, %s14022_s20 }
0x5d9a   : > { %v6928_v63 = vpop.xlane.xlu0 %6927 }
0x5d9b   : > { %13155 = vrcp.f32 %v6928_v63 }
0x5da5   : > { %v13156_v18 = vpop.eup %13155 }
0x5da6   : > { %v6930_v1 = vmul.f32 %v13156_v18, %v13152_v55 }
0x5da8   : > { %v6931_v41 = vpack.c.bf16 %v6930_v1, %v6930_v1 }
0x5daa   : > { %12275 = vmatmul.mubr.msk.bf16.vlgmr.msra.gmra.mrb[216].mxu0 %vm1454_vm2, %v6931_v41 }
0x5dab   : > { %12285 = vmatpush3.bf16.msra.mxu0 %v14893_v2  ;;  %12286 = vmatprep.mubr.msk.bf16.mxu0 %vm14020_vm0, %v16579_v16 }
0x5dac   : > { %12296 = vmatprep.subr.bf16.mxu0 %v16579_v16 }
0x5e0d   : > { %v7030_v60 = vpop.xlane.xlu0 %7029 }
0x5e0e   : > { %13157 = vrcp.f32 %v7030_v60 }
0x5e11   : > { %v7165_v1 = vpop.permute.xlu0 %7164 }
0x5e18   : > { %v13158_v21 = vpop.eup %13157 }
0x5e19   : > { %v7032_v0 = vmul.f32 %v13158_v21, %v13154_v17 }
0x5e1b   : > { %v7033_v7 = vpack.c.bf16 %v7032_v0, %v7032_v0 }
0x5e1d   : > { %12287 = vmatmul.mubr.msk.bf16.vlgmr.msra.gmra.mrb[220].mxu0 %vm1454_vm2, %v7033_v7 }
0x5e1e   : > { %12297 = vmatpush3.bf16.msra.mxu0 %v14898_v13  ;;  %12298 = vmatprep.mubr.msk.bf16.mxu0 %vm14020_vm0, %v16579_v16 }
0x5e1f   : > { %12308 = vmatprep.subr.bf16.mxu0 %v16579_v16 }
0x5e7d   : > { %v6969_v37 = vpop.f32.mrb[216].mxu0 }
0x5e7e   : > { %v6975_v55 = vpack.c.bf16 %v6969_v37, %v6969_v37  ;;  %v12276_v54 = vpop.f32.mrb[217].mxu0 }
0x5e7f   : > { %v6972_v30 = vpop.f32.mrb[218].mxu0 }
0x5e80   : > { %v12277_v3 = vpop.f32.mrb[219].mxu0  ;;  %12299 = vmatmul.mubr.msk.bf16.vlgmr.msra.gmra.mrb[224].mxu0 %vm1454_vm2, %v6975_v55 }
0x5e81   : > { %12309 = vmatpush3.bf16.msra.mxu0 %v14930_v58  ;;  %12310 = vmatprep.mubr.msk.bf16.mxu0 %vm14020_vm0, %v16579_v16 }
0x5e82   : > { %12320 = vmatprep.subr.bf16.mxu0 %v16579_v16 }
0x5ef0   : > { %v7071_v23 = vpop.f32.mrb[220].mxu0 }
0x5ef1   : > { %v7077_v17 = vpack.c.bf16 %v7071_v23, %v7071_v23  ;;  %v12288_v57 = vpop.f32.mrb[221].mxu0 }
0x5ef2   : > { %v7074_v63 = vpop.f32.mrb[222].mxu0 }
0x5ef3   : > { %v12289_v18 = vpop.f32.mrb[223].mxu0  ;;  %12293 = vmatmul.mubr.msk.bf16.vlgmr.msra.gmra.mrb[224].mxu1 %vm1454_vm2, %v7077_v17 }
0x5ef4   : > { %12303 = vmatpush3.bf16.xpose.msra.mxu1 %v14909_v24  ;;  %12304 = vmatprep.mubr.msk.bf16.mxu1 %vm14020_vm0, %v16579_v16 }
0x5ef5   : > { %12314 = vmatprep.subr.bf16.mxu1 %v16579_v16 }
0x5efb   : > { %12305 = vmatmul.mubr.msk.bf16.vlgmr.msra.gmra.mrb[228].mxu1 %vm1454_vm2, %v7165_v1 }
0x5efc   : > { %12315 = vmatpush3.bf16.msra.mxu1 %v16580_v39  ;;  %12316 = vmatprep.mubr.msk.bf16.mxu1 %vm14020_vm0, %v16579_v16 }
0x5efd   : > { %12326 = vmatprep.subr.bf16.mxu1 %v16579_v16 }
0x5f53   : > { %v7158_v41 = vpop.f32.mrb[224].mxu0 }
0x5f54   : > { %v12300_v60 = vpop.f32.mrb[225].mxu0 }
0x5f55   : > { %v7161_v21 = vpop.f32.mrb[226].mxu0 }
0x5f56   : > { %v12301_v0 = vpop.f32.mrb[227].mxu0 }
0x5fc6   : > { %v7115_v7 = vpop.f32.mrb[224].mxu1 }
0x5fc7   : > { %v7159_v37 = vadd.f32 %v7158_v41, %v7115_v7  ;;  %v12294_v55 = vpop.f32.mrb[225].mxu1 }
0x5fc8   : > { %v7118_v54 = vpop.f32.mrb[226].mxu1 }
0x5fc9   : > { %v12295_v30 = vpop.f32.mrb[227].mxu1 }
0x5fce   : > { %v7203_v3 = vpop.f32.mrb[228].mxu1 }
0x5fcf   : > { %v7204_v23 = vadd.f32 %v15527_v51, %v7203_v3  ;;  %v12306_v17 = vpop.f32.mrb[229].mxu1 }
0x5fd0   : > { %v7206_v57 = vpop.f32.mrb[230].mxu1 }
0x5fd1   : > { %v12307_v63 = vpop.f32.mrb[231].mxu1  ;;  %v7209_v18 = vsel %vm1454_vm2, %v7204_v23, -inf }
0x5fd2   : > { %7210 = vmax.xlane.f32.xlu1 %v7209_v18 }
0x605f   : > { %v7211_v1 = vpop.xlane.xlu1 %7210 }
0x6060   : > { %v7212_v39 = vsub.f32 %v7204_v23, %v7211_v1  ;;  %v15839_v23 = vld [vmem:[#allocation8] sm:$0xff] }
0x6062   : > { %v7213_v24 = vmul.f32 1.442695, %v7212_v39 }
0x6064   : > { %13159 = vpow2.f32 %v7213_v24 }
0x606e   : > { %v13160_v60 = vpop.eup %13159 }
0x606f   : > { %v7215_v21 = vsel %vm1454_vm2, %v13160_v60, 0.0 }
0x6070   : > { %7216 = vadd.xlane.f32.xlu1 %v7215_v21 }
0x6081   : > { %7309 = vrot.lane.b32.xlu1 %v15771_v50, %s14023_s10 }
0x60fd   : > { %v7217_v41 = vpop.xlane.xlu1 %7216 }
0x60fe   : > { %13161 = vrcp.f32 %v7217_v41 }
0x6101   : > { %v7310_v24 = vpop.permute.xlu1 %7309 }
0x6108   : > { %v13162_v51 = vpop.eup %13161 }
0x6109   : > { %v7219_v0 = vmul.f32 %v13162_v51, %v13160_v60 }
0x610b   : > { %v7220_v7 = vpack.c.bf16 %v7219_v0, %v7219_v0 }
0x610d   : > { %12311 = vmatmul.mubr.msk.bf16.vlgmr.msra.gmra.mrb[228].mxu0 %vm1454_vm2, %v7220_v7 }
0x610e   : > { %12321 = vmatpush3.bf16.xpose.msra.mxu0 %v14936_v9  ;;  %12322 = vmatprep.mubr.msk.bf16.mxu0 %vm14020_vm0, %v16579_v16 }
0x610f   : > { %12332 = vmatprep.subr.bf16.mxu0 %v16579_v16 }
0x6115   : > { %12323 = vmatmul.mubr.msk.bf16.vlgmr.msra.gmra.mrb[232].mxu0 %vm1454_vm2, %v7310_v24 }
0x6116   : > { %12333 = vmatpush3.bf16.msra.mxu0 %v14960_v12  ;;  %12334 = vmatprep.mubr.msk.bf16.mxu0 %vm14020_vm0, %v16579_v16 }
0x6117   : > { %12346 = vmatprep.subr.bf16.mxu0 %v16579_v16 }
0x61e0   : > { %v7258_v39 = vpop.f32.mrb[228].mxu0 }
0x61e1   : > { %v7264_v50 = vpack.c.bf16 %v7258_v39, %v7258_v39  ;;  %v12312_v55 = vpop.f32.mrb[229].mxu0 }
0x61e2   : > { %v7261_v54 = vpop.f32.mrb[230].mxu0 }
0x61e3   : > { %v12313_v30 = vpop.f32.mrb[231].mxu0  ;;  %12317 = vmatmul.mubr.msk.bf16.vlgmr.msra.gmra.mrb[232].mxu1 %vm1454_vm2, %v7264_v50 }
0x61e4   : > { %12327 = vmatpush3.bf16.msra.mxu1 %v14966_v45  ;;  %12328 = vmatprep.mubr.msk.bf16.mxu1 %vm14020_vm0, %v16579_v16 }
0x61e5   : > { %12338 = vmatprep.subr.bf16.mxu1 %v16579_v16 }
0x61e8   : > { %v7348_v3 = vpop.f32.mrb[232].mxu0 }
0x61e9   : > { %v7349_v17 = vadd.f32 %v15839_v23, %v7348_v3  ;;  %v12324_v57 = vpop.f32.mrb[233].mxu0 }
0x61ea   : > { %v7351_v63 = vpop.f32.mrb[234].mxu0 }
0x61eb   : > { %v12325_v18 = vpop.f32.mrb[235].mxu0  ;;  %v7354_v1 = vsel %vm1454_vm2, %v7349_v17, -inf }
0x61ec   : > { %7355 = vmax.xlane.f32.xlu0 %v7354_v1 }
0x6279   : > { %v7356_v60 = vpop.xlane.xlu0 %7355 }
0x627a   : > { %v7357_v21 = vsub.f32 %v7349_v17, %v7356_v60 }
0x627c   : > { %v7358_v41 = vmul.f32 1.442695, %v7357_v21 }
0x627e   : > { %13163 = vpow2.f32 %v7358_v41 }
0x6288   : > { %v13164_v51 = vpop.eup %13163 }
0x6289   : > { %v7360_v0 = vsel %vm1454_vm2, %v13164_v51, 0.0 }
0x628a   : > { %7361 = vadd.xlane.f32.xlu1 %v7360_v0  ;;  %v15863_v0 = vld [vmem:[%s16576_s11] ss:$0 sm:$0xff] }
0x62b6   : > { %v7302_v7 = vpop.f32.mrb[232].mxu1 }
0x62b7   : > { %v7308_v24 = vadd.f32 %v7302_v7, %v7159_v37  ;;  %v12318_v39 = vpop.f32.mrb[233].mxu1 }
0x62b8   : > { %v7305_v50 = vpop.f32.mrb[234].mxu1 }
0x62b9   : > { %v12319_v55 = vpop.f32.mrb[235].mxu1 }
0x6317   : > { %v7362_v54 = vpop.xlane.xlu1 %7361 }
0x6318   : > { %13165 = vrcp.f32 %v7362_v54 }
0x6322   : > { %v13166_v30 = vpop.eup %13165 }
0x6323   : > { %v7364_v3 = vmul.f32 %v13166_v30, %v13164_v51 }
0x6325   : > { %v7365_v57 = vpack.c.bf16 %v7364_v3, %v7364_v3 }
0x6327   : > { %12329 = vmatmul.mubr.msk.bf16.vlgmr.msra.gmra.mrb[236].mxu1 %vm1454_vm2, %v7365_v57 }
0x6328   : > { %12339 = vmatpush3.bf16.msra.mxu1 %v14982_v35  ;;  %12342 = vmatprep.mubr.msk.bf16.mxu1 %vm14020_vm0, %v16579_v16 }
0x6329   : > { %12340 = vmatprep.subr.bf16.mxu1 %v16579_v16 }
0x632c   : > { %12341 = vmatpush3.bf16.msra.mxu1 %v14988_v38 }
0x632d   : > { %12358 = vmatprep.subr.bf16.mxu1 %v16579_v16 }
0x63fa   : > { %v7403_v37 = vpop.f32.mrb[236].mxu1 }
0x63fb   : > { %v7409_v17 = vpack.c.bf16 %v7403_v37, %v7403_v37  ;;  %v12330_v63 = vpop.f32.mrb[237].mxu1 }
0x63fc   : > { %v7406_v18 = vpop.f32.mrb[238].mxu1 }
0x63fd   : > { %v12331_v1 = vpop.f32.mrb[239].mxu1  ;;  %12335 = vmatmul.mubr.msk.bf16.vlgmr.msra.gmra.mrb[236].mxu0 %vm1454_vm2, %v7409_v17 }
0x63fe   : > { %12347 = vmatpush3.bf16.msra.mxu0 %v14995_v47  ;;  %12354 = vmatprep.mubr.msk.bf16.mxu0 %vm14020_vm0, %v16579_v16 }
0x63ff   : > { %12348 = vmatprep.subr.bf16.mxu0 %v16579_v16 }
0x6402   : > { %12349 = vmatpush3.bf16.msra.mxu0 %v14999_v49 }
0x6403   : > { %12350 = vmatprep.subr.bf16.mxu0 %v16579_v16 }
0x6406   : > { %12351 = vmatpush3.bf16.msra.mxu0 %v15019_v61 }
0x6407   : > { %12352 = vmatprep.subr.bf16.mxu0 %v16579_v16 }
0x640a   : > { %12353 = vmatpush3.bf16.msra.mxu0 %v15025_v10 }
0x640b   : > { %12374 = vmatprep.subr.bf16.mxu0 %v16579_v16 }
0x64d0   : > { %v7447_v60 = vpop.f32.mrb[236].mxu0 }
0x64d1   : > { %v7453_v21 = vadd.f32 %v7447_v60, %v7308_v24  ;;  %v12336_v41 = vpop.f32.mrb[237].mxu0 }
0x64d2   : > { %v7450_v51 = vpop.f32.mrb[238].mxu0 }
0x64d3   : > { %v7454_v7 = vadd.f32 %v15863_v0, %v7453_v21  ;;  %v12337_v39 = vpop.f32.mrb[239].mxu0 }
0x64d5   : > { %v7455_v50 = vadd.f32 %v7454_v7, %v15759_v22 }
0x64d7   : > { %v7456_v55 = vsel %vm1314_vm1, %v7455_v50, 0.0 }
0x64d8   : > { %7457 = vadd.xlane.f32.xlu0 %v7456_v55 }
0x6565   : > { %v7458_v54 = vpop.xlane.xlu0 %7457 }
0x6566   : > { %v7459_v30 = vmul.f32 0.03125, %v7458_v54 }
0x6568   : > { %v7460_v3 = vsub.f32 %v7455_v50, %v7459_v30 }
0x656a   : > { %v7461_v57 = vmul.f32 %v7460_v3, %v7460_v3 }
0x656c   : > { %v7462_v37 = vsel %vm1314_vm1, %v7461_v57, 0.0 }
0x656d   : > { %7463 = vadd.xlane.f32.xlu0 %v7462_v37 }
0x65fa   : > { %v7464_v24 = vpop.xlane.xlu0 %7463 }
0x65fb   : > { %v7465_v17 = vmul.f32 0.03125, %v7464_v24 }
0x65fd   : > { %v7466_v63 = vadd.f32 1e-05, %v7465_v17 }
0x65ff   : > { %13167 = vrsqrt.f32 %v7466_v63 }
0x6609   : > { %v13168_v18 = vpop.eup %13167 }
0x660a   : > { %v7468_v1 = vmul.f32 %v13168_v18, %v7460_v3 }
0x660c   : > { %v7469_v60 = vmul.f32 %v15574_v31, %v7468_v1 }
0x660e   : > { %v7470_v22 = vadd.f32 %v15577_v43, %v7469_v60 }
0x6610   : > { %v7471_v21 = vpack.c.bf16 %v7470_v22, %v7470_v22 }
0x6612   : > { %12343 = vmatmul.mubr.msk.bf16.vlgmr.msra.gmra.mrb[240].mxu1 %vm1314_vm1, %v7471_v21 }
0x6613   : > { %12359 = vmatpush3.bf16.msra.mxu1 %v14633_v4  ;;  %12362 = vmatprep.mubr.msk.bf16.mxu1 %vm14020_vm0, %v16579_v16 }
0x6614   : > { %12360 = vmatprep.subr.bf16.mxu1 %v16579_v16 }
0x6617   : > { %12361 = vmatpush3.bf16.msra.mxu1 %v14637_v6 }
0x6618   : > { %12366 = vmatprep.subr.bf16.mxu1 %v16579_v16 }
0x66e5   : > { %v7509_v41 = vpop.f32.mrb[240].mxu1 }
0x66e6   : > { %v7510_v51 = vadd.f32 %v15588_v8, %v7509_v41  ;;  %v12344_v31 = vpop.f32.mrb[241].mxu1 }
0x66e7   : > { %v7512_v7 = vpop.f32.mrb[242].mxu1 }
0x66e8   : > { %v7515_v43 = vmax.f32 %v7510_v51, 0.0  ;;  %v12345_v39 = vpop.f32.mrb[243].mxu1 }
0x66ea   : > { %v7516_v50 = vpack.c.bf16 %v7515_v43, %v7515_v43 }
0x66ec   : > { %12355 = vmatmul.mubr.msk.bf16.vlgmr.msra.gmra.mrb[240].mxu0 %vm2989_vm4, %v7516_v50 }
0x66ed   : > { %12375 = vmatpush3.bf16.msra.mxu0 %v14684_v34  ;;  %12378 = vmatprep.mubr.msk.bf16.mxu0 %vm14020_vm0, %v16579_v16 }
0x66ee   : > { %12376 = vmatprep.subr.bf16.mxu0 %v16579_v16 }
0x66f1   : > { %12377 = vmatpush3.bf16.msra.mxu0 %v14688_v36 }
0x66f2   : > { %12388 = vmatprep.subr.bf16.mxu0 %v16579_v16 }
0x67bf   : > { %v7554_v55 = vpop.f32.mrb[240].mxu0 }
0x67c0   : > { %v7555_v8 = vadd.f32 %v15599_v48, %v7554_v55  ;;  %v12356_v54 = vpop.f32.mrb[241].mxu0 }
0x67c1   : > { %v7557_v30 = vpop.f32.mrb[242].mxu0 }
0x67c2   : > { %v7560_v3 = vadd.f32 %v7555_v8, %v7470_v22  ;;  %v12357_v57 = vpop.f32.mrb[243].mxu0 }
0x67c4   : > { %v7561_v37 = vsel %vm1314_vm1, %v7560_v3, 0.0 }
0x67c5   : > { %7562 = vadd.xlane.f32.xlu0 %v7561_v37 }
0x6852   : > { %v7563_v24 = vpop.xlane.xlu0 %7562 }
0x6853   : > { %v7564_v17 = vmul.f32 0.03125, %v7563_v24 }
0x6855   : > { %v7565_v63 = vsub.f32 %v7560_v3, %v7564_v17 }
0x6857   : > { %v7566_v18 = vmul.f32 %v7565_v63, %v7565_v63 }
0x6859   : > { %v7567_v1 = vsel %vm1314_vm1, %v7566_v18, 0.0 }
0x685a   : > { %7568 = vadd.xlane.f32.xlu1 %v7567_v1 }
0x68e7   : > { %v7569_v60 = vpop.xlane.xlu1 %7568 }
0x68e8   : > { %v7570_v21 = vmul.f32 0.03125, %v7569_v60 }
0x68ea   : > { %v7571_v41 = vadd.f32 1e-05, %v7570_v21 }
0x68ec   : > { %13169 = vrsqrt.f32 %v7571_v41 }
0x68f6   : > { %v13170_v51 = vpop.eup %13169 }
0x68f7   : > { %v7573_v48 = vmul.f32 %v13170_v51, %v7565_v63 }
0x68f9   : > { %v7574_v31 = vmul.f32 %v15604_v33, %v7573_v48 }
0x68fb   : > { %v15891_v22 = vadd.f32 %v15607_v5, %v7574_v31 }
0x68fd   : > { %v7576_v7 = vpack.c.bf16 %v15891_v22, %v15891_v22 }
0x68ff   : > { %12363 = vmatmul.mubr.msk.bf16.vlgmr.msra.gmra.mrb[244].mxu1 %vm1314_vm1, %v7576_v7  ;;  %12379 = vmatmul.mubr.msk.bf16.vlgmr.msra.gmra.mrb[244].mxu0 %vm1314_vm1, %v7576_v7 }
0x6900   : > { %12367 = vmatpush3.bf16.msra.mxu1 %v14649_v11  ;;  %12370 = vmatprep.mubr.msk.bf16.mxu1 %vm14020_vm0, %v16579_v16 }
0x6901   : > { %12368 = vmatprep.subr.bf16.mxu1 %v16579_v16  ;;  %12390 = vmatprep.mubr.msk.bf16.mxu0 %vm14020_vm0, %v16579_v16 }
0x6904   : > { %12369 = vmatpush3.bf16.msra.mxu1 %v14656_v14 }
0x6905   : > { %12382 = vmatprep.subr.bf16.mxu1 %v16579_v16 }
0x6907   : > { %12371 = vmatmul.mubr.msk.bf16.vlgmr.msra.gmra.mrb[248].mxu1 %vm1314_vm1, %v7576_v7 }
0x6908   : > { %12384 = vmatprep.mubr.msk.bf16.mxu1 %vm14020_vm0, %v16579_v16 }
0x69d2   : > { %v7614_v33 = vpop.f32.mrb[244].mxu1  ;;  %v7694_v5 = vpop.f32.mrb[244].mxu0 }
0x69d3   : > { %v7615_v43 = vadd.f32 %v15627_v42, %v7614_v33  ;;  %v7695_v39 = vadd.f32 %v15630_v28, %v7694_v5  ;;  %v12364_v50 = vpop.f32.mrb[245].mxu1  ;;  %v12380_v55 = vpop.f32.mrb[245].mxu0 }
0x69d4   : > { %v7617_v8 = vpop.f32.mrb[246].mxu1  ;;  %v7697_v54 = vpop.f32.mrb[246].mxu0 }
0x69d5   : > { %v7700_v30 = vmul.f32 0.35355338, %v7615_v43  ;;  %v15910_v3 = vpack.c.bf16 %v7695_v39, %v7695_v39  ;;  %v12365_v57 = vpop.f32.mrb[247].mxu1  ;;  %v12381_v37 = vpop.f32.mrb[247].mxu0 }
0x69d7   : > { %v15912_v24 = vpack.c.bf16 %v7700_v30, %v7700_v30  ;;  %v7766_v17 = vsel %vm1516_vm3, %v15910_v3, 0 }
0x69d8   : > { %12389 = vmatpush3.bf16.msra.mxu0 %v7766_v17 }
0x69d9   : > { %7810 = vrot.lane.b32.xlu1 %v15912_v24, %s14021_s12  ;;  %12400 = vmatprep.subr.bf16.mxu0 %v16579_v16 }
0x69da   : > { %v7654_v42 = vpop.f32.mrb[248].mxu1 }
0x69db   : > { %v7655_v28 = vadd.f32 %v15642_v25, %v7654_v42  ;;  %v12372_v63 = vpop.f32.mrb[249].mxu1 }
0x69dc   : > { %v7657_v18 = vpop.f32.mrb[250].mxu1 }
0x69dd   : > { %v15920_v1 = vpack.c.bf16 %v7655_v28, %v7655_v28  ;;  %v12373_v60 = vpop.f32.mrb[251].mxu1 }
0x69df   : > { %7813 = vrot.lane.b32.xlu0 %v15920_v1, %s14021_s12  ;;  %v7708_v21 = vsel %vm1454_vm2, %v15920_v1, 0 }
0x69e0   : > { %12383 = vmatpush3.bf16.xpose.msra.mxu1 %v7708_v21 }
0x69e1   : > { %12394 = vmatprep.subr.bf16.mxu1 %v16579_v16 }
0x69e7   : > { %12385 = vmatmul.mubr.msk.bf16.vlgmr.msra.gmra.mrb[252].mxu1 %vm1454_vm2, %v15912_v24 }
0x69e8   : > { %12396 = vmatprep.mubr.msk.bf16.mxu1 %vm14020_vm0, %v16579_v16 }
0x6a4b   : > { %v7811_v51 = vpop.permute.xlu1 %7810 }
0x6a51   : > { %v7814_v25 = vpop.permute.xlu0 %7813 }
0x6a52   : > { %v7819_v41 = vsel %vm1454_vm2, %v7814_v25, 0 }
0x6a53   : > { %12395 = vmatpush3.bf16.xpose.msra.mxu1 %v7819_v41 }
0x6a54   : > { %12406 = vmatprep.subr.bf16.mxu1 %v16579_v16 }
0x6a5a   : > { %12397 = vmatmul.mubr.msk.bf16.vlgmr.msra.gmra.mrb[0].mxu1 %vm1454_vm2, %v7811_v51 }
0x6a5b   : > { %12407 = vmatpush3.bf16.msra.mxu1 %v14727_v19  ;;  %12408 = vmatprep.mubr.msk.bf16.mxu1 %vm14020_vm0, %v16579_v16 }
0x6a5c   : > { %12418 = vmatprep.subr.bf16.mxu1 %v16579_v16 }
0x6aba   : > { %v7744_v48 = vpop.f32.mrb[252].mxu1 }
0x6abb   : > { %v7745_v31 = vadd.f32 %v15724_v27, %v7744_v48  ;;  %v12386_v7 = vpop.f32.mrb[253].mxu1 }
0x6abc   : > { %v7747_v33 = vpop.f32.mrb[254].mxu1 }
0x6abd   : > { %v12387_v5 = vpop.f32.mrb[255].mxu1  ;;  %v7750_v43 = vsel %vm1454_vm2, %v7745_v31, -inf }
0x6abe   : > { %7751 = vmax.xlane.f32.xlu1 %v7750_v43 }
0x6b2d   : > { %v7855_v39 = vpop.f32.mrb[0].mxu1 }
0x6b2e   : > { %v7856_v50 = vadd.f32 %v15724_v27, %v7855_v39  ;;  %v12398_v55 = vpop.f32.mrb[1].mxu1 }
0x6b2f   : > { %v7858_v8 = vpop.f32.mrb[2].mxu1 }
0x6b30   : > { %v12399_v54 = vpop.f32.mrb[3].mxu1  ;;  %v7861_v30 = vsel %vm1454_vm2, %v7856_v50, -inf }
0x6b31   : > { %7862 = vmax.xlane.f32.xlu0 %v7861_v30 }
0x6b4b   : > { %v7752_v57 = vpop.xlane.xlu1 %7751 }
0x6b4c   : > { %v7753_v37 = vsub.f32 %v7745_v31, %v7752_v57 }
0x6b4e   : > { %v7754_v17 = vmul.f32 1.442695, %v7753_v37 }
0x6b50   : > { %13171 = vpow2.f32 %v7754_v17 }
0x6b5a   : > { %v13172_v42 = vpop.eup %13171 }
0x6b5b   : > { %v7756_v28 = vsel %vm1454_vm2, %v13172_v42, 0.0 }
0x6b5c   : > { %7757 = vadd.xlane.f32.xlu0 %v7756_v28 }
0x6b72   : > { %7874 = vrot.lane.b32.xlu0 %v15910_v3, %s14021_s12 }
0x6bbe   : > { %v7863_v63 = vpop.xlane.xlu0 %7862 }
0x6bbf   : > { %v7864_v18 = vsub.f32 %v7856_v50, %v7863_v63 }
0x6bc1   : > { %v7865_v60 = vmul.f32 1.442695, %v7864_v18 }
0x6bc3   : > { %13173 = vpow2.f32 %v7865_v60 }
0x6bcd   : > { %v13174_v21 = vpop.eup %13173 }
0x6bce   : > { %v7867_v25 = vsel %vm1454_vm2, %v13174_v21, 0.0 }
0x6bcf   : > { %7868 = vadd.xlane.f32.xlu1 %v7867_v25 }
0x6be0   : > { %8011 = vrot.lane.b32.xlu1 %v15920_v1, %s14022_s20 }
0x6be4   : > { %8009 = vrot.lane.b32.xlu1 %v15912_v24, %s14022_s20 }
0x6be9   : > { %v7758_v41 = vpop.xlane.xlu0 %7757 }
0x6bea   : > { %13175 = vrcp.f32 %v7758_v41 }
0x6bed   : > { %v7875_v31 = vpop.permute.xlu0 %7874 }
0x6bee   : > { %v7880_v33 = vsel %vm1516_vm3, %v7875_v31, 0 }
0x6bf4   : > { %v13176_v51 = vpop.eup %13175 }
0x6bf5   : > { %v7760_v48 = vmul.f32 %v13176_v51, %v13172_v42 }
0x6bf7   : > { %v7761_v7 = vpack.c.bf16 %v7760_v48, %v7760_v48 }
0x6bf9   : > { %12391 = vmatmul.mubr.msk.bf16.vlgmr.msra.gmra.mrb[248].mxu0 %vm1454_vm2, %v7761_v7 }
0x6bfa   : > { %12401 = vmatpush3.bf16.msra.mxu0 %v7880_v33  ;;  %12402 = vmatprep.mubr.msk.bf16.mxu0 %vm14020_vm0, %v16579_v16 }
0x6bfb   : > { %12412 = vmatprep.subr.bf16.mxu0 %v16579_v16 }
0x6c5c   : > { %v7869_v5 = vpop.xlane.xlu1 %7868 }
0x6c5d   : > { %13177 = vrcp.f32 %v7869_v5 }
0x6c60   : > { %v8012_v37 = vpop.permute.xlu1 %8011 }
0x6c61   : > { %v8017_v18 = vsel %vm1454_vm2, %v8012_v37, 0 }
0x6c67   : > { %v13178_v43 = vpop.eup %13177 }
0x6c68   : > { %v7871_v39 = vmul.f32 %v13178_v43, %v13174_v21  ;;  %v8010_v21 = vpop.permute.xlu1 %8009 }
0x6c6a   : > { %v7872_v50 = vpack.c.bf16 %v7871_v39, %v7871_v39 }
0x6c6c   : > { %12403 = vmatmul.mubr.msk.bf16.vlgmr.msra.gmra.mrb[252].mxu0 %vm1454_vm2, %v7872_v50 }
0x6c6d   : > { %12413 = vmatpush3.bf16.msra.mxu0 %v14735_v29  ;;  %12414 = vmatprep.mubr.msk.bf16.mxu0 %vm14020_vm0, %v16579_v16 }
0x6c6e   : > { %12424 = vmatprep.subr.bf16.mxu0 %v16579_v16 }
0x6ccc   : > { %v7802_v55 = vpop.f32.mrb[248].mxu0 }
0x6ccd   : > { %v7808_v8 = vpack.c.bf16 %v7802_v55, %v7802_v55  ;;  %v12392_v54 = vpop.f32.mrb[249].mxu0 }
0x6cce   : > { %v7805_v30 = vpop.f32.mrb[250].mxu0 }
0x6ccf   : > { %v12393_v57 = vpop.f32.mrb[251].mxu0  ;;  %12415 = vmatmul.mubr.msk.bf16.vlgmr.msra.gmra.mrb[0].mxu0 %vm1454_vm2, %v7808_v8 }
0x6cd0   : > { %12426 = vmatprep.mubr.msk.bf16.mxu0 %vm14020_vm0, %v16579_v16 }
0x6d3f   : > { %v7916_v17 = vpop.f32.mrb[252].mxu0 }
0x6d40   : > { %v7922_v42 = vpack.c.bf16 %v7916_v17, %v7916_v17  ;;  %v12404_v28 = vpop.f32.mrb[253].mxu0 }
0x6d41   : > { %v7919_v63 = vpop.f32.mrb[254].mxu0 }
0x6d42   : > { %v12405_v60 = vpop.f32.mrb[255].mxu0  ;;  %12409 = vmatmul.mubr.msk.bf16.vlgmr.msra.gmra.mrb[4].mxu1 %vm1454_vm2, %v7922_v42 }
0x6d43   : > { %12419 = vmatpush3.bf16.xpose.msra.mxu1 %v8017_v18  ;;  %12420 = vmatprep.mubr.msk.bf16.mxu1 %vm14020_vm0, %v16579_v16 }
0x6d44   : > { %12430 = vmatprep.subr.bf16.mxu1 %v16579_v16 }
0x6d4a   : > { %12421 = vmatmul.mubr.msk.bf16.vlgmr.msra.gmra.mrb[8].mxu1 %vm1454_vm2, %v8010_v21 }
0x6d4b   : > { %12431 = vmatpush3.bf16.msra.mxu1 %v14774_v20  ;;  %12432 = vmatprep.mubr.msk.bf16.mxu1 %vm14020_vm0, %v16579_v16 }
0x6d4c   : > { %12442 = vmatprep.subr.bf16.mxu1 %v16579_v16 }
0x6da2   : > { %v8003_v25 = vpop.f32.mrb[0].mxu0 }
0x6da3   : > { %v12416_v41 = vpop.f32.mrb[1].mxu0 }
0x6da4   : > { %v8006_v51 = vpop.f32.mrb[2].mxu0 }
0x6da5   : > { %v12417_v48 = vpop.f32.mrb[3].mxu0 }
0x6e15   : > { %v7960_v31 = vpop.f32.mrb[4].mxu1 }
0x6e16   : > { %v15973_v7 = vadd.f32 %v8003_v25, %v7960_v31  ;;  %v12410_v33 = vpop.f32.mrb[5].mxu1 }
0x6e17   : > { %v7963_v5 = vpop.f32.mrb[6].mxu1 }
0x6e18   : > { %v12411_v43 = vpop.f32.mrb[7].mxu1 }
0x6e1d   : > { %v8053_v39 = vpop.f32.mrb[8].mxu1 }
0x6e1e   : > { %v8054_v50 = vadd.f32 %v15724_v27, %v8053_v39  ;;  %v12422_v55 = vpop.f32.mrb[9].mxu1 }
0x6e1f   : > { %v8056_v8 = vpop.f32.mrb[10].mxu1 }
0x6e20   : > { %v12423_v54 = vpop.f32.mrb[11].mxu1  ;;  %v8059_v30 = vsel %vm1454_vm2, %v8054_v50, -inf }
0x6e21   : > { %8060 = vmax.xlane.f32.xlu0 %v8059_v30 }
0x6e37   : > { %8071 = vrot.lane.b32.xlu0 %v15910_v3, %s14022_s20 }
0x6e3b   : > { %8164 = vrot.lane.b32.xlu0 %v15912_v24, %s14023_s10 }
0x6eae   : > { %v8061_v57 = vpop.xlane.xlu0 %8060 }
0x6eaf   : > { %v8062_v37 = vsub.f32 %v8054_v50, %v8061_v57 }
0x6eb1   : > { %v8063_v17 = vmul.f32 1.442695, %v8062_v37 }
0x6eb2   : > { %v8072_v42 = vpop.permute.xlu0 %8071 }
0x6eb3   : > { %13179 = vpow2.f32 %v8063_v17  ;;  %v8077_v28 = vsel %vm1516_vm3, %v8072_v42, 0 }
0x6eb4   : > { %12425 = vmatpush3.bf16.msra.mxu0 %v8077_v28 }
0x6eb5   : > { %12436 = vmatprep.subr.bf16.mxu0 %v16579_v16 }
0x6eb6   : > { %v8165_v48 = vpop.permute.xlu0 %8164 }
0x6ebd   : > { %v13180_v63 = vpop.eup %13179 }
0x6ebe   : > { %v8065_v18 = vsel %vm1454_vm2, %v13180_v63, 0.0 }
0x6ebf   : > { %8066 = vadd.xlane.f32.xlu1 %v8065_v18 }
0x6ed0   : > { %8166 = vrot.lane.b32.xlu1 %v15920_v1, %s14023_s10 }
0x6f4c   : > { %v8067_v60 = vpop.xlane.xlu1 %8066 }
0x6f4d   : > { %13181 = vrcp.f32 %v8067_v60 }
0x6f50   : > { %v8167_v25 = vpop.permute.xlu1 %8166 }
0x6f51   : > { %v8172_v51 = vsel %vm1454_vm2, %v8167_v25, 0 }
0x6f57   : > { %v13182_v24 = vpop.eup %13181 }
0x6f58   : > { %v8069_v21 = vmul.f32 %v13182_v24, %v13180_v63 }
0x6f5a   : > { %v8070_v41 = vpack.c.bf16 %v8069_v21, %v8069_v21 }
0x6f5c   : > { %12427 = vmatmul.mubr.msk.bf16.vlgmr.msra.gmra.mrb[4].mxu0 %vm1454_vm2, %v8070_v41 }
0x6f5d   : > { %12437 = vmatpush3.bf16.xpose.msra.mxu0 %v8172_v51  ;;  %12438 = vmatprep.mubr.msk.bf16.mxu0 %vm14020_vm0, %v16579_v16 }
0x6f5e   : > { %12448 = vmatprep.subr.bf16.mxu0 %v16579_v16 }
0x6f64   : > { %12439 = vmatmul.mubr.msk.bf16.vlgmr.msra.gmra.mrb[8].mxu0 %vm1454_vm2, %v8165_v48 }
0x6f65   : > { %12449 = vmatpush3.bf16.msra.mxu0 %v14788_v40  ;;  %12450 = vmatprep.mubr.msk.bf16.mxu0 %vm14020_vm0, %v16579_v16 }
0x6f66   : > { %12462 = vmatprep.subr.bf16.mxu0 %v16579_v16 }
0x702f   : > { %v8113_v1 = vpop.f32.mrb[4].mxu0 }
0x7030   : > { %v8119_v31 = vpack.c.bf16 %v8113_v1, %v8113_v1  ;;  %v12428_v33 = vpop.f32.mrb[5].mxu0 }
0x7031   : > { %v8116_v5 = vpop.f32.mrb[6].mxu0 }
0x7032   : > { %v12429_v43 = vpop.f32.mrb[7].mxu0  ;;  %12433 = vmatmul.mubr.msk.bf16.vlgmr.msra.gmra.mrb[12].mxu1 %vm1454_vm2, %v8119_v31 }
0x7033   : > { %12444 = vmatprep.mubr.msk.bf16.mxu1 %vm14020_vm0, %v16579_v16 }
0x7037   : > { %v8208_v39 = vpop.f32.mrb[8].mxu0 }
0x7038   : > { %v8209_v50 = vadd.f32 %v15724_v27, %v8208_v39  ;;  %v12440_v55 = vpop.f32.mrb[9].mxu0 }
0x7039   : > { %v8211_v8 = vpop.f32.mrb[10].mxu0 }
0x703a   : > { %v12441_v54 = vpop.f32.mrb[11].mxu0  ;;  %v8214_v30 = vsel %vm1454_vm2, %v8209_v50, -inf }
0x703b   : > { %8215 = vmax.xlane.f32.xlu1 %v8214_v30 }
0x70c8   : > { %v8216_v57 = vpop.xlane.xlu1 %8215 }
0x70c9   : > { %v8217_v37 = vsub.f32 %v8209_v50, %v8216_v57 }
0x70cb   : > { %v8218_v17 = vmul.f32 1.442695, %v8217_v37 }
0x70cd   : > { %13183 = vpow2.f32 %v8218_v17 }
0x70d7   : > { %v13184_v42 = vpop.eup %13183 }
0x70d8   : > { %v8220_v28 = vsel %vm1454_vm2, %v13184_v42, 0.0 }
0x70d9   : > { %8221 = vadd.xlane.f32.xlu0 %v8220_v28 }
0x70ef   : > { %8226 = vrot.lane.b32.xlu0 %v15910_v3, %s14023_s10 }
0x7105   : > { %v8157_v63 = vpop.f32.mrb[12].mxu1 }
0x7106   : > { %v8163_v27 = vadd.f32 %v8157_v63, %v15973_v7  ;;  %v12434_v18 = vpop.f32.mrb[13].mxu1 }
0x7107   : > { %v8160_v60 = vpop.f32.mrb[14].mxu1 }
0x7108   : > { %v12435_v24 = vpop.f32.mrb[15].mxu1 }
0x7166   : > { %v8222_v21 = vpop.xlane.xlu0 %8221 }
0x7167   : > { %13185 = vrcp.f32 %v8222_v21 }
0x716a   : > { %v8227_v25 = vpop.permute.xlu0 %8226 }
0x716b   : > { %v8232_v41 = vsel %vm1516_vm3, %v8227_v25, 0 }
0x716c   : > { %12443 = vmatpush3.bf16.msra.mxu1 %v8232_v41 }
0x716d   : > { %12454 = vmatprep.subr.bf16.mxu1 %v16579_v16 }
0x7171   : > { %v13186_v51 = vpop.eup %13185 }
0x7172   : > { %v8224_v48 = vmul.f32 %v13186_v51, %v13184_v42 }
0x7174   : > { %v8225_v1 = vpack.c.bf16 %v8224_v48, %v8224_v48 }
0x7176   : > { %12445 = vmatmul.mubr.msk.bf16.vlgmr.msra.gmra.mrb[16].mxu1 %vm1454_vm2, %v8225_v1 }
0x7177   : > { %12455 = vmatpush3.bf16.msra.mxu1 %v14812_v26  ;;  %12458 = vmatprep.mubr.msk.bf16.mxu1 %vm14020_vm0, %v16579_v16 }
0x7178   : > { %12456 = vmatprep.subr.bf16.mxu1 %v16579_v16 }
0x717b   : > { %12457 = vmatpush3.bf16.msra.mxu1 %v14818_v32 }
0x717c   : > { %12468 = vmatprep.subr.bf16.mxu1 %v16579_v16 }
0x7249   : > { %v8268_v3 = vpop.f32.mrb[16].mxu1 }
0x724a   : > { %v8274_v7 = vpack.c.bf16 %v8268_v3, %v8268_v3  ;;  %v12446_v31 = vpop.f32.mrb[17].mxu1 }
0x724b   : > { %v8271_v33 = vpop.f32.mrb[18].mxu1 }
0x724c   : > { %v12447_v5 = vpop.f32.mrb[19].mxu1  ;;  %12451 = vmatmul.mubr.msk.bf16.vlgmr.msra.gmra.mrb[12].mxu0 %vm1454_vm2, %v8274_v7 }
0x724d   : > { %12463 = vmatpush3.bf16.xpose.msra.mxu0 %v14836_v52  ;;  %12464 = vmatprep.mubr.msk.bf16.mxu0 %vm14020_vm0, %v16579_v16 }
0x724e   : > { %12474 = vmatprep.subr.bf16.mxu0 %v16579_v16 }
0x731f   : > { %v8312_v43 = vpop.f32.mrb[12].mxu0 }
0x7320   : > { %v8318_v39 = vadd.f32 %v8312_v43, %v8163_v27  ;;  %v12452_v50 = vpop.f32.mrb[13].mxu0 }
0x7321   : > { %v8315_v55 = vpop.f32.mrb[14].mxu0 }
0x7322   : > { %v8319_v8 = vadd.f32 %v15746_v56, %v8318_v39  ;;  %v12453_v54 = vpop.f32.mrb[15].mxu0 }
0x7324   : > { %v8320_v30 = vadd.f32 %v8319_v8, %v15891_v22 }
0x7326   : > { %v8321_v57 = vsel %vm1314_vm1, %v8320_v30, 0.0 }
0x7327   : > { %8322 = vadd.xlane.f32.xlu1 %v8321_v57 }
0x73b4   : > { %v8323_v37 = vpop.xlane.xlu1 %8322 }
0x73b5   : > { %v8324_v17 = vmul.f32 0.03125, %v8323_v37 }
0x73b7   : > { %v8325_v42 = vsub.f32 %v8320_v30, %v8324_v17 }
0x73b9   : > { %v8326_v28 = vmul.f32 %v8325_v42, %v8325_v42 }
0x73bb   : > { %v8327_v63 = vsel %vm1314_vm1, %v8326_v28, 0.0 }
0x73bc   : > { %8328 = vadd.xlane.f32.xlu1 %v8327_v63 }
0x7449   : > { %v8329_v18 = vpop.xlane.xlu1 %8328 }
0x744a   : > { %v8330_v60 = vmul.f32 0.03125, %v8329_v18 }
0x744c   : > { %v8331_v27 = vadd.f32 1e-05, %v8330_v60 }
0x744e   : > { %13187 = vrsqrt.f32 %v8331_v27 }
0x7458   : > { %v13188_v24 = vpop.eup %13187 }
0x7459   : > { %v8333_v21 = vmul.f32 %v13188_v24, %v8325_v42 }
0x745b   : > { %v8334_v56 = vmul.f32 %v15753_v53, %v8333_v21 }
0x745d   : > { %v16025_v22 = vadd.f32 %v15756_v15, %v8334_v56 }
0x745f   : > { %v8336_v25 = vpack.c.bf16 %v16025_v22, %v16025_v22 }
0x7461   : > { %12459 = vmatmul.mubr.msk.bf16.vlgmr.msra.gmra.mrb[20].mxu1 %vm1314_vm1, %v8336_v25 }
0x7462   : > { %12469 = vmatpush3.bf16.msra.mxu1 %v14873_v46  ;;  %12470 = vmatprep.mubr.msk.bf16.mxu1 %vm14020_vm0, %v16579_v16 }
0x7463   : > { %12480 = vmatprep.subr.bf16.mxu1 %v16579_v16 }
0x7534   : > { %v8374_v41 = vpop.f32.mrb[20].mxu1 }
0x7535   : > { %v8375_v51 = vadd.f32 %v15768_v44, %v8374_v41  ;;  %v12460_v48 = vpop.f32.mrb[21].mxu1 }
0x7536   : > { %v8377_v53 = vpop.f32.mrb[22].mxu1 }
0x7537   : > { %v8380_v1 = vmul.f32 0.35355338, %v8375_v51  ;;  %v12461_v15 = vpop.f32.mrb[23].mxu1 }
0x7539   : > { %v16035_v3 = vpack.c.bf16 %v8380_v1, %v8380_v1 }
0x753b   : > { %8482 = vrot.lane.b32.xlu1 %v16035_v3, %s14021_s12  ;;  %12465 = vmatmul.mubr.msk.bf16.vlgmr.msra.gmra.mrb[16].mxu0 %vm1454_vm2, %v16035_v3 }
0x753c   : > { %12475 = vmatpush3.bf16.xpose.msra.mxu0 %v14843_v62  ;;  %12476 = vmatprep.mubr.msk.bf16.mxu0 %vm14020_vm0, %v16579_v16 }
0x753d   : > { %12486 = vmatprep.subr.bf16.mxu0 %v16579_v16 }
0x75ad   : > { %v8483_v44 = vpop.permute.xlu1 %8482 }
0x75ae   : > { %12477 = vmatmul.mubr.msk.bf16.vlgmr.msra.gmra.mrb[20].mxu0 %vm1454_vm2, %v8483_v44 }
0x75af   : > { %12487 = vmatpush3.bf16.msra.mxu0 %v14888_v59  ;;  %12488 = vmatprep.mubr.msk.bf16.mxu0 %vm14020_vm0, %v16579_v16 }
0x75b0   : > { %12498 = vmatprep.subr.bf16.mxu0 %v16579_v16 }
0x760e   : > { %v8419_v7 = vpop.f32.mrb[16].mxu0 }
0x760f   : > { %v8420_v31 = vadd.f32 %v15839_v23, %v8419_v7  ;;  %v12466_v33 = vpop.f32.mrb[17].mxu0 }
0x7610   : > { %v8422_v5 = vpop.f32.mrb[18].mxu0 }
0x7611   : > { %v12467_v43 = vpop.f32.mrb[19].mxu0  ;;  %v8425_v39 = vsel %vm1454_vm2, %v8420_v31, -inf }
0x7612   : > { %8426 = vmax.xlane.f32.xlu0 %v8425_v39 }
0x7681   : > { %v8521_v50 = vpop.f32.mrb[20].mxu0 }
0x7682   : > { %v8522_v55 = vadd.f32 %v15839_v23, %v8521_v50  ;;  %v12478_v8 = vpop.f32.mrb[21].mxu0 }
0x7683   : > { %v8524_v54 = vpop.f32.mrb[22].mxu0 }
0x7684   : > { %v12479_v30 = vpop.f32.mrb[23].mxu0  ;;  %v8527_v57 = vsel %vm1454_vm2, %v8522_v55, -inf  ;;  %v16581_v54 = vld [vmem:[#allocation73_spill] sm:$0xff] }
0x7685   : > { %8528 = vmax.xlane.f32.xlu1 %v8527_v57  ;;  %v16582_v57 = vld [vmem:[#allocation74_spill] sm:$0xff] }
0x769f   : > { %v8427_v37 = vpop.xlane.xlu0 %8426 }
0x76a0   : > { %v8428_v17 = vsub.f32 %v8420_v31, %v8427_v37 }
0x76a2   : > { %v8429_v42 = vmul.f32 1.442695, %v8428_v17 }
0x76a4   : > { %13189 = vpow2.f32 %v8429_v42 }
0x76ae   : > { %v13190_v28 = vpop.eup %13189 }
0x76af   : > { %v8431_v63 = vsel %vm1454_vm2, %v13190_v28, 0.0 }
0x76b0   : > { %8432 = vadd.xlane.f32.xlu0 %v8431_v63 }
0x7712   : > { %v8529_v18 = vpop.xlane.xlu1 %8528 }
0x7713   : > { %v8530_v60 = vsub.f32 %v8522_v55, %v8529_v18 }
0x7715   : > { %v8531_v27 = vmul.f32 1.442695, %v8530_v60 }
0x7717   : > { %13191 = vpow2.f32 %v8531_v27 }
0x7721   : > { %v13192_v24 = vpop.eup %13191 }
0x7722   : > { %v8533_v21 = vsel %vm1454_vm2, %v13192_v24, 0.0 }
0x7723   : > { %8534 = vadd.xlane.f32.xlu0 %v8533_v21 }
0x7739   : > { %8669 = vrot.lane.b32.xlu0 %v16035_v3, %s14022_s20 }
0x773d   : > { %v8433_v56 = vpop.xlane.xlu0 %8432 }
0x773e   : > { %13193 = vrcp.f32 %v8433_v56 }
0x7748   : > { %v13194_v25 = vpop.eup %13193 }
0x7749   : > { %v8435_v41 = vmul.f32 %v13194_v25, %v13190_v28 }
0x774b   : > { %v8436_v51 = vpack.c.bf16 %v8435_v41, %v8435_v41 }
0x774d   : > { %12471 = vmatmul.mubr.msk.bf16.vlgmr.msra.gmra.mrb[24].mxu1 %vm1454_vm2, %v8436_v51 }
0x774e   : > { %12481 = vmatpush3.bf16.msra.mxu1 %v14893_v2  ;;  %12482 = vmatprep.mubr.msk.bf16.mxu1 %vm14020_vm0, %v16579_v16 }
0x774f   : > { %12492 = vmatprep.subr.bf16.mxu1 %v16579_v16 }
0x77b0   : > { %v8535_v48 = vpop.xlane.xlu0 %8534 }
0x77b1   : > { %13195 = vrcp.f32 %v8535_v48 }
0x77b4   : > { %v8670_v30 = vpop.permute.xlu0 %8669 }
0x77bb   : > { %v13196_v53 = vpop.eup %13195 }
0x77bc   : > { %v8537_v1 = vmul.f32 %v13196_v53, %v13192_v24 }
0x77be   : > { %v8538_v15 = vpack.c.bf16 %v8537_v1, %v8537_v1 }
0x77c0   : > { %12483 = vmatmul.mubr.msk.bf16.vlgmr.msra.gmra.mrb[28].mxu1 %vm1454_vm2, %v8538_v15 }
0x77c1   : > { %12493 = vmatpush3.bf16.msra.mxu1 %v14898_v13  ;;  %12494 = vmatprep.mubr.msk.bf16.mxu1 %vm14020_vm0, %v16579_v16 }
0x77c2   : > { %12504 = vmatprep.subr.bf16.mxu1 %v16579_v16 }
0x7820   : > { %v8474_v44 = vpop.f32.mrb[24].mxu1 }
0x7821   : > { %v8480_v7 = vpack.c.bf16 %v8474_v44, %v8474_v44  ;;  %v12472_v31 = vpop.f32.mrb[25].mxu1 }
0x7822   : > { %v8477_v33 = vpop.f32.mrb[26].mxu1 }
0x7823   : > { %v12473_v5 = vpop.f32.mrb[27].mxu1  ;;  %12495 = vmatmul.mubr.msk.bf16.vlgmr.msra.gmra.mrb[32].mxu1 %vm1454_vm2, %v8480_v7 }
0x7824   : > { %12505 = vmatpush3.bf16.msra.mxu1 %v14930_v58  ;;  %12506 = vmatprep.mubr.msk.bf16.mxu1 %vm14020_vm0, %v16579_v16 }
0x7825   : > { %12516 = vmatprep.subr.bf16.mxu1 %v16579_v16 }
0x7893   : > { %v8576_v43 = vpop.f32.mrb[28].mxu1 }
0x7894   : > { %v8582_v39 = vpack.c.bf16 %v8576_v43, %v8576_v43  ;;  %v12484_v50 = vpop.f32.mrb[29].mxu1 }
0x7895   : > { %v8579_v55 = vpop.f32.mrb[30].mxu1 }
0x7896   : > { %v12485_v8 = vpop.f32.mrb[31].mxu1  ;;  %12489 = vmatmul.mubr.msk.bf16.vlgmr.msra.gmra.mrb[24].mxu0 %vm1454_vm2, %v8582_v39 }
0x7897   : > { %12499 = vmatpush3.bf16.xpose.msra.mxu0 %v16581_v54  ;;  %12500 = vmatprep.mubr.msk.bf16.mxu0 %vm14020_vm0, %v16579_v16 }
0x7898   : > { %12510 = vmatprep.subr.bf16.mxu0 %v16579_v16 }
0x789e   : > { %12501 = vmatmul.mubr.msk.bf16.vlgmr.msra.gmra.mrb[28].mxu0 %vm1454_vm2, %v8670_v30 }
0x789f   : > { %12511 = vmatpush3.bf16.msra.mxu0 %v16582_v57  ;;  %12512 = vmatprep.mubr.msk.bf16.mxu0 %vm14020_vm0, %v16579_v16 }
0x78a0   : > { %12522 = vmatprep.subr.bf16.mxu0 %v16579_v16 }
0x78f6   : > { %v8663_v37 = vpop.f32.mrb[32].mxu1 }
0x78f7   : > { %v12496_v17 = vpop.f32.mrb[33].mxu1 }
0x78f8   : > { %v8666_v42 = vpop.f32.mrb[34].mxu1 }
0x78f9   : > { %v12497_v28 = vpop.f32.mrb[35].mxu1 }
0x7969   : > { %v8620_v63 = vpop.f32.mrb[24].mxu0 }
0x796a   : > { %v8664_v18 = vadd.f32 %v8663_v37, %v8620_v63  ;;  %v12490_v60 = vpop.f32.mrb[25].mxu0 }
0x796b   : > { %v8623_v27 = vpop.f32.mrb[26].mxu0 }
0x796c   : > { %v12491_v24 = vpop.f32.mrb[27].mxu0 }
0x7971   : > { %v8708_v21 = vpop.f32.mrb[28].mxu0 }
0x7972   : > { %v8709_v56 = vadd.f32 %v15839_v23, %v8708_v21  ;;  %v12502_v25 = vpop.f32.mrb[29].mxu0 }
0x7973   : > { %v8711_v41 = vpop.f32.mrb[30].mxu0 }
0x7974   : > { %v12503_v51 = vpop.f32.mrb[31].mxu0  ;;  %v8714_v48 = vsel %vm1454_vm2, %v8709_v56, -inf }
0x7975   : > { %8715 = vmax.xlane.f32.xlu1 %v8714_v48 }
0x7a02   : > { %v8716_v53 = vpop.xlane.xlu1 %8715 }
0x7a03   : > { %v8717_v1 = vsub.f32 %v8709_v56, %v8716_v53 }
0x7a05   : > { %v8718_v15 = vmul.f32 1.442695, %v8717_v1 }
0x7a07   : > { %13197 = vpow2.f32 %v8718_v15 }
0x7a11   : > { %v13198_v44 = vpop.eup %13197 }
0x7a12   : > { %v8720_v7 = vsel %vm1454_vm2, %v13198_v44, 0.0 }
0x7a13   : > { %8721 = vadd.xlane.f32.xlu1 %v8720_v7 }
0x7a24   : > { %8814 = vrot.lane.b32.xlu1 %v16035_v3, %s14023_s10 }
0x7aa0   : > { %v8722_v31 = vpop.xlane.xlu1 %8721 }
0x7aa1   : > { %13199 = vrcp.f32 %v8722_v31 }
0x7aa4   : > { %v8815_v39 = vpop.permute.xlu1 %8814 }
0x7aab   : > { %v13200_v33 = vpop.eup %13199 }
0x7aac   : > { %v8724_v5 = vmul.f32 %v13200_v33, %v13198_v44 }
0x7aae   : > { %v8725_v43 = vpack.c.bf16 %v8724_v5, %v8724_v5 }
0x7ab0   : > { %12507 = vmatmul.mubr.msk.bf16.vlgmr.msra.gmra.mrb[36].mxu1 %vm1454_vm2, %v8725_v43 }
0x7ab1   : > { %12517 = vmatpush3.bf16.xpose.msra.mxu1 %v14936_v9  ;;  %12518 = vmatprep.mubr.msk.bf16.mxu1 %vm14020_vm0, %v16579_v16 }
0x7ab2   : > { %12528 = vmatprep.subr.bf16.mxu1 %v16579_v16 }
0x7ab8   : > { %12519 = vmatmul.mubr.msk.bf16.vlgmr.msra.gmra.mrb[40].mxu1 %vm1454_vm2, %v8815_v39 }
0x7ab9   : > { %12529 = vmatpush3.bf16.msra.mxu1 %v14960_v12  ;;  %12530 = vmatprep.mubr.msk.bf16.mxu1 %vm14020_vm0, %v16579_v16 }
0x7aba   : > { %12542 = vmatprep.subr.bf16.mxu1 %v16579_v16 }
0x7b83   : > { %v8763_v3 = vpop.f32.mrb[36].mxu1 }
0x7b84   : > { %v8769_v50 = vpack.c.bf16 %v8763_v3, %v8763_v3  ;;  %v12508_v55 = vpop.f32.mrb[37].mxu1 }
0x7b85   : > { %v8766_v8 = vpop.f32.mrb[38].mxu1 }
0x7b86   : > { %v12509_v30 = vpop.f32.mrb[39].mxu1  ;;  %12513 = vmatmul.mubr.msk.bf16.vlgmr.msra.gmra.mrb[32].mxu0 %vm1454_vm2, %v8769_v50 }
0x7b87   : > { %12523 = vmatpush3.bf16.msra.mxu0 %v14966_v45  ;;  %12524 = vmatprep.mubr.msk.bf16.mxu0 %vm14020_vm0, %v16579_v16 }
0x7b88   : > { %12534 = vmatprep.subr.bf16.mxu0 %v16579_v16 }
0x7b8b   : > { %v8853_v37 = vpop.f32.mrb[40].mxu1 }
0x7b8c   : > { %v8854_v17 = vadd.f32 %v15839_v23, %v8853_v37  ;;  %v12520_v42 = vpop.f32.mrb[41].mxu1 }
0x7b8d   : > { %v8856_v28 = vpop.f32.mrb[42].mxu1 }
0x7b8e   : > { %v12521_v63 = vpop.f32.mrb[43].mxu1  ;;  %v8859_v60 = vsel %vm1454_vm2, %v8854_v17, -inf }
0x7b8f   : > { %8860 = vmax.xlane.f32.xlu0 %v8859_v60 }
0x7c1c   : > { %v8861_v27 = vpop.xlane.xlu0 %8860 }
0x7c1d   : > { %v8862_v24 = vsub.f32 %v8854_v17, %v8861_v27 }
0x7c1f   : > { %v8863_v21 = vmul.f32 1.442695, %v8862_v24 }
0x7c21   : > { %13201 = vpow2.f32 %v8863_v21 }
0x7c2b   : > { %v13202_v56 = vpop.eup %13201 }
0x7c2c   : > { %v8865_v25 = vsel %vm1454_vm2, %v13202_v56, 0.0 }
0x7c2d   : > { %8866 = vadd.xlane.f32.xlu1 %v8865_v25 }
0x7c59   : > { %v8807_v41 = vpop.f32.mrb[32].mxu0 }
0x7c5a   : > { %v8813_v51 = vadd.f32 %v8807_v41, %v8664_v18  ;;  %v12514_v48 = vpop.f32.mrb[33].mxu0  ;;  %v16128_v41 = vld [vmem:[#allocation28] ss:$0 sm:$0xff] }
0x7c5b   : > { %v8810_v53 = vpop.f32.mrb[34].mxu0 }
0x7c5c   : > { %v12515_v1 = vpop.f32.mrb[35].mxu0 }
0x7cba   : > { %v8867_v23 = vpop.xlane.xlu1 %8866 }
0x7cbb   : > { %13203 = vrcp.f32 %v8867_v23  ;;  %v16142_v23 = vld [vmem:[%s14168_s19] ss:$0 sm:$0xff] }
0x7cc5   : > { %v13204_v15 = vpop.eup %13203 }
0x7cc6   : > { %v8869_v44 = vmul.f32 %v13204_v15, %v13202_v56 }
0x7cc8   : > { %v8870_v7 = vpack.c.bf16 %v8869_v44, %v8869_v44 }
0x7cca   : > { %12525 = vmatmul.mubr.msk.bf16.vlgmr.msra.gmra.mrb[36].mxu0 %vm1454_vm2, %v8870_v7 }
0x7ccb   : > { %12535 = vmatpush3.bf16.msra.mxu0 %v14982_v35  ;;  %12538 = vmatprep.mubr.msk.bf16.mxu0 %vm14020_vm0, %v16579_v16 }
0x7ccc   : > { %12536 = vmatprep.subr.bf16.mxu0 %v16579_v16 }
0x7ccf   : > { %12537 = vmatpush3.bf16.msra.mxu0 %v14988_v38 }
0x7cd0   : > { %12554 = vmatprep.subr.bf16.mxu0 %v16579_v16 }
0x7d9d   : > { %v8908_v18 = vpop.f32.mrb[36].mxu0 }
0x7d9e   : > { %v8914_v31 = vpack.c.bf16 %v8908_v18, %v8908_v18  ;;  %v12526_v33 = vpop.f32.mrb[37].mxu0 }
0x7d9f   : > { %v8911_v5 = vpop.f32.mrb[38].mxu0  ;;  %v16153_v33 = vld [vmem:[%s16578_s14] ss:$0 sm:$0xff] }
0x7da0   : > { %v12527_v43 = vpop.f32.mrb[39].mxu0  ;;  %12531 = vmatmul.mubr.msk.bf16.vlgmr.msra.gmra.mrb[44].mxu1 %vm1454_vm2, %v8914_v31 }
0x7da1   : > { %12543 = vmatpush3.bf16.msra.mxu1 %v14995_v47  ;;  %12550 = vmatprep.mubr.msk.bf16.mxu1 %vm14020_vm0, %v16579_v16 }
0x7da2   : > { %12544 = vmatprep.subr.bf16.mxu1 %v16579_v16 }
0x7da5   : > { %12545 = vmatpush3.bf16.msra.mxu1 %v14999_v49 }
0x7da6   : > { %12546 = vmatprep.subr.bf16.mxu1 %v16579_v16 }
0x7da9   : > { %12547 = vmatpush3.bf16.msra.mxu1 %v15019_v61 }
0x7daa   : > { %12548 = vmatprep.subr.bf16.mxu1 %v16579_v16 }
0x7dad   : > { %12549 = vmatpush3.bf16.msra.mxu1 %v15025_v10 }
0x7dae   : > { %12570 = vmatprep.subr.bf16.mxu1 %v16579_v16 }
0x7e73   : > { %v8952_v39 = vpop.f32.mrb[44].mxu1 }
0x7e74   : > { %v8958_v3 = vadd.f32 %v8952_v39, %v8813_v51  ;;  %v12532_v50 = vpop.f32.mrb[45].mxu1  ;;  %v16131_v51 = vld [vmem:[#allocation29] ss:$0 sm:$0xff] }
0x7e75   : > { %v8955_v55 = vpop.f32.mrb[46].mxu1 }
0x7e76   : > { %v8959_v8 = vadd.f32 %v15863_v0, %v8958_v3  ;;  %v12533_v30 = vpop.f32.mrb[47].mxu1 }
0x7e78   : > { %v8960_v37 = vadd.f32 %v8959_v8, %v16025_v22 }
0x7e7a   : > { %v8961_v17 = vsel %vm1314_vm1, %v8960_v37, 0.0 }
0x7e7b   : > { %8962 = vadd.xlane.f32.xlu0 %v8961_v17 }
0x7f08   : > { %v8963_v42 = vpop.xlane.xlu0 %8962 }
0x7f09   : > { %v8964_v28 = vmul.f32 0.03125, %v8963_v42 }
0x7f0b   : > { %v8965_v63 = vsub.f32 %v8960_v37, %v8964_v28 }
0x7f0d   : > { %v8966_v60 = vmul.f32 %v8965_v63, %v8965_v63 }
0x7f0f   : > { %v8967_v27 = vsel %vm1314_vm1, %v8966_v60, 0.0 }
0x7f10   : > { %8968 = vadd.xlane.f32.xlu0 %v8967_v27  ;;  %v16158_v27 = vld [vmem:[#allocation31] ss:$0 sm:$0xff] }
0x7f9d   : > { %v8969_v24 = vpop.xlane.xlu0 %8968 }
0x7f9e   : > { %v8970_v21 = vmul.f32 0.03125, %v8969_v24 }
0x7fa0   : > { %v8971_v56 = vadd.f32 1e-05, %v8970_v21  ;;  %v16161_v21 = vld [vmem:[#allocation32] ss:$0 sm:$0xff] }
0x7fa2   : > { %13205 = vrsqrt.f32 %v8971_v56 }
0x7fac   : > { %v13206_v25 = vpop.eup %13205 }
0x7fad   : > { %v8973_v0 = vmul.f32 %v13206_v25, %v8965_v63 }
0x7faf   : > { %v8974_v22 = vmul.f32 %v16128_v41, %v8973_v0 }
0x7fb1   : > { %v8975_v48 = vadd.f32 %v16131_v51, %v8974_v22 }
0x7fb3   : > { %v8976_v53 = vpack.c.bf16 %v8975_v48, %v8975_v48 }
0x7fb5   : > { %12539 = vmatmul.mubr.msk.bf16.vlgmr.msra.gmra.mrb[40].mxu0 %vm1314_vm1, %v8976_v53  ;;  %v13282_v53 = vld [vmem:[#allocation13] ss:$0 sm:$0xff] }
0x7fb6   : > { %12555 = vmatpush3.bf16.msra.mxu0 %v14633_v4  ;;  %12558 = vmatprep.mubr.msk.bf16.mxu0 %vm14020_vm0, %v16579_v16 }
0x7fb7   : > { %12556 = vmatprep.subr.bf16.mxu0 %v16579_v16 }
0x7fba   : > { %12557 = vmatpush3.bf16.msra.mxu0 %v14637_v6 }
0x7fbb   : > { %12562 = vmatprep.subr.bf16.mxu0 %v16579_v16 }
0x8088   : > { %v9014_v1 = vpop.f32.mrb[40].mxu0 }
0x8089   : > { %v9015_v15 = vadd.f32 %v16142_v23, %v9014_v1  ;;  %v12540_v44 = vpop.f32.mrb[41].mxu0 }
0x808a   : > { %v9017_v7 = vpop.f32.mrb[42].mxu0 }
0x808b   : > { %v9020_v18 = vmax.f32 %v9015_v15, 0.0  ;;  %v12541_v31 = vpop.f32.mrb[43].mxu0 }
0x808d   : > { %v9021_v4 = vpack.c.bf16 %v9020_v18, %v9020_v18 }
0x808f   : > { %12551 = vmatmul.mubr.msk.bf16.vlgmr.msra.gmra.mrb[48].mxu1 %vm2989_vm4, %v9021_v4 }
0x8090   : > { %12571 = vmatpush3.bf16.msra.mxu1 %v14684_v34  ;;  %12574 = vmatprep.mubr.msk.bf16.mxu1 %vm14020_vm0, %v16579_v16 }
0x8091   : > { %12572 = vmatprep.subr.bf16.mxu1 %v16579_v16 }
0x8094   : > { %12573 = vmatpush3.bf16.msra.mxu1 %v14688_v36 }
0x8095   : > { %12584 = vmatprep.subr.bf16.mxu1 %v16579_v16 }
0x8162   : > { %v9059_v6 = vpop.f32.mrb[48].mxu1 }
0x8163   : > { %v9060_v5 = vadd.f32 %v16153_v33, %v9059_v6  ;;  %v12552_v43 = vpop.f32.mrb[49].mxu1 }
0x8164   : > { %v9062_v39 = vpop.f32.mrb[50].mxu1 }
0x8165   : > { %v9065_v3 = vadd.f32 %v9060_v5, %v8975_v48  ;;  %v12553_v50 = vpop.f32.mrb[51].mxu1 }
0x8167   : > { %v9066_v34 = vsel %vm1314_vm1, %v9065_v3, 0.0 }
0x8168   : > { %9067 = vadd.xlane.f32.xlu0 %v9066_v34 }
0x81f5   : > { %v9068_v55 = vpop.xlane.xlu0 %9067 }
0x81f6   : > { %v9069_v8 = vmul.f32 0.03125, %v9068_v55 }
0x81f8   : > { %v9070_v30 = vsub.f32 %v9065_v3, %v9069_v8  ;;  %v13283_v3 = vld [vmem:[#allocation11] ss:$0 sm:$0xff] }
0x81fa   : > { %v9071_v37 = vmul.f32 %v9070_v30, %v9070_v30 }
0x81fc   : > { %v9072_v36 = vsel %vm1314_vm1, %v9071_v37, 0.0 }
0x81fd   : > { %9073 = vadd.xlane.f32.xlu1 %v9072_v36 }
0x828a   : > { %v9074_v17 = vpop.xlane.xlu1 %9073 }
0x828b   : > { %v9075_v42 = vmul.f32 0.03125, %v9074_v17 }
0x828d   : > { %v9076_v28 = vadd.f32 1e-05, %v9075_v42 }
0x828f   : > { %13207 = vrsqrt.f32 %v9076_v28 }
0x8299   : > { %v13208_v63 = vpop.eup %13207 }
0x829a   : > { %v9078_v60 = vmul.f32 %v13208_v63, %v9070_v30  ;;  %v16208_v63 = vld [vmem:[#allocation7] sm:$0xff] }
0x829c   : > { %v9079_v24 = vmul.f32 %v16158_v27, %v9078_v60 }
0x829e   : > { %v16164_v56 = vadd.f32 %v16161_v21, %v9079_v24 }
0x82a0   : > { %v9081_v25 = vpack.c.bf16 %v16164_v56, %v16164_v56 }
0x82a2   : > { %12559 = vmatmul.mubr.msk.bf16.vlgmr.msra.gmra.mrb[44].mxu0 %vm1314_vm1, %v9081_v25  ;;  %12575 = vmatmul.mubr.msk.bf16.vlgmr.msra.gmra.mrb[52].mxu1 %vm1314_vm1, %v9081_v25 }
0x82a3   : > { %12563 = vmatpush3.bf16.msra.mxu0 %v14649_v11  ;;  %12566 = vmatprep.mubr.msk.bf16.mxu0 %vm14020_vm0, %v16579_v16  ;;  %v13281_v11 = vld [vmem:[#allocation10] ss:$0 sm:$0xff] }
0x82a4   : > { %12564 = vmatprep.subr.bf16.mxu0 %v16579_v16  ;;  %12586 = vmatprep.mubr.msk.bf16.mxu1 %vm14020_vm0, %v16579_v16 }
0x82a7   : > { %12565 = vmatpush3.bf16.msra.mxu0 %v14656_v14 }
0x82a8   : > { %12578 = vmatprep.subr.bf16.mxu0 %v16579_v16 }
0x82aa   : > { %12567 = vmatmul.mubr.msk.bf16.vlgmr.msra.gmra.mrb[48].mxu0 %vm1314_vm1, %v9081_v25 }
0x82ab   : > { %12580 = vmatprep.mubr.msk.bf16.mxu0 %vm14020_vm0, %v16579_v16 }
0x8375   : > { %v9119_v0 = vpop.f32.mrb[44].mxu0  ;;  %v9199_v22 = vpop.f32.mrb[52].mxu1 }
0x8376   : > { %v9120_v48 = vadd.f32 %v13281_v11, %v9119_v0  ;;  %v9200_v1 = vadd.f32 %v13282_v53, %v9199_v22  ;;  %v12560_v15 = vpop.f32.mrb[45].mxu0  ;;  %v12576_v44 = vpop.f32.mrb[53].mxu1 }
0x8377   : > { %v9122_v7 = vpop.f32.mrb[46].mxu0  ;;  %v9202_v18 = vpop.f32.mrb[54].mxu1 }
0x8378   : > { %v9205_v31 = vmul.f32 0.35355338, %v9120_v48  ;;  %v16181_v4 = vpack.c.bf16 %v9200_v1, %v9200_v1  ;;  %v12561_v14 = vpop.f32.mrb[47].mxu0  ;;  %v12577_v6 = vpop.f32.mrb[55].mxu1 }
0x837a   : > { %v16183_v5 = vpack.c.bf16 %v9205_v31, %v9205_v31  ;;  %v9271_v43 = vsel %vm1516_vm3, %v16181_v4, 0 }
0x837b   : > { %12585 = vmatpush3.bf16.msra.mxu1 %v9271_v43 }
0x837c   : > { %9315 = vrot.lane.b32.xlu1 %v16183_v5, %s14021_s12  ;;  %12596 = vmatprep.subr.bf16.mxu1 %v16579_v16 }
0x837d   : > { %v9159_v39 = vpop.f32.mrb[48].mxu0 }
0x837e   : > { %v9160_v50 = vadd.f32 %v13283_v3, %v9159_v39  ;;  %v12568_v34 = vpop.f32.mrb[49].mxu0 }
0x837f   : > { %v9162_v55 = vpop.f32.mrb[50].mxu0 }
0x8380   : > { %v16190_v8 = vpack.c.bf16 %v9160_v50, %v9160_v50  ;;  %v12569_v30 = vpop.f32.mrb[51].mxu0 }
0x8382   : > { %9318 = vrot.lane.b32.xlu0 %v16190_v8, %s14021_s12  ;;  %v9213_v37 = vsel %vm1454_vm2, %v16190_v8, 0 }
0x8383   : > { %12579 = vmatpush3.bf16.xpose.msra.mxu0 %v9213_v37 }
0x8384   : > { %12590 = vmatprep.subr.bf16.mxu0 %v16579_v16 }
0x838a   : > { %12581 = vmatmul.mubr.msk.bf16.vlgmr.msra.gmra.mrb[52].mxu0 %vm1454_vm2, %v16183_v5 }
0x838b   : > { %12592 = vmatprep.mubr.msk.bf16.mxu0 %vm14020_vm0, %v16579_v16 }
0x83ee   : > { %v9316_v42 = vpop.permute.xlu1 %9315 }
0x83f4   : > { %v9319_v36 = vpop.permute.xlu0 %9318 }
0x83f5   : > { %v9324_v17 = vsel %vm1454_vm2, %v9319_v36, 0 }
0x83f6   : > { %12591 = vmatpush3.bf16.xpose.msra.mxu0 %v9324_v17 }
0x83f7   : > { %12602 = vmatprep.subr.bf16.mxu0 %v16579_v16 }
0x83fd   : > { %12593 = vmatmul.mubr.msk.bf16.vlgmr.msra.gmra.mrb[56].mxu0 %vm1454_vm2, %v9316_v42 }
0x83fe   : > { %12603 = vmatpush3.bf16.msra.mxu0 %v14727_v19  ;;  %12604 = vmatprep.mubr.msk.bf16.mxu0 %vm14020_vm0, %v16579_v16 }
0x83ff   : > { %12614 = vmatprep.subr.bf16.mxu0 %v16579_v16 }
0x845d   : > { %v9249_v28 = vpop.f32.mrb[52].mxu0 }
0x845e   : > { %v9250_v60 = vadd.f32 %v16208_v63, %v9249_v28  ;;  %v12582_v24 = vpop.f32.mrb[53].mxu0 }
0x845f   : > { %v9252_v25 = vpop.f32.mrb[54].mxu0 }
0x8460   : > { %v12583_v0 = vpop.f32.mrb[55].mxu0  ;;  %v9255_v22 = vsel %vm1454_vm2, %v9250_v60, -inf }
0x8461   : > { %9256 = vmax.xlane.f32.xlu1 %v9255_v22 }
0x84d0   : > { %v9360_v11 = vpop.f32.mrb[56].mxu0 }
0x84d1   : > { %v9361_v48 = vadd.f32 %v16208_v63, %v9360_v11  ;;  %v12594_v19 = vpop.f32.mrb[57].mxu0 }
0x84d2   : > { %v9363_v53 = vpop.f32.mrb[58].mxu0 }
0x84d3   : > { %v12595_v1 = vpop.f32.mrb[59].mxu0  ;;  %v9366_v15 = vsel %vm1454_vm2, %v9361_v48, -inf }
0x84d4   : > { %9367 = vmax.xlane.f32.xlu0 %v9366_v15 }
0x84ee   : > { %v9257_v44 = vpop.xlane.xlu1 %9256 }
0x84ef   : > { %v9258_v7 = vsub.f32 %v9250_v60, %v9257_v44 }
0x84f1   : > { %v9259_v18 = vmul.f32 1.442695, %v9258_v7 }
0x84f3   : > { %13209 = vpow2.f32 %v9259_v18 }
0x84fd   : > { %v13210_v31 = vpop.eup %13209 }
0x84fe   : > { %v9261_v14 = vsel %vm1454_vm2, %v13210_v31, 0.0 }
0x84ff   : > { %9262 = vadd.xlane.f32.xlu0 %v9261_v14 }
0x8515   : > { %9379 = vrot.lane.b32.xlu0 %v16181_v4, %s14021_s12 }
0x8561   : > { %v9368_v6 = vpop.xlane.xlu0 %9367 }
0x8562   : > { %v9369_v43 = vsub.f32 %v9361_v48, %v9368_v6 }
0x8564   : > { %v9370_v39 = vmul.f32 1.442695, %v9369_v43 }
0x8566   : > { %13211 = vpow2.f32 %v9370_v39 }
0x8570   : > { %v13212_v3 = vpop.eup %13211 }
0x8571   : > { %v9372_v50 = vsel %vm1454_vm2, %v13212_v3, 0.0 }
0x8572   : > { %9373 = vadd.xlane.f32.xlu1 %v9372_v50 }
0x8583   : > { %9516 = vrot.lane.b32.xlu1 %v16190_v8, %s14022_s20 }
0x8587   : > { %9514 = vrot.lane.b32.xlu1 %v16183_v5, %s14022_s20 }
0x858c   : > { %v9263_v34 = vpop.xlane.xlu0 %9262 }
0x858d   : > { %13213 = vrcp.f32 %v9263_v34 }
0x8590   : > { %v9380_v37 = vpop.permute.xlu0 %9379 }
0x8591   : > { %v9385_v17 = vsel %vm1516_vm3, %v9380_v37, 0 }
0x8597   : > { %v13214_v55 = vpop.eup %13213 }
0x8598   : > { %v9265_v30 = vmul.f32 %v13214_v55, %v13210_v31 }
0x859a   : > { %v9266_v36 = vpack.c.bf16 %v9265_v30, %v9265_v30 }
0x859c   : > { %12587 = vmatmul.mubr.msk.bf16.vlgmr.msra.gmra.mrb[56].mxu1 %vm1454_vm2, %v9266_v36 }
0x859d   : > { %12597 = vmatpush3.bf16.msra.mxu1 %v9385_v17  ;;  %12598 = vmatprep.mubr.msk.bf16.mxu1 %vm14020_vm0, %v16579_v16 }
0x859e   : > { %12608 = vmatprep.subr.bf16.mxu1 %v16579_v16 }
0x85ff   : > { %v9374_v42 = vpop.xlane.xlu1 %9373 }
0x8600   : > { %13215 = vrcp.f32 %v9374_v42 }
0x8603   : > { %v9517_v19 = vpop.permute.xlu1 %9516 }
0x8604   : > { %v9522_v44 = vsel %vm1454_vm2, %v9517_v19, 0 }
0x8607   : > { %v9515_v18 = vpop.permute.xlu1 %9514 }
0x860a   : > { %v13216_v28 = vpop.eup %13215 }
0x860b   : > { %v9376_v60 = vmul.f32 %v13216_v28, %v13212_v3 }
0x860d   : > { %v9377_v24 = vpack.c.bf16 %v9376_v60, %v9376_v60 }
0x860f   : > { %12599 = vmatmul.mubr.msk.bf16.vlgmr.msra.gmra.mrb[60].mxu1 %vm1454_vm2, %v9377_v24 }
0x8610   : > { %12609 = vmatpush3.bf16.msra.mxu1 %v14735_v29  ;;  %12610 = vmatprep.mubr.msk.bf16.mxu1 %vm14020_vm0, %v16579_v16 }
0x8611   : > { %12620 = vmatprep.subr.bf16.mxu1 %v16579_v16 }
0x866f   : > { %v9307_v25 = vpop.f32.mrb[56].mxu1 }
0x8670   : > { %v9313_v0 = vpack.c.bf16 %v9307_v25, %v9307_v25  ;;  %v12588_v22 = vpop.f32.mrb[57].mxu1 }
0x8671   : > { %v9310_v11 = vpop.f32.mrb[58].mxu1 }
0x8672   : > { %v12589_v48 = vpop.f32.mrb[59].mxu1  ;;  %12611 = vmatmul.mubr.msk.bf16.vlgmr.msra.gmra.mrb[64].mxu1 %vm1454_vm2, %v9313_v0 }
0x8673   : > { %12622 = vmatprep.mubr.msk.bf16.mxu1 %vm14020_vm0, %v16579_v16 }
0x86e2   : > { %v9421_v53 = vpop.f32.mrb[60].mxu1 }
0x86e3   : > { %v9427_v1 = vpack.c.bf16 %v9421_v53, %v9421_v53  ;;  %v12600_v15 = vpop.f32.mrb[61].mxu1 }
0x86e4   : > { %v9424_v29 = vpop.f32.mrb[62].mxu1 }
0x86e5   : > { %v12601_v7 = vpop.f32.mrb[63].mxu1  ;;  %12605 = vmatmul.mubr.msk.bf16.vlgmr.msra.gmra.mrb[60].mxu0 %vm1454_vm2, %v9427_v1 }
0x86e6   : > { %12615 = vmatpush3.bf16.xpose.msra.mxu0 %v9522_v44  ;;  %12616 = vmatprep.mubr.msk.bf16.mxu0 %vm14020_vm0, %v16579_v16 }
0x86e7   : > { %12626 = vmatprep.subr.bf16.mxu0 %v16579_v16 }
0x86ed   : > { %12617 = vmatmul.mubr.msk.bf16.vlgmr.msra.gmra.mrb[64].mxu0 %vm1454_vm2, %v9515_v18 }
0x86ee   : > { %12627 = vmatpush3.bf16.msra.mxu0 %v14774_v20  ;;  %12628 = vmatprep.mubr.msk.bf16.mxu0 %vm14020_vm0, %v16579_v16 }
0x86ef   : > { %12638 = vmatprep.subr.bf16.mxu0 %v16579_v16 }
0x8745   : > { %v9508_v31 = vpop.f32.mrb[64].mxu1 }
0x8746   : > { %v12612_v14 = vpop.f32.mrb[65].mxu1 }
0x8747   : > { %v9511_v6 = vpop.f32.mrb[66].mxu1 }
0x8748   : > { %v12613_v43 = vpop.f32.mrb[67].mxu1 }
0x87b8   : > { %v9465_v39 = vpop.f32.mrb[60].mxu0 }
0x87b9   : > { %v16245_v3 = vadd.f32 %v9508_v31, %v9465_v39  ;;  %v12606_v50 = vpop.f32.mrb[61].mxu0 }
0x87ba   : > { %v9468_v34 = vpop.f32.mrb[62].mxu0 }
0x87bb   : > { %v12607_v55 = vpop.f32.mrb[63].mxu0 }
0x87c0   : > { %v9558_v30 = vpop.f32.mrb[64].mxu0 }
0x87c1   : > { %v9559_v37 = vadd.f32 %v16208_v63, %v9558_v30  ;;  %v12618_v36 = vpop.f32.mrb[65].mxu0 }
0x87c2   : > { %v9561_v20 = vpop.f32.mrb[66].mxu0 }
0x87c3   : > { %v12619_v17 = vpop.f32.mrb[67].mxu0  ;;  %v9564_v42 = vsel %vm1454_vm2, %v9559_v37, -inf }
0x87c4   : > { %9565 = vmax.xlane.f32.xlu0 %v9564_v42 }
0x87da   : > { %9576 = vrot.lane.b32.xlu0 %v16181_v4, %s14022_s20 }
0x87de   : > { %9669 = vrot.lane.b32.xlu0 %v16183_v5, %s14023_s10 }
0x8851   : > { %v9566_v28 = vpop.xlane.xlu0 %9565 }
0x8852   : > { %v9567_v60 = vsub.f32 %v9559_v37, %v9566_v28 }
0x8854   : > { %v9568_v24 = vmul.f32 1.442695, %v9567_v60 }
0x8855   : > { %v9577_v25 = vpop.permute.xlu0 %9576 }
0x8856   : > { %13217 = vpow2.f32 %v9568_v24  ;;  %v9582_v0 = vsel %vm1516_vm3, %v9577_v25, 0 }
0x8857   : > { %12621 = vmatpush3.bf16.msra.mxu1 %v9582_v0 }
0x8858   : > { %12632 = vmatprep.subr.bf16.mxu1 %v16579_v16 }
0x8859   : > { %v9670_v29 = vpop.permute.xlu0 %9669 }
0x8860   : > { %v13218_v22 = vpop.eup %13217 }
0x8861   : > { %v9570_v11 = vsel %vm1454_vm2, %v13218_v22, 0.0 }
0x8862   : > { %9571 = vadd.xlane.f32.xlu1 %v9570_v11 }
0x8873   : > { %9671 = vrot.lane.b32.xlu1 %v16190_v8, %s14023_s10 }
0x88ef   : > { %v9572_v48 = vpop.xlane.xlu1 %9571 }
0x88f0   : > { %13219 = vrcp.f32 %v9572_v48 }
0x88f3   : > { %v9672_v53 = vpop.permute.xlu1 %9671 }
0x88f4   : > { %v9677_v15 = vsel %vm1454_vm2, %v9672_v53, 0 }
0x88fa   : > { %v13220_v5 = vpop.eup %13219 }
0x88fb   : > { %v9574_v19 = vmul.f32 %v13220_v5, %v13218_v22 }
0x88fd   : > { %v9575_v1 = vpack.c.bf16 %v9574_v19, %v9574_v19 }
0x88ff   : > { %12623 = vmatmul.mubr.msk.bf16.vlgmr.msra.gmra.mrb[68].mxu1 %vm1454_vm2, %v9575_v1 }
0x8900   : > { %12633 = vmatpush3.bf16.xpose.msra.mxu1 %v9677_v15  ;;  %12634 = vmatprep.mubr.msk.bf16.mxu1 %vm14020_vm0, %v16579_v16  ;;  %v13285_v15 = vld [vmem:[#allocation14] ss:$0 sm:$0xff] }
0x8901   : > { %12644 = vmatprep.subr.bf16.mxu1 %v16579_v16 }
0x8907   : > { %12635 = vmatmul.mubr.msk.bf16.vlgmr.msra.gmra.mrb[72].mxu1 %vm1454_vm2, %v9670_v29 }
0x8908   : > { %12645 = vmatpush3.bf16.msra.mxu1 %v14788_v40  ;;  %12646 = vmatprep.mubr.msk.bf16.mxu1 %vm14020_vm0, %v16579_v16 }
0x8909   : > { %12658 = vmatprep.subr.bf16.mxu1 %v16579_v16 }
0x89d2   : > { %v9618_v8 = vpop.f32.mrb[68].mxu1 }
0x89d3   : > { %v9624_v44 = vpack.c.bf16 %v9618_v8, %v9618_v8  ;;  %v12624_v7 = vpop.f32.mrb[69].mxu1 }
0x89d4   : > { %v9621_v18 = vpop.f32.mrb[70].mxu1 }
0x89d5   : > { %v12625_v31 = vpop.f32.mrb[71].mxu1  ;;  %12629 = vmatmul.mubr.msk.bf16.vlgmr.msra.gmra.mrb[68].mxu0 %vm1454_vm2, %v9624_v44 }
0x89d6   : > { %12640 = vmatprep.mubr.msk.bf16.mxu0 %vm14020_vm0, %v16579_v16 }
0x89da   : > { %v9713_v14 = vpop.f32.mrb[72].mxu1 }
0x89db   : > { %v9714_v6 = vadd.f32 %v16208_v63, %v9713_v14  ;;  %v12636_v43 = vpop.f32.mrb[73].mxu1 }
0x89dc   : > { %v9716_v40 = vpop.f32.mrb[74].mxu1 }
0x89dd   : > { %v12637_v39 = vpop.f32.mrb[75].mxu1  ;;  %v9719_v50 = vsel %vm1454_vm2, %v9714_v6, -inf }
0x89de   : > { %9720 = vmax.xlane.f32.xlu1 %v9719_v50 }
0x8a6b   : > { %v9721_v34 = vpop.xlane.xlu1 %9720 }
0x8a6c   : > { %v9722_v55 = vsub.f32 %v9714_v6, %v9721_v34 }
0x8a6e   : > { %v9723_v30 = vmul.f32 1.442695, %v9722_v55  ;;  %v13286_v55 = vld [vmem:[%s16573_s5] ss:$0 sm:$0xff] }
0x8a70   : > { %13221 = vpow2.f32 %v9723_v30 }
0x8a7a   : > { %v13222_v37 = vpop.eup %13221 }
0x8a7b   : > { %v9725_v36 = vsel %vm1454_vm2, %v13222_v37, 0.0 }
0x8a7c   : > { %9726 = vadd.xlane.f32.xlu0 %v9725_v36 }
0x8a92   : > { %9731 = vrot.lane.b32.xlu0 %v16181_v4, %s14023_s10 }
0x8aa8   : > { %v9662_v20 = vpop.f32.mrb[68].mxu0 }
0x8aa9   : > { %v9668_v63 = vadd.f32 %v9662_v20, %v16245_v3  ;;  %v12630_v17 = vpop.f32.mrb[69].mxu0 }
0x8aaa   : > { %v9665_v42 = vpop.f32.mrb[70].mxu0 }
0x8aab   : > { %v12631_v28 = vpop.f32.mrb[71].mxu0 }
0x8b09   : > { %v9727_v60 = vpop.xlane.xlu0 %9726 }
0x8b0a   : > { %13223 = vrcp.f32 %v9727_v60 }
0x8b0d   : > { %v9732_v24 = vpop.permute.xlu0 %9731 }
0x8b0e   : > { %v9737_v25 = vsel %vm1516_vm3, %v9732_v24, 0 }
0x8b0f   : > { %12639 = vmatpush3.bf16.msra.mxu0 %v9737_v25 }
0x8b10   : > { %12650 = vmatprep.subr.bf16.mxu0 %v16579_v16 }
0x8b14   : > { %v13224_v0 = vpop.eup %13223 }
0x8b15   : > { %v9729_v22 = vmul.f32 %v13224_v0, %v13222_v37  ;;  %v13287_v37 = vld [vmem:[#allocation26] ss:$0 sm:$0xff] }
0x8b17   : > { %v9730_v11 = vpack.c.bf16 %v9729_v22, %v9729_v22  ;;  %v16319_v22 = vld [vmem:[#allocation8] sm:$0xff] }
0x8b19   : > { %12641 = vmatmul.mubr.msk.bf16.vlgmr.msra.gmra.mrb[72].mxu0 %vm1454_vm2, %v9730_v11 }
0x8b1a   : > { %12651 = vmatpush3.bf16.msra.mxu0 %v14812_v26  ;;  %12654 = vmatprep.mubr.msk.bf16.mxu0 %vm14020_vm0, %v16579_v16 }
0x8b1b   : > { %12652 = vmatprep.subr.bf16.mxu0 %v16579_v16 }
0x8b1e   : > { %12653 = vmatpush3.bf16.msra.mxu0 %v14818_v32 }
0x8b1f   : > { %12664 = vmatprep.subr.bf16.mxu0 %v16579_v16 }
0x8bec   : > { %v9773_v4 = vpop.f32.mrb[72].mxu0 }
0x8bed   : > { %v9779_v3 = vpack.c.bf16 %v9773_v4, %v9773_v4  ;;  %v12642_v48 = vpop.f32.mrb[73].mxu0 }
0x8bee   : > { %v9776_v5 = vpop.f32.mrb[74].mxu0 }
0x8bef   : > { %v12643_v19 = vpop.f32.mrb[75].mxu0  ;;  %12647 = vmatmul.mubr.msk.bf16.vlgmr.msra.gmra.mrb[76].mxu1 %vm1454_vm2, %v9779_v3 }
0x8bf0   : > { %12659 = vmatpush3.bf16.xpose.msra.mxu1 %v14836_v52  ;;  %12660 = vmatprep.mubr.msk.bf16.mxu1 %vm14020_vm0, %v16579_v16 }
0x8bf1   : > { %12670 = vmatprep.subr.bf16.mxu1 %v16579_v16 }
0x8cc2   : > { %v9817_v26 = vpop.f32.mrb[76].mxu1 }
0x8cc3   : > { %v9823_v53 = vadd.f32 %v9817_v26, %v9668_v63  ;;  %v12648_v1 = vpop.f32.mrb[77].mxu1  ;;  %v13288_v63 = vld [vmem:[#allocation17] ss:$0 sm:$0xff] }
0x8cc4   : > { %v9820_v32 = vpop.f32.mrb[78].mxu1 }
0x8cc5   : > { %v9824_v29 = vadd.f32 %v13285_v15, %v9823_v53  ;;  %v12649_v8 = vpop.f32.mrb[79].mxu1 }
0x8cc7   : > { %v9825_v44 = vadd.f32 %v9824_v29, %v16164_v56 }
0x8cc9   : > { %v9826_v7 = vsel %vm1314_vm1, %v9825_v44, 0.0 }
0x8cca   : > { %9827 = vadd.xlane.f32.xlu1 %v9826_v7 }
0x8d57   : > { %v9828_v18 = vpop.xlane.xlu1 %9827 }
0x8d58   : > { %v9829_v52 = vmul.f32 0.03125, %v9828_v18 }
0x8d5a   : > { %v9830_v31 = vsub.f32 %v9825_v44, %v9829_v52 }
0x8d5c   : > { %v9831_v14 = vmul.f32 %v9830_v31, %v9830_v31 }
0x8d5e   : > { %v9832_v6 = vsel %vm1314_vm1, %v9831_v14, 0.0 }
0x8d5f   : > { %9833 = vadd.xlane.f32.xlu1 %v9832_v6 }
0x8dec   : > { %v9834_v43 = vpop.xlane.xlu1 %9833 }
0x8ded   : > { %v9835_v40 = vmul.f32 0.03125, %v9834_v43 }
0x8def   : > { %v9836_v39 = vadd.f32 1e-05, %v9835_v40 }
0x8df1   : > { %13225 = vrsqrt.f32 %v9836_v39 }
0x8dfb   : > { %v13226_v50 = vpop.eup %13225 }
0x8dfc   : > { %v9838_v34 = vmul.f32 %v13226_v50, %v9830_v31 }
0x8dfe   : > { %v9839_v30 = vmul.f32 %v13286_v55, %v9838_v34 }
0x8e00   : > { %v16295_v56 = vadd.f32 %v13287_v37, %v9839_v30 }
0x8e02   : > { %v9841_v36 = vpack.c.bf16 %v16295_v56, %v16295_v56 }
0x8e04   : > { %12655 = vmatmul.mubr.msk.bf16.vlgmr.msra.gmra.mrb[76].mxu0 %vm1314_vm1, %v9841_v36 }
0x8e05   : > { %12665 = vmatpush3.bf16.msra.mxu0 %v14873_v46  ;;  %12666 = vmatprep.mubr.msk.bf16.mxu0 %vm14020_vm0, %v16579_v16 }
0x8e06   : > { %12676 = vmatprep.subr.bf16.mxu0 %v16579_v16 }
0x8ed7   : > { %v9879_v20 = vpop.f32.mrb[76].mxu0 }
0x8ed8   : > { %v9880_v17 = vadd.f32 %v13288_v63, %v9879_v20  ;;  %v12656_v42 = vpop.f32.mrb[77].mxu0 }
0x8ed9   : > { %v9882_v28 = vpop.f32.mrb[78].mxu0 }
0x8eda   : > { %v9885_v60 = vmul.f32 0.35355338, %v9880_v17  ;;  %v12657_v24 = vpop.f32.mrb[79].mxu0 }
0x8edc   : > { %v16304_v25 = vpack.c.bf16 %v9885_v60, %v9885_v60 }
0x8ede   : > { %9987 = vrot.lane.b32.xlu1 %v16304_v25, %s14021_s12  ;;  %12661 = vmatmul.mubr.msk.bf16.vlgmr.msra.gmra.mrb[80].mxu1 %vm1454_vm2, %v16304_v25  ;;  %s11141_s12 = sshll.u32 %s14206_s26, 7  ;;  %s14024_s26 = smov [#allocation34]  }
0x8edf   : > { %12671 = vmatpush3.bf16.xpose.msra.mxu1 %v14843_v62  ;;  %12672 = vmatprep.mubr.msk.bf16.mxu1 %vm14020_vm0, %v16579_v16  ;;  %s16410_s1 = scalar_lea.hbm %s16583_s28, %s11141_s12 }
0x8ee0   : > { %12682 = vmatprep.subr.bf16.mxu1 %v16579_v16 }
0x8f50   : > { %v9988_v46 = vpop.permute.xlu1 %9987 }
0x8f51   : > { %12673 = vmatmul.mubr.msk.bf16.vlgmr.msra.gmra.mrb[84].mxu1 %vm1454_vm2, %v9988_v46 }
0x8f52   : > { %12683 = vmatpush3.bf16.msra.mxu1 %v14888_v59  ;;  %12684 = vmatprep.mubr.msk.bf16.mxu1 %vm14020_vm0, %v16579_v16 }
0x8f53   : > { %12694 = vmatprep.subr.bf16.mxu1 %v16579_v16 }
0x8fb1   : > { %v9924_v0 = vpop.f32.mrb[80].mxu1 }
0x8fb2   : > { %v9925_v62 = vadd.f32 %v16319_v22, %v9924_v0  ;;  %v12662_v11 = vpop.f32.mrb[81].mxu1 }
0x8fb3   : > { %v9927_v4 = vpop.f32.mrb[82].mxu1 }
0x8fb4   : > { %v12663_v3 = vpop.f32.mrb[83].mxu1  ;;  %v9930_v48 = vsel %vm1454_vm2, %v9925_v62, -inf }
0x8fb5   : > { %9931 = vmax.xlane.f32.xlu0 %v9930_v48 }
0x9024   : > { %v10026_v5 = vpop.f32.mrb[84].mxu1 }
0x9025   : > { %v10027_v19 = vadd.f32 %v16319_v22, %v10026_v5  ;;  %v12674_v59 = vpop.f32.mrb[85].mxu1 }
0x9026   : > { %v10029_v26 = vpop.f32.mrb[86].mxu1 }
0x9027   : > { %v12675_v53 = vpop.f32.mrb[87].mxu1  ;;  %v10032_v1 = vsel %vm1454_vm2, %v10027_v19, -inf }
0x9028   : > { %10033 = vmax.xlane.f32.xlu1 %v10032_v1 }
0x9042   : > { %v9932_v32 = vpop.xlane.xlu0 %9931 }
0x9043   : > { %v9933_v15 = vsub.f32 %v9925_v62, %v9932_v32 }
0x9045   : > { %v9934_v29 = vmul.f32 1.442695, %v9933_v15 }
0x9047   : > { %13227 = vpow2.f32 %v9934_v29 }
0x9051   : > { %v13228_v8 = vpop.eup %13227 }
0x9052   : > { %v9936_v44 = vsel %vm1454_vm2, %v13228_v8, 0.0 }
0x9053   : > { %9937 = vadd.xlane.f32.xlu0 %v9936_v44 }
0x90b5   : > { %v10034_v7 = vpop.xlane.xlu1 %10033 }
0x90b6   : > { %v10035_v18 = vsub.f32 %v10027_v19, %v10034_v7 }
0x90b8   : > { %v10036_v52 = vmul.f32 1.442695, %v10035_v18 }
0x90ba   : > { %13229 = vpow2.f32 %v10036_v52 }
0x90c4   : > { %v13230_v31 = vpop.eup %13229 }
0x90c5   : > { %v10038_v14 = vsel %vm1454_vm2, %v13230_v31, 0.0 }
0x90c6   : > { %10039 = vadd.xlane.f32.xlu0 %v10038_v14 }
0x90dc   : > { %10174 = vrot.lane.b32.xlu0 %v16304_v25, %s14022_s20  ;;  %s1215_s20 = scalar_lea.vmem [#allocation34], %s14570_s17  ;;  %s13859_s17 = sshll.u32 %s14024_s26, 4  ;;  %s13860_s17 = int_to_ptr.vmem [resolvable:$false] %s13859_s17 }
0x90dd   : > { %s13861_s7 = scalar_lea.vmem %s13860_s17, 256 }
0x90e0   : > { %v9938_v6 = vpop.xlane.xlu0 %9937 }
0x90e1   : > { %13231 = vrcp.f32 %v9938_v6 }
0x90eb   : > { %v13232_v43 = vpop.eup %13231 }
0x90ec   : > { %v9940_v40 = vmul.f32 %v13232_v43, %v13228_v8 }
0x90ee   : > { %v9941_v39 = vpack.c.bf16 %v9940_v40, %v9940_v40 }
0x90f0   : > { %12667 = vmatmul.mubr.msk.bf16.vlgmr.msra.gmra.mrb[80].mxu0 %vm1454_vm2, %v9941_v39 }
0x90f1   : > { %12677 = vmatpush3.bf16.msra.mxu0 %v14893_v2  ;;  %12678 = vmatprep.mubr.msk.bf16.mxu0 %vm14020_vm0, %v16579_v16 }
0x90f2   : > { %12688 = vmatprep.subr.bf16.mxu0 %v16579_v16 }
0x9153   : > { %v10040_v50 = vpop.xlane.xlu0 %10039 }
0x9154   : > { %13233 = vrcp.f32 %v10040_v50 }
0x915e   : > { %v13234_v34 = vpop.eup %13233 }
0x915f   : > { %v10042_v55 = vmul.f32 %v13234_v34, %v13230_v31 }
0x9161   : > { %v10043_v30 = vpack.c.bf16 %v10042_v55, %v10042_v55 }
0x9163   : > { %12679 = vmatmul.mubr.msk.bf16.vlgmr.msra.gmra.mrb[84].mxu0 %vm1454_vm2, %v10043_v30 }
0x9164   : > { %12689 = vmatpush3.bf16.msra.mxu0 %v14898_v13  ;;  %12690 = vmatprep.mubr.msk.bf16.mxu0 %vm14020_vm0, %v16579_v16 }
0x9165   : > { %12700 = vmatprep.subr.bf16.mxu0 %v16579_v16 }
0x91c3   : > { %v9979_v2 = vpop.f32.mrb[80].mxu0 }
0x91c4   : > { %v9985_v37 = vpack.c.bf16 %v9979_v2, %v9979_v2  ;;  %v12668_v36 = vpop.f32.mrb[81].mxu0 }
0x91c5   : > { %v9982_v20 = vpop.f32.mrb[82].mxu0 }
0x91c6   : > { %v12669_v63 = vpop.f32.mrb[83].mxu0  ;;  %12691 = vmatmul.mubr.msk.bf16.vlgmr.msra.gmra.mrb[88].mxu0 %vm1454_vm2, %v9985_v37 }
0x91c7   : > { %12701 = vmatpush3.bf16.msra.mxu0 %v14930_v58  ;;  %12702 = vmatprep.mubr.msk.bf16.mxu0 %vm14020_vm0, %v16579_v16  ;;  %v10175_v58 = vpop.permute.xlu0 %10174 }
0x91c8   : > { %12712 = vmatprep.subr.bf16.mxu0 %v16579_v16 }
0x9236   : > { %v10081_v13 = vpop.f32.mrb[84].mxu0 }
0x9237   : > { %v10087_v17 = vpack.c.bf16 %v10081_v13, %v10081_v13  ;;  %v12680_v42 = vpop.f32.mrb[85].mxu0 }
0x9238   : > { %v10084_v28 = vpop.f32.mrb[86].mxu0 }
0x9239   : > { %v12681_v60 = vpop.f32.mrb[87].mxu0  ;;  %12685 = vmatmul.mubr.msk.bf16.vlgmr.msra.gmra.mrb[88].mxu1 %vm1454_vm2, %v10087_v17 }
0x923a   : > { %12695 = vmatpush3.bf16.xpose.msra.mxu1 %v16581_v54  ;;  %12696 = vmatprep.mubr.msk.bf16.mxu1 %vm14020_vm0, %v16579_v16 }
0x923b   : > { %12706 = vmatprep.subr.bf16.mxu1 %v16579_v16 }
0x9241   : > { %12697 = vmatmul.mubr.msk.bf16.vlgmr.msra.gmra.mrb[92].mxu1 %vm1454_vm2, %v10175_v58 }
0x9242   : > { %12707 = vmatpush3.bf16.msra.mxu1 %v16582_v57  ;;  %12708 = vmatprep.mubr.msk.bf16.mxu1 %vm14020_vm0, %v16579_v16 }
0x9243   : > { %12718 = vmatprep.subr.bf16.mxu1 %v16579_v16 }
0x9299   : > { %v10168_v24 = vpop.f32.mrb[88].mxu0 }
0x929a   : > { %v12692_v46 = vpop.f32.mrb[89].mxu0 }
0x929b   : > { %v10171_v0 = vpop.f32.mrb[90].mxu0 }
0x929c   : > { %v12693_v62 = vpop.f32.mrb[91].mxu0 }
0x930c   : > { %v10125_v54 = vpop.f32.mrb[88].mxu1 }
0x930d   : > { %v10169_v11 = vadd.f32 %v10168_v24, %v10125_v54  ;;  %v12686_v4 = vpop.f32.mrb[89].mxu1 }
0x930e   : > { %v10128_v3 = vpop.f32.mrb[90].mxu1 }
0x930f   : > { %v12687_v48 = vpop.f32.mrb[91].mxu1 }
0x9314   : > { %v10213_v5 = vpop.f32.mrb[92].mxu1 }
0x9315   : > { %v10214_v19 = vadd.f32 %v16319_v22, %v10213_v5  ;;  %v12698_v59 = vpop.f32.mrb[93].mxu1 }
0x9316   : > { %v10216_v26 = vpop.f32.mrb[94].mxu1 }
0x9317   : > { %v12699_v57 = vpop.f32.mrb[95].mxu1  ;;  %v10219_v53 = vsel %vm1454_vm2, %v10214_v19, -inf }
0x9318   : > { %10220 = vmax.xlane.f32.xlu1 %v10219_v53 }
0x93a5   : > { %v10221_v1 = vpop.xlane.xlu1 %10220 }
0x93a6   : > { %v10222_v32 = vsub.f32 %v10214_v19, %v10221_v1 }
0x93a8   : > { %v10223_v15 = vmul.f32 1.442695, %v10222_v32 }
0x93aa   : > { %13235 = vpow2.f32 %v10223_v15 }
0x93b4   : > { %v13236_v29 = vpop.eup %13235 }
0x93b5   : > { %v10225_v8 = vsel %vm1454_vm2, %v13236_v29, 0.0 }
0x93b6   : > { %10226 = vadd.xlane.f32.xlu1 %v10225_v8 }
0x93c7   : > { %10319 = vrot.lane.b32.xlu1 %v16304_v25, %s14023_s10  ;;  %s10601_s10 = sshll.u32 %s1215_s20, 4  ;;  %s16412_s10 = int_to_ptr.vmem [resolvable:$true] %s10601_s10 }
0x93c8   : > { %s13855_s5 = scalar_lea.vmem %s16412_s10, 128  ;;  %p13862_p6 = scmp.lt.s32.totalorder %s16412_s10, %s13860_s17 }
0x93c9   : > { %p13856_p10 = scmp.ne.s32.totalorder %s16412_s10, %s13855_s5  ;;  %p13863_p9 = scmp.lt.s32.totalorder %s13861_s7, %s13855_s5 }
0x93cb   : > { %p13857_p12 = pnand %p13856_p10, %p16584_p11  ;;  %p13864_p0 = por %p13863_p9, %p13862_p6 }
0x93cd   : > { %p13858_p13 = pneg %p13857_p12 }
0x93cf   : > { %p13865_p8 = pnand %p13864_p0, %p13858_p13 }
0x9443   : > { %v10227_v44 = vpop.xlane.xlu1 %10226 }
0x9444   : > { %13237 = vrcp.f32 %v10227_v44 }
0x9447   : > { %v10320_v31 = vpop.permute.xlu1 %10319 }
0x944e   : > { %v13238_v7 = vpop.eup %13237 }
0x944f   : > { %v10229_v18 = vmul.f32 %v13238_v7, %v13236_v29 }
0x9451   : > { %v10230_v52 = vpack.c.bf16 %v10229_v18, %v10229_v18 }
0x9453   : > { %12703 = vmatmul.mubr.msk.bf16.vlgmr.msra.gmra.mrb[92].mxu0 %vm1454_vm2, %v10230_v52 }
0x9454   : > { %12713 = vmatpush3.bf16.xpose.msra.mxu0 %v14936_v9  ;;  %12714 = vmatprep.mubr.msk.bf16.mxu0 %vm14020_vm0, %v16579_v16 }
0x9455   : > { %12724 = vmatprep.subr.bf16.mxu0 %v16579_v16 }
0x945b   : > { %12715 = vmatmul.mubr.msk.bf16.vlgmr.msra.gmra.mrb[96].mxu0 %vm1454_vm2, %v10320_v31 }
0x945c   : > { %12725 = vmatpush3.bf16.msra.mxu0 %v14960_v12  ;;  %12726 = vmatprep.mubr.msk.bf16.mxu0 %vm14020_vm0, %v16579_v16 }
0x945d   : > { %12738 = vmatprep.subr.bf16.mxu0 %v16579_v16 }
0x9526   : > { %v10268_v25 = vpop.f32.mrb[92].mxu0 }
0x9527   : > { %v10274_v14 = vpack.c.bf16 %v10268_v25, %v10268_v25  ;;  %v12704_v6 = vpop.f32.mrb[93].mxu0 }
0x9528   : > { %v10271_v43 = vpop.f32.mrb[94].mxu0 }
0x9529   : > { %v12705_v9 = vpop.f32.mrb[95].mxu0  ;;  %12709 = vmatmul.mubr.msk.bf16.vlgmr.msra.gmra.mrb[96].mxu1 %vm1454_vm2, %v10274_v14 }
0x952a   : > { %12719 = vmatpush3.bf16.msra.mxu1 %v14966_v45  ;;  %12720 = vmatprep.mubr.msk.bf16.mxu1 %vm14020_vm0, %v16579_v16 }
0x952b   : > { %12730 = vmatprep.subr.bf16.mxu1 %v16579_v16 }
0x952e   : > { %v10358_v12 = vpop.f32.mrb[96].mxu0 }
0x952f   : > { %v10359_v40 = vadd.f32 %v16319_v22, %v10358_v12  ;;  %v12716_v39 = vpop.f32.mrb[97].mxu0 }
0x9530   : > { %v10361_v50 = vpop.f32.mrb[98].mxu0 }
0x9531   : > { %v12717_v34 = vpop.f32.mrb[99].mxu0  ;;  %v10364_v55 = vsel %vm1454_vm2, %v10359_v40, -inf }
0x9532   : > { %10365 = vmax.xlane.f32.xlu0 %v10364_v55 }
0x95bf   : > { %v10366_v30 = vpop.xlane.xlu0 %10365 }
0x95c0   : > { %v10367_v2 = vsub.f32 %v10359_v40, %v10366_v30 }
0x95c2   : > { %v10368_v37 = vmul.f32 1.442695, %v10367_v2 }
0x95c4   : > { %13239 = vpow2.f32 %v10368_v37 }
0x95ce   : > { %v13240_v36 = vpop.eup %13239 }
0x95cf   : > { %v10370_v45 = vsel %vm1454_vm2, %v13240_v36, 0.0 }
0x95d0   : > { %10371 = vadd.xlane.f32.xlu1 %v10370_v45 }
0x95fc   : > { %v10312_v20 = vpop.f32.mrb[96].mxu1 }
0x95fd   : > { %v10318_v63 = vadd.f32 %v10312_v20, %v10169_v11  ;;  %v12710_v13 = vpop.f32.mrb[97].mxu1 }
0x95fe   : > { %v10315_v17 = vpop.f32.mrb[98].mxu1 }
0x95ff   : > { %v12711_v42 = vpop.f32.mrb[99].mxu1 }
0x965d   : > { %v10372_v22 = vpop.xlane.xlu1 %10371 }
0x965e   : > { %13241 = vrcp.f32 %v10372_v22 }
0x9668   : > { %v13242_v28 = vpop.eup %13241 }
0x9669   : > { %v10374_v60 = vmul.f32 %v13242_v28, %v13240_v36 }
0x966b   : > { %v10375_v58 = vpack.c.bf16 %v10374_v60, %v10374_v60 }
0x966d   : > { %12721 = vmatmul.mubr.msk.bf16.vlgmr.msra.gmra.mrb[100].mxu1 %vm1454_vm2, %v10375_v58 }
0x966e   : > { %12731 = vmatpush3.bf16.msra.mxu1 %v14982_v35  ;;  %12734 = vmatprep.mubr.msk.bf16.mxu1 %vm14020_vm0, %v16579_v16 }
0x966f   : > { %12732 = vmatprep.subr.bf16.mxu1 %v16579_v16 }
0x9672   : > { %12733 = vmatpush3.bf16.msra.mxu1 %v14988_v38 }
0x9740   : > { %v10413_v24 = vpop.f32.mrb[100].mxu1 }
0x9741   : > { %v10419_v46 = vpack.c.bf16 %v10413_v24, %v10413_v24  ;;  %v12722_v0 = vpop.f32.mrb[101].mxu1 }
0x9742   : > { %v10416_v62 = vpop.f32.mrb[102].mxu1 }
0x9743   : > { %v12723_v54 = vpop.f32.mrb[103].mxu1  ;;  %12727 = vmatmul.mubr.msk.bf16.vlgmr.msra.gmra.mrb[100].mxu0 %vm1454_vm2, %v10419_v46 }
0x9744   : > { %12739 = vmatpush3.bf16.msra.mxu0 %v14995_v47  ;;  %12746 = vmatprep.mubr.msk.bf16.mxu0 %vm14020_vm0, %v16579_v16  ;;  %v13290_v47 = vld [vmem:[%s16576_s11] ss:$0 sm:$0xff] }
0x9745   : > { %12740 = vmatprep.subr.bf16.mxu0 %v16579_v16 }
0x9748   : > { %12741 = vmatpush3.bf16.msra.mxu0 %v14999_v49 }
0x9749   : > { %12742 = vmatprep.subr.bf16.mxu0 %v16579_v16 }
0x974c   : > { %12743 = vmatpush3.bf16.msra.mxu0 %v15019_v61 }
0x974d   : > { %12744 = vmatprep.subr.bf16.mxu0 %v16579_v16 }
0x9750   : > { %12745 = vmatpush3.bf16.msra.mxu0 %v15025_v10 }
0x9816   : > { %v10457_v35 = vpop.f32.mrb[100].mxu0 }
0x9817   : > { %v10463_v38 = vadd.f32 %v10457_v35, %v10318_v63  ;;  %v12728_v11 = vpop.f32.mrb[101].mxu0 }
0x9818   : > { %v10460_v4 = vpop.f32.mrb[102].mxu0 }
0x9819   : > { %v10464_v3 = vadd.f32 %v13290_v47, %v10463_v38  ;;  %v12729_v48 = vpop.f32.mrb[103].mxu0 }
0x981b   : > { %v10465_v5 = vadd.f32 %v10464_v3, %v16295_v56 }
0x981d   : > { %v10466_v19 = vsel %vm1314_vm1, %v10465_v5, 0.0 }
0x981e   : > { %10467 = vadd.xlane.f32.xlu0 %v10466_v19 }
0x98ab   : > { %v10468_v49 = vpop.xlane.xlu0 %10467 }
0x98ac   : > { %v10469_v59 = vmul.f32 0.03125, %v10468_v49 }
0x98ae   : > { %v10470_v26 = vsub.f32 %v10465_v5, %v10469_v59 }
0x98b0   : > { %v10471_v61 = vmul.f32 %v10470_v26, %v10470_v26 }
0x98b2   : > { %v10472_v16 = vsel %vm1314_vm1, %v10471_v61, 0.0 }
0x98b3   : > { %10473 = vadd.xlane.f32.xlu0 %v10472_v16 }
0x9940   : > { %v10474_v10 = vpop.xlane.xlu0 %10473 }
0x9941   : > { %v10475_v57 = vmul.f32 0.03125, %v10474_v10 }
0x9943   : > { %v10476_v53 = vadd.f32 1e-05, %v10475_v57 }
0x9945   : > { %13243 = vrsqrt.f32 %v10476_v53 }
0x994f   : > { %v13244_v1 = vpop.eup %13243 }
0x9950   : > { %v10478_v32 = vmul.f32 %v13244_v1, %v10470_v26 }
0x9952   : > { %v10479_v15 = vmul.f32 %v16128_v41, %v10478_v32 }
0x9954   : > { %v10480_v56 = vadd.f32 %v16131_v51, %v10479_v15 }
0x9956   : > { %v10481_v29 = vpack.c.bf16 %v10480_v56, %v10480_v56 }
0x9958   : > { %12735 = vmatmul.mubr.msk.bf16.vlgmr.msra.gmra.mrb[104].mxu1 %vm1314_vm1, %v10481_v29 }
0x9a2b   : > { %v10519_v8 = vpop.f32.mrb[104].mxu1 }
0x9a2c   : > { %v10520_v44 = vadd.f32 %v16142_v23, %v10519_v8  ;;  %v12736_v7 = vpop.f32.mrb[105].mxu1 }
0x9a2d   : > { %v10522_v18 = vpop.f32.mrb[106].mxu1 }
0x9a2e   : > { %v10525_v52 = vmax.f32 %v10520_v44, 0.0  ;;  %v12737_v31 = vpop.f32.mrb[107].mxu1 }
0x9a30   : > { %v10526_v25 = vpack.c.bf16 %v10525_v52, %v10525_v52 }
0x9a32   : > { %12747 = vmatmul.mubr.msk.bf16.vlgmr.msra.gmra.mrb[104].mxu0 %vm2989_vm4, %v10526_v25 }
0x9b05   : > { %v10564_v14 = vpop.f32.mrb[104].mxu0 }
0x9b06   : > { %v10565_v6 = vadd.f32 %v16153_v33, %v10564_v14  ;;  %v12748_v43 = vpop.f32.mrb[105].mxu0 }
0x9b07   : > { %v10567_v41 = vpop.f32.mrb[106].mxu0 }
0x9b08   : > { %v10570_v9 = vadd.f32 %v10565_v6, %v10480_v56  ;;  %v12749_v51 = vpop.f32.mrb[107].mxu0 }
0x9b0a   : > { %v10571_v12 = vsel %vm1314_vm1, %v10570_v9, 0.0 }
0x9b0b   : > { %10572 = vadd.xlane.f32.xlu0 %v10571_v12 }
0x9b98   : > { %v10573_v23 = vpop.xlane.xlu0 %10572 }
0x9b99   : > { %v10574_v40 = vmul.f32 0.03125, %v10573_v23 }
0x9b9b   : > { %v10575_v39 = vsub.f32 %v10570_v9, %v10574_v40 }
0x9b9d   : > { %v10576_v50 = vmul.f32 %v10575_v39, %v10575_v39 }
0x9b9f   : > { %v10577_v34 = vsel %vm1314_vm1, %v10576_v50, 0.0 }
0x9ba0   : > { %10578 = vadd.xlane.f32.xlu1 %v10577_v34 }
0x9c2d   : > { %v10579_v55 = vpop.xlane.xlu1 %10578 }
0x9c2e   : > { %v10580_v33 = vmul.f32 0.03125, %v10579_v55 }
0x9c30   : > { %v10581_v30 = vadd.f32 1e-05, %v10580_v33 }
0x9c32   : > { %13245 = vrsqrt.f32 %v10581_v30 }
0x9c3c   : > { %v13246_v2 = vpop.eup %13245 }
0x9c3d   : > { %v10583_v37 = vmul.f32 %v13246_v2, %v10575_v39 }
0x9c3f   : > { %v10584_v36 = vmul.f32 %v16158_v27, %v10583_v37 }
0x9c41   : > { %v10585_v45 = vadd.f32 %v16161_v21, %v10584_v36 }
0x9c43   : > { %10586 = vst.msk [vmem:[%s1215_s20] sm:$0xff] %vm1314_vm1, %v10585_v45 }
0x9c44   : > { %13868 = shalt.err (!%p13865_p8)
}
0x9c45   : > { %s13869_s21 = scalar_lea.hbm %s16410_s1, 128  ;;  %s13873_s12 = scalar_lea.hbm %s16583_s28, 256 }
0x9c46   : > { %p13870_p2 = scmp.ne.s32.totalorder %s16410_s1, %s13869_s21  ;;  %p13874_p4 = scmp.lt.u32.totalorder %s16410_s1, %s16583_s28 }
0x9c47   : > { %p13875_p5 = scmp.lt.u32.totalorder %s13873_s12, %s13869_s21  ;;  %p13877_p10 = scmp.lt.u32.totalorder %s13869_s21, %s16410_s1 }
0x9c48   : > { %p13871_p1 = pnand %p13870_p2, %p16584_p11 }
0x9c49   : > { %p13876_p7 = por %p13875_p5, %p13874_p4 }
0x9c4a   : > { %p13872_p3 = pneg %p13871_p1 }
0x9c4b   : > { %p13878_p12 = por %p13877_p10, %p13876_p7 }
0x9c4d   : > { %p13879_p13 = pnand %p13878_p12, %p13872_p3 }
0x9c4f   : > { %13882 = shalt.err (!%p13879_p13)
}
0x9c50   : > { %12826 = dma.vmem_to_hbm [thread:$0]  (%p16584_p11), %s16412_s10, 128, %s16410_s1, %s10588_s4  }
0x9c51 PF: > { %s10613_s7 = sand.u32 1, %s13953_s15   ;;  %p16585_p6 = scmp.ne.s32.totalorder %s16544_s9, 0 }
0x9c52   : > { %p16586_p9 = scmp.ge.s32.totalorder %s13965_s18, 2  ;;  %s10614_s5 = scalar_lea.sflag [#allocation4], %s10613_s7 }
0x9c54   : > { %p12891_p0 = pnand %p16586_p9, %p16585_p6 }
0x9c56   : > { %13948 = dma.done.wait (!%p12891_p0), %s10614_s5, 128  }
0x9c57   : > { %13950 = vsyncadd (!%p12891_p0), %s10614_s5, 4294967168  ;;  %p86_p8 = scmp.ge.s32.totalorder %s14472_s3, 4   ;;  %s16587_s15 = smov %s13957_s16 }
0x9c58   : > { %s16588_s16 = smov %s13961_s0  ;;  %s16589_s0 = smov %s14483_s6 }
0x9c59   : > { %s16590_s18 = smov %s14472_s3  ;;  %88 = sbr.rel (!%p86_p8) target bundleno = 78 (0x4e), region = 300 }
0x9c60   :  { %10619 = vsyncpa [#allocation3], 1 }
0x9c61   :  { %10621 = vsyncpa [#allocation3 + $0x1], 1 }
0x9c62   :  { %10622 = vsyncpa [#allocation6], 1 }
0x9c63   :  { %10624 = vsyncpa [#allocation6 + $0x1], 1 }
0x9c64   :  { %10625 = vsyncpa [#allocation9], 1 }
0x9c65   :  { %10626 = vsyncpa [#allocation12], 1 }
0x9c66   :  { %10627 = vsyncpa [#allocation15], 1 }
0x9c67   :  { %10628 = vsyncpa [#allocation18], 1 }
0x9c68   :  { %10629 = vsyncpa [#allocation21], 1 }
0x9c69   :  { %10630 = vsyncpa [#allocation24], 1 }
0x9c6a   :  { %10631 = vsyncpa [#allocation27], 1 }
0x9c6b   :  { %10632 = vsyncpa [#allocation30], 1 }
0x9c6c   :  { %10633 = vsyncpa [#allocation33], 1 }
0x9c6d   :  { %10634 = vsyncpa [#allocation4], 1 }
0x9c6e   :  { %10636 = vsyncpa [#allocation4 + $0x1], 1 }

</bundles_post_ra>
